<compile_context>
chip_gen: v5e
topology: v5e:2x2
jax: 0.10.0
libtpu: 0.0.40
codegen_flags: <defaults>
</compile_context>

<pallas_src>
import functools

import jax
import jax.numpy as jnp
from jax.experimental import pallas as pl
from jax.experimental.pallas import tpu as pltpu


# ----------------------------- Pallas kernels ------------------------------

def _mm_epilogue_kernel(a_ref, b_ref, s_ref, c_ref, o_ref, acc_ref, *, relu):
    """C[i,j] = act( (sum_k A[i,k] B[k,j]) * scale[j] + bias[j] )."""
    @pl.when(pl.program_id(2) == 0)
    def _():
        acc_ref[...] = jnp.zeros_like(acc_ref)

    acc_ref[...] += jnp.dot(a_ref[...], b_ref[...],
                            preferred_element_type=jnp.float32)

    @pl.when(pl.program_id(2) == pl.num_programs(2) - 1)
    def _():
        y = acc_ref[...] * s_ref[...] + c_ref[...]
        if relu:
            y = jnp.maximum(y, 0.0)
        o_ref[...] = y.astype(o_ref.dtype)


def _mm_epilogue_res_kernel(a_ref, b_ref, s_ref, c_ref, r_ref, o_ref, acc_ref,
                            *, relu):
    """Same as above, plus a fused residual add before the activation."""
    @pl.when(pl.program_id(2) == 0)
    def _():
        acc_ref[...] = jnp.zeros_like(acc_ref)

    acc_ref[...] += jnp.dot(a_ref[...], b_ref[...],
                            preferred_element_type=jnp.float32)

    @pl.when(pl.program_id(2) == pl.num_programs(2) - 1)
    def _():
        y = acc_ref[...] * s_ref[...] + c_ref[...] + r_ref[...]
        if relu:
            y = jnp.maximum(y, 0.0)
        o_ref[...] = y.astype(o_ref.dtype)


def _maxpool_kernel(ee_ref, eo_ref, oe_ref, oo_ref, o_ref, *, Ho, Wo):
    """3x3 stride-2 max pool, decomposed over even/odd row/col planes so only
    unit-stride reads are needed inside the kernel."""
    taps = [
        ee_ref[0, 0:Ho, 0:Wo, :], ee_ref[0, 0:Ho, 1:Wo + 1, :],
        ee_ref[0, 1:Ho + 1, 0:Wo, :], ee_ref[0, 1:Ho + 1, 1:Wo + 1, :],
        eo_ref[0, 0:Ho, 0:Wo, :], eo_ref[0, 1:Ho + 1, 0:Wo, :],
        oe_ref[0, 0:Ho, 0:Wo, :], oe_ref[0, 0:Ho, 1:Wo + 1, :],
        oo_ref[0, 0:Ho, 0:Wo, :],
    ]
    r = taps[0]
    for t in taps[1:]:
        r = jnp.maximum(r, t)
    o_ref[0] = r


# ------------------------------ tile selection -------------------------------

def _round_up(x, m):
    return -(-x // m) * m


def _pick_tile_m(M):
    Mp = _round_up(M, 128)
    for tm in (512, 256, 128):
        if Mp % tm == 0 and Mp // tm >= 2:   # keep a >=2-wide parallel axis
            return tm, Mp
    return Mp, Mp


def _pick_tile_n(Ncol):
    if Ncol <= 256:
        return Ncol                          # full-dim block (64 / 128 / 256)
    for tn in (256, 128):
        if Ncol % tn == 0:
            return tn
    return Ncol                              # odd sizes (e.g. fc 1000): full dim


def _pick_tile_k(K):
    if K <= 2048:
        return K                             # single K step, full-dim block
    for tk in range(2048, 127, -128):
        if K % tk == 0:
            return tk
    # TODO(synk): pad K for pathological sizes; never hit by ResNet-34 shapes.
    return K


# ------------------------------ fused matmul ---------------------------------

def matmul_fused(a, b, scale, bias, residual=None, relu=False):
    """(M,K)@(K,N) on the MXU in bf16 with f32 accumulation, with a fused
    per-column affine (scale/bias), optional residual add and optional ReLU."""
    M, K = a.shape
    Ncol = b.shape[1]
    a = a.astype(jnp.bfloat16)
    b = b.astype(jnp.bfloat16)

    tm, Mp = _pick_tile_m(M)
    tn = _pick_tile_n(Ncol)
    tk = _pick_tile_k(K)
    nk = K // tk

    if Mp != M:
        a = jnp.pad(a, ((0, Mp - M), (0, 0)))
        if residual is not None:
            residual = jnp.pad(residual, ((0, Mp - M), (0, 0)))

    scale2 = scale.reshape(1, Ncol).astype(jnp.float32)
    bias2 = bias.reshape(1, Ncol).astype(jnp.float32)

    in_specs = [
        pl.BlockSpec((tm, tk), lambda i, j, k: (i, k)),
        pl.BlockSpec((tk, tn), lambda i, j, k: (k, j)),
        pl.BlockSpec((1, tn), lambda i, j, k: (0, j)),
        pl.BlockSpec((1, tn), lambda i, j, k: (0, j)),
    ]
    args = [a, b, scale2, bias2]
    if residual is not None:
        in_specs.append(pl.BlockSpec((tm, tn), lambda i, j, k: (i, j)))
        args.append(residual.astype(jnp.float32))
        kernel = functools.partial(_mm_epilogue_res_kernel, relu=relu)
    else:
        kernel = functools.partial(_mm_epilogue_kernel, relu=relu)

    out = pl.pallas_call(
        kernel,
        out_shape=jax.ShapeDtypeStruct((Mp, Ncol), jnp.float32),
        grid_spec=pltpu.PrefetchScalarGridSpec(
            num_scalar_prefetch=0,
            grid=(Mp // tm, Ncol // tn, nk),
            in_specs=in_specs,
            out_specs=pl.BlockSpec((tm, tn), lambda i, j, k: (i, j)),
            scratch_shapes=[pltpu.VMEM((tm, tn), jnp.float32)]),
        compiler_params=pltpu.CompilerParams(
            dimension_semantics=("parallel", "parallel", "arbitrary"),
            vmem_limit_bytes=32 * 1024 * 1024),
    )(*args)

    if Mp != M:
        out = out[:M]
    return out


# ------------------------------ NN layer glue --------------------------------

def conv2d(x, wmat, ksize, stride, padding,
           scale=None, bias=None, relu=False, residual=None):
    """x: (N,H,W,Cin) NHWC f32; wmat: (KH*KW*Cin, Cout) bf16 (kh,kw,cin order).
    BN scale/bias, residual add and ReLU are fused into the matmul epilogue."""
    N, H, W, Cin = x.shape
    Cout = wmat.shape[1]
    KH = KW = ksize
    Ho = (H + 2 * padding - KH) // stride + 1
    Wo = (W + 2 * padding - KW) // stride + 1

    xp = x
    if padding:
        xp = jnp.pad(x, ((0, 0), (padding, padding), (padding, padding), (0, 0)))
    xp = xp.astype(jnp.bfloat16)            # im2col blob materializes in bf16

    if KH == 1 and KW == 1 and stride == 1:
        a = xp.reshape(N * H * W, Cin)
    else:
        cols = [xp[:, kh:kh + stride * Ho:stride, kw:kw + stride * Wo:stride, :]
                for kh in range(KH) for kw in range(KW)]
        a = jnp.concatenate(cols, axis=-1).reshape(N * Ho * Wo, KH * KW * Cin)

    if scale is None:
        scale = jnp.ones((Cout,), jnp.float32)
    if bias is None:
        bias = jnp.zeros((Cout,), jnp.float32)
    res2d = None
    if residual is not None:
        res2d = residual.reshape(N * Ho * Wo, Cout)

    y = matmul_fused(a, wmat, scale, bias, residual=res2d, relu=relu)
    return y.reshape(N, Ho, Wo, Cout)


def _bn_fold(bnp, eps=1e-5):
    scale = bnp["gamma"] / jnp.sqrt(bnp["var"] + eps)
    bias = bnp["beta"] - bnp["mean"] * scale
    return scale, bias


def maxpool3x3s2(x):
    """MaxPool2d(kernel_size=3, stride=2, padding=1); assumes even H, W."""
    N, H, W, C = x.shape
    Ho = (H + 2 - 3) // 2 + 1
    Wo = (W + 2 - 3) // 2 + 1
    xp = jnp.pad(x, ((0, 0), (1, 1), (1, 1), (0, 0)),
                 constant_values=-jnp.inf)
    # even/odd row x col planes, each (N, Ho+1, Wo+1, C); subsampling happens
    # here in glue so the kernel only does unit-stride reads.
    ee = xp[:, 0::2, 0::2, :]
    eo = xp[:, 0::2, 1::2, :]
    oe = xp[:, 1::2, 0::2, :]
    oo = xp[:, 1::2, 1::2, :]
    plane_spec = pl.BlockSpec((1, Ho + 1, Wo + 1, C), lambda n: (n, 0, 0, 0))
    out = pl.pallas_call(
        functools.partial(_maxpool_kernel, Ho=Ho, Wo=Wo),
        out_shape=jax.ShapeDtypeStruct((N, Ho, Wo, C), jnp.float32),
        grid_spec=pltpu.PrefetchScalarGridSpec(
            num_scalar_prefetch=0,
            grid=(N,),
            in_specs=[plane_spec, plane_spec, plane_spec, plane_spec],
            out_specs=pl.BlockSpec((1, Ho, Wo, C), lambda n: (n, 0, 0, 0))),
        compiler_params=pltpu.CompilerParams(
            dimension_semantics=("parallel",),
            vmem_limit_bytes=32 * 1024 * 1024),
    )(ee, eo, oe, oo)
    return out


def basic_block(x, blk, stride):
    """torchvision BasicBlock with BN/ReLU/residual fused into the conv matmuls."""
    if "down_conv" in blk:
        ds, db = _bn_fold(blk["down_bn"])
        identity = conv2d(x, blk["down_conv"], 1, stride, 0, scale=ds, bias=db)
    else:
        identity = x
    s1, b1 = _bn_fold(blk["bn1"])
    out = conv2d(x, blk["conv1"], 3, stride, 1, scale=s1, bias=b1, relu=True)
    s2, b2 = _bn_fold(blk["bn2"])
    out = conv2d(out, blk["conv2"], 3, 1, 1, scale=s2, bias=b2, relu=True,
                 residual=identity)
    return out


# --------------------------- ResNet-34 parameters ----------------------------

RESNET34_LAYERS = [(64, 3, 1), (128, 4, 2), (256, 6, 2), (512, 3, 2)]
# torchvision resnet._modules order:
MODULE_NAMES = ["conv1", "bn1", "relu", "maxpool",
                "layer1", "layer2", "layer3", "layer4", "avgpool", "fc"]


def make_params(key):
    ks = iter(jax.random.split(key, 256))

    def conv(cout, cin, ksize):
        fan_in = cin * ksize * ksize
        w = jax.random.normal(next(ks), (cout, cin, ksize, ksize),
                              jnp.float32) * (2.0 / fan_in) ** 0.5
        # pre-transform once to the im2col matmul layout (kh,kw,cin)xCout, bf16.
        return jnp.transpose(w, (2, 3, 1, 0)).reshape(
            ksize * ksize * cin, cout).astype(jnp.bfloat16)

    def bn(c):
        return dict(
            gamma=1.0 + 0.1 * jax.random.normal(next(ks), (c,), jnp.float32),
            beta=0.1 * jax.random.normal(next(ks), (c,), jnp.float32),
            mean=0.1 * jax.random.normal(next(ks), (c,), jnp.float32),
            var=1.0 + 0.1 * jax.random.uniform(next(ks), (c,), jnp.float32),
        )

    p = {"conv1": conv(64, 3, 7), "bn1": bn(64)}
    layers = []
    cin = 64
    for (cout, nblocks, stride) in RESNET34_LAYERS:
        blocks = []
        for b in range(nblocks):
            s = stride if b == 0 else 1
            blk = dict(conv1=conv(cout, cin, 3), bn1=bn(cout),
                       conv2=conv(cout, cout, 3), bn2=bn(cout))
            if s != 1 or cin != cout:
                blk["down_conv"] = conv(cout, cin, 1)
                blk["down_bn"] = bn(cout)
            blocks.append(blk)
            cin = cout
        layers.append(blocks)
    p["layers"] = layers
    # fc stored pre-transposed (512, 1000); bias fused into the matmul epilogue.
    p["fc_wT"] = jax.random.normal(next(ks), (512, 1000), jnp.float32) * (1.0 / 512) ** 0.5
    p["fc_b"] = jnp.zeros((1000,), jnp.float32)
    return p


# ------------------------------- forward pass --------------------------------

def enc_resnet_forward(params, x_nchw, num_layers):
    """Matches enc_ResNet.forward(x, num_layers): runs the first `num_layers`
    top-level modules of torchvision ResNet-34 in eval mode (num_layers is
    static, so the module prefix is resolved at trace time and bn1/relu are
    fused into conv1's epilogue whenever both modules execute)."""
    n = num_layers
    x = jnp.transpose(x_nchw, (0, 2, 3, 1)).astype(jnp.float32)  # NCHW -> NHWC

    if n >= 1:                                   # conv1 (+ bn1 [+ relu] fused)
        if n >= 2:
            s, b = _bn_fold(params["bn1"])
            x = conv2d(x, params["conv1"], 7, 2, 3, scale=s, bias=b,
                       relu=(n >= 3))
        else:
            x = conv2d(x, params["conv1"], 7, 2, 3)
    if n >= 4:                                   # maxpool
        x = maxpool3x3s2(x)
    for li, (_cout, _nblocks, lstride) in enumerate(RESNET34_LAYERS):
        if n >= 5 + li:                          # layer1..layer4
            for bi, blk in enumerate(params["layers"][li]):
                x = basic_block(x, blk, lstride if bi == 0 else 1)
    if n >= 9:                                   # avgpool (AdaptiveAvgPool2d(1))
        x = jnp.mean(x, axis=(1, 2), keepdims=True)
    if n >= 10:                                  # fc
        # TODO(synk): the original module-dict iteration applies nn.Linear to
        # the 4-D avgpool output (shape error in PyTorch for num_layers==10);
        # here we flatten first and fuse the bias into the matmul epilogue.
        flat = x.reshape(x.shape[0], -1)
        ones = jnp.ones((params["fc_b"].shape[0],), jnp.float32)
        x = matmul_fused(flat, params["fc_wT"], ones, params["fc_b"])

    if x.ndim == 4:
        x = jnp.transpose(x, (0, 3, 1, 2))       # NHWC -> NCHW (torch layout)
    return x


# ----------------------------------- main -------------------------------------

if __name__ == "__main__":
    key = jax.random.PRNGKey(0)
    pkey, xkey = jax.random.split(key)
    params = make_params(pkey)

    # Small input consistent with the ResNet stem: NCHW, 3 channels, 64x64.
    x = jax.random.normal(xkey, (2, 3, 64, 64), jnp.float32)

    # num_layers=5 -> conv1, bn1, relu, maxpool, layer1 (3 BasicBlocks)
    fwd = jax.jit(enc_resnet_forward, static_argnums=2)
    out = jax.block_until_ready(fwd(params, x, 5))
    assert out.shape == (2, 64, 16, 16), out.shape
    assert bool(jnp.all(jnp.isfinite(out)))
    print("KERNEL_OK")
</pallas_src>

<mosaic_0001>
module attributes {stable_mosaic.version = 11 : i64} {
  func.func @_mm_epilogue_kernel(%arg0: i32, %arg1: i32, %arg2: i32, %arg3: memref<512x147xbf16, #tpu.memory_space<vmem>>, %arg4: memref<147x64xbf16, #tpu.memory_space<vmem>>, %arg5: memref<1x64xf32, #tpu.memory_space<vmem>>, %arg6: memref<1x64xf32, #tpu.memory_space<vmem>>, %arg7: memref<512x64xf32, #tpu.memory_space<vmem>>, %arg8: memref<512x64xf32, #tpu.memory_space<vmem>>) attributes {dimension_semantics = [#tpu.dimension_semantics<parallel>, #tpu.dimension_semantics<parallel>, #tpu.dimension_semantics<arbitrary>], iteration_bounds = array<i64: 4, 1, 1>, scalar_prefetch = 0 : i64, scratch_operands = 1 : i64, tpu.core_type = #tpu.core_type<tc>, window_params = [{transform_indices = @transform_0, window_bounds = array<i64: 512, 147>}, {transform_indices = @transform_1, window_bounds = array<i64: 147, 64>}, {transform_indices = @transform_2, window_bounds = array<i64: 1, 64>}, {transform_indices = @transform_3, window_bounds = array<i64: 1, 64>}, {transform_indices = @transform_4, window_bounds = array<i64: 512, 64>}]} {
    %c0_i32 = arith.constant 0 : i32
    %0 = arith.cmpi eq, %arg2, %c0_i32 : i32
    %1 = arith.extui %0 : i1 to i32
    %c0_i32_0 = arith.constant 0 : i32
    %2 = arith.cmpi ne, %1, %c0_i32_0 : i32
    scf.if %2 {
      %cst_10 = arith.constant 0.000000e+00 : f32
      %12 = vector.broadcast %cst_10 : f32 to vector<512x64xf32>
      %c0_11 = arith.constant 0 : index
      %c0_12 = arith.constant 0 : index
      %13 = vector.load %arg8[%c0_11, %c0_12] : memref<512x64xf32, #tpu.memory_space<vmem>>, vector<512x64xf32>
      tpu.vector_store %arg8[%c0_11, %c0_12], %12 {strides = array<i32>} : memref<512x64xf32, #tpu.memory_space<vmem>>, vector<512x64xf32>,
    } else {
    }
    %c0 = arith.constant 0 : index
    %c0_1 = arith.constant 0 : index
    %3 = vector.load %arg8[%c0, %c0_1] : memref<512x64xf32, #tpu.memory_space<vmem>>, vector<512x64xf32>
    %c0_2 = arith.constant 0 : index
    %c0_3 = arith.constant 0 : index
    %4 = vector.load %arg3[%c0_2, %c0_3] : memref<512x147xbf16, #tpu.memory_space<vmem>>, vector<512x147xbf16>
    %c0_4 = arith.constant 0 : index
    %c0_5 = arith.constant 0 : index
    %5 = vector.load %arg4[%c0_4, %c0_5] : memref<147x64xbf16, #tpu.memory_space<vmem>>, vector<147x64xbf16>
    %cst = arith.constant dense<0.000000e+00> : vector<512x64xf32>
    %6 = tpu.matmul %4, %5, %cst {dimension_numbers = #tpu.dot_dimension_numbers<[1], [0], [0], [1], [0, 0, 1, 1], [], []>} : vector<512x147xbf16>, vector<147x64xbf16>, vector<512x64xf32> -> vector<512x64xf32>
    %7 = arith.addf %3, %6 : vector<512x64xf32>
    %c0_6 = arith.constant 0 : index
    %c0_7 = arith.constant 0 : index
    %8 = vector.load %arg8[%c0_6, %c0_7] : memref<512x64xf32, #tpu.memory_space<vmem>>, vector<512x64xf32>
    tpu.vector_store %arg8[%c0_6, %c0_7], %7 {strides = array<i32>} : memref<512x64xf32, #tpu.memory_space<vmem>>, vector<512x64xf32>,
    %c0_i32_8 = arith.constant 0 : i32
    %9 = arith.cmpi eq, %arg2, %c0_i32_8 : i32
    %10 = arith.extui %9 : i1 to i32
    %c0_i32_9 = arith.constant 0 : i32
    %11 = arith.cmpi ne, %10, %c0_i32_9 : i32
    scf.if %11 {
      %c0_10 = arith.constant 0 : index
      %c0_11 = arith.constant 0 : index
      %12 = vector.load %arg8[%c0_10, %c0_11] : memref<512x64xf32, #tpu.memory_space<vmem>>, vector<512x64xf32>
      %c0_12 = arith.constant 0 : index
      %c0_13 = arith.constant 0 : index
      %13 = vector.load %arg5[%c0_12, %c0_13] : memref<1x64xf32, #tpu.memory_space<vmem>>, vector<1x64xf32>
      %14 = vector.broadcast %13 : vector<1x64xf32> to vector<512x64xf32>
      %15 = arith.mulf %12, %14 : vector<512x64xf32>
      %c0_14 = arith.constant 0 : index
      %c0_15 = arith.constant 0 : index
      %16 = vector.load %arg6[%c0_14, %c0_15] : memref<1x64xf32, #tpu.memory_space<vmem>>, vector<1x64xf32>
      %17 = vector.broadcast %16 : vector<1x64xf32> to vector<512x64xf32>
      %18 = arith.addf %15, %17 : vector<512x64xf32>
      %cst_16 = arith.constant 0.000000e+00 : f32
      %19 = vector.broadcast %cst_16 : f32 to vector<512x64xf32>
      %20 = arith.maximumf %18, %19 : vector<512x64xf32>
      %c0_17 = arith.constant 0 : index
      %c0_18 = arith.constant 0 : index
      %21 = vector.load %arg7[%c0_17, %c0_18] : memref<512x64xf32, #tpu.memory_space<vmem>>, vector<512x64xf32>
      tpu.vector_store %arg7[%c0_17, %c0_18], %20 {strides = array<i32>} : memref<512x64xf32, #tpu.memory_space<vmem>>, vector<512x64xf32>,
    } else {
    }
    return
  }
  func.func @transform_0(%arg0: i32, %arg1: i32, %arg2: i32) -> (i32, i32) {
    %c0_i32 = arith.constant 0 : i32
    return %arg0, %arg2 : i32, i32
  }
  func.func @transform_1(%arg0: i32, %arg1: i32, %arg2: i32) -> (i32, i32) {
    %c0_i32 = arith.constant 0 : i32
    return %arg2, %arg1 : i32, i32
  }
  func.func @transform_2(%arg0: i32, %arg1: i32, %arg2: i32) -> (i32, i32) {
    %c0_i32 = arith.constant 0 : i32
    %c0_i32_0 = arith.constant 0 : i32
    return %c0_i32, %arg1 : i32, i32
  }
  func.func @transform_3(%arg0: i32, %arg1: i32, %arg2: i32) -> (i32, i32) {
    %c0_i32 = arith.constant 0 : i32
    %c0_i32_0 = arith.constant 0 : i32
    return %c0_i32, %arg1 : i32, i32
  }
  func.func @transform_4(%arg0: i32, %arg1: i32, %arg2: i32) -> (i32, i32) {
    %c0_i32 = arith.constant 0 : i32
    return %arg0, %arg1 : i32, i32
  }
}

module attributes {stable_mosaic.version = 11 : i64} {
  func.func @_maxpool_kernel(%arg0: i32, %arg1: memref<1x17x17x64xf32, #tpu.memory_space<vmem>>, %arg2: memref<1x17x17x64xf32, #tpu.memory_space<vmem>>, %arg3: memref<1x17x17x64xf32, #tpu.memory_space<vmem>>, %arg4: memref<1x17x17x64xf32, #tpu.memory_space<vmem>>, %arg5: memref<1x16x16x64xf32, #tpu.memory_space<vmem>>) attributes {dimension_semantics = [#tpu.dimension_semantics<parallel>], iteration_bounds = array<i64: 2>, scalar_prefetch = 0 : i64, scratch_operands = 0 : i64, tpu.core_type = #tpu.core_type<tc>, window_params = [{transform_indices = @transform_0, window_bounds = array<i64: 1, 17, 17, 64>}, {transform_indices = @transform_1, window_bounds = array<i64: 1, 17, 17, 64>}, {transform_indices = @transform_2, window_bounds = array<i64: 1, 17, 17, 64>}, {transform_indices = @transform_3, window_bounds = array<i64: 1, 17, 17, 64>}, {transform_indices = @transform_4, window_bounds = array<i64: 1, 16, 16, 64>}]} {
    %c0 = arith.constant 0 : index
    %c0_0 = arith.constant 0 : index
    %c0_1 = arith.constant 0 : index
    %c0_2 = arith.constant 0 : index
    %0 = vector.load %arg1[%c0, %c0_0, %c0_1, %c0_2] : memref<1x17x17x64xf32, #tpu.memory_space<vmem>>, vector<1x16x16x64xf32>
    %1 = vector.shape_cast %0 : vector<1x16x16x64xf32> to vector<16x16x64xf32>
    %c0_3 = arith.constant 0 : index
    %c0_4 = arith.constant 0 : index
    %c1 = arith.constant 1 : index
    %c0_5 = arith.constant 0 : index
    %2 = vector.load %arg1[%c0_3, %c0_4, %c1, %c0_5] : memref<1x17x17x64xf32, #tpu.memory_space<vmem>>, vector<1x16x16x64xf32>
    %3 = vector.shape_cast %2 : vector<1x16x16x64xf32> to vector<16x16x64xf32>
    %c0_6 = arith.constant 0 : index
    %c1_7 = arith.constant 1 : index
    %c0_8 = arith.constant 0 : index
    %c0_9 = arith.constant 0 : index
    %4 = vector.load %arg1[%c0_6, %c1_7, %c0_8, %c0_9] : memref<1x17x17x64xf32, #tpu.memory_space<vmem>>, vector<1x16x16x64xf32>
    %5 = vector.shape_cast %4 : vector<1x16x16x64xf32> to vector<16x16x64xf32>
    %c0_10 = arith.constant 0 : index
    %c1_11 = arith.constant 1 : index
    %c1_12 = arith.constant 1 : index
    %c0_13 = arith.constant 0 : index
    %6 = vector.load %arg1[%c0_10, %c1_11, %c1_12, %c0_13] : memref<1x17x17x64xf32, #tpu.memory_space<vmem>>, vector<1x16x16x64xf32>
    %7 = vector.shape_cast %6 : vector<1x16x16x64xf32> to vector<16x16x64xf32>
    %c0_14 = arith.constant 0 : index
    %c0_15 = arith.constant 0 : index
    %c0_16 = arith.constant 0 : index
    %c0_17 = arith.constant 0 : index
    %8 = vector.load %arg2[%c0_14, %c0_15, %c0_16, %c0_17] : memref<1x17x17x64xf32, #tpu.memory_space<vmem>>, vector<1x16x16x64xf32>
    %9 = vector.shape_cast %8 : vector<1x16x16x64xf32> to vector<16x16x64xf32>
    %c0_18 = arith.constant 0 : index
    %c1_19 = arith.constant 1 : index
    %c0_20 = arith.constant 0 : index
    %c0_21 = arith.constant 0 : index
    %10 = vector.load %arg2[%c0_18, %c1_19, %c0_20, %c0_21] : memref<1x17x17x64xf32, #tpu.memory_space<vmem>>, vector<1x16x16x64xf32>
    %11 = vector.shape_cast %10 : vector<1x16x16x64xf32> to vector<16x16x64xf32>
    %c0_22 = arith.constant 0 : index
    %c0_23 = arith.constant 0 : index
    %c0_24 = arith.constant 0 : index
    %c0_25 = arith.constant 0 : index
    %12 = vector.load %arg3[%c0_22, %c0_23, %c0_24, %c0_25] : memref<1x17x17x64xf32, #tpu.memory_space<vmem>>, vector<1x16x16x64xf32>
    %13 = vector.shape_cast %12 : vector<1x16x16x64xf32> to vector<16x16x64xf32>
    %c0_26 = arith.constant 0 : index
    %c0_27 = arith.constant 0 : index
    %c1_28 = arith.constant 1 : index
    %c0_29 = arith.constant 0 : index
    %14 = vector.load %arg3[%c0_26, %c0_27, %c1_28, %c0_29] : memref<1x17x17x64xf32, #tpu.memory_space<vmem>>, vector<1x16x16x64xf32>
    %15 = vector.shape_cast %14 : vector<1x16x16x64xf32> to vector<16x16x64xf32>
    %c0_30 = arith.constant 0 : index
    %c0_31 = arith.constant 0 : index
    %c0_32 = arith.constant 0 : index
    %c0_33 = arith.constant 0 : index
    %16 = vector.load %arg4[%c0_30, %c0_31, %c0_32, %c0_33] : memref<1x17x17x64xf32, #tpu.memory_space<vmem>>, vector<1x16x16x64xf32>
    %17 = vector.shape_cast %16 : vector<1x16x16x64xf32> to vector<16x16x64xf32>
    %18 = arith.maximumf %1, %3 : vector<16x16x64xf32>
    %19 = arith.maximumf %18, %5 : vector<16x16x64xf32>
    %20 = arith.maximumf %19, %7 : vector<16x16x64xf32>
    %21 = arith.maximumf %20, %9 : vector<16x16x64xf32>
    %22 = arith.maximumf %21, %11 : vector<16x16x64xf32>
    %23 = arith.maximumf %22, %13 : vector<16x16x64xf32>
    %24 = arith.maximumf %23, %15 : vector<16x16x64xf32>
    %25 = arith.maximumf %24, %17 : vector<16x16x64xf32>
    %c0_34 = arith.constant 0 : index
    %c0_35 = arith.constant 0 : index
    %c0_36 = arith.constant 0 : index
    %c0_37 = arith.constant 0 : index
    %26 = vector.load %arg5[%c0_34, %c0_35, %c0_36, %c0_37] : memref<1x16x16x64xf32, #tpu.memory_space<vmem>>, vector<1x16x16x64xf32>
    %27 = vector.shape_cast %26 : vector<1x16x16x64xf32> to vector<16x16x64xf32>
    %28 = vector.shape_cast %25 : vector<16x16x64xf32> to vector<1x16x16x64xf32>
    tpu.vector_store %arg5[%c0_34, %c0_35, %c0_36, %c0_37], %28 {strides = array<i32>} : memref<1x16x16x64xf32, #tpu.memory_space<vmem>>, vector<1x16x16x64xf32>,
    return
  }
  func.func @transform_0(%arg0: i32) -> (i32, i32, i32, i32) {
    %c0_i32 = arith.constant 0 : i32
    %c0_i32_0 = arith.constant 0 : i32
    %c0_i32_1 = arith.constant 0 : i32
    %c0_i32_2 = arith.constant 0 : i32
    return %arg0, %c0_i32, %c0_i32_0, %c0_i32_1 : i32, i32, i32, i32
  }
  func.func @transform_1(%arg0: i32) -> (i32, i32, i32, i32) {
    %c0_i32 = arith.constant 0 : i32
    %c0_i32_0 = arith.constant 0 : i32
    %c0_i32_1 = arith.constant 0 : i32
    %c0_i32_2 = arith.constant 0 : i32
    return %arg0, %c0_i32, %c0_i32_0, %c0_i32_1 : i32, i32, i32, i32
  }
  func.func @transform_2(%arg0: i32) -> (i32, i32, i32, i32) {
    %c0_i32 = arith.constant 0 : i32
    %c0_i32_0 = arith.constant 0 : i32
    %c0_i32_1 = arith.constant 0 : i32
    %c0_i32_2 = arith.constant 0 : i32
    return %arg0, %c0_i32, %c0_i32_0, %c0_i32_1 : i32, i32, i32, i32
  }
  func.func @transform_3(%arg0: i32) -> (i32, i32, i32, i32) {
    %c0_i32 = arith.constant 0 : i32
    %c0_i32_0 = arith.constant 0 : i32
    %c0_i32_1 = arith.constant 0 : i32
    %c0_i32_2 = arith.constant 0 : i32
    return %arg0, %c0_i32, %c0_i32_0, %c0_i32_1 : i32, i32, i32, i32
  }
  func.func @transform_4(%arg0: i32) -> (i32, i32, i32, i32) {
    %c0_i32 = arith.constant 0 : i32
    %c0_i32_0 = arith.constant 0 : i32
    %c0_i32_1 = arith.constant 0 : i32
    %c0_i32_2 = arith.constant 0 : i32
    return %arg0, %c0_i32, %c0_i32_0, %c0_i32_1 : i32, i32, i32, i32
  }
}

module attributes {stable_mosaic.version = 11 : i64} {
  func.func @_mm_epilogue_kernel(%arg0: i32, %arg1: i32, %arg2: i32, %arg3: memref<256x576xbf16, #tpu.memory_space<vmem>>, %arg4: memref<576x64xbf16, #tpu.memory_space<vmem>>, %arg5: memref<1x64xf32, #tpu.memory_space<vmem>>, %arg6: memref<1x64xf32, #tpu.memory_space<vmem>>, %arg7: memref<256x64xf32, #tpu.memory_space<vmem>>, %arg8: memref<256x64xf32, #tpu.memory_space<vmem>>) attributes {dimension_semantics = [#tpu.dimension_semantics<parallel>, #tpu.dimension_semantics<parallel>, #tpu.dimension_semantics<arbitrary>], iteration_bounds = array<i64: 2, 1, 1>, scalar_prefetch = 0 : i64, scratch_operands = 1 : i64, tpu.core_type = #tpu.core_type<tc>, window_params = [{transform_indices = @transform_0, window_bounds = array<i64: 256, 576>}, {transform_indices = @transform_1, window_bounds = array<i64: 576, 64>}, {transform_indices = @transform_2, window_bounds = array<i64: 1, 64>}, {transform_indices = @transform_3, window_bounds = array<i64: 1, 64>}, {transform_indices = @transform_4, window_bounds = array<i64: 256, 64>}]} {
    %c0_i32 = arith.constant 0 : i32
    %0 = arith.cmpi eq, %arg2, %c0_i32 : i32
    %1 = arith.extui %0 : i1 to i32
    %c0_i32_0 = arith.constant 0 : i32
    %2 = arith.cmpi ne, %1, %c0_i32_0 : i32
    scf.if %2 {
      %cst_10 = arith.constant 0.000000e+00 : f32
      %12 = vector.broadcast %cst_10 : f32 to vector<256x64xf32>
      %c0_11 = arith.constant 0 : index
      %c0_12 = arith.constant 0 : index
      %13 = vector.load %arg8[%c0_11, %c0_12] : memref<256x64xf32, #tpu.memory_space<vmem>>, vector<256x64xf32>
      tpu.vector_store %arg8[%c0_11, %c0_12], %12 {strides = array<i32>} : memref<256x64xf32, #tpu.memory_space<vmem>>, vector<256x64xf32>,
    } else {
    }
    %c0 = arith.constant 0 : index
    %c0_1 = arith.constant 0 : index
    %3 = vector.load %arg8[%c0, %c0_1] : memref<256x64xf32, #tpu.memory_space<vmem>>, vector<256x64xf32>
    %c0_2 = arith.constant 0 : index
    %c0_3 = arith.constant 0 : index
    %4 = vector.load %arg3[%c0_2, %c0_3] : memref<256x576xbf16, #tpu.memory_space<vmem>>, vector<256x576xbf16>
    %c0_4 = arith.constant 0 : index
    %c0_5 = arith.constant 0 : index
    %5 = vector.load %arg4[%c0_4, %c0_5] : memref<576x64xbf16, #tpu.memory_space<vmem>>, vector<576x64xbf16>
    %cst = arith.constant dense<0.000000e+00> : vector<256x64xf32>
    %6 = tpu.matmul %4, %5, %cst {dimension_numbers = #tpu.dot_dimension_numbers<[1], [0], [0], [1], [0, 0, 1, 1], [], []>} : vector<256x576xbf16>, vector<576x64xbf16>, vector<256x64xf32> -> vector<256x64xf32>
    %7 = arith.addf %3, %6 : vector<256x64xf32>
    %c0_6 = arith.constant 0 : index
    %c0_7 = arith.constant 0 : index
    %8 = vector.load %arg8[%c0_6, %c0_7] : memref<256x64xf32, #tpu.memory_space<vmem>>, vector<256x64xf32>
    tpu.vector_store %arg8[%c0_6, %c0_7], %7 {strides = array<i32>} : memref<256x64xf32, #tpu.memory_space<vmem>>, vector<256x64xf32>,
    %c0_i32_8 = arith.constant 0 : i32
    %9 = arith.cmpi eq, %arg2, %c0_i32_8 : i32
    %10 = arith.extui %9 : i1 to i32
    %c0_i32_9 = arith.constant 0 : i32
    %11 = arith.cmpi ne, %10, %c0_i32_9 : i32
    scf.if %11 {
      %c0_10 = arith.constant 0 : index
      %c0_11 = arith.constant 0 : index
      %12 = vector.load %arg8[%c0_10, %c0_11] : memref<256x64xf32, #tpu.memory_space<vmem>>, vector<256x64xf32>
      %c0_12 = arith.constant 0 : index
      %c0_13 = arith.constant 0 : index
      %13 = vector.load %arg5[%c0_12, %c0_13] : memref<1x64xf32, #tpu.memory_space<vmem>>, vector<1x64xf32>
      %14 = vector.broadcast %13 : vector<1x64xf32> to vector<256x64xf32>
      %15 = arith.mulf %12, %14 : vector<256x64xf32>
      %c0_14 = arith.constant 0 : index
      %c0_15 = arith.constant 0 : index
      %16 = vector.load %arg6[%c0_14, %c0_15] : memref<1x64xf32, #tpu.memory_space<vmem>>, vector<1x64xf32>
      %17 = vector.broadcast %16 : vector<1x64xf32> to vector<256x64xf32>
      %18 = arith.addf %15, %17 : vector<256x64xf32>
      %cst_16 = arith.constant 0.000000e+00 : f32
      %19 = vector.broadcast %cst_16 : f32 to vector<256x64xf32>
      %20 = arith.maximumf %18, %19 : vector<256x64xf32>
      %c0_17 = arith.constant 0 : index
      %c0_18 = arith.constant 0 : index
      %21 = vector.load %arg7[%c0_17, %c0_18] : memref<256x64xf32, #tpu.memory_space<vmem>>, vector<256x64xf32>
      tpu.vector_store %arg7[%c0_17, %c0_18], %20 {strides = array<i32>} : memref<256x64xf32, #tpu.memory_space<vmem>>, vector<256x64xf32>,
    } else {
    }
    return
  }
  func.func @transform_0(%arg0: i32, %arg1: i32, %arg2: i32) -> (i32, i32) {
    %c0_i32 = arith.constant 0 : i32
    return %arg0, %arg2 : i32, i32
  }
  func.func @transform_1(%arg0: i32, %arg1: i32, %arg2: i32) -> (i32, i32) {
    %c0_i32 = arith.constant 0 : i32
    return %arg2, %arg1 : i32, i32
  }
  func.func @transform_2(%arg0: i32, %arg1: i32, %arg2: i32) -> (i32, i32) {
    %c0_i32 = arith.constant 0 : i32
    %c0_i32_0 = arith.constant 0 : i32
    return %c0_i32, %arg1 : i32, i32
  }
  func.func @transform_3(%arg0: i32, %arg1: i32, %arg2: i32) -> (i32, i32) {
    %c0_i32 = arith.constant 0 : i32
    %c0_i32_0 = arith.constant 0 : i32
    return %c0_i32, %arg1 : i32, i32
  }
  func.func @transform_4(%arg0: i32, %arg1: i32, %arg2: i32) -> (i32, i32) {
    %c0_i32 = arith.constant 0 : i32
    return %arg0, %arg1 : i32, i32
  }
}

module attributes {stable_mosaic.version = 11 : i64} {
  func.func @_mm_epilogue_res_kernel(%arg0: i32, %arg1: i32, %arg2: i32, %arg3: memref<256x576xbf16, #tpu.memory_space<vmem>>, %arg4: memref<576x64xbf16, #tpu.memory_space<vmem>>, %arg5: memref<1x64xf32, #tpu.memory_space<vmem>>, %arg6: memref<1x64xf32, #tpu.memory_space<vmem>>, %arg7: memref<256x64xf32, #tpu.memory_space<vmem>>, %arg8: memref<256x64xf32, #tpu.memory_space<vmem>>, %arg9: memref<256x64xf32, #tpu.memory_space<vmem>>) attributes {dimension_semantics = [#tpu.dimension_semantics<parallel>, #tpu.dimension_semantics<parallel>, #tpu.dimension_semantics<arbitrary>], iteration_bounds = array<i64: 2, 1, 1>, scalar_prefetch = 0 : i64, scratch_operands = 1 : i64, tpu.core_type = #tpu.core_type<tc>, window_params = [{transform_indices = @transform_0, window_bounds = array<i64: 256, 576>}, {transform_indices = @transform_1, window_bounds = array<i64: 576, 64>}, {transform_indices = @transform_2, window_bounds = array<i64: 1, 64>}, {transform_indices = @transform_3, window_bounds = array<i64: 1, 64>}, {transform_indices = @transform_4, window_bounds = array<i64: 256, 64>}, {transform_indices = @transform_5, window_bounds = array<i64: 256, 64>}]} {
    %c0_i32 = arith.constant 0 : i32
    %0 = arith.cmpi eq, %arg2, %c0_i32 : i32
    %1 = arith.extui %0 : i1 to i32
    %c0_i32_0 = arith.constant 0 : i32
    %2 = arith.cmpi ne, %1, %c0_i32_0 : i32
    scf.if %2 {
      %cst_10 = arith.constant 0.000000e+00 : f32
      %12 = vector.broadcast %cst_10 : f32 to vector<256x64xf32>
      %c0_11 = arith.constant 0 : index
      %c0_12 = arith.constant 0 : index
      %13 = vector.load %arg9[%c0_11, %c0_12] : memref<256x64xf32, #tpu.memory_space<vmem>>, vector<256x64xf32>
      tpu.vector_store %arg9[%c0_11, %c0_12], %12 {strides = array<i32>} : memref<256x64xf32, #tpu.memory_space<vmem>>, vector<256x64xf32>,
    } else {
    }
    %c0 = arith.constant 0 : index
    %c0_1 = arith.constant 0 : index
    %3 = vector.load %arg9[%c0, %c0_1] : memref<256x64xf32, #tpu.memory_space<vmem>>, vector<256x64xf32>
    %c0_2 = arith.constant 0 : index
    %c0_3 = arith.constant 0 : index
    %4 = vector.load %arg3[%c0_2, %c0_3] : memref<256x576xbf16, #tpu.memory_space<vmem>>, vector<256x576xbf16>
    %c0_4 = arith.constant 0 : index
    %c0_5 = arith.constant 0 : index
    %5 = vector.load %arg4[%c0_4, %c0_5] : memref<576x64xbf16, #tpu.memory_space<vmem>>, vector<576x64xbf16>
    %cst = arith.constant dense<0.000000e+00> : vector<256x64xf32>
    %6 = tpu.matmul %4, %5, %cst {dimension_numbers = #tpu.dot_dimension_numbers<[1], [0], [0], [1], [0, 0, 1, 1], [], []>} : vector<256x576xbf16>, vector<576x64xbf16>, vector<256x64xf32> -> vector<256x64xf32>
    %7 = arith.addf %3, %6 : vector<256x64xf32>
    %c0_6 = arith.constant 0 : index
    %c0_7 = arith.constant 0 : index
    %8 = vector.load %arg9[%c0_6, %c0_7] : memref<256x64xf32, #tpu.memory_space<vmem>>, vector<256x64xf32>
    tpu.vector_store %arg9[%c0_6, %c0_7], %7 {strides = array<i32>} : memref<256x64xf32, #tpu.memory_space<vmem>>, vector<256x64xf32>,
    %c0_i32_8 = arith.constant 0 : i32
    %9 = arith.cmpi eq, %arg2, %c0_i32_8 : i32
    %10 = arith.extui %9 : i1 to i32
    %c0_i32_9 = arith.constant 0 : i32
    %11 = arith.cmpi ne, %10, %c0_i32_9 : i32
    scf.if %11 {
      %c0_10 = arith.constant 0 : index
      %c0_11 = arith.constant 0 : index
      %12 = vector.load %arg9[%c0_10, %c0_11] : memref<256x64xf32, #tpu.memory_space<vmem>>, vector<256x64xf32>
      %c0_12 = arith.constant 0 : index
      %c0_13 = arith.constant 0 : index
      %13 = vector.load %arg5[%c0_12, %c0_13] : memref<1x64xf32, #tpu.memory_space<vmem>>, vector<1x64xf32>
      %14 = vector.broadcast %13 : vector<1x64xf32> to vector<256x64xf32>
      %15 = arith.mulf %12, %14 : vector<256x64xf32>
      %c0_14 = arith.constant 0 : index
      %c0_15 = arith.constant 0 : index
      %16 = vector.load %arg6[%c0_14, %c0_15] : memref<1x64xf32, #tpu.memory_space<vmem>>, vector<1x64xf32>
      %17 = vector.broadcast %16 : vector<1x64xf32> to vector<256x64xf32>
      %18 = arith.addf %15, %17 : vector<256x64xf32>
      %c0_16 = arith.constant 0 : index
      %c0_17 = arith.constant 0 : index
      %19 = vector.load %arg7[%c0_16, %c0_17] : memref<256x64xf32, #tpu.memory_space<vmem>>, vector<256x64xf32>
      %20 = arith.addf %18, %19 : vector<256x64xf32>
      %cst_18 = arith.constant 0.000000e+00 : f32
      %21 = vector.broadcast %cst_18 : f32 to vector<256x64xf32>
      %22 = arith.maximumf %20, %21 : vector<256x64xf32>
      %c0_19 = arith.constant 0 : index
      %c0_20 = arith.constant 0 : index
      %23 = vector.load %arg8[%c0_19, %c0_20] : memref<256x64xf32, #tpu.memory_space<vmem>>, vector<256x64xf32>
      tpu.vector_store %arg8[%c0_19, %c0_20], %22 {strides = array<i32>} : memref<256x64xf32, #tpu.memory_space<vmem>>, vector<256x64xf32>,
    } else {
    }
    return
  }
  func.func @transform_0(%arg0: i32, %arg1: i32, %arg2: i32) -> (i32, i32) {
    %c0_i32 = arith.constant 0 : i32
    return %arg0, %arg2 : i32, i32
  }
  func.func @transform_1(%arg0: i32, %arg1: i32, %arg2: i32) -> (i32, i32) {
    %c0_i32 = arith.constant 0 : i32
    return %arg2, %arg1 : i32, i32
  }
  func.func @transform_2(%arg0: i32, %arg1: i32, %arg2: i32) -> (i32, i32) {
    %c0_i32 = arith.constant 0 : i32
    %c0_i32_0 = arith.constant 0 : i32
    return %c0_i32, %arg1 : i32, i32
  }
  func.func @transform_3(%arg0: i32, %arg1: i32, %arg2: i32) -> (i32, i32) {
    %c0_i32 = arith.constant 0 : i32
    %c0_i32_0 = arith.constant 0 : i32
    return %c0_i32, %arg1 : i32, i32
  }
  func.func @transform_4(%arg0: i32, %arg1: i32, %arg2: i32) -> (i32, i32) {
    %c0_i32 = arith.constant 0 : i32
    return %arg0, %arg1 : i32, i32
  }
  func.func @transform_5(%arg0: i32, %arg1: i32, %arg2: i32) -> (i32, i32) {
    %c0_i32 = arith.constant 0 : i32
    return %arg0, %arg1 : i32, i32
  }
}

module attributes {stable_mosaic.version = 11 : i64} {
  func.func @_mm_epilogue_res_kernel(%arg0: i32, %arg1: i32, %arg2: i32, %arg3: memref<256x576xbf16, #tpu.memory_space<vmem>>, %arg4: memref<576x64xbf16, #tpu.memory_space<vmem>>, %arg5: memref<1x64xf32, #tpu.memory_space<vmem>>, %arg6: memref<1x64xf32, #tpu.memory_space<vmem>>, %arg7: memref<256x64xf32, #tpu.memory_space<vmem>>, %arg8: memref<256x64xf32, #tpu.memory_space<vmem>>, %arg9: memref<256x64xf32, #tpu.memory_space<vmem>>) attributes {dimension_semantics = [#tpu.dimension_semantics<parallel>, #tpu.dimension_semantics<parallel>, #tpu.dimension_semantics<arbitrary>], iteration_bounds = array<i64: 2, 1, 1>, scalar_prefetch = 0 : i64, scratch_operands = 1 : i64, tpu.core_type = #tpu.core_type<tc>, window_params = [{transform_indices = @transform_0, window_bounds = array<i64: 256, 576>}, {transform_indices = @transform_1, window_bounds = array<i64: 576, 64>}, {transform_indices = @transform_2, window_bounds = array<i64: 1, 64>}, {transform_indices = @transform_3, window_bounds = array<i64: 1, 64>}, {transform_indices = @transform_4, window_bounds = array<i64: 256, 64>}, {transform_indices = @transform_5, window_bounds = array<i64: 256, 64>}]} {
    %c0_i32 = arith.constant 0 : i32
    %0 = arith.cmpi eq, %arg2, %c0_i32 : i32
    %1 = arith.extui %0 : i1 to i32
    %c0_i32_0 = arith.constant 0 : i32
    %2 = arith.cmpi ne, %1, %c0_i32_0 : i32
    scf.if %2 {
      %cst_10 = arith.constant 0.000000e+00 : f32
      %12 = vector.broadcast %cst_10 : f32 to vector<256x64xf32>
      %c0_11 = arith.constant 0 : index
      %c0_12 = arith.constant 0 : index
      %13 = vector.load %arg9[%c0_11, %c0_12] : memref<256x64xf32, #tpu.memory_space<vmem>>, vector<256x64xf32>
      tpu.vector_store %arg9[%c0_11, %c0_12], %12 {strides = array<i32>} : memref<256x64xf32, #tpu.memory_space<vmem>>, vector<256x64xf32>,
    } else {
    }
    %c0 = arith.constant 0 : index
    %c0_1 = arith.constant 0 : index
    %3 = vector.load %arg9[%c0, %c0_1] : memref<256x64xf32, #tpu.memory_space<vmem>>, vector<256x64xf32>
    %c0_2 = arith.constant 0 : index
    %c0_3 = arith.constant 0 : index
    %4 = vector.load %arg3[%c0_2, %c0_3] : memref<256x576xbf16, #tpu.memory_space<vmem>>, vector<256x576xbf16>
    %c0_4 = arith.constant 0 : index
    %c0_5 = arith.constant 0 : index
    %5 = vector.load %arg4[%c0_4, %c0_5] : memref<576x64xbf16, #tpu.memory_space<vmem>>, vector<576x64xbf16>
    %cst = arith.constant dense<0.000000e+00> : vector<256x64xf32>
    %6 = tpu.matmul %4, %5, %cst {dimension_numbers = #tpu.dot_dimension_numbers<[1], [0], [0], [1], [0, 0, 1, 1], [], []>} : vector<256x576xbf16>, vector<576x64xbf16>, vector<256x64xf32> -> vector<256x64xf32>
    %7 = arith.addf %3, %6 : vector<256x64xf32>
    %c0_6 = arith.constant 0 : index
    %c0_7 = arith.constant 0 : index
    %8 = vector.load %arg9[%c0_6, %c0_7] : memref<256x64xf32, #tpu.memory_space<vmem>>, vector<256x64xf32>
    tpu.vector_store %arg9[%c0_6, %c0_7], %7 {strides = array<i32>} : memref<256x64xf32, #tpu.memory_space<vmem>>, vector<256x64xf32>,
    %c0_i32_8 = arith.constant 0 : i32
    %9 = arith.cmpi eq, %arg2, %c0_i32_8 : i32
    %10 = arith.extui %9 : i1 to i32
    %c0_i32_9 = arith.constant 0 : i32
    %11 = arith.cmpi ne, %10, %c0_i32_9 : i32
    scf.if %11 {
      %c0_10 = arith.constant 0 : index
      %c0_11 = arith.constant 0 : index
      %12 = vector.load %arg9[%c0_10, %c0_11] : memref<256x64xf32, #tpu.memory_space<vmem>>, vector<256x64xf32>
      %c0_12 = arith.constant 0 : index
      %c0_13 = arith.constant 0 : index
      %13 = vector.load %arg5[%c0_12, %c0_13] : memref<1x64xf32, #tpu.memory_space<vmem>>, vector<1x64xf32>
      %14 = vector.broadcast %13 : vector<1x64xf32> to vector<256x64xf32>
      %15 = arith.mulf %12, %14 : vector<256x64xf32>
      %c0_14 = arith.constant 0 : index
      %c0_15 = arith.constant 0 : index
      %16 = vector.load %arg6[%c0_14, %c0_15] : memref<1x64xf32, #tpu.memory_space<vmem>>, vector<1x64xf32>
      %17 = vector.broadcast %16 : vector<1x64xf32> to vector<256x64xf32>
      %18 = arith.addf %15, %17 : vector<256x64xf32>
      %c0_16 = arith.constant 0 : index
      %c0_17 = arith.constant 0 : index
      %19 = vector.load %arg7[%c0_16, %c0_17] : memref<256x64xf32, #tpu.memory_space<vmem>>, vector<256x64xf32>
      %20 = arith.addf %18, %19 : vector<256x64xf32>
      %cst_18 = arith.constant 0.000000e+00 : f32
      %21 = vector.broadcast %cst_18 : f32 to vector<256x64xf32>
      %22 = arith.maximumf %20, %21 : vector<256x64xf32>
      %c0_19 = arith.constant 0 : index
      %c0_20 = arith.constant 0 : index
      %23 = vector.load %arg8[%c0_19, %c0_20] : memref<256x64xf32, #tpu.memory_space<vmem>>, vector<256x64xf32>
      tpu.vector_store %arg8[%c0_19, %c0_20], %22 {strides = array<i32>} : memref<256x64xf32, #tpu.memory_space<vmem>>, vector<256x64xf32>,
    } else {
    }
    return
  }
  func.func @transform_0(%arg0: i32, %arg1: i32, %arg2: i32) -> (i32, i32) {
    %c0_i32 = arith.constant 0 : i32
    return %arg0, %arg2 : i32, i32
  }
  func.func @transform_1(%arg0: i32, %arg1: i32, %arg2: i32) -> (i32, i32) {
    %c0_i32 = arith.constant 0 : i32
    return %arg2, %arg1 : i32, i32
  }
  func.func @transform_2(%arg0: i32, %arg1: i32, %arg2: i32) -> (i32, i32) {
    %c0_i32 = arith.constant 0 : i32
    %c0_i32_0 = arith.constant 0 : i32
    return %c0_i32, %arg1 : i32, i32
  }
  func.func @transform_3(%arg0: i32, %arg1: i32, %arg2: i32) -> (i32, i32) {
    %c0_i32 = arith.constant 0 : i32
    %c0_i32_0 = arith.constant 0 : i32
    return %c0_i32, %arg1 : i32, i32
  }
  func.func @transform_4(%arg0: i32, %arg1: i32, %arg2: i32) -> (i32, i32) {
    %c0_i32 = arith.constant 0 : i32
    return %arg0, %arg1 : i32, i32
  }
  func.func @transform_5(%arg0: i32, %arg1: i32, %arg2: i32) -> (i32, i32) {
    %c0_i32 = arith.constant 0 : i32
    return %arg0, %arg1 : i32, i32
  }
}

</mosaic_0001>

<bundles_post_ra>
// kernel: enc_resnet_forward.8
= control target key start
LH: loop header
LB: loop body
LE: loop exit
PB: predicated region body
PF: predicated region fallthrough
CT: control target
= control target key end

     0   :  { %s2402_s15 = smov 0   ;;  %s2404_s16 = smov 0   ;;  %s3212_s0 = inlined_call_operand.vmem [shape: bf16[2048,147], index: 0, kind: input, shape index: {}]   ;;  %s3213_s1 = inlined_call_operand.vmem [shape: bf16[147,64], index: 1, kind: input, shape index: {}]   ;;  %s3214_s2 = inlined_call_operand.vmem [shape: f32[1,64], index: 2, kind: input, shape index: {}]   ;;  %s3215_s3 = inlined_call_operand.vmem [shape: f32[1,64], index: 3, kind: input, shape index: {}]   ;;  %s3216_s4 = inlined_call_operand.vmem [shape: f32[2048,64], index: 4, kind: output, shape index: {}]  }
   0x1   :  { %s2406_s17 = smov 0  }
   0x2 LB: > { %s33_s18 = sadd.s32 1, %s2369_s16  ;;  %p1905_p0 = scmp.ge.s32.totalorder %s2373_s17, 1  ;;  %s2373_s17 = sphi %s2406_s17, %s14_s17   ;;  %s2369_s16 = sphi %s2404_s16, %s3218_s16   ;;  %s2365_s15 = sphi %s2402_s15, %s3217_s15  }
   0x3   : > { %p35_p1 = scmp.ge.s32.totalorder %s33_s18, 4  ;;  %p224_p2 = scmp.lt.s32.totalorder %s2373_s17, 5 }
   0x5   : > { %s3220_s18 = smov (%p35_p1, %s33_s18), 0  ;;  %p225_p3 = pnand %p1905_p0, %p224_p2 }
   0x6   : > { %s1906_s23 = sshll.u32 (!%p225_p3), %s2365_s15, 6 }
   0x7   : > { %228 = sbr.rel (%p225_p3) target bundleno = 445 (0x1bd), region = 36  ;;  %p274_p4 = scmp.lt.s32.totalorder (!%p225_p3), %s1906_s23, 255 }
   0xc   : > { %v2309_v0 = vld [vmem:[%s3213_s1 + $0x38] sm:$0xff]  ;;  %v524_v1 = vld [vmem:[%s3213_s1 + $0x48] sm:$0x3]  ;;  %vm967_vm0 = vcmask 1040384   ;;  %vm968_vm1 = vcmask 1041408   ;;  %v2308_v3 = vld [vmem:[%s3213_s1 + $0x30] sm:$0xff] }
   0xd   : > { %v850_v2 = vunpack.c.l.b16 %v524_v1  ;;  %974 = vmatpush.bf16.msra.mxu0 %v2309_v0  ;;  %2311 = vmatpush.bf16.msra.mxu2 %v2309_v0  ;;  %v2375_v4 = vmov 65535   ;;  %s3222_s23 = smov (!%p274_p4, %s1906_s23), 255  ;;  %v2307_v9 = vld [vmem:[%s3213_s1 + $0x28] sm:$0xff]  ;;  %v2310_v10 = vld [vmem:[%s3213_s1 + $0x40] sm:$0xff]  ;;  %vm870_vm2 = vcmask 154624   ;;  %v2305_v18 = vld [vmem:[%s3213_s1 + $0x18] sm:$0xff] }
   0xe   : > { %v969_v5 = vsel %vm967_vm0, 4294967295, %v2375_v4  ;;  %s2237_s28 = sshll.u32 %s3222_s23, 3  ;;  %v2306_v14 = vld [vmem:[%s3213_s1 + $0x20] sm:$0xff]  ;;  %v2304_v19 = vld [vmem:[%s3213_s1 + $0x10] sm:$0xff]  ;;  %v2303_v20 = vld [vmem:[%s3213_s1 + $0x8] sm:$0xff]  ;;  %vm313_vm3 = vcmask 523264  }
   0xf   : > { %v860_v6 = vpack.c.b16 %v850_v2, %v850_v2  ;;  %v970_v7 = vsel %vm968_vm1, %v969_v5, 0  ;;  %s2443_s7 = scalar_lea.vmem %s3212_s0, %s2237_s28  ;;  %v2302_v26 = vld [vmem:[%s3213_s1] sm:$0xff]  ;;  %s2700_s29 = scalar_lea.vmem %s3216_s4, %s2237_s28 }
  0x10   : > { %v2238_v11 = vld [vmem:[%s2443_s7 + $0x4] sm:$0xf]  ;;  %v1915_v12 = vld [vmem:[%s2443_s7 + $0x8] sm:$0xf0]  ;;  %v2272_v15 = vld [vmem:[%s2443_s7 + $0x114] sm:$0xf] }
  0x11   : > { %v972_v8 = vand.u32 %v970_v7, %v860_v6  ;;  %975 = vmatpush.bf16.msra.mxu0 %v2308_v3  ;;  %2312 = vmatpush.bf16.msra.mxu2 %v2308_v3  ;;  %v1918_v13 = vor.u32 %v2238_v11, %v1915_v12  ;;  %v2051_v16 = vld [vmem:[%s2443_s7 + $0x118] sm:$0xf0]  ;;  %v2240_v21 = vld [vmem:[%s2443_s7 + $0x14] sm:$0xf]  ;;  %v2274_v23 = vld [vmem:[%s2443_s7 + $0x124] sm:$0xf] }
  0x12   : > { %v2054_v17 = vor.u32 %v2272_v15, %v2051_v16  ;;  %v1923_v22 = vld [vmem:[%s2443_s7 + $0x18] sm:$0xf0]  ;;  %v2059_v24 = vld [vmem:[%s2443_s7 + $0x128] sm:$0xf0]  ;;  %v1913_v27 = vld [vmem:[%s2443_s7] sm:$0xf] }
  0x13   : > { %1149 = vmatpush.bf16.msra.mxu1 %v972_v8  ;;  %2319 = vmatpush.bf16.msra.mxu3 %v972_v8  ;;  %v1926_v25 = vor.u32 %v2240_v21, %v1923_v22  ;;  %v2239_v28 = vld [vmem:[%s2443_s7 + $0x4] sm:$0xf0]  ;;  %v2041_v29 = vld [vmem:[%s2443_s7 + $0x100] sm:$0xf]  ;;  %v2062_v31 = vor.u32 %v2274_v23, %v2059_v24  ;;  %v2242_v34 = vld [vmem:[%s2443_s7 + $0x24] sm:$0xf] }
  0x14   : > { %v2271_v30 = vld [vmem:[%s2443_s7 + $0x104] sm:$0xf0]  ;;  %v1914_v32 = vor.u32 %v2239_v28, %v1913_v27  ;;  %v1931_v35 = vld [vmem:[%s2443_s7 + $0x28] sm:$0xf0]  ;;  %v2276_v36 = vld [vmem:[%s2443_s7 + $0x134] sm:$0xf] }
  0x15   : > { %976 = vmatpush.bf16.msra.mxu0 %v2307_v9  ;;  %2313 = vmatpush.bf16.msra.mxu2 %v2307_v9  ;;  %v2042_v33 = vor.u32 %v2271_v30, %v2041_v29  ;;  %v2067_v37 = vld [vmem:[%s2443_s7 + $0x138] sm:$0xf0]  ;;  %v1934_v38 = vor.u32 %v2242_v34, %v1931_v35  ;;  %v1921_v39 = vld [vmem:[%s2443_s7 + $0x10] sm:$0xf]  ;;  %v2241_v40 = vld [vmem:[%s2443_s7 + $0x14] sm:$0xf0] }
  0x16   : > { %v2049_v41 = vld [vmem:[%s2443_s7 + $0x110] sm:$0xf]  ;;  %v2273_v42 = vld [vmem:[%s2443_s7 + $0x114] sm:$0xf0]  ;;  %v2070_v43 = vor.u32 %v2276_v36, %v2067_v37  ;;  %v1922_v44 = vor.u32 %v2241_v40, %v1921_v39  ;;  %v2244_v46 = vld [vmem:[%s2443_s7 + $0x34] sm:$0xf] }
  0x17   : > { %1150 = vmatpush.bf16.msra.mxu1 %v2310_v10  ;;  %2320 = vmatpush.bf16.msra.mxu3 %v2310_v10  ;;  %v2050_v45 = vor.u32 %v2273_v42, %v2049_v41  ;;  %v1939_v47 = vld [vmem:[%s2443_s7 + $0x38] sm:$0xf0]  ;;  %v2278_v48 = vld [vmem:[%s2443_s7 + $0x144] sm:$0xf]  ;;  %v2075_v49 = vld [vmem:[%s2443_s7 + $0x148] sm:$0xf0] }
  0x18   : > { %v1942_v50 = vor.u32 %v2244_v46, %v1939_v47  ;;  %v1929_v51 = vld [vmem:[%s2443_s7 + $0x20] sm:$0xf]  ;;  %v2243_v52 = vld [vmem:[%s2443_s7 + $0x24] sm:$0xf0]  ;;  %v2078_v55 = vor.u32 %v2278_v48, %v2075_v49  ;;  %v2246_v58 = vld [vmem:[%s2443_s7 + $0x44] sm:$0xf] }
  0x19   : > { %977 = vmatpush.bf16.msra.mxu0 %v2306_v14  ;;  %2314 = vmatpush.bf16.msra.mxu2 %v2306_v14  ;;  %v2057_v53 = vld [vmem:[%s2443_s7 + $0x120] sm:$0xf]  ;;  %v2275_v54 = vld [vmem:[%s2443_s7 + $0x124] sm:$0xf0]  ;;  %v1930_v56 = vor.u32 %v2243_v52, %v1929_v51  ;;  %v1947_v59 = vld [vmem:[%s2443_s7 + $0x48] sm:$0xf0] }
  0x1a   : > { %2203 = vmatmul.msk.bf16.vlgmr.msra.gmra.mxu1 %vm870_vm2, %v1918_v13  ;;  %2220 = vmatmul.msk.bf16.vlgmr.msra.gmra.mxu3 %vm870_vm2, %v2054_v17  ;;  %v2058_v57 = vor.u32 %v2275_v54, %v2057_v53  ;;  %v2280_v60 = vld [vmem:[%s2443_s7 + $0x154] sm:$0xf]  ;;  %v2083_v61 = vld [vmem:[%s2443_s7 + $0x158] sm:$0xf0]  ;;  %v1950_v62 = vor.u32 %v2246_v58, %v1947_v59  ;;  %v1937_v63 = vld [vmem:[%s2443_s7 + $0x30] sm:$0xf] }
  0x1b   : > { %v2245_v0 = vld [vmem:[%s2443_s7 + $0x34] sm:$0xf0]  ;;  %v2065_v1 = vld [vmem:[%s2443_s7 + $0x130] sm:$0xf]  ;;  %v2086_v3 = vor.u32 %v2280_v60, %v2083_v61  ;;  %v2248_v6 = vld [vmem:[%s2443_s7 + $0x54] sm:$0xf] }
  0x1c   : > { %v2277_v2 = vld [vmem:[%s2443_s7 + $0x134] sm:$0xf0]  ;;  %v1938_v4 = vor.u32 %v2245_v0, %v1937_v63  ;;  %v1955_v7 = vld [vmem:[%s2443_s7 + $0x58] sm:$0xf0]  ;;  %v2282_v8 = vld [vmem:[%s2443_s7 + $0x164] sm:$0xf] }
  0x1d   : > { %978 = vmatpush.bf16.msra.mxu0 %v2305_v18  ;;  %2315 = vmatpush.bf16.msra.mxu2 %v2305_v18  ;;  %v2066_v5 = vor.u32 %v2277_v2, %v2065_v1  ;;  %v2091_v9 = vld [vmem:[%s2443_s7 + $0x168] sm:$0xf0]  ;;  %v1958_v10 = vor.u32 %v2248_v6, %v1955_v7  ;;  %v1945_v11 = vld [vmem:[%s2443_s7 + $0x40] sm:$0xf]  ;;  %v2247_v12 = vld [vmem:[%s2443_s7 + $0x44] sm:$0xf0] }
  0x1e   : > { %v2073_v13 = vld [vmem:[%s2443_s7 + $0x140] sm:$0xf]  ;;  %v2279_v14 = vld [vmem:[%s2443_s7 + $0x144] sm:$0xf0]  ;;  %v2094_v15 = vor.u32 %v2282_v8, %v2091_v9  ;;  %v1946_v16 = vor.u32 %v2247_v12, %v1945_v11  ;;  %v2250_v18 = vld [vmem:[%s2443_s7 + $0x64] sm:$0xf] }
  0x1f   : > { %v2074_v17 = vor.u32 %v2279_v14, %v2073_v13  ;;  %v2099_v21 = vld [vmem:[%s2443_s7 + $0x178] sm:$0xf0]  ;;  %v1953_v23 = vld [vmem:[%s2443_s7 + $0x50] sm:$0xf]  ;;  %v2249_v24 = vld [vmem:[%s2443_s7 + $0x54] sm:$0xf0] }
  0x20   : > { %v1954_v28 = vor.u32 %v2249_v24, %v1953_v23  ;;  %v2252_v30 = vld [vmem:[%s2443_s7 + $0x74] sm:$0xf]  ;;  %v1961_v35 = vld [vmem:[%s2443_s7 + $0x60] sm:$0xf]  ;;  %v2251_v36 = vld [vmem:[%s2443_s7 + $0x64] sm:$0xf0] }
  0x21   : > { %979 = vmatpush.bf16.msra.mxu0 %v2304_v19  ;;  %2316 = vmatpush.bf16.msra.mxu2 %v2304_v19  ;;  %v1963_v19 = vld [vmem:[%s2443_s7 + $0x68] sm:$0xf0]  ;;  %v2376_v37 = vmov 0.0   ;;  %v2283_v39 = vld [vmem:[%s2443_s7 + $0x164] sm:$0xf0]  ;;  %v1962_v41 = vor.u32 %v2251_v36, %v1961_v35 }
  0x22   : > { %v1966_v22 = vor.u32 %v2250_v18, %v1963_v19  ;;  %314 = vst.msk [vmem:[#allocation2] sm:$0xff] %vm313_vm3, %v2376_v37  ;;  %v1969_v46 = vld [vmem:[%s2443_s7 + $0x70] sm:$0xf]  ;;  %v2253_v47 = vld [vmem:[%s2443_s7 + $0x74] sm:$0xf0] }
  0x23   : > { %315 = vst.msk [vmem:[#allocation2 + $0x8] sm:$0xff] %vm313_vm3, %v2376_v37  ;;  %v2097_v49 = vld [vmem:[%s2443_s7 + $0x170] sm:$0xf]  ;;  %v1970_v51 = vor.u32 %v2253_v47, %v1969_v46  ;;  %v2256_v54 = vld [vmem:[%s2443_s7 + $0x94] sm:$0xf] }
  0x24   : > { %316 = vst.msk [vmem:[#allocation2 + $0x10] sm:$0xff] %vm313_vm3, %v2376_v37  ;;  %v1977_v60 = vld [vmem:[%s2443_s7 + $0x80] sm:$0xf]  ;;  %v2255_v61 = vld [vmem:[%s2443_s7 + $0x84] sm:$0xf0] }
  0x25   : > { %980 = vmatpush.bf16.msra.mxu0 %v2303_v20  ;;  %2317 = vmatpush.bf16.msra.mxu2 %v2303_v20  ;;  %v2284_v20 = vld [vmem:[%s2443_s7 + $0x174] sm:$0xf]  ;;  %317 = vst.msk [vmem:[#allocation2 + $0x18] sm:$0xff] %vm313_vm3, %v2376_v37  ;;  %v2105_v63 = vld [vmem:[%s2443_s7 + $0x180] sm:$0xf]  ;;  %v1978_v1 = vor.u32 %v2255_v61, %v1977_v60 }
  0x26   : > { %v2102_v27 = vor.u32 %v2284_v20, %v2099_v21  ;;  %318 = vst.msk [vmem:[#allocation2 + $0x20] sm:$0xff] %vm313_vm3, %v2376_v37  ;;  %v2287_v0 = vld [vmem:[%s2443_s7 + $0x184] sm:$0xf0]  ;;  %v2649_v9 = vld [vmem:[%s3214_s2] ss:$0 sm:$0xff] }
  0x27   : > { %319 = vst.msk [vmem:[#allocation2 + $0x28] sm:$0xff] %vm313_vm3, %v2376_v37  ;;  %v2258_v13 = vld [vmem:[%s2443_s7 + $0xa4] sm:$0xf]  ;;  %v1995_v14 = vld [vmem:[%s2443_s7 + $0xa8] sm:$0xf0] }
  0x28   : > { %320 = vst.msk [vmem:[#allocation2 + $0x30] sm:$0xff] %vm313_vm3, %v2376_v37  ;;  %v2670_v18 = vld [vmem:[%s3215_s3] ss:$0 sm:$0xff]  ;;  %v1998_v20 = vor.u32 %v2258_v13, %v1995_v14  ;;  %v1985_v21 = vld [vmem:[%s2443_s7 + $0x90] sm:$0xf] }
  0x29   : > { %981 = vmatpush.bf16.msra.mxu0 %v2302_v26  ;;  %2318 = vmatpush.bf16.msra.mxu2 %v2302_v26  ;;  %v2281_v26 = vld [vmem:[%s2443_s7 + $0x154] sm:$0xf0]  ;;  %321 = vst.msk [vmem:[#allocation2 + $0x38] sm:$0xff] %vm313_vm3, %v2376_v37  ;;  %v2121_v60 = vld [vmem:[%s2443_s7 + $0x1a0] sm:$0xf] }
  0x2a   : > { %2204 = vmatmul.msk.bf16.gmra.mxu1 %vm870_vm2, %v1926_v25  ;;  %2221 = vmatmul.msk.bf16.gmra.mxu3 %vm870_vm2, %v2062_v31  ;;  %v2081_v25 = vld [vmem:[%s2443_s7 + $0x150] sm:$0xf]  ;;  %v1971_v31 = vld [vmem:[%s2443_s7 + $0x78] sm:$0xf0]  ;;  %322 = vst.msk [vmem:[#allocation2 + $0x40] sm:$0xff] %vm313_vm3, %v2376_v37  ;;  %v379_v36 = vld [vmem:[#allocation2 + $0x8] sm:$0xff] }
  0x2b   : > { %v2082_v29 = vor.u32 %v2281_v26, %v2081_v25  ;;  %v1974_v34 = vor.u32 %v2252_v30, %v1971_v31  ;;  %323 = vst.msk [vmem:[#allocation2 + $0x48] sm:$0xff] %vm313_vm3, %v2376_v37  ;;  %v2113_v25 = vld [vmem:[%s2443_s7 + $0x190] sm:$0xf]  ;;  %v2289_v26 = vld [vmem:[%s2443_s7 + $0x194] sm:$0xf0] }
  0x2c   : > { %982 = vmatmul.bf16.vlgmr.msra.gmra.mxu0 %v1914_v32  ;;  %1062 = vmatmul.bf16.vlgmr.msra.gmra.mxu2 %v2042_v33  ;;  %v2286_v32 = vld [vmem:[%s2443_s7 + $0x184] sm:$0xf]  ;;  %v2107_v33 = vld [vmem:[%s2443_s7 + $0x188] sm:$0xf0]  ;;  %324 = vst.msk [vmem:[#allocation2 + $0x50] sm:$0xff] %vm313_vm3, %v2376_v37 }
  0x2d   : > { %v2110_v40 = vor.u32 %v2286_v32, %v2107_v33  ;;  %325 = vst.msk [vmem:[#allocation2 + $0x58] sm:$0xff] %vm313_vm3, %v2376_v37  ;;  %v2114_v32 = vor.u32 %v2289_v26, %v2113_v25  ;;  %v2291_v61 = vld [vmem:[%s2443_s7 + $0x1a4] sm:$0xf0]  ;;  %v2262_v25 = vld [vmem:[%s2443_s7 + $0xc4] sm:$0xf] }
  0x2e   : > { %326 = vst.msk [vmem:[#allocation2 + $0x60] sm:$0xff] %vm313_vm3, %v2376_v37 }
  0x2f   : > { %327 = vst.msk [vmem:[#allocation2 + $0x68] sm:$0xff] %vm313_vm3, %v2376_v37 }
  0x30   : > { %328 = vst.msk [vmem:[#allocation2 + $0x70] sm:$0xff] %vm313_vm3, %v2376_v37 }
  0x31   : > { %329 = vst.msk [vmem:[#allocation2 + $0x78] sm:$0xff] %vm313_vm3, %v2376_v37 }
  0x32   : > { %330 = vst.msk [vmem:[#allocation2 + $0x80] sm:$0xff] %vm313_vm3, %v2376_v37 }
  0x33   : > { %331 = vst.msk [vmem:[#allocation2 + $0x88] sm:$0xff] %vm313_vm3, %v2376_v37 }
  0x34   : > { %332 = vst.msk [vmem:[#allocation2 + $0x90] sm:$0xff] %vm313_vm3, %v2376_v37 }
  0x35   : > { %333 = vst.msk [vmem:[#allocation2 + $0x98] sm:$0xff] %vm313_vm3, %v2376_v37 }
  0x36   : > { %334 = vst.msk [vmem:[#allocation2 + $0xa0] sm:$0xff] %vm313_vm3, %v2376_v37 }
  0x37   : > { %335 = vst.msk [vmem:[#allocation2 + $0xa8] sm:$0xff] %vm313_vm3, %v2376_v37 }
  0x38   : > { %336 = vst.msk [vmem:[#allocation2 + $0xb0] sm:$0xff] %vm313_vm3, %v2376_v37 }
  0x39   : > { %337 = vst.msk [vmem:[#allocation2 + $0xb8] sm:$0xff] %vm313_vm3, %v2376_v37 }
  0x3a   : > { %2205 = vmatmul.msk.bf16.gmra.mxu1 %vm870_vm2, %v1934_v38  ;;  %2222 = vmatmul.msk.bf16.gmra.mxu3 %vm870_vm2, %v2070_v43  ;;  %v2089_v38 = vld [vmem:[%s2443_s7 + $0x160] sm:$0xf]  ;;  %v2254_v43 = vld [vmem:[%s2443_s7 + $0x84] sm:$0xf]  ;;  %338 = vst.msk [vmem:[#allocation2 + $0xc0] sm:$0xff] %vm313_vm3, %v2376_v37 }
  0x3b   : > { %v2090_v42 = vor.u32 %v2283_v39, %v2089_v38  ;;  %339 = vst.msk [vmem:[#allocation2 + $0xc8] sm:$0xff] %vm313_vm3, %v2376_v37 }
  0x3c   : > { %987 = vmatmul.bf16.gmra.mxu0 %v1922_v44  ;;  %1067 = vmatmul.bf16.gmra.mxu2 %v2050_v45  ;;  %v1979_v44 = vld [vmem:[%s2443_s7 + $0x88] sm:$0xf0]  ;;  %340 = vst.msk [vmem:[#allocation2 + $0xd0] sm:$0xff] %vm313_vm3, %v2376_v37 }
  0x3d   : > { %v1982_v45 = vor.u32 %v2254_v43, %v1979_v44  ;;  %341 = vst.msk [vmem:[#allocation2 + $0xd8] sm:$0xff] %vm313_vm3, %v2376_v37  ;;  %v2260_v44 = vld [vmem:[%s2443_s7 + $0xb4] sm:$0xf] }
  0x3e   : > { %342 = vst.msk [vmem:[#allocation2 + $0xe0] sm:$0xff] %vm313_vm3, %v2376_v37 }
  0x3f   : > { %343 = vst.msk [vmem:[#allocation2 + $0xe8] sm:$0xff] %vm313_vm3, %v2376_v37 }
  0x40   : > { %344 = vst.msk [vmem:[#allocation2 + $0xf0] sm:$0xff] %vm313_vm3, %v2376_v37 }
  0x41   : > { %345 = vst.msk [vmem:[#allocation2 + $0xf8] sm:$0xff] %vm313_vm3, %v2376_v37 }
  0x42   : > { %346 = vst.msk [vmem:[#allocation2 + $0x100] sm:$0xff] %vm313_vm3, %v2376_v37 }
  0x43   : > { %347 = vst.msk [vmem:[#allocation2 + $0x108] sm:$0xff] %vm313_vm3, %v2376_v37 }
  0x44   : > { %348 = vst.msk [vmem:[#allocation2 + $0x110] sm:$0xff] %vm313_vm3, %v2376_v37 }
  0x45   : > { %349 = vst.msk [vmem:[#allocation2 + $0x118] sm:$0xff] %vm313_vm3, %v2376_v37 }
  0x46   : > { %350 = vst.msk [vmem:[#allocation2 + $0x120] sm:$0xff] %vm313_vm3, %v2376_v37 }
  0x47   : > { %351 = vst.msk [vmem:[#allocation2 + $0x128] sm:$0xff] %vm313_vm3, %v2376_v37 }
  0x48   : > { %352 = vst.msk [vmem:[#allocation2 + $0x130] sm:$0xff] %vm313_vm3, %v2376_v37 }
  0x49   : > { %353 = vst.msk [vmem:[#allocation2 + $0x138] sm:$0xff] %vm313_vm3, %v2376_v37 }
  0x4a   : > { %2206 = vmatmul.msk.bf16.gmra.mxu1 %vm870_vm2, %v1942_v50  ;;  %2223 = vmatmul.msk.bf16.gmra.mxu3 %vm870_vm2, %v2078_v55  ;;  %v2285_v50 = vld [vmem:[%s2443_s7 + $0x174] sm:$0xf0]  ;;  %v1987_v55 = vld [vmem:[%s2443_s7 + $0x98] sm:$0xf0]  ;;  %354 = vst.msk [vmem:[#allocation2 + $0x140] sm:$0xff] %vm313_vm3, %v2376_v37 }
  0x4b   : > { %v2098_v52 = vor.u32 %v2285_v50, %v2097_v49  ;;  %v1990_v59 = vor.u32 %v2256_v54, %v1987_v55  ;;  %355 = vst.msk [vmem:[#allocation2 + $0x148] sm:$0xff] %vm313_vm3, %v2376_v37  ;;  %v412_v46 = vld [vmem:[#allocation2 + $0x110] sm:$0xff]  ;;  %v2131_v49 = vld [vmem:[%s2443_s7 + $0x1b8] sm:$0xf0] }
  0x4c   : > { %992 = vmatmul.bf16.gmra.mxu0 %v1930_v56  ;;  %1072 = vmatmul.bf16.gmra.mxu2 %v2058_v57  ;;  %v2288_v56 = vld [vmem:[%s2443_s7 + $0x194] sm:$0xf]  ;;  %v2115_v57 = vld [vmem:[%s2443_s7 + $0x198] sm:$0xf0]  ;;  %356 = vst.msk [vmem:[#allocation2 + $0x150] sm:$0xff] %vm313_vm3, %v2376_v37 }
  0x4d   : > { %v2118_v58 = vor.u32 %v2288_v56, %v2115_v57  ;;  %357 = vst.msk [vmem:[#allocation2 + $0x158] sm:$0xff] %vm313_vm3, %v2376_v37  ;;  %v1993_v56 = vld [vmem:[%s2443_s7 + $0xa0] sm:$0xf]  ;;  %v2259_v57 = vld [vmem:[%s2443_s7 + $0xa4] sm:$0xf0] }
  0x4e   : > { %358 = vst.msk [vmem:[#allocation2 + $0x160] sm:$0xff] %vm313_vm3, %v2376_v37 }
  0x4f   : > { %359 = vst.msk [vmem:[#allocation2 + $0x168] sm:$0xff] %vm313_vm3, %v2376_v37 }
  0x50   : > { %360 = vst.msk [vmem:[#allocation2 + $0x170] sm:$0xff] %vm313_vm3, %v2376_v37 }
  0x51   : > { %361 = vst.msk [vmem:[#allocation2 + $0x178] sm:$0xff] %vm313_vm3, %v2376_v37 }
  0x52   : > { %362 = vst.msk [vmem:[#allocation2 + $0x180] sm:$0xff] %vm313_vm3, %v2376_v37 }
  0x53   : > { %363 = vst.msk [vmem:[#allocation2 + $0x188] sm:$0xff] %vm313_vm3, %v2376_v37 }
  0x54   : > { %364 = vst.msk [vmem:[#allocation2 + $0x190] sm:$0xff] %vm313_vm3, %v2376_v37 }
  0x55   : > { %365 = vst.msk [vmem:[#allocation2 + $0x198] sm:$0xff] %vm313_vm3, %v2376_v37 }
  0x56   : > { %366 = vst.msk [vmem:[#allocation2 + $0x1a0] sm:$0xff] %vm313_vm3, %v2376_v37 }
  0x57   : > { %367 = vst.msk [vmem:[#allocation2 + $0x1a8] sm:$0xff] %vm313_vm3, %v2376_v37 }
  0x58   : > { %368 = vst.msk [vmem:[#allocation2 + $0x1b0] sm:$0xff] %vm313_vm3, %v2376_v37 }
  0x59   : > { %369 = vst.msk [vmem:[#allocation2 + $0x1b8] sm:$0xff] %vm313_vm3, %v2376_v37 }
  0x5a   : > { %2207 = vmatmul.msk.bf16.gmra.mxu1 %vm870_vm2, %v1950_v62  ;;  %2224 = vmatmul.msk.bf16.gmra.mxu3 %vm870_vm2, %v2086_v3  ;;  %v378_v3 = vld [vmem:[#allocation2] sm:$0xff]  ;;  %370 = vst.msk [vmem:[#allocation2 + $0x1c0] sm:$0xff] %vm313_vm3, %v2376_v37 }
  0x5b   : > { %371 = vst.msk [vmem:[#allocation2 + $0x1c8] sm:$0xff] %vm313_vm3, %v2376_v37 }
  0x5c   : > { %997 = vmatmul.bf16.gmra.mxu0 %v1938_v4  ;;  %1077 = vmatmul.bf16.gmra.mxu2 %v2066_v5  ;;  %v2106_v5 = vor.u32 %v2287_v0, %v2105_v63  ;;  %372 = vst.msk [vmem:[#allocation2 + $0x1d0] sm:$0xff] %vm313_vm3, %v2376_v37  ;;  %v1994_v0 = vor.u32 %v2259_v57, %v1993_v56  ;;  %v415_v57 = vld [vmem:[#allocation2 + $0x128] sm:$0xff] }
  0x5d   : > { %373 = vst.msk [vmem:[#allocation2 + $0x1d8] sm:$0xff] %vm313_vm3, %v2376_v37 }
  0x5e   : > { %374 = vst.msk [vmem:[#allocation2 + $0x1e0] sm:$0xff] %vm313_vm3, %v2376_v37 }
  0x5f   : > { %375 = vst.msk [vmem:[#allocation2 + $0x1e8] sm:$0xff] %vm313_vm3, %v2376_v37 }
  0x60   : > { %376 = vst.msk [vmem:[#allocation2 + $0x1f0] sm:$0xff] %vm313_vm3, %v2376_v37 }
  0x61   : > { %377 = vst.msk [vmem:[#allocation2 + $0x1f8] sm:$0xff] %vm313_vm3, %v2376_v37  ;;  %v382_v37 = vld [vmem:[#allocation2 + $0x20] sm:$0xff] }
  0x6a   : > { %2208 = vmatmul.msk.bf16.gmra.mxu1 %vm870_vm2, %v1958_v10  ;;  %2225 = vmatmul.msk.bf16.gmra.mxu3 %vm870_vm2, %v2094_v15  ;;  %v2290_v15 = vld [vmem:[%s2443_s7 + $0x1a4] sm:$0xf] }
  0x6c   : > { %1002 = vmatmul.bf16.gmra.mxu0 %v1946_v16  ;;  %1082 = vmatmul.bf16.gmra.mxu2 %v2074_v17  ;;  %v2123_v16 = vld [vmem:[%s2443_s7 + $0x1a8] sm:$0xf0] }
  0x6d   : > { %v2126_v17 = vor.u32 %v2290_v15, %v2123_v16 }
  0x7a   : > { %2209 = vmatmul.msk.bf16.gmra.mxu1 %vm870_vm2, %v1966_v22  ;;  %2226 = vmatmul.msk.bf16.gmra.mxu3 %vm870_vm2, %v2102_v27  ;;  %v2257_v22 = vld [vmem:[%s2443_s7 + $0x94] sm:$0xf0] }
  0x7c   : > { %1007 = vmatmul.bf16.gmra.mxu0 %v1954_v28  ;;  %1087 = vmatmul.bf16.gmra.mxu2 %v2082_v29  ;;  %v1986_v29 = vor.u32 %v2257_v22, %v1985_v21  ;;  %v414_v22 = vld [vmem:[#allocation2 + $0x120] sm:$0xff] }
  0x8a   : > { %2210 = vmatmul.msk.bf16.gmra.mxu1 %vm870_vm2, %v1974_v34  ;;  %2227 = vmatmul.msk.bf16.gmra.mxu3 %vm870_vm2, %v2110_v40 }
  0x8c   : > { %1012 = vmatmul.bf16.gmra.mxu0 %v1962_v41  ;;  %1092 = vmatmul.bf16.gmra.mxu2 %v2090_v42  ;;  %v380_v41 = vld [vmem:[#allocation2 + $0x10] sm:$0xff] }
  0x97   : > { %v1152_v48 = vpop.f32.mrf.mxu1 }
  0x9a   : > { %2211 = vmatmul.msk.bf16.gmra.mxu1 %vm870_vm2, %v1982_v45  ;;  %2228 = vmatmul.msk.bf16.gmra.mxu3 %vm870_vm2, %v2118_v58  ;;  %v2003_v45 = vld [vmem:[%s2443_s7 + $0xb8] sm:$0xf0] }
  0x9b   : > { %v2006_v55 = vor.u32 %v2260_v44, %v2003_v45 }
  0x9c   : > { %1017 = vmatmul.bf16.gmra.mxu0 %v1970_v51  ;;  %1097 = vmatmul.bf16.gmra.mxu2 %v2098_v52  ;;  %v381_v51 = vld [vmem:[#allocation2 + $0x18] sm:$0xff] }
  0x9d   : > { %v2628_v2 = vpop.f32.mrf.mxu3 }
  0x9f   : > { %v2593_v53 = vpop.f32.mrf.mxu1 }
  0xa5   : > { %v2655_v11 = vpop.f32.mrf.mxu3 }
  0xa7   : > { %v2618_v62 = vpop.f32.mrf.mxu1 }
  0xa9   : > { %v983_v4 = vpop.f32.mrf.mxu0 }
  0xaa   : > { %2212 = vmatmul.msk.bf16.gmra.mxu1 %vm870_vm2, %v1990_v59  ;;  %v1153_v6 = vadd.f32 %v1152_v48, %v983_v4  ;;  %2229 = vmatmul.msk.bf16.gmra.mxu3 %vm870_vm2, %v2126_v17  ;;  %v2292_v48 = vld [vmem:[%s2443_s7 + $0x1b4] sm:$0xf]  ;;  %v2122_v4 = vor.u32 %v2291_v61, %v2121_v60 }
  0xab   : > { %v2134_v52 = vor.u32 %v2292_v48, %v2131_v49  ;;  %v2261_v48 = vld [vmem:[%s2443_s7 + $0xb4] sm:$0xf0] }
  0xac   : > { %v1312_v7 = vadd.f32 %v1153_v6, %v378_v3  ;;  %1022 = vmatmul.bf16.gmra.mxu0 %v1978_v1  ;;  %1102 = vmatmul.bf16.gmra.mxu2 %v2106_v5 }
  0xad   : > { %v2693_v30 = vpop.f32.mrf.mxu3 }
  0xae   : > { %1377 = vst.msk [vmem:[#allocation2] sm:$0xff] %vm313_vm3, %v1312_v7 }
  0xaf   : > { %v2642_v8 = vpop.f32.mrf.mxu1  ;;  %v2653_v10 = vpop.f32.mrf.mxu2 }
  0xb1   : > { %v985_v12 = vpop.f32.mrf.mxu0 }
  0xb2   : > { %v1155_v35 = vadd.f32 %v2593_v53, %v985_v12 }
  0xb4   : > { %v1313_v50 = vadd.f32 %v1155_v35, %v379_v36 }
  0xb5   : > { %v1444_v19 = vld [vmem:[#allocation2] sm:$0xff]  ;;  %v2723_v40 = vpop.f32.mrf.mxu3 }
  0xb6   : > { %v1512_v23 = vmul.f32 %v2649_v9, %v1444_v19  ;;  %1378 = vst.msk [vmem:[#allocation2 + $0x8] sm:$0xff] %vm313_vm3, %v1313_v50 }
  0xb7   : > { %v2682_v24 = vpop.f32.mrf.mxu1  ;;  %v2691_v28 = vpop.f32.mrf.mxu2 }
  0xb8   : > { %v1580_v27 = vadd.f32 %v2670_v18, %v1512_v23 }
  0xb9   : > { %v988_v31 = vpop.f32.mrf.mxu0 }
  0xba   : > { %2213 = vmatmul.msk.bf16.gmra.mxu1 %vm870_vm2, %v1998_v20  ;;  %v1644_v33 = vmax.f32 %v1580_v27, 0.0  ;;  %v1158_v38 = vadd.f32 %v2618_v62, %v988_v31  ;;  %2230 = vmatmul.msk.bf16.gmra.mxu3 %vm870_vm2, %v2134_v52  ;;  %v413_v62 = vld [vmem:[#allocation2 + $0x118] sm:$0xff]  ;;  %v2011_v31 = vld [vmem:[%s2443_s7 + $0xc8] sm:$0xf0] }
  0xbc   : > { %1708 = vst.msk [vmem:[%s2700_s29] sm:$0xff] %vm313_vm3, %v1644_v33  ;;  %1027 = vmatmul.bf16.gmra.mxu0 %v1986_v29  ;;  %1107 = vmatmul.bf16.gmra.mxu2 %v2114_v32  ;;  %v1314_v53 = vadd.f32 %v1158_v38, %v380_v41  ;;  %v2294_v32 = vld [vmem:[%s2443_s7 + $0x1c4] sm:$0xf]  ;;  %v2139_v33 = vld [vmem:[%s2443_s7 + $0x1c8] sm:$0xf0] }
  0xbd   : > { %v2752_v1 = vpop.f32.mrf.mxu3  ;;  %v383_v38 = vld [vmem:[#allocation2 + $0x28] sm:$0xff] }
  0xbe   : > { %1379 = vst.msk [vmem:[#allocation2 + $0x10] sm:$0xff] %vm313_vm3, %v1314_v53  ;;  %v2129_v53 = vld [vmem:[%s2443_s7 + $0x1b0] sm:$0xf] }
  0xbf   : > { %v2715_v34 = vpop.f32.mrf.mxu1  ;;  %v1068_v39 = vpop.f32.mrf.mxu2 }
  0xc0   : > { %v1238_v42 = vadd.f32 %v2628_v2, %v1068_v39 }
  0xc1   : > { %v990_v43 = vpop.f32.mrf.mxu0 }
  0xc2   : > { %v1160_v47 = vadd.f32 %v2642_v8, %v990_v43  ;;  %v1346_v54 = vadd.f32 %v1238_v42, %v412_v46  ;;  %v1445_v8 = vld [vmem:[#allocation2 + $0x8] sm:$0xff]  ;;  %v2001_v43 = vld [vmem:[%s2443_s7 + $0xb0] sm:$0xf] }
  0xc3   : > { %v1513_v12 = vmul.f32 %v2649_v9, %v1445_v8  ;;  %v2002_v60 = vor.u32 %v2261_v48, %v2001_v43  ;;  %v2137_v43 = vld [vmem:[%s2443_s7 + $0x1c0] sm:$0xf] }
  0xc4   : > { %v1315_v58 = vadd.f32 %v1160_v47, %v381_v51  ;;  %1411 = vst.msk [vmem:[#allocation2 + $0x110] sm:$0xff] %vm313_vm3, %v1346_v54  ;;  %v2014_v47 = vor.u32 %v2262_v25, %v2011_v31  ;;  %v2293_v54 = vld [vmem:[%s2443_s7 + $0x1b4] sm:$0xf0]  ;;  %v2147_v25 = vld [vmem:[%s2443_s7 + $0x1d8] sm:$0xf0] }
  0xc5   : > { %v1446_v13 = vld [vmem:[#allocation2 + $0x10] sm:$0xff]  ;;  %v2765_v17 = vpop.f32.mrf.mxu3  ;;  %v1581_v19 = vadd.f32 %v2670_v18, %v1513_v12 }
  0xc6   : > { %1380 = vst.msk [vmem:[#allocation2 + $0x18] sm:$0xff] %vm313_vm3, %v1315_v58  ;;  %v1514_v14 = vmul.f32 %v2649_v9, %v1446_v13 }
  0xc7   : > { %v2746_v59 = vpop.f32.mrf.mxu1  ;;  %v1070_v63 = vpop.f32.mrf.mxu2  ;;  %v1645_v35 = vmax.f32 %v1581_v19, 0.0 }
  0xc8   : > { %v1240_v2 = vadd.f32 %v2655_v11, %v1070_v63  ;;  %v1582_v26 = vadd.f32 %v2670_v18, %v1514_v14 }
  0xc9   : > { %v993_v3 = vpop.f32.mrf.mxu0  ;;  %1709 = vst.msk [vmem:[%s2700_s29 + $0x8] sm:$0xff] %vm313_vm3, %v1645_v35 }
  0xca   : > { %2214 = vmatmul.msk.bf16.gmra.mxu1 %vm870_vm2, %v2006_v55  ;;  %v1163_v5 = vadd.f32 %v2682_v24, %v993_v3  ;;  %v1347_v6 = vadd.f32 %v1240_v2, %v413_v62  ;;  %v1646_v39 = vmax.f32 %v1582_v26, 0.0 }
  0xcb   : > { %v1478_v15 = vld [vmem:[#allocation2 + $0x110] sm:$0xff] }
  0xcc   : > { %v1316_v7 = vadd.f32 %v1163_v5, %v382_v37  ;;  %1032 = vmatmul.bf16.gmra.mxu0 %v1994_v0  ;;  %1412 = vst.msk [vmem:[#allocation2 + $0x118] sm:$0xff] %vm313_vm3, %v1347_v6  ;;  %1112 = vmatmul.bf16.gmra.mxu2 %v2122_v4  ;;  %v1546_v20 = vmul.f32 %v2649_v9, %v1478_v15  ;;  %v384_v0 = vld [vmem:[#allocation2 + $0x30] sm:$0xff] }
  0xcd   : > { %v1447_v21 = vld [vmem:[#allocation2 + $0x18] sm:$0xff]  ;;  %1710 = vst.msk [vmem:[%s2700_s29 + $0x10] sm:$0xff] %vm313_vm3, %v1646_v39  ;;  %v2798_v61 = vpop.f32.mrf.mxu3  ;;  %v2130_v37 = vor.u32 %v2293_v54, %v2129_v53  ;;  %v386_v53 = vld [vmem:[#allocation2 + $0x40] sm:$0xff] }
  0xce   : > { %1381 = vst.msk [vmem:[#allocation2 + $0x20] sm:$0xff] %vm313_vm3, %v1316_v7  ;;  %v1515_v27 = vmul.f32 %v2649_v9, %v1447_v21  ;;  %v1614_v36 = vadd.f32 %v2670_v18, %v1546_v20  ;;  %v2264_v20 = vld [vmem:[%s2443_s7 + $0xd4] sm:$0xf] }
  0xcf   : > { %v2761_v11 = vpop.f32.mrf.mxu1  ;;  %v1073_v16 = vpop.f32.mrf.mxu2 }
  0xd0   : > { %v1243_v23 = vadd.f32 %v2693_v30, %v1073_v16  ;;  %v2142_v30 = vor.u32 %v2294_v32, %v2139_v33  ;;  %v1583_v41 = vadd.f32 %v2670_v18, %v1515_v27  ;;  %v385_v16 = vld [vmem:[#allocation2 + $0x38] sm:$0xff]  ;;  %v2009_v33 = vld [vmem:[%s2443_s7 + $0xc0] sm:$0xf] }
  0xd1   : > { %v995_v24 = vpop.f32.mrf.mxu0 }
  0xd2   : > { %v1165_v29 = vadd.f32 %v2715_v34, %v995_v24  ;;  %v1678_v34 = vmax.f32 %v1614_v36, 0.0  ;;  %v1348_v46 = vadd.f32 %v1243_v23, %v414_v22  ;;  %2231 = vmatmul.msk.bf16.gmra.mxu3 %vm870_vm2, %v2142_v30  ;;  %v1647_v49 = vmax.f32 %v1583_v41, 0.0  ;;  %v2019_v23 = vld [vmem:[%s2443_s7 + $0xd8] sm:$0xf0]  ;;  %v2296_v24 = vld [vmem:[%s2443_s7 + $0x1d4] sm:$0xf] }
  0xd3   : > { %v1479_v42 = vld [vmem:[#allocation2 + $0x118] sm:$0xff]  ;;  %v2263_v30 = vld [vmem:[%s2443_s7 + $0xc4] sm:$0xf0] }
  0xd4   : > { %v1547_v44 = vmul.f32 %v2649_v9, %v1479_v42  ;;  %v1317_v51 = vadd.f32 %v1165_v29, %v383_v38  ;;  %1742 = vst.msk [vmem:[%s2700_s29 + $0x110] sm:$0xff] %vm313_vm3, %v1678_v34  ;;  %v2150_v29 = vor.u32 %v2296_v24, %v2147_v25  ;;  %v2022_v38 = vor.u32 %v2264_v20, %v2019_v23  ;;  %v2295_v34 = vld [vmem:[%s2443_s7 + $0x1c4] sm:$0xf0]  ;;  %v2155_v20 = vld [vmem:[%s2443_s7 + $0x1e8] sm:$0xf0] }
  0xd5   : > { %v1448_v45 = vld [vmem:[#allocation2 + $0x20] sm:$0xff]  ;;  %1711 = vst.msk [vmem:[%s2700_s29 + $0x18] sm:$0xff] %vm313_vm3, %v1647_v49  ;;  %v2813_v12 = vpop.f32.mrf.mxu3  ;;  %v2010_v48 = vor.u32 %v2263_v30, %v2009_v33 }
  0xd6   : > { %v1516_v50 = vmul.f32 %v2649_v9, %v1448_v45  ;;  %v1615_v55 = vadd.f32 %v2670_v18, %v1547_v44  ;;  %1413 = vst.msk [vmem:[#allocation2 + $0x120] sm:$0xff] %vm313_vm3, %v1348_v46  ;;  %v417_v46 = vld [vmem:[#allocation2 + $0x138] sm:$0xff] }
  0xd7   : > { %v2788_v52 = vpop.f32.mrf.mxu1  ;;  %v1075_v58 = vpop.f32.mrf.mxu2  ;;  %1382 = vst.msk [vmem:[#allocation2 + $0x28] sm:$0xff] %vm313_vm3, %v1317_v51 }
  0xd8   : > { %v1584_v56 = vadd.f32 %v2670_v18, %v1516_v50  ;;  %v1679_v62 = vmax.f32 %v1615_v55, 0.0  ;;  %v1245_v63 = vadd.f32 %v2723_v40, %v1075_v58  ;;  %v2138_v55 = vor.u32 %v2295_v34, %v2137_v43  ;;  %v388_v43 = vld [vmem:[#allocation2 + $0x50] sm:$0xff] }
  0xd9   : > { %v998_v2 = vpop.f32.mrf.mxu0 }
  0xda   : > { %2215 = vmatmul.msk.bf16.gmra.mxu1 %vm870_vm2, %v2014_v47  ;;  %v1648_v3 = vmax.f32 %v1584_v56, 0.0  ;;  %v1168_v4 = vadd.f32 %v2746_v59, %v998_v2  ;;  %1743 = vst.msk [vmem:[%s2700_s29 + $0x118] sm:$0xff] %vm313_vm3, %v1679_v62  ;;  %v1349_v5 = vadd.f32 %v1245_v63, %v415_v57  ;;  %v416_v59 = vld [vmem:[#allocation2 + $0x130] sm:$0xff] }
  0xdc   : > { %1712 = vst.msk [vmem:[%s2700_s29 + $0x20] sm:$0xff] %vm313_vm3, %v1648_v3  ;;  %v1318_v6 = vadd.f32 %v1168_v4, %v384_v0  ;;  %1037 = vmatmul.bf16.gmra.mxu0 %v2002_v60  ;;  %1117 = vmatmul.bf16.gmra.mxu2 %v2130_v37  ;;  %v418_v3 = vld [vmem:[#allocation2 + $0x140] sm:$0xff] }
  0xdd   : > { %1414 = vst.msk [vmem:[#allocation2 + $0x128] sm:$0xff] %vm313_vm3, %v1349_v5  ;;  %v1480_v7 = vld [vmem:[#allocation2 + $0x120] sm:$0xff]  ;;  %v2842_v49 = vpop.f32.mrf.mxu3 }
  0xde   : > { %1383 = vst.msk [vmem:[#allocation2 + $0x30] sm:$0xff] %vm313_vm3, %v1318_v6  ;;  %v1548_v13 = vmul.f32 %v2649_v9, %v1480_v7  ;;  %v1449_v14 = vld [vmem:[#allocation2 + $0x28] sm:$0xff] }
  0xdf   : > { %v2811_v40 = vpop.f32.mrf.mxu1  ;;  %v1078_v8 = vpop.f32.mrf.mxu2  ;;  %v1517_v21 = vmul.f32 %v2649_v9, %v1449_v14  ;;  %v2027_v14 = vld [vmem:[%s2443_s7 + $0xe8] sm:$0xf0] }
  0xe0   : > { %v1248_v15 = vadd.f32 %v2752_v1, %v1078_v8  ;;  %v1616_v26 = vadd.f32 %v2670_v18, %v1548_v13  ;;  %v2266_v13 = vld [vmem:[%s2443_s7 + $0xe4] sm:$0xf] }
  0xe1   : > { %v1000_v19 = vpop.f32.mrf.mxu0  ;;  %v1585_v31 = vadd.f32 %v2670_v18, %v1517_v21 }
  0xe2   : > { %v1170_v22 = vadd.f32 %v2761_v11, %v1000_v19  ;;  %v1350_v27 = vadd.f32 %v1248_v15, %v416_v59  ;;  %v1680_v35 = vmax.f32 %v1616_v26, 0.0  ;;  %2232 = vmatmul.msk.bf16.gmra.mxu3 %vm870_vm2, %v2150_v29  ;;  %v387_v59 = vld [vmem:[#allocation2 + $0x48] sm:$0xff]  ;;  %v2298_v19 = vld [vmem:[%s2443_s7 + $0x1e4] sm:$0xf]  ;;  %v2030_v26 = vor.u32 %v2266_v13, %v2027_v14 }
  0xe3   : > { %v1649_v39 = vmax.f32 %v1585_v31, 0.0 }
  0xe4   : > { %v1481_v1 = vld [vmem:[#allocation2 + $0x128] sm:$0xff]  ;;  %v1319_v32 = vadd.f32 %v1170_v22, %v385_v16  ;;  %1415 = vst.msk [vmem:[#allocation2 + $0x130] sm:$0xff] %vm313_vm3, %v1350_v27  ;;  %v2158_v22 = vor.u32 %v2298_v19, %v2155_v20  ;;  %v2017_v27 = vld [vmem:[%s2443_s7 + $0xd0] sm:$0xf] }
  0xe5   : > { %v1549_v11 = vmul.f32 %v2649_v9, %v1481_v1  ;;  %v1450_v36 = vld [vmem:[#allocation2 + $0x30] sm:$0xff]  ;;  %1744 = vst.msk [vmem:[%s2700_s29 + $0x120] sm:$0xff] %vm313_vm3, %v1680_v35  ;;  %v2859_v5 = vpop.f32.mrf.mxu3 }
  0xe6   : > { %v1518_v41 = vmul.f32 %v2649_v9, %v1450_v36  ;;  %1384 = vst.msk [vmem:[#allocation2 + $0x38] sm:$0xff] %vm313_vm3, %v1319_v32  ;;  %v2145_v1 = vld [vmem:[%s2443_s7 + $0x1d0] sm:$0xf]  ;;  %v2297_v32 = vld [vmem:[%s2443_s7 + $0x1d4] sm:$0xf0] }
  0xe7   : > { %v2832_v42 = vpop.f32.mrf.mxu1  ;;  %v1617_v44 = vadd.f32 %v2670_v18, %v1549_v11  ;;  %1713 = vst.msk [vmem:[%s2700_s29 + $0x28] sm:$0xff] %vm313_vm3, %v1649_v39  ;;  %v1080_v47 = vpop.f32.mrf.mxu2  ;;  %v419_v11 = vld [vmem:[#allocation2 + $0x148] sm:$0xff] }
  0xe8   : > { %v1586_v45 = vadd.f32 %v2670_v18, %v1518_v41  ;;  %v1250_v51 = vadd.f32 %v2765_v17, %v1080_v47 }
  0xe9   : > { %v1681_v50 = vmax.f32 %v1617_v44, 0.0  ;;  %v1003_v54 = vpop.f32.mrf.mxu0  ;;  %v2146_v44 = vor.u32 %v2297_v32, %v2145_v1  ;;  %v390_v1 = vld [vmem:[#allocation2 + $0x60] sm:$0xff] }
  0xea   : > { %2216 = vmatmul.msk.bf16.gmra.mxu1 %vm870_vm2, %v2022_v38  ;;  %v1650_v56 = vmax.f32 %v1586_v45, 0.0  ;;  %v1173_v57 = vadd.f32 %v2788_v52, %v1003_v54  ;;  %v1351_v58 = vadd.f32 %v1250_v51, %v417_v46 }
  0xeb   : > { %1745 = vst.msk [vmem:[%s2700_s29 + $0x128] sm:$0xff] %vm313_vm3, %v1681_v50  ;;  %v1482_v60 = vld [vmem:[#allocation2 + $0x130] sm:$0xff] }
  0xec   : > { %1714 = vst.msk [vmem:[%s2700_s29 + $0x30] sm:$0xff] %vm313_vm3, %v1650_v56  ;;  %v1320_v62 = vadd.f32 %v1173_v57, %v386_v53  ;;  %1042 = vmatmul.bf16.gmra.mxu0 %v2010_v48  ;;  %v1550_v63 = vmul.f32 %v2649_v9, %v1482_v60  ;;  %1122 = vmatmul.bf16.gmra.mxu2 %v2138_v55  ;;  %v420_v56 = vld [vmem:[#allocation2 + $0x150] sm:$0xff] }
  0xed   : > { %v1451_v17 = vld [vmem:[#allocation2 + $0x38] sm:$0xff]  ;;  %1416 = vst.msk [vmem:[#allocation2 + $0x138] sm:$0xff] %vm313_vm3, %v1351_v58  ;;  %v2884_v30 = vpop.f32.mrf.mxu3 }
  0xee   : > { %v1519_v0 = vmul.f32 %v2649_v9, %v1451_v17  ;;  %1385 = vst.msk [vmem:[#allocation2 + $0x40] sm:$0xff] %vm313_vm3, %v1320_v62  ;;  %v1618_v2 = vadd.f32 %v2670_v18, %v1550_v63  ;;  %v389_v63 = vld [vmem:[#allocation2 + $0x58] sm:$0xff] }
  0xef   : > { %v2855_v52 = vpop.f32.mrf.mxu1  ;;  %v1083_v4 = vpop.f32.mrf.mxu2 }
  0xf0   : > { %v1587_v37 = vadd.f32 %v2670_v18, %v1519_v0  ;;  %v1682_v6 = vmax.f32 %v1618_v2, 0.0  ;;  %v1253_v7 = vadd.f32 %v2798_v61, %v1083_v4  ;;  %v2268_v0 = vld [vmem:[%s2443_s7 + $0xf4] sm:$0xf]  ;;  %v2035_v2 = vld [vmem:[%s2443_s7 + $0xf8] sm:$0xf0] }
  0xf1   : > { %v1005_v8 = vpop.f32.mrf.mxu0  ;;  %v2300_v4 = vld [vmem:[%s2443_s7 + $0x1f4] sm:$0xf] }
  0xf2   : > { %v1651_v15 = vmax.f32 %v1587_v37, 0.0  ;;  %v1175_v16 = vadd.f32 %v2811_v40, %v1005_v8  ;;  %1746 = vst.msk [vmem:[%s2700_s29 + $0x130] sm:$0xff] %vm313_vm3, %v1682_v6  ;;  %v1352_v21 = vadd.f32 %v1253_v7, %v418_v3  ;;  %v2265_v40 = vld [vmem:[%s2443_s7 + $0xd4] sm:$0xf0]  ;;  %2233 = vmatmul.msk.bf16.gmra.mxu3 %vm870_vm2, %v2158_v22  ;;  %v2163_v6 = vld [vmem:[%s2443_s7 + $0x1f8] sm:$0xf0] }
  0xf3   : > { %v2018_v38 = vor.u32 %v2265_v40, %v2017_v27  ;;  %v2299_v22 = vld [vmem:[%s2443_s7 + $0x1e4] sm:$0xf0] }
  0xf4   : > { %1715 = vst.msk [vmem:[%s2700_s29 + $0x38] sm:$0xff] %vm313_vm3, %v1651_v15  ;;  %v1483_v61 = vld [vmem:[#allocation2 + $0x138] sm:$0xff]  ;;  %v1321_v23 = vadd.f32 %v1175_v16, %v387_v59  ;;  %v2166_v59 = vor.u32 %v2300_v4, %v2163_v6  ;;  %v2038_v15 = vor.u32 %v2268_v0, %v2035_v2  ;;  %v2025_v16 = vld [vmem:[%s2443_s7 + $0xe0] sm:$0xf]  ;;  %v2033_v0 = vld [vmem:[%s2443_s7 + $0xf0] sm:$0xf] }
  0xf5   : > { %v1551_v24 = vmul.f32 %v2649_v9, %v1483_v61  ;;  %v1452_v25 = vld [vmem:[#allocation2 + $0x40] sm:$0xff]  ;;  %1417 = vst.msk [vmem:[#allocation2 + $0x140] sm:$0xff] %vm313_vm3, %v1352_v21  ;;  %v2901_v58 = vpop.f32.mrf.mxu3  ;;  %v2269_v2 = vld [vmem:[%s2443_s7 + $0xf4] sm:$0xf0] }
  0xf6   : > { %v1520_v29 = vmul.f32 %v2649_v9, %v1452_v25  ;;  %1386 = vst.msk [vmem:[#allocation2 + $0x48] sm:$0xff] %vm313_vm3, %v1321_v23  ;;  %v2153_v21 = vld [vmem:[%s2443_s7 + $0x1e0] sm:$0xf]  ;;  %v2301_v4 = vld [vmem:[%s2443_s7 + $0x1f4] sm:$0xf0] }
  0xf7   : > { %v2878_v31 = vpop.f32.mrf.mxu1  ;;  %v1619_v33 = vadd.f32 %v2670_v18, %v1551_v24  ;;  %v1085_v36 = vpop.f32.mrf.mxu2  ;;  %v421_v24 = vld [vmem:[#allocation2 + $0x158] sm:$0xff] }
  0xf8   : > { %v1588_v35 = vadd.f32 %v2670_v18, %v1520_v29  ;;  %v1255_v41 = vadd.f32 %v2813_v12, %v1085_v36 }
  0xf9   : > { %v1683_v39 = vmax.f32 %v1619_v33, 0.0  ;;  %v1008_v34 = vpop.f32.mrf.mxu0  ;;  %v2154_v33 = vor.u32 %v2299_v22, %v2153_v21 }
  0xfa   : > { %2217 = vmatmul.msk.bf16.gmra.mxu1 %vm870_vm2, %v2030_v26  ;;  %v1652_v45 = vmax.f32 %v1588_v35, 0.0  ;;  %v1178_v46 = vadd.f32 %v2832_v42, %v1008_v34  ;;  %v1353_v47 = vadd.f32 %v1255_v41, %v419_v11 }
  0xfb   : > { %1747 = vst.msk [vmem:[%s2700_s29 + $0x138] sm:$0xff] %vm313_vm3, %v1683_v39 }
  0xfc   : > { %1716 = vst.msk [vmem:[%s2700_s29 + $0x40] sm:$0xff] %vm313_vm3, %v1652_v45  ;;  %v1484_v48 = vld [vmem:[#allocation2 + $0x140] sm:$0xff]  ;;  %v1322_v50 = vadd.f32 %v1178_v46, %v388_v43  ;;  %1047 = vmatmul.bf16.gmra.mxu0 %v2018_v38  ;;  %1127 = vmatmul.bf16.gmra.mxu2 %v2146_v44 }
  0xfd   : > { %v1552_v51 = vmul.f32 %v2649_v9, %v1484_v48  ;;  %v1453_v12 = vld [vmem:[#allocation2 + $0x48] sm:$0xff]  ;;  %1418 = vst.msk [vmem:[#allocation2 + $0x148] sm:$0xff] %vm313_vm3, %v1353_v47  ;;  %v2926_v27 = vpop.f32.mrf.mxu3  ;;  %v422_v45 = vld [vmem:[#allocation2 + $0x160] sm:$0xff] }
  0xfe   : > { %v1521_v53 = vmul.f32 %v2649_v9, %v1453_v12  ;;  %1387 = vst.msk [vmem:[#allocation2 + $0x50] sm:$0xff] %vm313_vm3, %v1322_v50 }
  0xff   : > { %v2897_v42 = vpop.f32.mrf.mxu1  ;;  %v1620_v54 = vadd.f32 %v2670_v18, %v1552_v51  ;;  %v1088_v57 = vpop.f32.mrf.mxu2  ;;  %v391_v51 = vld [vmem:[#allocation2 + $0x68] sm:$0xff] }
 0x100   : > { %v1589_v55 = vadd.f32 %v2670_v18, %v1521_v53  ;;  %v1258_v62 = vadd.f32 %v2842_v49, %v1088_v57 }
 0x101   : > { %v1684_v60 = vmax.f32 %v1620_v54, 0.0  ;;  %v1010_v17 = vpop.f32.mrf.mxu0 }
 0x102   : > { %v1653_v37 = vmax.f32 %v1589_v55, 0.0  ;;  %v1180_v3 = vadd.f32 %v2855_v52, %v1010_v17  ;;  %v1354_v7 = vadd.f32 %v1258_v62, %v420_v56  ;;  %v2267_v52 = vld [vmem:[%s2443_s7 + $0xe4] sm:$0xf0]  ;;  %2234 = vmatmul.msk.bf16.gmra.mxu3 %vm870_vm2, %v2166_v59  ;;  %v2270_v55 = vld [vmem:[%s2443_s7 + $0x104] sm:$0xf] }
 0x103   : > { %1748 = vst.msk [vmem:[%s2700_s29 + $0x140] sm:$0xff] %vm313_vm3, %v1684_v60  ;;  %v2026_v26 = vor.u32 %v2267_v52, %v2025_v16  ;;  %v2043_v56 = vld [vmem:[%s2443_s7 + $0x108] sm:$0xf0]  ;;  %v392_v16 = vld [vmem:[#allocation2 + $0x70] sm:$0xff] }
 0x104   : > { %1717 = vst.msk [vmem:[%s2700_s29 + $0x48] sm:$0xff] %vm313_vm3, %v1653_v37  ;;  %v1485_v49 = vld [vmem:[#allocation2 + $0x148] sm:$0xff]  ;;  %v1323_v8 = vadd.f32 %v1180_v3, %v389_v63  ;;  %v2046_v17 = vor.u32 %v2270_v55, %v2043_v56  ;;  %v2161_v3 = vld [vmem:[%s2443_s7 + $0x1f0] sm:$0xf]  ;;  %v394_v55 = vld [vmem:[#allocation2 + $0x80] sm:$0xff] }
 0x105   : > { %v1553_v13 = vmul.f32 %v2649_v9, %v1485_v49  ;;  %v1454_v14 = vld [vmem:[#allocation2 + $0x50] sm:$0xff]  ;;  %1419 = vst.msk [vmem:[#allocation2 + $0x150] sm:$0xff] %vm313_vm3, %v1354_v7  ;;  %v2943_v47 = vpop.f32.mrf.mxu3  ;;  %v423_v59 = vld [vmem:[#allocation2 + $0x168] sm:$0xff] }
 0x106   : > { %v1522_v19 = vmul.f32 %v2649_v9, %v1454_v14  ;;  %1388 = vst.msk [vmem:[#allocation2 + $0x58] sm:$0xff] %vm313_vm3, %v1323_v8  ;;  %v2034_v8 = vor.u32 %v2269_v2, %v2033_v0 }
 0x107   : > { %v2920_v20 = vpop.f32.mrf.mxu1  ;;  %v1621_v61 = vadd.f32 %v2670_v18, %v1553_v13  ;;  %v1090_v25 = vpop.f32.mrf.mxu2 }
 0x108   : > { %v1590_v23 = vadd.f32 %v2670_v18, %v1522_v19  ;;  %v1260_v29 = vadd.f32 %v2859_v5, %v1090_v25  ;;  %v2162_v19 = vor.u32 %v2301_v4, %v2161_v3  ;;  %v426_v3 = vld [vmem:[#allocation2 + $0x180] sm:$0xff] }
 0x109   : > { %v1685_v40 = vmax.f32 %v1621_v61, 0.0  ;;  %v1013_v32 = vpop.f32.mrf.mxu0 }
 0x10a   : > { %2218 = vmatmul.msk.bf16.gmra.mxu1 %vm870_vm2, %v2038_v15  ;;  %v1654_v35 = vmax.f32 %v1590_v23, 0.0  ;;  %v1183_v11 = vadd.f32 %v2878_v31, %v1013_v32  ;;  %v1355_v36 = vadd.f32 %v1260_v29, %v421_v24 }
 0x10b   : > { %1749 = vst.msk [vmem:[%s2700_s29 + $0x148] sm:$0xff] %vm313_vm3, %v1685_v40 }
 0x10c   : > { %1718 = vst.msk [vmem:[%s2700_s29 + $0x50] sm:$0xff] %vm313_vm3, %v1654_v35  ;;  %v1486_v38 = vld [vmem:[#allocation2 + $0x150] sm:$0xff]  ;;  %v1324_v39 = vadd.f32 %v1183_v11, %v390_v1  ;;  %1052 = vmatmul.bf16.gmra.mxu0 %v2026_v26  ;;  %1132 = vmatmul.bf16.gmra.mxu2 %v2154_v33 }
 0x10d   : > { %v1554_v41 = vmul.f32 %v2649_v9, %v1486_v38  ;;  %v1455_v43 = vld [vmem:[#allocation2 + $0x58] sm:$0xff]  ;;  %1420 = vst.msk [vmem:[#allocation2 + $0x158] sm:$0xff] %vm313_vm3, %v1355_v36  ;;  %v2963_v13 = vpop.f32.mrf.mxu3  ;;  %v424_v1 = vld [vmem:[#allocation2 + $0x170] sm:$0xff] }
 0x10e   : > { %v1523_v5 = vmul.f32 %v2649_v9, %v1455_v43  ;;  %1389 = vst.msk [vmem:[#allocation2 + $0x60] sm:$0xff] %vm313_vm3, %v1324_v39  ;;  %v393_v36 = vld [vmem:[#allocation2 + $0x78] sm:$0xff] }
 0x10f   : > { %v2939_v31 = vpop.f32.mrf.mxu1  ;;  %v1622_v34 = vadd.f32 %v2670_v18, %v1554_v41  ;;  %v1093_v46 = vpop.f32.mrf.mxu2 }
 0x110   : > { %v1591_v44 = vadd.f32 %v2670_v18, %v1523_v5  ;;  %v1263_v50 = vadd.f32 %v2884_v30, %v1093_v46 }
 0x111   : > { %v1686_v48 = vmax.f32 %v1622_v34, 0.0  ;;  %v1015_v12 = vpop.f32.mrf.mxu0 }
 0x112   : > { %v1655_v53 = vmax.f32 %v1591_v44, 0.0  ;;  %v1185_v54 = vadd.f32 %v2897_v42, %v1015_v12  ;;  %v1356_v57 = vadd.f32 %v1263_v50, %v422_v45  ;;  %v425_v50 = vld [vmem:[#allocation2 + $0x178] sm:$0xff] }
 0x113   : > { %1750 = vst.msk [vmem:[%s2700_s29 + $0x150] sm:$0xff] %vm313_vm3, %v1686_v48 }
 0x114   : > { %1719 = vst.msk [vmem:[%s2700_s29 + $0x58] sm:$0xff] %vm313_vm3, %v1655_v53  ;;  %v1487_v60 = vld [vmem:[#allocation2 + $0x158] sm:$0xff]  ;;  %v1325_v62 = vadd.f32 %v1185_v54, %v391_v51 }
 0x115   : > { %v1555_v30 = vmul.f32 %v2649_v9, %v1487_v60  ;;  %v1456_v63 = vld [vmem:[#allocation2 + $0x60] sm:$0xff]  ;;  %1421 = vst.msk [vmem:[#allocation2 + $0x160] sm:$0xff] %vm313_vm3, %v1356_v57  ;;  %v2978_v33 = vpop.f32.mrf.mxu3 }
 0x116   : > { %v1524_v42 = vmul.f32 %v2649_v9, %v1456_v63  ;;  %1390 = vst.msk [vmem:[#allocation2 + $0x68] sm:$0xff] %vm313_vm3, %v1325_v62 }
 0x117   : > { %v1192_v37 = vpop.f32.mrf.mxu1  ;;  %v1623_v6 = vadd.f32 %v2670_v18, %v1555_v30  ;;  %v1095_v49 = vpop.f32.mrf.mxu2 }
 0x118   : > { %v1592_v7 = vadd.f32 %v2670_v18, %v1524_v42  ;;  %v1265_v15 = vadd.f32 %v2901_v58, %v1095_v49  ;;  %v395_v49 = vld [vmem:[#allocation2 + $0x88] sm:$0xff] }
 0x119   : > { %v1687_v14 = vmax.f32 %v1623_v6, 0.0  ;;  %v1018_v52 = vpop.f32.mrf.mxu0 }
 0x11a   : > { %2219 = vmatmul.msk.bf16.gmra.mxu1 %vm870_vm2, %v2046_v17  ;;  %v1656_v21 = vmax.f32 %v1592_v7, 0.0  ;;  %v1188_v22 = vadd.f32 %v2920_v20, %v1018_v52  ;;  %v1357_v61 = vadd.f32 %v1265_v15, %v423_v59 }
 0x11b   : > { %1751 = vst.msk [vmem:[%s2700_s29 + $0x158] sm:$0xff] %vm313_vm3, %v1687_v14 }
 0x11c   : > { %1720 = vst.msk [vmem:[%s2700_s29 + $0x60] sm:$0xff] %vm313_vm3, %v1656_v21  ;;  %v1488_v23 = vld [vmem:[#allocation2 + $0x160] sm:$0xff]  ;;  %v1326_v24 = vadd.f32 %v1188_v22, %v392_v16  ;;  %1057 = vmatmul.bf16.gmra.mxu0 %v2034_v8  ;;  %1137 = vmatmul.bf16.gmra.mxu2 %v2162_v19 }
 0x11d   : > { %v1556_v25 = vmul.f32 %v2649_v9, %v1488_v23  ;;  %v1457_v26 = vld [vmem:[#allocation2 + $0x68] sm:$0xff]  ;;  %1422 = vst.msk [vmem:[#allocation2 + $0x168] sm:$0xff] %vm313_vm3, %v1357_v61  ;;  %v2992_v12 = vpop.f32.mrf.mxu3 }
 0x11e   : > { %v1525_v58 = vmul.f32 %v2649_v9, %v1457_v26  ;;  %1391 = vst.msk [vmem:[#allocation2 + $0x70] sm:$0xff] %vm313_vm3, %v1326_v24 }
 0x11f   : > { %v1194_v20 = vpop.f32.mrf.mxu1  ;;  %v1624_v40 = vadd.f32 %v2670_v18, %v1556_v25  ;;  %v1098_v32 = vpop.f32.mrf.mxu2  ;;  %v427_v25 = vld [vmem:[#allocation2 + $0x188] sm:$0xff] }
 0x120   : > { %v1593_v29 = vadd.f32 %v2670_v18, %v1525_v58  ;;  %v1268_v11 = vadd.f32 %v2926_v27, %v1098_v32 }
 0x121   : > { %v1688_v35 = vmax.f32 %v1624_v40, 0.0  ;;  %v1020_v38 = vpop.f32.mrf.mxu0  ;;  %v396_v40 = vld [vmem:[#allocation2 + $0x90] sm:$0xff] }
 0x122   : > { %v1657_v39 = vmax.f32 %v1593_v29, 0.0  ;;  %v1190_v41 = vadd.f32 %v2939_v31, %v1020_v38  ;;  %v1358_v43 = vadd.f32 %v1268_v11, %v424_v1 }
 0x123   : > { %1752 = vst.msk [vmem:[%s2700_s29 + $0x160] sm:$0xff] %vm313_vm3, %v1688_v35 }
 0x124   : > { %1721 = vst.msk [vmem:[%s2700_s29 + $0x68] sm:$0xff] %vm313_vm3, %v1657_v39  ;;  %v1489_v5 = vld [vmem:[#allocation2 + $0x168] sm:$0xff]  ;;  %v1327_v34 = vadd.f32 %v1190_v41, %v393_v36 }
 0x125   : > { %v1557_v44 = vmul.f32 %v2649_v9, %v1489_v5  ;;  %v1458_v45 = vld [vmem:[#allocation2 + $0x70] sm:$0xff]  ;;  %1423 = vst.msk [vmem:[#allocation2 + $0x170] sm:$0xff] %vm313_vm3, %v1358_v43  ;;  %v3005_v6 = vpop.f32.mrf.mxu3 }
 0x126   : > { %v1526_v27 = vmul.f32 %v2649_v9, %v1458_v45  ;;  %1392 = vst.msk [vmem:[#allocation2 + $0x78] sm:$0xff] %vm313_vm3, %v1327_v34 }
 0x127   : > { %v1197_v46 = vpop.f32.mrf.mxu1  ;;  %v1625_v31 = vadd.f32 %v2670_v18, %v1557_v44  ;;  %v1100_v51 = vpop.f32.mrf.mxu2  ;;  %v428_v44 = vld [vmem:[#allocation2 + $0x190] sm:$0xff] }
 0x128   : > { %v1594_v48 = vadd.f32 %v2670_v18, %v1526_v27  ;;  %v1270_v54 = vadd.f32 %v2943_v47, %v1100_v51 }
 0x129   : > { %v1689_v53 = vmax.f32 %v1625_v31, 0.0  ;;  %v1023_v56 = vpop.f32.mrf.mxu0  ;;  %v397_v31 = vld [vmem:[#allocation2 + $0x98] sm:$0xff] }
 0x12a   : > { %v1658_v57 = vmax.f32 %v1594_v48, 0.0  ;;  %v1193_v60 = vadd.f32 %v1192_v37, %v1023_v56  ;;  %v1359_v62 = vadd.f32 %v1270_v54, %v425_v50  ;;  %v3039_v56 = vld [vmem:[%s3214_s2] ss:$0 sm:$0xff] }
 0x12b   : > { %1753 = vst.msk [vmem:[%s2700_s29 + $0x168] sm:$0xff] %vm313_vm3, %v1689_v53 }
 0x12c   : > { %1722 = vst.msk [vmem:[%s2700_s29 + $0x70] sm:$0xff] %vm313_vm3, %v1658_v57  ;;  %v1490_v30 = vld [vmem:[#allocation2 + $0x170] sm:$0xff]  ;;  %v1328_v63 = vadd.f32 %v1193_v60, %v394_v55 }
 0x12d   : > { %v1558_v17 = vmul.f32 %v2649_v9, %v1490_v30  ;;  %v1459_v0 = vld [vmem:[#allocation2 + $0x78] sm:$0xff]  ;;  %1424 = vst.msk [vmem:[#allocation2 + $0x178] sm:$0xff] %vm313_vm3, %v1359_v62  ;;  %v3019_v35 = vpop.f32.mrf.mxu3 }
 0x12e   : > { %v1527_v2 = vmul.f32 %v2649_v9, %v1459_v0  ;;  %1393 = vst.msk [vmem:[#allocation2 + $0x80] sm:$0xff] %vm313_vm3, %v1328_v63 }
 0x12f   : > { %v1199_v47 = vpop.f32.mrf.mxu1  ;;  %v1626_v42 = vadd.f32 %v2670_v18, %v1558_v17  ;;  %v1103_v4 = vpop.f32.mrf.mxu2  ;;  %v429_v17 = vld [vmem:[#allocation2 + $0x198] sm:$0xff] }
 0x130   : > { %v1595_v37 = vadd.f32 %v2670_v18, %v1527_v2  ;;  %v1273_v59 = vadd.f32 %v2963_v13, %v1103_v4 }
 0x131   : > { %v1690_v7 = vmax.f32 %v1626_v42, 0.0  ;;  %v1025_v8 = vpop.f32.mrf.mxu0  ;;  %v398_v42 = vld [vmem:[#allocation2 + $0xa0] sm:$0xff] }
 0x132   : > { %v1659_v14 = vmax.f32 %v1595_v37, 0.0  ;;  %v1195_v15 = vadd.f32 %v1194_v20, %v1025_v8  ;;  %v1360_v16 = vadd.f32 %v1273_v59, %v426_v3 }
 0x133   : > { %1754 = vst.msk [vmem:[%s2700_s29 + $0x170] sm:$0xff] %vm313_vm3, %v1690_v7 }
 0x134   : > { %1723 = vst.msk [vmem:[%s2700_s29 + $0x78] sm:$0xff] %vm313_vm3, %v1659_v14  ;;  %v1491_v52 = vld [vmem:[#allocation2 + $0x178] sm:$0xff]  ;;  %v1329_v19 = vadd.f32 %v1195_v15, %v395_v49 }
 0x135   : > { %v1559_v21 = vmul.f32 %v2649_v9, %v1491_v52  ;;  %v1460_v22 = vld [vmem:[#allocation2 + $0x80] sm:$0xff]  ;;  %1425 = vst.msk [vmem:[#allocation2 + $0x180] sm:$0xff] %vm313_vm3, %v1360_v16  ;;  %v1284_v55 = vpop.f32.mrf.mxu3 }
 0x136   : > { %v1528_v61 = vmul.f32 %v2649_v9, %v1460_v22  ;;  %1394 = vst.msk [vmem:[#allocation2 + $0x88] sm:$0xff] %vm313_vm3, %v1329_v19  ;;  %v3059_v16 = vld [vmem:[%s3215_s3] ss:$0 sm:$0xff] }
 0x137   : > { %v1202_v13 = vpop.f32.mrf.mxu1  ;;  %v1627_v23 = vadd.f32 %v2670_v18, %v1559_v21  ;;  %v1105_v26 = vpop.f32.mrf.mxu2  ;;  %v430_v21 = vld [vmem:[#allocation2 + $0x1a0] sm:$0xff] }
 0x138   : > { %v1596_v24 = vadd.f32 %v2670_v18, %v1528_v61  ;;  %v1275_v20 = vadd.f32 %v2978_v33, %v1105_v26 }
 0x139   : > { %v1691_v58 = vmax.f32 %v1627_v23, 0.0  ;;  %v1028_v29 = vpop.f32.mrf.mxu0  ;;  %v399_v23 = vld [vmem:[#allocation2 + $0xa8] sm:$0xff] }
 0x13a   : > { %v1660_v1 = vmax.f32 %v1596_v24, 0.0  ;;  %v1198_v32 = vadd.f32 %v1197_v46, %v1028_v29  ;;  %v1361_v11 = vadd.f32 %v1275_v20, %v427_v25 }
 0x13b   : > { %1755 = vst.msk [vmem:[%s2700_s29 + $0x178] sm:$0xff] %vm313_vm3, %v1691_v58 }
 0x13c   : > { %1724 = vst.msk [vmem:[%s2700_s29 + $0x80] sm:$0xff] %vm313_vm3, %v1660_v1  ;;  %v1492_v36 = vld [vmem:[#allocation2 + $0x180] sm:$0xff]  ;;  %v1330_v38 = vadd.f32 %v1198_v32, %v396_v40 }
 0x13d   : > { %v1560_v39 = vmul.f32 %v2649_v9, %v1492_v36  ;;  %v1461_v41 = vld [vmem:[#allocation2 + $0x88] sm:$0xff]  ;;  %1426 = vst.msk [vmem:[#allocation2 + $0x188] sm:$0xff] %vm313_vm3, %v1361_v11  ;;  %v1287_v15 = vpop.f32.mrf.mxu3 }
 0x13e   : > { %v1529_v33 = vmul.f32 %v2649_v9, %v1461_v41  ;;  %1395 = vst.msk [vmem:[#allocation2 + $0x90] sm:$0xff] %vm313_vm3, %v1330_v38  ;;  %v431_v38 = vld [vmem:[#allocation2 + $0x1a8] sm:$0xff] }
 0x13f   : > { %v1204_v43 = vpop.f32.mrf.mxu1  ;;  %v1628_v5 = vadd.f32 %v2670_v18, %v1560_v39  ;;  %v1108_v45 = vpop.f32.mrf.mxu2 }
 0x140   : > { %v1597_v34 = vadd.f32 %v2670_v18, %v1529_v33  ;;  %v1278_v46 = vadd.f32 %v2992_v12, %v1108_v45 }
 0x141   : > { %v1692_v27 = vmax.f32 %v1628_v5, 0.0  ;;  %v1030_v48 = vpop.f32.mrf.mxu0  ;;  %v400_v5 = vld [vmem:[#allocation2 + $0xb0] sm:$0xff] }
 0x142   : > { %v1661_v50 = vmax.f32 %v1597_v34, 0.0  ;;  %v1200_v51 = vadd.f32 %v1199_v47, %v1030_v48  ;;  %v1362_v53 = vadd.f32 %v1278_v46, %v428_v44 }
 0x143   : > { %1756 = vst.msk [vmem:[%s2700_s29 + $0x180] sm:$0xff] %vm313_vm3, %v1692_v27 }
 0x144   : > { %1725 = vst.msk [vmem:[%s2700_s29 + $0x88] sm:$0xff] %vm313_vm3, %v1661_v50  ;;  %v1493_v9 = vld [vmem:[#allocation2 + $0x188] sm:$0xff]  ;;  %v1331_v54 = vadd.f32 %v1200_v51, %v397_v31 }
 0x145   : > { %v1561_v57 = vmul.f32 %v3039_v56, %v1493_v9  ;;  %v1462_v12 = vld [vmem:[#allocation2 + $0x90] sm:$0xff]  ;;  %1427 = vst.msk [vmem:[#allocation2 + $0x190] sm:$0xff] %vm313_vm3, %v1362_v53  ;;  %v1289_v41 = vpop.f32.mrf.mxu3 }
 0x146   : > { %v1530_v60 = vmul.f32 %v3039_v56, %v1462_v12  ;;  %1396 = vst.msk [vmem:[#allocation2 + $0x98] sm:$0xff] %vm313_vm3, %v1331_v54 }
 0x147   : > { %v1207_v62 = vpop.f32.mrf.mxu1  ;;  %v1629_v30 = vadd.f32 %v2670_v18, %v1561_v57  ;;  %v1110_v0 = vpop.f32.mrf.mxu2 }
 0x148   : > { %v1598_v63 = vadd.f32 %v2670_v18, %v1530_v60  ;;  %v1280_v47 = vadd.f32 %v3005_v6, %v1110_v0 }
 0x149   : > { %v1693_v2 = vmax.f32 %v1629_v30, 0.0  ;;  %v1033_v37 = vpop.f32.mrf.mxu0 }
 0x14a   : > { %v1662_v3 = vmax.f32 %v1598_v63, 0.0  ;;  %v1203_v4 = vadd.f32 %v1202_v13, %v1033_v37  ;;  %v1363_v7 = vadd.f32 %v1280_v47, %v429_v17 }
 0x14b   : > { %1757 = vst.msk [vmem:[%s2700_s29 + $0x188] sm:$0xff] %vm313_vm3, %v1693_v2 }
 0x14c   : > { %1726 = vst.msk [vmem:[%s2700_s29 + $0x90] sm:$0xff] %vm313_vm3, %v1662_v3  ;;  %v1494_v59 = vld [vmem:[#allocation2 + $0x190] sm:$0xff]  ;;  %v1332_v49 = vadd.f32 %v1203_v4, %v398_v42 }
 0x14d   : > { %v1562_v8 = vmul.f32 %v3039_v56, %v1494_v59  ;;  %v1463_v14 = vld [vmem:[#allocation2 + $0x98] sm:$0xff]  ;;  %1428 = vst.msk [vmem:[#allocation2 + $0x198] sm:$0xff] %vm313_vm3, %v1363_v7 }
 0x14e   : > { %v1531_v18 = vmul.f32 %v3039_v56, %v1463_v14  ;;  %1397 = vst.msk [vmem:[#allocation2 + $0xa0] sm:$0xff] %vm313_vm3, %v1332_v49 }
 0x14f   : > { %v1209_v6 = vpop.f32.mrf.mxu1  ;;  %v1630_v52 = vadd.f32 %v3059_v16, %v1562_v8  ;;  %v1113_v22 = vpop.f32.mrf.mxu2  ;;  %v433_v8 = vld [vmem:[#allocation2 + $0x1b8] sm:$0xff] }
 0x150   : > { %v1599_v19 = vadd.f32 %v3059_v16, %v1531_v18  ;;  %v1283_v13 = vadd.f32 %v3019_v35, %v1113_v22 }
 0x151   : > { %v1694_v61 = vmax.f32 %v1630_v52, 0.0  ;;  %v1035_v24 = vpop.f32.mrf.mxu0 }
 0x152   : > { %v1663_v25 = vmax.f32 %v1599_v19, 0.0  ;;  %v1205_v26 = vadd.f32 %v1204_v43, %v1035_v24  ;;  %v1364_v58 = vadd.f32 %v1283_v13, %v430_v21 }
 0x153   : > { %1758 = vst.msk [vmem:[%s2700_s29 + $0x190] sm:$0xff] %vm313_vm3, %v1694_v61 }
 0x154   : > { %1727 = vst.msk [vmem:[%s2700_s29 + $0x98] sm:$0xff] %vm313_vm3, %v1663_v25  ;;  %v1495_v20 = vld [vmem:[#allocation2 + $0x198] sm:$0xff]  ;;  %v1333_v40 = vadd.f32 %v1205_v26, %v399_v23 }
 0x155   : > { %v1563_v29 = vmul.f32 %v3039_v56, %v1495_v20  ;;  %v1464_v1 = vld [vmem:[#allocation2 + $0xa0] sm:$0xff]  ;;  %1429 = vst.msk [vmem:[#allocation2 + $0x1a0] sm:$0xff] %vm313_vm3, %v1364_v58  ;;  %v1292_v0 = vpop.f32.mrf.mxu3 }
 0x156   : > { %v1532_v32 = vmul.f32 %v3039_v56, %v1464_v1  ;;  %1398 = vst.msk [vmem:[#allocation2 + $0xa8] sm:$0xff] %vm313_vm3, %v1333_v40 }
 0x157   : > { %v1212_v35 = vpop.f32.mrf.mxu1  ;;  %v1631_v11 = vadd.f32 %v3059_v16, %v1563_v29  ;;  %v1115_v39 = vpop.f32.mrf.mxu2  ;;  %v434_v29 = vld [vmem:[#allocation2 + $0x1c0] sm:$0xff] }
 0x158   : > { %v1600_v36 = vadd.f32 %v3059_v16, %v1532_v32  ;;  %v1285_v43 = vadd.f32 %v1284_v55, %v1115_v39  ;;  %v432_v55 = vld [vmem:[#allocation2 + $0x1b0] sm:$0xff] }
 0x159   : > { %v1695_v33 = vmax.f32 %v1631_v11, 0.0  ;;  %v1038_v34 = vpop.f32.mrf.mxu0  ;;  %v403_v11 = vld [vmem:[#allocation2 + $0xc8] sm:$0xff] }
 0x15a   : > { %v1664_v44 = vmax.f32 %v1600_v36, 0.0  ;;  %v1208_v45 = vadd.f32 %v1207_v62, %v1038_v34  ;;  %v1365_v27 = vadd.f32 %v1285_v43, %v431_v38  ;;  %v401_v62 = vld [vmem:[#allocation2 + $0xb8] sm:$0xff] }
 0x15b   : > { %1759 = vst.msk [vmem:[%s2700_s29 + $0x198] sm:$0xff] %vm313_vm3, %v1695_v33 }
 0x15c   : > { %1728 = vst.msk [vmem:[%s2700_s29 + $0xa0] sm:$0xff] %vm313_vm3, %v1664_v44  ;;  %v1496_v46 = vld [vmem:[#allocation2 + $0x1a0] sm:$0xff]  ;;  %v1334_v31 = vadd.f32 %v1208_v45, %v400_v5 }
 0x15d   : > { %v1564_v48 = vmul.f32 %v3039_v56, %v1496_v46  ;;  %v1465_v50 = vld [vmem:[#allocation2 + $0xa8] sm:$0xff]  ;;  %1430 = vst.msk [vmem:[#allocation2 + $0x1a8] sm:$0xff] %vm313_vm3, %v1365_v27  ;;  %v1294_v23 = vpop.f32.mrf.mxu3 }
 0x15e   : > { %v1533_v51 = vmul.f32 %v3039_v56, %v1465_v50  ;;  %1399 = vst.msk [vmem:[#allocation2 + $0xb0] sm:$0xff] %vm313_vm3, %v1334_v31 }
 0x15f   : > { %v1214_v53 = vpop.f32.mrf.mxu1  ;;  %v1632_v9 = vadd.f32 %v3059_v16, %v1564_v48  ;;  %v1118_v57 = vpop.f32.mrf.mxu2  ;;  %v435_v48 = vld [vmem:[#allocation2 + $0x1c8] sm:$0xff] }
 0x160   : > { %v1601_v54 = vadd.f32 %v3059_v16, %v1533_v51  ;;  %v1288_v60 = vadd.f32 %v1287_v15, %v1118_v57  ;;  %v402_v15 = vld [vmem:[#allocation2 + $0xc0] sm:$0xff] }
 0x161   : > { %v1696_v12 = vmax.f32 %v1632_v9, 0.0  ;;  %v1040_v30 = vpop.f32.mrf.mxu0  ;;  %v404_v9 = vld [vmem:[#allocation2 + $0xd0] sm:$0xff] }
 0x162   : > { %v1665_v63 = vmax.f32 %v1601_v54, 0.0  ;;  %v1210_v17 = vadd.f32 %v1209_v6, %v1040_v30  ;;  %v1366_v2 = vadd.f32 %v1288_v60, %v432_v55 }
 0x163   : > { %1760 = vst.msk [vmem:[%s2700_s29 + $0x1a0] sm:$0xff] %vm313_vm3, %v1696_v12 }
 0x164   : > { %1729 = vst.msk [vmem:[%s2700_s29 + $0xa8] sm:$0xff] %vm313_vm3, %v1665_v63  ;;  %v1497_v47 = vld [vmem:[#allocation2 + $0x1a8] sm:$0xff]  ;;  %v1335_v42 = vadd.f32 %v1210_v17, %v401_v62 }
 0x165   : > { %v1565_v37 = vmul.f32 %v3039_v56, %v1497_v47  ;;  %v1466_v3 = vld [vmem:[#allocation2 + $0xb0] sm:$0xff]  ;;  %1431 = vst.msk [vmem:[#allocation2 + $0x1b0] sm:$0xff] %vm313_vm3, %v1366_v2  ;;  %v1297_v27 = vpop.f32.mrf.mxu3 }
 0x166   : > { %v1534_v4 = vmul.f32 %v3039_v56, %v1466_v3  ;;  %1400 = vst.msk [vmem:[#allocation2 + $0xb8] sm:$0xff] %vm313_vm3, %v1335_v42  ;;  %v436_v42 = vld [vmem:[#allocation2 + $0x1d0] sm:$0xff] }
 0x167   : > { %v1217_v7 = vpop.f32.mrf.mxu1  ;;  %v1633_v59 = vadd.f32 %v3059_v16, %v1565_v37  ;;  %v1120_v14 = vpop.f32.mrf.mxu2 }
 0x168   : > { %v1602_v49 = vadd.f32 %v3059_v16, %v1534_v4  ;;  %v1290_v6 = vadd.f32 %v1289_v41, %v1120_v14 }
 0x169   : > { %v1697_v18 = vmax.f32 %v1633_v59, 0.0  ;;  %v1043_v52 = vpop.f32.mrf.mxu0  ;;  %v405_v59 = vld [vmem:[#allocation2 + $0xd8] sm:$0xff] }
 0x16a   : > { %v1666_v19 = vmax.f32 %v1602_v49, 0.0  ;;  %v1213_v21 = vadd.f32 %v1212_v35, %v1043_v52  ;;  %v1367_v22 = vadd.f32 %v1290_v6, %v433_v8 }
 0x16b   : > { %1761 = vst.msk [vmem:[%s2700_s29 + $0x1a8] sm:$0xff] %vm313_vm3, %v1697_v18 }
 0x16c   : > { %1730 = vst.msk [vmem:[%s2700_s29 + $0xb0] sm:$0xff] %vm313_vm3, %v1666_v19  ;;  %v1498_v61 = vld [vmem:[#allocation2 + $0x1b0] sm:$0xff]  ;;  %v1336_v13 = vadd.f32 %v1213_v21, %v402_v15 }
 0x16d   : > { %v1566_v24 = vmul.f32 %v3039_v56, %v1498_v61  ;;  %v1467_v25 = vld [vmem:[#allocation2 + $0xb8] sm:$0xff]  ;;  %1432 = vst.msk [vmem:[#allocation2 + $0x1b8] sm:$0xff] %vm313_vm3, %v1367_v22  ;;  %v1299_v3 = vpop.f32.mrf.mxu3 }
 0x16e   : > { %v1535_v26 = vmul.f32 %v3039_v56, %v1467_v25  ;;  %1401 = vst.msk [vmem:[#allocation2 + $0xc0] sm:$0xff] %vm313_vm3, %v1336_v13 }
 0x16f   : > { %v1219_v58 = vpop.f32.mrf.mxu1  ;;  %v1634_v20 = vadd.f32 %v3059_v16, %v1566_v24  ;;  %v1123_v1 = vpop.f32.mrf.mxu2 }
 0x170   : > { %v1603_v40 = vadd.f32 %v3059_v16, %v1535_v26  ;;  %v1293_v35 = vadd.f32 %v1292_v0, %v1123_v1 }
 0x171   : > { %v1698_v32 = vmax.f32 %v1634_v20, 0.0  ;;  %v1045_v36 = vpop.f32.mrf.mxu0 }
 0x172   : > { %v1667_v38 = vmax.f32 %v1603_v40, 0.0  ;;  %v1215_v39 = vadd.f32 %v1214_v53, %v1045_v36  ;;  %v1368_v41 = vadd.f32 %v1293_v35, %v434_v29 }
 0x173   : > { %1762 = vst.msk [vmem:[%s2700_s29 + $0x1b0] sm:$0xff] %vm313_vm3, %v1698_v32 }
 0x174   : > { %1731 = vst.msk [vmem:[%s2700_s29 + $0xb8] sm:$0xff] %vm313_vm3, %v1667_v38  ;;  %v1499_v33 = vld [vmem:[#allocation2 + $0x1b8] sm:$0xff]  ;;  %v1337_v43 = vadd.f32 %v1215_v39, %v403_v11 }
 0x175   : > { %v1567_v5 = vmul.f32 %v3039_v56, %v1499_v33  ;;  %v1468_v34 = vld [vmem:[#allocation2 + $0xc0] sm:$0xff]  ;;  %1433 = vst.msk [vmem:[#allocation2 + $0x1c0] sm:$0xff] %vm313_vm3, %v1368_v41  ;;  %v1302_v29 = vpop.f32.mrf.mxu3 }
 0x176   : > { %v1536_v44 = vmul.f32 %v3039_v56, %v1468_v34  ;;  %1402 = vst.msk [vmem:[#allocation2 + $0xc8] sm:$0xff] %vm313_vm3, %v1337_v43 }
 0x177   : > { %v1222_v45 = vpop.f32.mrf.mxu1  ;;  %v1635_v46 = vadd.f32 %v3059_v16, %v1567_v5  ;;  %v1125_v50 = vpop.f32.mrf.mxu2  ;;  %v438_v5 = vld [vmem:[#allocation2 + $0x1e0] sm:$0xff] }
 0x178   : > { %v1604_v31 = vadd.f32 %v3059_v16, %v1536_v44  ;;  %v1295_v53 = vadd.f32 %v1294_v23, %v1125_v50  ;;  %v437_v23 = vld [vmem:[#allocation2 + $0x1d8] sm:$0xff] }
 0x179   : > { %v1699_v51 = vmax.f32 %v1635_v46, 0.0  ;;  %v1048_v54 = vpop.f32.mrf.mxu0 }
 0x17a   : > { %v1668_v55 = vmax.f32 %v1604_v31, 0.0  ;;  %v1218_v57 = vadd.f32 %v1217_v7, %v1048_v54  ;;  %v1369_v12 = vadd.f32 %v1295_v53, %v435_v48 }
 0x17b   : > { %1763 = vst.msk [vmem:[%s2700_s29 + $0x1b8] sm:$0xff] %vm313_vm3, %v1699_v51 }
 0x17c   : > { %1732 = vst.msk [vmem:[%s2700_s29 + $0xc0] sm:$0xff] %vm313_vm3, %v1668_v55  ;;  %v1500_v60 = vld [vmem:[#allocation2 + $0x1c0] sm:$0xff]  ;;  %v1338_v62 = vadd.f32 %v1218_v57, %v404_v9 }
 0x17d   : > { %v1568_v30 = vmul.f32 %v3039_v56, %v1500_v60  ;;  %v1469_v63 = vld [vmem:[#allocation2 + $0xc8] sm:$0xff]  ;;  %1434 = vst.msk [vmem:[#allocation2 + $0x1c8] sm:$0xff] %vm313_vm3, %v1369_v12  ;;  %v1304_v53 = vpop.f32.mrf.mxu3  ;;  %v410_v12 = vld [vmem:[#allocation2 + $0x100] sm:$0xff] }
 0x17e   : > { %v1537_v17 = vmul.f32 %v3039_v56, %v1469_v63  ;;  %1403 = vst.msk [vmem:[#allocation2 + $0xd0] sm:$0xff] %vm313_vm3, %v1338_v62 }
 0x17f   : > { %v1224_v0 = vpop.f32.mrf.mxu1  ;;  %v1636_v2 = vadd.f32 %v3059_v16, %v1568_v30  ;;  %v1128_v37 = vpop.f32.mrf.mxu2 }
 0x180   : > { %v1605_v47 = vadd.f32 %v3059_v16, %v1537_v17  ;;  %v1298_v7 = vadd.f32 %v1297_v27, %v1128_v37  ;;  %v407_v27 = vld [vmem:[#allocation2 + $0xe8] sm:$0xff]  ;;  %v408_v37 = vld [vmem:[#allocation2 + $0xf0] sm:$0xff] }
 0x181   : > { %v1700_v4 = vmax.f32 %v1636_v2, 0.0  ;;  %v1050_v49 = vpop.f32.mrf.mxu0  ;;  %v439_v17 = vld [vmem:[#allocation2 + $0x1e8] sm:$0xff] }
 0x182   : > { %v1669_v8 = vmax.f32 %v1605_v47, 0.0  ;;  %v1220_v14 = vadd.f32 %v1219_v58, %v1050_v49  ;;  %v1370_v18 = vadd.f32 %v1298_v7, %v436_v42  ;;  %v406_v58 = vld [vmem:[#allocation2 + $0xe0] sm:$0xff] }
 0x183   : > { %1764 = vst.msk [vmem:[%s2700_s29 + $0x1c0] sm:$0xff] %vm313_vm3, %v1700_v4 }
 0x184   : > { %1733 = vst.msk [vmem:[%s2700_s29 + $0xc8] sm:$0xff] %vm313_vm3, %v1669_v8  ;;  %v1501_v6 = vld [vmem:[#allocation2 + $0x1c8] sm:$0xff]  ;;  %v1339_v15 = vadd.f32 %v1220_v14, %v405_v59 }
 0x185   : > { %v1569_v52 = vmul.f32 %v3039_v56, %v1501_v6  ;;  %v1470_v19 = vld [vmem:[#allocation2 + $0xd0] sm:$0xff]  ;;  %1435 = vst.msk [vmem:[#allocation2 + $0x1d0] sm:$0xff] %vm313_vm3, %v1370_v18  ;;  %v1307_v6 = vpop.f32.mrf.mxu3 }
 0x186   : > { %v1538_v21 = vmul.f32 %v3039_v56, %v1470_v19  ;;  %1404 = vst.msk [vmem:[#allocation2 + $0xd8] sm:$0xff] %vm313_vm3, %v1339_v15  ;;  %v411_v15 = vld [vmem:[#allocation2 + $0x108] sm:$0xff] }
 0x187   : > { %v1227_v22 = vpop.f32.mrf.mxu1  ;;  %v1637_v61 = vadd.f32 %v3059_v16, %v1569_v52  ;;  %v1130_v24 = vpop.f32.mrf.mxu2 }
 0x188   : > { %v1606_v13 = vadd.f32 %v3059_v16, %v1538_v21  ;;  %v1300_v26 = vadd.f32 %v1299_v3, %v1130_v24 }
 0x189   : > { %v1701_v25 = vmax.f32 %v1637_v61, 0.0  ;;  %v1053_v20 = vpop.f32.mrf.mxu0  ;;  %v440_v61 = vld [vmem:[#allocation2 + $0x1f0] sm:$0xff] }
 0x18a   : > { %v1670_v40 = vmax.f32 %v1606_v13, 0.0  ;;  %v1223_v1 = vadd.f32 %v1222_v45, %v1053_v20  ;;  %v1371_v32 = vadd.f32 %v1300_v26, %v437_v23  ;;  %v409_v26 = vld [vmem:[#allocation2 + $0xf8] sm:$0xff] }
 0x18b   : > { %1765 = vst.msk [vmem:[%s2700_s29 + $0x1c8] sm:$0xff] %vm313_vm3, %v1701_v25 }
 0x18c   : > { %1734 = vst.msk [vmem:[%s2700_s29 + $0xd0] sm:$0xff] %vm313_vm3, %v1670_v40  ;;  %v1502_v35 = vld [vmem:[#allocation2 + $0x1d0] sm:$0xff]  ;;  %v1340_v11 = vadd.f32 %v1223_v1, %v406_v58 }
 0x18d   : > { %v1570_v36 = vmul.f32 %v3039_v56, %v1502_v35  ;;  %v1471_v38 = vld [vmem:[#allocation2 + $0xd8] sm:$0xff]  ;;  %1436 = vst.msk [vmem:[#allocation2 + $0x1d8] sm:$0xff] %vm313_vm3, %v1371_v32 }
 0x18e   : > { %v1539_v39 = vmul.f32 %v3039_v56, %v1471_v38  ;;  %1405 = vst.msk [vmem:[#allocation2 + $0xe0] sm:$0xff] %vm313_vm3, %v1340_v11 }
 0x18f   : > { %v1229_v41 = vpop.f32.mrf.mxu1  ;;  %v1638_v33 = vadd.f32 %v3059_v16, %v1570_v36  ;;  %v1133_v34 = vpop.f32.mrf.mxu2 }
 0x190   : > { %v1607_v43 = vadd.f32 %v3059_v16, %v1539_v39  ;;  %v1303_v45 = vadd.f32 %v1302_v29, %v1133_v34 }
 0x191   : > { %v1702_v44 = vmax.f32 %v1638_v33, 0.0  ;;  %v1055_v46 = vpop.f32.mrf.mxu0  ;;  %v1309_v33 = vpop.f32.mrf.mxu3 }
 0x192   : > { %v1671_v31 = vmax.f32 %v1607_v43, 0.0  ;;  %v1225_v48 = vadd.f32 %v1224_v0, %v1055_v46  ;;  %v1372_v50 = vadd.f32 %v1303_v45, %v438_v5  ;;  %v441_v43 = vld [vmem:[#allocation2 + $0x1f8] sm:$0xff] }
 0x193   : > { %1766 = vst.msk [vmem:[%s2700_s29 + $0x1d0] sm:$0xff] %vm313_vm3, %v1702_v44 }
 0x194   : > { %1735 = vst.msk [vmem:[%s2700_s29 + $0xd8] sm:$0xff] %vm313_vm3, %v1671_v31  ;;  %v1503_v51 = vld [vmem:[#allocation2 + $0x1d8] sm:$0xff]  ;;  %v1341_v9 = vadd.f32 %v1225_v48, %v407_v27 }
 0x195   : > { %v1571_v54 = vmul.f32 %v3039_v56, %v1503_v51  ;;  %v1472_v55 = vld [vmem:[#allocation2 + $0xe0] sm:$0xff]  ;;  %1437 = vst.msk [vmem:[#allocation2 + $0x1e0] sm:$0xff] %vm313_vm3, %v1372_v50 }
 0x196   : > { %v1540_v57 = vmul.f32 %v3039_v56, %v1472_v55  ;;  %1406 = vst.msk [vmem:[#allocation2 + $0xe8] sm:$0xff] %vm313_vm3, %v1341_v9 }
 0x197   : > { %v1232_v60 = vpop.f32.mrf.mxu1  ;;  %v1639_v62 = vadd.f32 %v3059_v16, %v1571_v54  ;;  %v1135_v0 = vpop.f32.mrf.mxu2 }
 0x198   : > { %v1233_v30 = vadd.f32 %v1232_v60, %v2653_v10  ;;  %v1608_v63 = vadd.f32 %v3059_v16, %v1540_v57  ;;  %v1305_v42 = vadd.f32 %v1304_v53, %v1135_v0 }
 0x199   : > { %v1703_v2 = vmax.f32 %v1639_v62, 0.0  ;;  %v1058_v3 = vpop.f32.mrf.mxu0 }
 0x19a   : > { %v1344_v47 = vadd.f32 %v1233_v30, %v410_v12  ;;  %v1672_v4 = vmax.f32 %v1608_v63, 0.0  ;;  %v1228_v7 = vadd.f32 %v1227_v22, %v1058_v3  ;;  %v1373_v59 = vadd.f32 %v1305_v42, %v439_v17 }
 0x19b   : > { %1767 = vst.msk [vmem:[%s2700_s29 + $0x1d8] sm:$0xff] %vm313_vm3, %v1703_v2 }
 0x19c   : > { %1736 = vst.msk [vmem:[%s2700_s29 + $0xe0] sm:$0xff] %vm313_vm3, %v1672_v4  ;;  %v1504_v49 = vld [vmem:[#allocation2 + $0x1e0] sm:$0xff]  ;;  %v1342_v8 = vadd.f32 %v1228_v7, %v408_v37 }
 0x19d   : > { %v1572_v10 = vmul.f32 %v3039_v56, %v1504_v49  ;;  %v1473_v14 = vld [vmem:[#allocation2 + $0xe8] sm:$0xff]  ;;  %1409 = vst.msk [vmem:[#allocation2 + $0x100] sm:$0xff] %vm313_vm3, %v1344_v47 }
 0x19e   : > { %v1541_v18 = vmul.f32 %v3039_v56, %v1473_v14  ;;  %1438 = vst.msk [vmem:[#allocation2 + $0x1e8] sm:$0xff] %vm313_vm3, %v1373_v59 }
 0x19f   : > { %v1234_v52 = vpop.f32.mrf.mxu1  ;;  %v1640_v19 = vadd.f32 %v3059_v16, %v1572_v10  ;;  %1407 = vst.msk [vmem:[#allocation2 + $0xf0] sm:$0xff] %vm313_vm3, %v1342_v8  ;;  %v1138_v13 = vpop.f32.mrf.mxu2 }
 0x1a0   : > { %v1235_v21 = vadd.f32 %v1234_v52, %v2691_v28  ;;  %v1609_v22 = vadd.f32 %v3059_v16, %v1541_v18  ;;  %v1308_v25 = vadd.f32 %v1307_v6, %v1138_v13 }
 0x1a1   : > { %v1704_v23 = vmax.f32 %v1640_v19, 0.0  ;;  %v1060_v58 = vpop.f32.mrf.mxu0 }
 0x1a2   : > { %v1345_v24 = vadd.f32 %v1235_v21, %v411_v15  ;;  %v1673_v20 = vmax.f32 %v1609_v22, 0.0  ;;  %v1230_v40 = vadd.f32 %v1229_v41, %v1060_v58  ;;  %v1374_v29 = vadd.f32 %v1308_v25, %v440_v61 }
 0x1a3   : > { %1768 = vst.msk [vmem:[%s2700_s29 + $0x1e0] sm:$0xff] %vm313_vm3, %v1704_v23 }
 0x1a4   : > { %1737 = vst.msk [vmem:[%s2700_s29 + $0xe8] sm:$0xff] %vm313_vm3, %v1673_v20  ;;  %v1476_v1 = vld [vmem:[#allocation2 + $0x100] sm:$0xff]  ;;  %v1343_v32 = vadd.f32 %v1230_v40, %v409_v26 }
 0x1a5   : > { %v1544_v28 = vmul.f32 %v3039_v56, %v1476_v1  ;;  %v1505_v35 = vld [vmem:[#allocation2 + $0x1e8] sm:$0xff]  ;;  %1410 = vst.msk [vmem:[#allocation2 + $0x108] sm:$0xff] %vm313_vm3, %v1345_v24 }
 0x1a6   : > { %v1573_v11 = vmul.f32 %v3039_v56, %v1505_v35  ;;  %v1474_v36 = vld [vmem:[#allocation2 + $0xf0] sm:$0xff]  ;;  %1439 = vst.msk [vmem:[#allocation2 + $0x1f0] sm:$0xff] %vm313_vm3, %v1374_v29 }
 0x1a7   : > { %v1612_v38 = vadd.f32 %v3059_v16, %v1544_v28  ;;  %v1542_v39 = vmul.f32 %v3039_v56, %v1474_v36  ;;  %1408 = vst.msk [vmem:[#allocation2 + $0xf8] sm:$0xff] %vm313_vm3, %v1343_v32  ;;  %v1140_v5 = vpop.f32.mrf.mxu2 }
 0x1a8   : > { %v1641_v41 = vadd.f32 %v3059_v16, %v1573_v11  ;;  %v1310_v45 = vadd.f32 %v1309_v33, %v1140_v5 }
 0x1a9   : > { %v1676_v34 = vmax.f32 %v1612_v38, 0.0  ;;  %v1610_v44 = vadd.f32 %v3059_v16, %v1542_v39 }
 0x1aa   : > { %v1705_v27 = vmax.f32 %v1641_v41, 0.0  ;;  %v1375_v31 = vadd.f32 %v1310_v45, %v441_v43 }
 0x1ab   : > { %1740 = vst.msk [vmem:[%s2700_s29 + $0x100] sm:$0xff] %vm313_vm3, %v1676_v34  ;;  %v1674_v46 = vmax.f32 %v1610_v44, 0.0 }
 0x1ac   : > { %1769 = vst.msk [vmem:[%s2700_s29 + $0x1e8] sm:$0xff] %vm313_vm3, %v1705_v27  ;;  %v1477_v48 = vld [vmem:[#allocation2 + $0x108] sm:$0xff] }
 0x1ad   : > { %1738 = vst.msk [vmem:[%s2700_s29 + $0xf0] sm:$0xff] %vm313_vm3, %v1674_v46  ;;  %v1545_v50 = vmul.f32 %v3039_v56, %v1477_v48  ;;  %v1506_v51 = vld [vmem:[#allocation2 + $0x1f0] sm:$0xff] }
 0x1ae   : > { %v1574_v53 = vmul.f32 %v3039_v56, %v1506_v51  ;;  %v1475_v9 = vld [vmem:[#allocation2 + $0xf8] sm:$0xff]  ;;  %1440 = vst.msk [vmem:[#allocation2 + $0x1f8] sm:$0xff] %vm313_vm3, %v1375_v31 }
 0x1af   : > { %v1613_v54 = vadd.f32 %v3059_v16, %v1545_v50  ;;  %v1543_v55 = vmul.f32 %v3039_v56, %v1475_v9 }
 0x1b0   : > { %v1642_v57 = vadd.f32 %v3059_v16, %v1574_v53 }
 0x1b1   : > { %v1677_v12 = vmax.f32 %v1613_v54, 0.0  ;;  %v1611_v60 = vadd.f32 %v3059_v16, %v1543_v55 }
 0x1b2   : > { %v1706_v62 = vmax.f32 %v1642_v57, 0.0 }
 0x1b3   : > { %1741 = vst.msk [vmem:[%s2700_s29 + $0x108] sm:$0xff] %vm313_vm3, %v1677_v12  ;;  %v1675_v30 = vmax.f32 %v1611_v60, 0.0 }
 0x1b4   : > { %1770 = vst.msk [vmem:[%s2700_s29 + $0x1f0] sm:$0xff] %vm313_vm3, %v1706_v62 }
 0x1b5   : > { %1739 = vst.msk [vmem:[%s2700_s29 + $0xf8] sm:$0xff] %vm313_vm3, %v1675_v30  ;;  %v1507_v63 = vld [vmem:[#allocation2 + $0x1f8] sm:$0xff] }
 0x1b6   : > { %v1575_v17 = vmul.f32 %v3039_v56, %v1507_v63 }
 0x1b8   : > { %v1643_v0 = vadd.f32 %v3059_v16, %v1575_v17 }
 0x1ba   : > { %v1707_v2 = vmax.f32 %v1643_v0, 0.0 }
 0x1bc   : > { %1771 = vst.msk [vmem:[%s2700_s29 + $0x1f8] sm:$0xff] %vm313_vm3, %v1707_v2 }
 0x1bd PF: > { %s14_s17 = sadd.s32 1, %s2373_s17   ;;  %s3217_s15 = smov %s2369_s16 }
 0x1be   : > { %p11_p5 = scmp.ge.s32.totalorder %s14_s17, 6   ;;  %s3218_s16 = smov %s3220_s18 }
 0x1c0   :  { %13 = sbr.rel (!%p11_p5) target bundleno = 2 (0x2), region = 83 }

// kernel: enc_resnet_forward.9
= control target key start
LH: loop header
LB: loop body
LE: loop exit
PB: predicated region body
PF: predicated region fallthrough
CT: control target
= control target key end

     0   :  { %s1080_s15 = smov 0   ;;  %s1382_s0 = inlined_call_operand.vmem [shape: f32[2,17,17,64], index: 0, kind: input, shape index: {}]   ;;  %s1383_s1 = inlined_call_operand.vmem [shape: f32[2,17,17,64], index: 1, kind: input, shape index: {}]   ;;  %s1384_s2 = inlined_call_operand.vmem [shape: f32[2,17,17,64], index: 2, kind: input, shape index: {}]   ;;  %s1385_s3 = inlined_call_operand.vmem [shape: f32[2,17,17,64], index: 3, kind: input, shape index: {}]   ;;  %s1386_s4 = inlined_call_operand.vmem [shape: f32[2,16,16,64], index: 4, kind: output, shape index: {}]  }
   0x1 LB: > { %s928_s16 = sadd.s32 4294967295, %s1053_s15   ;;  %p932_p0 = scmp.ge.s32.totalorder %s1053_s15, 1  ;;  %s1053_s15 = sphi %s1080_s15, %s14_s15  }
   0x2   : > { %p192_p1 = scmp.lt.s32.totalorder %s1053_s15, 3 }
   0x4   : > { %p193_p2 = pnand %p932_p0, %p192_p1 }
   0x5   : > { %p233_p3 = scmp.lt.s32.totalorder (!%p193_p2), %s928_s16, 1 }
   0x6   : > { %196 = sbr.rel (%p193_p2) target bundleno = 92 (0x5c), region = 36 }
   0xb   : > { %s1388_s16 = smov (!%p233_p3, %s928_s16), 1  ;;  %vm804_vm0 = vcmask 523264  }
   0xc   : > { %s1038_s17 = smul.u32 408, %s1388_s16  ;;  %s1037_s30 = sshll.u32 %s1388_s16, 8 }
   0xd   : > { %s1145_s7 = scalar_lea.vmem %s1386_s4, %s1037_s30 }
   0xe   : > { %s1094_s20 = scalar_lea.vmem %s1382_s0, %s1038_s17  ;;  %s1102_s23 = scalar_lea.vmem %s1383_s1, %s1038_s17 }
   0xf   : > { %v258_v0 = vld [vmem:[%s1094_s20] sm:$0xff]  ;;  %v939_v2 = vld [vmem:[%s1094_s20 + $0x18] sm:$0xff]  ;;  %v259_v6 = vld [vmem:[%s1094_s20 + $0x8] sm:$0xff]  ;;  %s1113_s26 = scalar_lea.vmem %s1384_s2, %s1038_s17  ;;  %s1120_s29 = scalar_lea.vmem %s1385_s3, %s1038_s17 }
  0x10   : > { %v290_v1 = vld [vmem:[%s1094_s20 + $0x1] sm:$0xff]  ;;  %v971_v3 = vld [vmem:[%s1094_s20 + $0x19] sm:$0xff]  ;;  %v291_v7 = vld [vmem:[%s1094_s20 + $0x9] sm:$0xff] }
  0x11   : > { %v548_v4 = vmax.f32 %v258_v0, %v290_v1  ;;  %v940_v8 = vld [vmem:[%s1094_s20 + $0x20] sm:$0xff]  ;;  %v550_v9 = vmax.f32 %v939_v2, %v971_v3  ;;  %v549_v12 = vmax.f32 %v259_v6, %v291_v7  ;;  %v941_v16 = vld [vmem:[%s1094_s20 + $0x30] sm:$0xff]  ;;  %v1003_v18 = vld [vmem:[%s1102_s23 + $0x18] sm:$0xff] }
  0x12   : > { %v387_v10 = vld [vmem:[%s1102_s23] sm:$0xff]  ;;  %v973_v17 = vld [vmem:[%s1094_s20 + $0x31] sm:$0xff]  ;;  %v388_v20 = vld [vmem:[%s1102_s23 + $0x8] sm:$0xff] }
  0x13   : > { %v580_v5 = vmax.f32 %v548_v4, %v939_v2  ;;  %v972_v11 = vld [vmem:[%s1094_s20 + $0x21] sm:$0xff]  ;;  %v581_v15 = vmax.f32 %v549_v12, %v940_v8  ;;  %v582_v21 = vmax.f32 %v550_v9, %v941_v16  ;;  %v552_v22 = vmax.f32 %v941_v16, %v973_v17  ;;  %v942_v25 = vld [vmem:[%s1094_s20 + $0x38] sm:$0xff]  ;;  %v975_v35 = vld [vmem:[%s1094_s20 + $0x49] sm:$0xff] }
  0x14   : > { %v551_v14 = vmax.f32 %v940_v8, %v972_v11  ;;  %v452_v23 = vld [vmem:[%s1113_s26] sm:$0xff]  ;;  %v943_v34 = vld [vmem:[%s1094_s20 + $0x48] sm:$0xff]  ;;  %v1005_v40 = vld [vmem:[%s1102_s23 + $0x30] sm:$0xff] }
  0x15   : > { %v612_v13 = vmax.f32 %v580_v5, %v971_v3  ;;  %v613_v24 = vmax.f32 %v581_v15, %v972_v11  ;;  %v974_v26 = vld [vmem:[%s1094_s20 + $0x39] sm:$0xff]  ;;  %v484_v27 = vld [vmem:[%s1113_s26 + $0x1] sm:$0xff]  ;;  %v614_v29 = vmax.f32 %v582_v21, %v973_v17  ;;  %v485_v39 = vld [vmem:[%s1113_s26 + $0x9] sm:$0xff]  ;;  %v584_v43 = vmax.f32 %v552_v22, %v943_v34 }
  0x16   : > { %v583_v30 = vmax.f32 %v551_v14, %v942_v25  ;;  %v516_v31 = vld [vmem:[%s1120_s29] sm:$0xff]  ;;  %v553_v36 = vmax.f32 %v942_v25, %v974_v26  ;;  %v453_v38 = vld [vmem:[%s1113_s26 + $0x8] sm:$0xff]  ;;  %v454_v45 = vld [vmem:[%s1113_s26 + $0x18] sm:$0xff]  ;;  %v554_v48 = vmax.f32 %v943_v34, %v975_v35 }
  0x17   : > { %v644_v19 = vmax.f32 %v612_v13, %v387_v10  ;;  %v1004_v32 = vld [vmem:[%s1102_s23 + $0x20] sm:$0xff]  ;;  %v645_v33 = vmax.f32 %v613_v24, %v388_v20  ;;  %v646_v41 = vmax.f32 %v614_v29, %v1003_v18  ;;  %v944_v46 = vld [vmem:[%s1094_s20 + $0x50] sm:$0xff]  ;;  %v517_v50 = vld [vmem:[%s1120_s29 + $0x8] sm:$0xff]  ;;  %v616_v55 = vmax.f32 %v584_v43, %v975_v35 }
  0x18   : > { %v615_v42 = vmax.f32 %v583_v30, %v974_v26  ;;  %v976_v47 = vld [vmem:[%s1094_s20 + $0x51] sm:$0xff]  ;;  %v486_v51 = vld [vmem:[%s1113_s26 + $0x19] sm:$0xff]  ;;  %v585_v58 = vmax.f32 %v553_v36, %v944_v46  ;;  %v977_v60 = vld [vmem:[%s1094_s20 + $0x61] sm:$0xff] }
  0x19   : > { %v676_v28 = vmax.f32 %v644_v19, %v1003_v18  ;;  %v677_v44 = vmax.f32 %v645_v33, %v1004_v32  ;;  %v678_v52 = vmax.f32 %v646_v41, %v1005_v40  ;;  %v1006_v53 = vld [vmem:[%s1102_s23 + $0x38] sm:$0xff]  ;;  %v455_v57 = vld [vmem:[%s1113_s26 + $0x20] sm:$0xff]  ;;  %v555_v61 = vmax.f32 %v944_v46, %v976_v47  ;;  %v1007_v3 = vld [vmem:[%s1102_s23 + $0x48] sm:$0xff] }
  0x1a   : > { %v647_v54 = vmax.f32 %v615_v42, %v1004_v32  ;;  %v945_v59 = vld [vmem:[%s1094_s20 + $0x60] sm:$0xff]  ;;  %v518_v63 = vld [vmem:[%s1120_s29 + $0x18] sm:$0xff]  ;;  %v648_v4 = vmax.f32 %v616_v55, %v1005_v40  ;;  %v456_v6 = vld [vmem:[%s1113_s26 + $0x30] sm:$0xff]  ;;  %v617_v7 = vmax.f32 %v585_v58, %v976_v47 }
  0x1b   : > { %v708_v37 = vmax.f32 %v676_v28, %v452_v23  ;;  %v709_v56 = vmax.f32 %v677_v44, %v453_v38  ;;  %v710_v0 = vmax.f32 %v678_v52, %v454_v45  ;;  %v487_v1 = vld [vmem:[%s1113_s26 + $0x21] sm:$0xff]  ;;  %v586_v8 = vmax.f32 %v554_v48, %v945_v59  ;;  %v978_v10 = vld [vmem:[%s1094_s20 + $0x69] sm:$0xff]  ;;  %v488_v15 = vld [vmem:[%s1113_s26 + $0x31] sm:$0xff] }
  0x1c   : > { %v679_v2 = vmax.f32 %v647_v54, %v1006_v53  ;;  %v946_v9 = vld [vmem:[%s1094_s20 + $0x68] sm:$0xff]  ;;  %v556_v11 = vmax.f32 %v945_v59, %v977_v60  ;;  %v519_v13 = vld [vmem:[%s1120_s29 + $0x20] sm:$0xff]  ;;  %v680_v16 = vmax.f32 %v648_v4, %v1007_v3  ;;  %v1008_v19 = vld [vmem:[%s1102_s23 + $0x50] sm:$0xff]  ;;  %v649_v20 = vmax.f32 %v617_v7, %v1006_v53 }
  0x1d   : > { %v740_v49 = vmax.f32 %v708_v37, %v484_v27  ;;  %v741_v5 = vmax.f32 %v709_v56, %v485_v39  ;;  %v742_v12 = vmax.f32 %v710_v0, %v486_v51  ;;  %v587_v17 = vmax.f32 %v555_v61, %v946_v9  ;;  %v947_v22 = vld [vmem:[%s1094_s20 + $0x78] sm:$0xff]  ;;  %v520_v27 = vld [vmem:[%s1120_s29 + $0x30] sm:$0xff]  ;;  %v948_v35 = vld [vmem:[%s1094_s20 + $0x80] sm:$0xff] }
  0x1e   : > { %v711_v14 = vmax.f32 %v679_v2, %v455_v57  ;;  %v618_v21 = vmax.f32 %v586_v8, %v977_v60  ;;  %v979_v23 = vld [vmem:[%s1094_s20 + $0x79] sm:$0xff]  ;;  %v557_v24 = vmax.f32 %v946_v9, %v978_v10  ;;  %v712_v28 = vmax.f32 %v680_v16, %v456_v6  ;;  %v980_v36 = vld [vmem:[%s1094_s20 + $0x81] sm:$0xff]  ;;  %v459_v48 = vld [vmem:[%s1113_s26 + $0x50] sm:$0xff] }
  0x1f   : > { %v772_v62 = vmax.f32 %v740_v49, %v516_v31  ;;  %v773_v18 = vmax.f32 %v741_v5, %v517_v50  ;;  %v774_v25 = vmax.f32 %v742_v12, %v518_v63  ;;  %v457_v29 = vld [vmem:[%s1113_s26 + $0x38] sm:$0xff]  ;;  %v619_v30 = vmax.f32 %v587_v17, %v978_v10  ;;  %v1009_v41 = vld [vmem:[%s1102_s23 + $0x60] sm:$0xff]  ;;  %v458_v42 = vld [vmem:[%s1113_s26 + $0x48] sm:$0xff] }
  0x20   : > { %v743_v26 = vmax.f32 %v711_v14, %v487_v1  ;;  %v489_v31 = vld [vmem:[%s1113_s26 + $0x39] sm:$0xff]  ;;  %v681_v32 = vmax.f32 %v649_v20, %v1008_v19  ;;  %v650_v33 = vmax.f32 %v618_v21, %v1007_v3  ;;  %v588_v34 = vmax.f32 %v556_v11, %v947_v22  ;;  %v1010_v43 = vld [vmem:[%s1102_s23 + $0x68] sm:$0xff]  ;;  %v949_v50 = vld [vmem:[%s1094_s20 + $0x90] sm:$0xff] }
  0x21   : > { %805 = vst.msk [vmem:[%s1145_s7] sm:$0xff] %vm804_vm0, %v772_v62  ;;  %v558_v37 = vmax.f32 %v947_v22, %v979_v23  ;;  %v744_v39 = vmax.f32 %v712_v28, %v488_v15  ;;  %v521_v40 = vld [vmem:[%s1120_s29 + $0x38] sm:$0xff]  ;;  %v651_v44 = vmax.f32 %v619_v30, %v1008_v19  ;;  %v589_v45 = vmax.f32 %v557_v24, %v948_v35  ;;  %v490_v54 = vld [vmem:[%s1113_s26 + $0x49] sm:$0xff]  ;;  %v460_v5 = vld [vmem:[%s1113_s26 + $0x60] sm:$0xff] }
  0x22   : > { %806 = vst.msk [vmem:[%s1145_s7 + $0x8] sm:$0xff] %vm804_vm0, %v773_v18  ;;  %v775_v38 = vmax.f32 %v743_v26, %v519_v13  ;;  %v713_v46 = vmax.f32 %v681_v32, %v457_v29  ;;  %v682_v47 = vmax.f32 %v650_v33, %v1009_v41  ;;  %v620_v49 = vmax.f32 %v588_v34, %v979_v23  ;;  %v981_v51 = vld [vmem:[%s1094_s20 + $0x91] sm:$0xff]  ;;  %v522_v55 = vld [vmem:[%s1120_s29 + $0x48] sm:$0xff]  ;;  %v982_v2 = vld [vmem:[%s1094_s20 + $0x99] sm:$0xff] }
  0x23   : > { %807 = vst.msk [vmem:[%s1145_s7 + $0x10] sm:$0xff] %vm804_vm0, %v774_v25  ;;  %v559_v52 = vmax.f32 %v948_v35, %v980_v36  ;;  %v776_v53 = vmax.f32 %v744_v39, %v520_v27  ;;  %v491_v56 = vld [vmem:[%s1113_s26 + $0x51] sm:$0xff]  ;;  %v683_v57 = vmax.f32 %v651_v44, %v1010_v43  ;;  %v621_v58 = vmax.f32 %v589_v45, %v980_v36  ;;  %v492_v6 = vld [vmem:[%s1113_s26 + $0x61] sm:$0xff]  ;;  %v983_v16 = vld [vmem:[%s1094_s20 + $0xa9] sm:$0xff] }
  0x24   : > { %808 = vst.msk [vmem:[%s1145_s7 + $0x18] sm:$0xff] %vm804_vm0, %v775_v38  ;;  %v590_v59 = vmax.f32 %v558_v37, %v949_v50  ;;  %v745_v60 = vmax.f32 %v713_v46, %v489_v31  ;;  %v714_v61 = vmax.f32 %v682_v47, %v458_v42  ;;  %v523_v62 = vld [vmem:[%s1120_s29 + $0x50] sm:$0xff]  ;;  %v1011_v63 = vld [vmem:[%s1102_s23 + $0x78] sm:$0xff]  ;;  %v652_v0 = vmax.f32 %v620_v49, %v1009_v41  ;;  %v1012_v7 = vld [vmem:[%s1102_s23 + $0x80] sm:$0xff] }
  0x25   : > { %v950_v1 = vld [vmem:[%s1094_s20 + $0x98] sm:$0xff]  ;;  %v560_v3 = vmax.f32 %v949_v50, %v981_v51  ;;  %809 = vst.msk [vmem:[%s1145_s7 + $0x20] sm:$0xff] %vm804_vm0, %v776_v53  ;;  %v715_v4 = vmax.f32 %v683_v57, %v459_v48  ;;  %v653_v8 = vmax.f32 %v621_v58, %v1010_v43  ;;  %v461_v14 = vld [vmem:[%s1113_s26 + $0x68] sm:$0xff]  ;;  %v524_v19 = vld [vmem:[%s1120_s29 + $0x60] sm:$0xff] }
  0x26   : > { %v622_v9 = vmax.f32 %v590_v59, %v981_v51  ;;  %v591_v10 = vmax.f32 %v559_v52, %v950_v1  ;;  %v777_v11 = vmax.f32 %v745_v60, %v521_v40  ;;  %v746_v12 = vmax.f32 %v714_v61, %v490_v54  ;;  %v951_v15 = vld [vmem:[%s1094_s20 + $0xa8] sm:$0xff]  ;;  %v1013_v22 = vld [vmem:[%s1102_s23 + $0x90] sm:$0xff]  ;;  %v462_v27 = vld [vmem:[%s1113_s26 + $0x78] sm:$0xff] }
  0x27   : > { %v684_v13 = vmax.f32 %v652_v0, %v1011_v63  ;;  %v561_v17 = vmax.f32 %v950_v1, %v982_v2  ;;  %v747_v18 = vmax.f32 %v715_v4, %v491_v56  ;;  %v493_v20 = vld [vmem:[%s1113_s26 + $0x69] sm:$0xff]  ;;  %v685_v21 = vmax.f32 %v653_v8, %v1012_v7  ;;  %v984_v30 = vld [vmem:[%s1094_s20 + $0xb1] sm:$0xff]  ;;  %v494_v35 = vld [vmem:[%s1113_s26 + $0x79] sm:$0xff] }
  0x28   : > { %v654_v23 = vmax.f32 %v622_v9, %v1011_v63  ;;  %v623_v24 = vmax.f32 %v591_v10, %v982_v2  ;;  %810 = vst.msk [vmem:[%s1145_s7 + $0x28] sm:$0xff] %vm804_vm0, %v777_v11  ;;  %v778_v25 = vmax.f32 %v746_v12, %v522_v55  ;;  %v592_v28 = vmax.f32 %v560_v3, %v951_v15  ;;  %v952_v29 = vld [vmem:[%s1094_s20 + $0xb0] sm:$0xff]  ;;  %v525_v33 = vld [vmem:[%s1120_s29 + $0x68] sm:$0xff]  ;;  %v1014_v37 = vld [vmem:[%s1102_s23 + $0x98] sm:$0xff] }
  0x29   : > { %v716_v26 = vmax.f32 %v684_v13, %v460_v5  ;;  %v562_v31 = vmax.f32 %v951_v15, %v983_v16  ;;  %v779_v32 = vmax.f32 %v747_v18, %v523_v62  ;;  %v717_v34 = vmax.f32 %v685_v21, %v461_v14  ;;  %v463_v40 = vld [vmem:[%s1113_s26 + $0x80] sm:$0xff]  ;;  %v526_v47 = vld [vmem:[%s1120_s29 + $0x78] sm:$0xff]  ;;  %v1015_v53 = vld [vmem:[%s1102_s23 + $0xa8] sm:$0xff] }
  0x2a   : > { %v686_v36 = vmax.f32 %v654_v23, %v1013_v22  ;;  %v655_v38 = vmax.f32 %v623_v24, %v1012_v7  ;;  %811 = vst.msk [vmem:[%s1145_s7 + $0x30] sm:$0xff] %vm804_vm0, %v778_v25  ;;  %v624_v41 = vmax.f32 %v592_v28, %v983_v16  ;;  %v593_v42 = vmax.f32 %v561_v17, %v952_v29  ;;  %v953_v43 = vld [vmem:[%s1094_s20 + $0xc0] sm:$0xff]  ;;  %v954_v56 = vld [vmem:[%s1094_s20 + $0xc8] sm:$0xff]  ;;  %v464_v63 = vld [vmem:[%s1113_s26 + $0x90] sm:$0xff] }
  0x2b   : > { %v748_v39 = vmax.f32 %v716_v26, %v492_v6  ;;  %v985_v44 = vld [vmem:[%s1094_s20 + $0xc1] sm:$0xff]  ;;  %v563_v45 = vmax.f32 %v952_v29, %v984_v30  ;;  %812 = vst.msk [vmem:[%s1145_s7 + $0x38] sm:$0xff] %vm804_vm0, %v779_v32  ;;  %v749_v46 = vmax.f32 %v717_v34, %v493_v20  ;;  %v594_v51 = vmax.f32 %v562_v31, %v953_v43  ;;  %v986_v57 = vld [vmem:[%s1094_s20 + $0xc9] sm:$0xff]  ;;  %v496_v1 = vld [vmem:[%s1113_s26 + $0x91] sm:$0xff] }
  0x2c   : > { %v718_v48 = vmax.f32 %v686_v36, %v462_v27  ;;  %v495_v49 = vld [vmem:[%s1113_s26 + $0x81] sm:$0xff]  ;;  %v687_v50 = vmax.f32 %v655_v38, %v1014_v37  ;;  %v656_v54 = vmax.f32 %v624_v41, %v1013_v22  ;;  %v625_v55 = vmax.f32 %v593_v42, %v984_v30  ;;  %v955_v5 = vld [vmem:[%s1094_s20 + $0xd8] sm:$0xff]  ;;  %v528_v10 = vld [vmem:[%s1120_s29 + $0x90] sm:$0xff] }
  0x2d   : > { %v780_v52 = vmax.f32 %v748_v39, %v524_v19  ;;  %v564_v58 = vmax.f32 %v953_v43, %v985_v44  ;;  %v781_v59 = vmax.f32 %v749_v46, %v525_v33  ;;  %v527_v61 = vld [vmem:[%s1120_s29 + $0x80] sm:$0xff]  ;;  %v626_v0 = vmax.f32 %v594_v51, %v985_v44  ;;  %v1016_v11 = vld [vmem:[%s1102_s23 + $0xb0] sm:$0xff]  ;;  %v465_v12 = vld [vmem:[%s1113_s26 + $0x98] sm:$0xff] }
  0x2e   : > { %v750_v60 = vmax.f32 %v718_v48, %v494_v35  ;;  %v719_v62 = vmax.f32 %v687_v50, %v463_v40  ;;  %v688_v2 = vmax.f32 %v656_v54, %v1015_v53  ;;  %v657_v3 = vmax.f32 %v625_v55, %v1014_v37  ;;  %v987_v6 = vld [vmem:[%s1094_s20 + $0xd9] sm:$0xff]  ;;  %v466_v18 = vld [vmem:[%s1113_s26 + $0xa8] sm:$0xff]  ;;  %v957_v35 = vld [vmem:[%s1094_s20 + $0xf0] sm:$0xff] }
  0x2f   : > { %813 = vst.msk [vmem:[%s1145_s7 + $0x40] sm:$0xff] %vm804_vm0, %v780_v52  ;;  %v595_v4 = vmax.f32 %v563_v45, %v954_v56  ;;  %v565_v7 = vmax.f32 %v954_v56, %v986_v57  ;;  %v1017_v13 = vld [vmem:[%s1102_s23 + $0xc0] sm:$0xff]  ;;  %v658_v14 = vmax.f32 %v626_v0, %v1015_v53  ;;  %v596_v15 = vmax.f32 %v564_v58, %v955_v5  ;;  %v529_v25 = vld [vmem:[%s1120_s29 + $0x98] sm:$0xff]  ;;  %v498_v26 = vld [vmem:[%s1113_s26 + $0xa9] sm:$0xff] }
  0x30   : > { %814 = vst.msk [vmem:[%s1145_s7 + $0x48] sm:$0xff] %vm804_vm0, %v781_v59  ;;  %v782_v8 = vmax.f32 %v750_v60, %v526_v47  ;;  %v751_v9 = vmax.f32 %v719_v62, %v495_v49  ;;  %v720_v16 = vmax.f32 %v688_v2, %v464_v63  ;;  %v689_v17 = vmax.f32 %v657_v3, %v1016_v11  ;;  %v956_v20 = vld [vmem:[%s1094_s20 + $0xe0] sm:$0xff]  ;;  %v530_v32 = vld [vmem:[%s1120_s29 + $0xa8] sm:$0xff]  ;;  %v989_v36 = vld [vmem:[%s1094_s20 + $0xf1] sm:$0xff] }
  0x31   : > { %v627_v19 = vmax.f32 %v595_v4, %v986_v57  ;;  %v988_v21 = vld [vmem:[%s1094_s20 + $0xe1] sm:$0xff]  ;;  %v566_v22 = vmax.f32 %v955_v5, %v987_v6  ;;  %v497_v24 = vld [vmem:[%s1113_s26 + $0x99] sm:$0xff]  ;;  %v690_v27 = vmax.f32 %v658_v14, %v1017_v13  ;;  %v628_v28 = vmax.f32 %v596_v15, %v987_v6  ;;  %v467_v39 = vld [vmem:[%s1113_s26 + $0xb0] sm:$0xff] }
  0x32   : > { %815 = vst.msk [vmem:[%s1145_s7 + $0x50] sm:$0xff] %vm804_vm0, %v782_v8  ;;  %v783_v23 = vmax.f32 %v751_v9, %v527_v61  ;;  %v597_v29 = vmax.f32 %v565_v7, %v956_v20  ;;  %v752_v30 = vmax.f32 %v720_v16, %v496_v1  ;;  %v721_v31 = vmax.f32 %v689_v17, %v465_v12  ;;  %v1018_v33 = vld [vmem:[%s1102_s23 + $0xc8] sm:$0xff]  ;;  %v499_v40 = vld [vmem:[%s1113_s26 + $0xb1] sm:$0xff]  ;;  %v468_v48 = vld [vmem:[%s1113_s26 + $0xc0] sm:$0xff] }
  0x33   : > { %v659_v34 = vmax.f32 %v627_v19, %v1016_v11  ;;  %v567_v37 = vmax.f32 %v956_v20, %v988_v21  ;;  %v722_v38 = vmax.f32 %v690_v27, %v466_v18  ;;  %v1019_v41 = vld [vmem:[%s1102_s23 + $0xd8] sm:$0xff]  ;;  %v660_v42 = vmax.f32 %v628_v28, %v1017_v13  ;;  %v531_v53 = vld [vmem:[%s1120_s29 + $0xb0] sm:$0xff]  ;;  %v500_v54 = vld [vmem:[%s1113_s26 + $0xc1] sm:$0xff] }
  0x34   : > { %816 = vst.msk [vmem:[%s1145_s7 + $0x58] sm:$0xff] %vm804_vm0, %v783_v23  ;;  %v629_v43 = vmax.f32 %v597_v29, %v988_v21  ;;  %v598_v44 = vmax.f32 %v566_v22, %v957_v35  ;;  %v784_v45 = vmax.f32 %v752_v30, %v528_v10  ;;  %v753_v46 = vmax.f32 %v721_v31, %v497_v24  ;;  %v958_v49 = vld [vmem:[%s1094_s20 + $0xf8] sm:$0xff]  ;;  %v1020_v56 = vld [vmem:[%s1102_s23 + $0xe0] sm:$0xff]  ;;  %v469_v61 = vld [vmem:[%s1113_s26 + $0xc8] sm:$0xff] }
  0x35   : > { %v691_v47 = vmax.f32 %v659_v34, %v1018_v33  ;;  %v990_v50 = vld [vmem:[%s1094_s20 + $0xf9] sm:$0xff]  ;;  %v568_v51 = vmax.f32 %v957_v35, %v989_v36  ;;  %v754_v52 = vmax.f32 %v722_v38, %v498_v26  ;;  %v692_v55 = vmax.f32 %v660_v42, %v1019_v41  ;;  %v959_v63 = vld [vmem:[%s1094_s20 + $0x108] sm:$0xff]  ;;  %v1021_v7 = vld [vmem:[%s1102_s23 + $0xf0] sm:$0xff] }
  0x36   : > { %v661_v57 = vmax.f32 %v629_v43, %v1018_v33  ;;  %v630_v58 = vmax.f32 %v598_v44, %v989_v36  ;;  %817 = vst.msk [vmem:[%s1145_s7 + $0x60] sm:$0xff] %vm804_vm0, %v784_v45  ;;  %v785_v59 = vmax.f32 %v753_v46, %v529_v25  ;;  %v599_v62 = vmax.f32 %v567_v37, %v958_v49  ;;  %v991_v0 = vld [vmem:[%s1094_s20 + $0x109] sm:$0xff]  ;;  %v532_v3 = vld [vmem:[%s1120_s29 + $0xc0] sm:$0xff]  ;;  %v470_v10 = vld [vmem:[%s1113_s26 + $0xd8] sm:$0xff] }
  0x37   : > { %v723_v60 = vmax.f32 %v691_v47, %v467_v39  ;;  %v569_v1 = vmax.f32 %v958_v49, %v990_v50  ;;  %v786_v2 = vmax.f32 %v754_v52, %v530_v32  ;;  %v724_v4 = vmax.f32 %v692_v55, %v468_v48  ;;  %v501_v5 = vld [vmem:[%s1113_s26 + $0xc9] sm:$0xff]  ;;  %v992_v14 = vld [vmem:[%s1094_s20 + $0x111] sm:$0xff]  ;;  %v502_v19 = vld [vmem:[%s1113_s26 + $0xd9] sm:$0xff] }
  0x38   : > { %v693_v6 = vmax.f32 %v661_v57, %v1020_v56  ;;  %v662_v8 = vmax.f32 %v630_v58, %v1019_v41  ;;  %818 = vst.msk [vmem:[%s1145_s7 + $0x68] sm:$0xff] %vm804_vm0, %v785_v59  ;;  %v631_v11 = vmax.f32 %v599_v62, %v990_v50  ;;  %v600_v12 = vmax.f32 %v568_v51, %v959_v63  ;;  %v960_v13 = vld [vmem:[%s1094_s20 + $0x110] sm:$0xff]  ;;  %v533_v17 = vld [vmem:[%s1120_s29 + $0xc8] sm:$0xff]  ;;  %v1022_v23 = vld [vmem:[%s1102_s23 + $0xf8] sm:$0xff] }
  0x39   : > { %v755_v9 = vmax.f32 %v723_v60, %v499_v40  ;;  %v570_v15 = vmax.f32 %v959_v63, %v991_v0  ;;  %819 = vst.msk [vmem:[%s1145_s7 + $0x70] sm:$0xff] %vm804_vm0, %v786_v2  ;;  %v756_v16 = vmax.f32 %v724_v4, %v500_v54  ;;  %v601_v21 = vmax.f32 %v569_v1, %v960_v13  ;;  %v961_v26 = vld [vmem:[%s1094_s20 + $0x120] sm:$0xff]  ;;  %v534_v31 = vld [vmem:[%s1120_s29 + $0xd8] sm:$0xff]  ;;  %v962_v39 = vld [vmem:[%s1094_s20 + $0x128] sm:$0xff] }
  0x3a   : > { %v725_v18 = vmax.f32 %v693_v6, %v469_v61  ;;  %v694_v20 = vmax.f32 %v662_v8, %v1021_v7  ;;  %v663_v24 = vmax.f32 %v631_v11, %v1020_v56  ;;  %v632_v25 = vmax.f32 %v600_v12, %v991_v0  ;;  %v993_v27 = vld [vmem:[%s1094_s20 + $0x121] sm:$0xff]  ;;  %v994_v40 = vld [vmem:[%s1094_s20 + $0x129] sm:$0xff]  ;;  %v473_v52 = vld [vmem:[%s1113_s26 + $0xf8] sm:$0xff] }
  0x3b   : > { %v787_v22 = vmax.f32 %v755_v9, %v531_v53  ;;  %v571_v28 = vmax.f32 %v960_v13, %v992_v14  ;;  %v788_v29 = vmax.f32 %v756_v16, %v532_v3  ;;  %v471_v33 = vld [vmem:[%s1113_s26 + $0xe0] sm:$0xff]  ;;  %v633_v34 = vmax.f32 %v601_v21, %v992_v14  ;;  %v1023_v45 = vld [vmem:[%s1102_s23 + $0x108] sm:$0xff]  ;;  %v472_v46 = vld [vmem:[%s1113_s26 + $0xf0] sm:$0xff] }
  0x3c   : > { %v757_v30 = vmax.f32 %v725_v18, %v501_v5  ;;  %v726_v32 = vmax.f32 %v694_v20, %v470_v10  ;;  %v503_v35 = vld [vmem:[%s1113_s26 + $0xe1] sm:$0xff]  ;;  %v695_v36 = vmax.f32 %v663_v24, %v1022_v23  ;;  %v664_v37 = vmax.f32 %v632_v25, %v1021_v7  ;;  %v1024_v47 = vld [vmem:[%s1102_s23 + $0x110] sm:$0xff]  ;;  %v963_v54 = vld [vmem:[%s1094_s20 + $0x138] sm:$0xff] }
  0x3d   : > { %820 = vst.msk [vmem:[%s1145_s7 + $0x78] sm:$0xff] %vm804_vm0, %v787_v22  ;;  %v602_v38 = vmax.f32 %v570_v15, %v961_v26  ;;  %v572_v41 = vmax.f32 %v961_v26, %v993_v27  ;;  %v535_v44 = vld [vmem:[%s1120_s29 + $0xe0] sm:$0xff]  ;;  %v665_v48 = vmax.f32 %v633_v34, %v1022_v23  ;;  %v603_v49 = vmax.f32 %v571_v28, %v962_v39  ;;  %v504_v58 = vld [vmem:[%s1113_s26 + $0xf1] sm:$0xff]  ;;  %v474_v9 = vld [vmem:[%s1113_s26 + $0x108] sm:$0xff] }
  0x3e   : > { %821 = vst.msk [vmem:[%s1145_s7 + $0x80] sm:$0xff] %vm804_vm0, %v788_v29  ;;  %v789_v42 = vmax.f32 %v757_v30, %v533_v17  ;;  %v758_v43 = vmax.f32 %v726_v32, %v502_v19  ;;  %v727_v50 = vmax.f32 %v695_v36, %v471_v33  ;;  %v696_v51 = vmax.f32 %v664_v37, %v1023_v45  ;;  %v995_v55 = vld [vmem:[%s1094_s20 + $0x139] sm:$0xff]  ;;  %v536_v59 = vld [vmem:[%s1120_s29 + $0xf0] sm:$0xff]  ;;  %v996_v6 = vld [vmem:[%s1094_s20 + $0x141] sm:$0xff] }
  0x3f   : > { %v634_v53 = vmax.f32 %v602_v38, %v993_v27  ;;  %v573_v56 = vmax.f32 %v962_v39, %v994_v40  ;;  %v505_v60 = vld [vmem:[%s1113_s26 + $0xf9] sm:$0xff]  ;;  %v697_v61 = vmax.f32 %v665_v48, %v1024_v47  ;;  %v635_v62 = vmax.f32 %v603_v49, %v994_v40  ;;  %v506_v10 = vld [vmem:[%s1113_s26 + $0x109] sm:$0xff]  ;;  %v997_v20 = vld [vmem:[%s1094_s20 + $0x151] sm:$0xff] }
  0x40   : > { %822 = vst.msk [vmem:[%s1145_s7 + $0x88] sm:$0xff] %vm804_vm0, %v789_v42  ;;  %v790_v57 = vmax.f32 %v758_v43, %v534_v31  ;;  %v604_v63 = vmax.f32 %v572_v41, %v963_v54  ;;  %v759_v0 = vmax.f32 %v727_v50, %v503_v35  ;;  %v728_v1 = vmax.f32 %v696_v51, %v472_v46  ;;  %v537_v2 = vld [vmem:[%s1120_s29 + $0xf8] sm:$0xff]  ;;  %v1025_v3 = vld [vmem:[%s1102_s23 + $0x120] sm:$0xff]  ;;  %v1026_v11 = vld [vmem:[%s1102_s23 + $0x128] sm:$0xff] }
  0x41   : > { %v666_v4 = vmax.f32 %v634_v53, %v1023_v45  ;;  %v964_v5 = vld [vmem:[%s1094_s20 + $0x140] sm:$0xff]  ;;  %v574_v7 = vmax.f32 %v963_v54, %v995_v55  ;;  %v729_v8 = vmax.f32 %v697_v61, %v473_v52  ;;  %v667_v12 = vmax.f32 %v635_v62, %v1024_v47  ;;  %v475_v18 = vld [vmem:[%s1113_s26 + $0x110] sm:$0xff]  ;;  %v538_v23 = vld [vmem:[%s1120_s29 + $0x108] sm:$0xff] }
  0x42   : > { %823 = vst.msk [vmem:[%s1145_s7 + $0x90] sm:$0xff] %vm804_vm0, %v790_v57  ;;  %v636_v13 = vmax.f32 %v604_v63, %v995_v55  ;;  %v605_v14 = vmax.f32 %v573_v56, %v964_v5  ;;  %v791_v15 = vmax.f32 %v759_v0, %v535_v44  ;;  %v760_v16 = vmax.f32 %v728_v1, %v504_v58  ;;  %v965_v19 = vld [vmem:[%s1094_s20 + $0x150] sm:$0xff]  ;;  %v1027_v26 = vld [vmem:[%s1102_s23 + $0x138] sm:$0xff]  ;;  %v476_v31 = vld [vmem:[%s1113_s26 + $0x120] sm:$0xff] }
  0x43   : > { %v698_v17 = vmax.f32 %v666_v4, %v1025_v3  ;;  %v575_v21 = vmax.f32 %v964_v5, %v996_v6  ;;  %v761_v22 = vmax.f32 %v729_v8, %v505_v60  ;;  %v507_v24 = vld [vmem:[%s1113_s26 + $0x111] sm:$0xff]  ;;  %v699_v25 = vmax.f32 %v667_v12, %v1026_v11  ;;  %v998_v34 = vld [vmem:[%s1094_s20 + $0x159] sm:$0xff]  ;;  %v508_v39 = vld [vmem:[%s1113_s26 + $0x121] sm:$0xff] }
  0x44   : > { %v668_v27 = vmax.f32 %v636_v13, %v1025_v3  ;;  %v637_v28 = vmax.f32 %v605_v14, %v996_v6  ;;  %824 = vst.msk [vmem:[%s1145_s7 + $0x98] sm:$0xff] %vm804_vm0, %v791_v15  ;;  %v792_v29 = vmax.f32 %v760_v16, %v536_v59  ;;  %v606_v32 = vmax.f32 %v574_v7, %v965_v19  ;;  %v966_v33 = vld [vmem:[%s1094_s20 + $0x158] sm:$0xff]  ;;  %v539_v37 = vld [vmem:[%s1120_s29 + $0x110] sm:$0xff]  ;;  %v1028_v41 = vld [vmem:[%s1102_s23 + $0x140] sm:$0xff] }
  0x45   : > { %v730_v30 = vmax.f32 %v698_v17, %v474_v9  ;;  %v576_v35 = vmax.f32 %v965_v19, %v997_v20  ;;  %v793_v36 = vmax.f32 %v761_v22, %v537_v2  ;;  %v731_v38 = vmax.f32 %v699_v25, %v475_v18  ;;  %v477_v44 = vld [vmem:[%s1113_s26 + $0x128] sm:$0xff]  ;;  %v540_v51 = vld [vmem:[%s1120_s29 + $0x120] sm:$0xff]  ;;  %v1029_v57 = vld [vmem:[%s1102_s23 + $0x150] sm:$0xff] }
  0x46   : > { %v700_v40 = vmax.f32 %v668_v27, %v1027_v26  ;;  %v669_v42 = vmax.f32 %v637_v28, %v1026_v11  ;;  %825 = vst.msk [vmem:[%s1145_s7 + $0xa0] sm:$0xff] %vm804_vm0, %v792_v29  ;;  %v638_v45 = vmax.f32 %v606_v32, %v997_v20  ;;  %v607_v46 = vmax.f32 %v575_v21, %v966_v33  ;;  %v967_v47 = vld [vmem:[%s1094_s20 + $0x168] sm:$0xff]  ;;  %v968_v60 = vld [vmem:[%s1094_s20 + $0x170] sm:$0xff]  ;;  %v478_v3 = vld [vmem:[%s1113_s26 + $0x138] sm:$0xff] }
  0x47   : > { %v762_v43 = vmax.f32 %v730_v30, %v506_v10  ;;  %v999_v48 = vld [vmem:[%s1094_s20 + $0x169] sm:$0xff]  ;;  %v577_v49 = vmax.f32 %v966_v33, %v998_v34  ;;  %826 = vst.msk [vmem:[%s1145_s7 + $0xa8] sm:$0xff] %vm804_vm0, %v793_v36  ;;  %v763_v50 = vmax.f32 %v731_v38, %v507_v24  ;;  %v608_v55 = vmax.f32 %v576_v35, %v967_v47  ;;  %v1000_v61 = vld [vmem:[%s1094_s20 + $0x171] sm:$0xff]  ;;  %v510_v5 = vld [vmem:[%s1113_s26 + $0x139] sm:$0xff] }
  0x48   : > { %v732_v52 = vmax.f32 %v700_v40, %v476_v31  ;;  %v509_v53 = vld [vmem:[%s1113_s26 + $0x129] sm:$0xff]  ;;  %v701_v54 = vmax.f32 %v669_v42, %v1028_v41  ;;  %v670_v58 = vmax.f32 %v638_v45, %v1027_v26  ;;  %v639_v59 = vmax.f32 %v607_v46, %v998_v34  ;;  %v969_v9 = vld [vmem:[%s1094_s20 + $0x180] sm:$0xff]  ;;  %v1030_v14 = vld [vmem:[%s1102_s23 + $0x158] sm:$0xff] }
  0x49   : > { %v794_v56 = vmax.f32 %v762_v43, %v538_v23  ;;  %v578_v62 = vmax.f32 %v967_v47, %v999_v48  ;;  %v795_v63 = vmax.f32 %v763_v50, %v539_v37  ;;  %v541_v1 = vld [vmem:[%s1120_s29 + $0x128] sm:$0xff]  ;;  %v640_v4 = vmax.f32 %v608_v55, %v999_v48  ;;  %v479_v15 = vld [vmem:[%s1113_s26 + $0x140] sm:$0xff]  ;;  %v480_v21 = vld [vmem:[%s1113_s26 + $0x150] sm:$0xff] }
  0x4a   : > { %v764_v0 = vmax.f32 %v732_v52, %v508_v39  ;;  %v733_v2 = vmax.f32 %v701_v54, %v477_v44  ;;  %v702_v6 = vmax.f32 %v670_v58, %v1029_v57  ;;  %v671_v7 = vmax.f32 %v639_v59, %v1028_v41  ;;  %v1001_v10 = vld [vmem:[%s1094_s20 + $0x181] sm:$0xff]  ;;  %v1002_v24 = vld [vmem:[%s1094_s20 + $0x189] sm:$0xff]  ;;  %v542_v26 = vld [vmem:[%s1120_s29 + $0x138] sm:$0xff] }
  0x4b   : > { %827 = vst.msk [vmem:[%s1145_s7 + $0xb0] sm:$0xff] %vm804_vm0, %v794_v56  ;;  %v609_v8 = vmax.f32 %v577_v49, %v968_v60  ;;  %v579_v11 = vmax.f32 %v968_v60, %v1000_v61  ;;  %v1031_v16 = vld [vmem:[%s1102_s23 + $0x168] sm:$0xff]  ;;  %v672_v17 = vmax.f32 %v640_v4, %v1029_v57  ;;  %v610_v18 = vmax.f32 %v578_v62, %v969_v9  ;;  %v512_v33 = vld [vmem:[%s1113_s26 + $0x151] sm:$0xff]  ;;  %v1033_v36 = vld [vmem:[%s1102_s23 + $0x180] sm:$0xff] }
  0x4c   : > { %828 = vst.msk [vmem:[%s1145_s7 + $0xb8] sm:$0xff] %vm804_vm0, %v795_v63  ;;  %v796_v12 = vmax.f32 %v764_v0, %v540_v51  ;;  %v765_v13 = vmax.f32 %v733_v2, %v509_v53  ;;  %v734_v19 = vmax.f32 %v702_v6, %v478_v3  ;;  %v703_v20 = vmax.f32 %v671_v7, %v1030_v14  ;;  %v970_v23 = vld [vmem:[%s1094_s20 + $0x188] sm:$0xff]  ;;  %v1032_v34 = vld [vmem:[%s1102_s23 + $0x170] sm:$0xff]  ;;  %v543_v37 = vld [vmem:[%s1120_s29 + $0x140] sm:$0xff] }
  0x4d   : > { %v641_v22 = vmax.f32 %v609_v8, %v1000_v61  ;;  %v511_v27 = vld [vmem:[%s1113_s26 + $0x141] sm:$0xff]  ;;  %v704_v28 = vmax.f32 %v672_v17, %v1031_v16  ;;  %v642_v29 = vmax.f32 %v610_v18, %v1001_v10  ;;  %v611_v30 = vmax.f32 %v579_v11, %v970_v23  ;;  %v481_v39 = vld [vmem:[%s1113_s26 + $0x158] sm:$0xff]  ;;  %v544_v44 = vld [vmem:[%s1120_s29 + $0x150] sm:$0xff] }
  0x4e   : > { %829 = vst.msk [vmem:[%s1145_s7 + $0xc0] sm:$0xff] %vm804_vm0, %v796_v12  ;;  %v797_v25 = vmax.f32 %v765_v13, %v541_v1  ;;  %v766_v31 = vmax.f32 %v734_v19, %v510_v5  ;;  %v735_v32 = vmax.f32 %v703_v20, %v479_v15  ;;  %v482_v46 = vld [vmem:[%s1113_s26 + $0x168] sm:$0xff]  ;;  %v513_v49 = vld [vmem:[%s1113_s26 + $0x159] sm:$0xff]  ;;  %v483_v55 = vld [vmem:[%s1113_s26 + $0x170] sm:$0xff] }
  0x4f   : > { %v673_v35 = vmax.f32 %v641_v22, %v1030_v14  ;;  %v736_v38 = vmax.f32 %v704_v28, %v480_v21  ;;  %v674_v40 = vmax.f32 %v642_v29, %v1031_v16  ;;  %v643_v41 = vmax.f32 %v611_v30, %v1002_v24  ;;  %v1034_v47 = vld [vmem:[%s1102_s23 + $0x188] sm:$0xff]  ;;  %v545_v57 = vld [vmem:[%s1120_s29 + $0x158] sm:$0xff]  ;;  %v547_v2 = vld [vmem:[%s1120_s29 + $0x170] sm:$0xff] }
  0x50   : > { %830 = vst.msk [vmem:[%s1145_s7 + $0xc8] sm:$0xff] %vm804_vm0, %v797_v25  ;;  %v798_v42 = vmax.f32 %v766_v31, %v542_v26  ;;  %v767_v43 = vmax.f32 %v735_v32, %v511_v27  ;;  %v514_v54 = vld [vmem:[%s1113_s26 + $0x169] sm:$0xff]  ;;  %v515_v62 = vld [vmem:[%s1113_s26 + $0x171] sm:$0xff] }
  0x51   : > { %v705_v45 = vmax.f32 %v673_v35, %v1032_v34  ;;  %v768_v48 = vmax.f32 %v736_v38, %v512_v33  ;;  %v706_v50 = vmax.f32 %v674_v40, %v1033_v36  ;;  %v675_v51 = vmax.f32 %v643_v41, %v1032_v34  ;;  %v546_v61 = vld [vmem:[%s1120_s29 + $0x168] sm:$0xff] }
  0x52   : > { %831 = vst.msk [vmem:[%s1145_s7 + $0xd0] sm:$0xff] %vm804_vm0, %v798_v42  ;;  %v799_v52 = vmax.f32 %v767_v43, %v543_v37 }
  0x53   : > { %v737_v53 = vmax.f32 %v705_v45, %v481_v39  ;;  %v800_v56 = vmax.f32 %v768_v48, %v544_v44  ;;  %v738_v58 = vmax.f32 %v706_v50, %v482_v46  ;;  %v707_v59 = vmax.f32 %v675_v51, %v1034_v47 }
  0x54   : > { %832 = vst.msk [vmem:[%s1145_s7 + $0xd8] sm:$0xff] %vm804_vm0, %v799_v52 }
  0x55   : > { %v769_v60 = vmax.f32 %v737_v53, %v513_v49  ;;  %833 = vst.msk [vmem:[%s1145_s7 + $0xe0] sm:$0xff] %vm804_vm0, %v800_v56  ;;  %v770_v63 = vmax.f32 %v738_v58, %v514_v54  ;;  %v739_v0 = vmax.f32 %v707_v59, %v483_v55 }
  0x57   : > { %v801_v1 = vmax.f32 %v769_v60, %v545_v57  ;;  %v802_v3 = vmax.f32 %v770_v63, %v546_v61  ;;  %v771_v4 = vmax.f32 %v739_v0, %v515_v62 }
  0x59   : > { %834 = vst.msk [vmem:[%s1145_s7 + $0xe8] sm:$0xff] %vm804_vm0, %v801_v1  ;;  %v803_v5 = vmax.f32 %v771_v4, %v547_v2 }
  0x5a   : > { %835 = vst.msk [vmem:[%s1145_s7 + $0xf0] sm:$0xff] %vm804_vm0, %v802_v3 }
  0x5b   : > { %836 = vst.msk [vmem:[%s1145_s7 + $0xf8] sm:$0xff] %vm804_vm0, %v803_v5 }
  0x5c PF: > { %s14_s15 = sadd.s32 1, %s1053_s15  }
  0x5d   : > { %p11_p4 = scmp.ge.s32.totalorder %s14_s15, 4  }
  0x5f   :  { %13 = sbr.rel (!%p11_p4) target bundleno = 1 (0x1), region = 77 }

// kernel: enc_resnet_forward.11
= control target key start
LH: loop header
LB: loop body
LE: loop exit
PB: predicated region body
PF: predicated region fallthrough
CT: control target
= control target key end

     0   :  { %s2877_s18 = smov 0   ;;  %s2879_s19 = smov 0   ;;  %s3586_s0 = inlined_call_operand.vmem [shape: bf16[512,576], index: 0, kind: input, shape index: {}]   ;;  %s3587_s1 = inlined_call_operand.vmem [shape: bf16[576,64], index: 1, kind: input, shape index: {}]   ;;  %s3588_s2 = inlined_call_operand.vmem [shape: f32[1,64], index: 2, kind: input, shape index: {}]   ;;  %s3589_s3 = inlined_call_operand.vmem [shape: f32[1,64], index: 3, kind: input, shape index: {}]   ;;  %s3590_s4 = inlined_call_operand.vmem [shape: f32[512,64], index: 4, kind: input, shape index: {}]   ;;  %s3591_s5 = inlined_call_operand.vmem [shape: f32[512,64], index: 5, kind: output, shape index: {}]  }
   0x1   :  { %s2881_s20 = smov 0  }
   0x2 LB: > { %s34_s21 = sadd.s32 1, %s2840_s19  ;;  %p2163_p0 = scmp.ge.s32.totalorder %s2844_s20, 1  ;;  %s2844_s20 = sphi %s2881_s20, %s15_s20   ;;  %s2840_s19 = sphi %s2879_s19, %s3593_s19   ;;  %s2836_s18 = sphi %s2877_s18, %s3592_s18  }
   0x3   : > { %p36_p1 = scmp.ge.s32.totalorder %s34_s21, 2  ;;  %p265_p2 = scmp.lt.s32.totalorder %s2844_s20, 3 }
   0x5   : > { %s3595_s21 = smov (%p36_p1, %s34_s21), 0  ;;  %p266_p3 = pnand %p2163_p0, %p265_p2 }
   0x6   : > { %s2164_s28 = sshll.u32 (!%p266_p3), %s2836_s18, 5 }
   0x7   : > { %269 = sbr.rel (%p266_p3) target bundleno = 514 (0x202), region = 40  ;;  %p325_p4 = scmp.lt.s32.totalorder (!%p266_p3), %s2164_s28, 63 }
   0xc   : > { %v2739_v0 = vld [vmem:[%s3587_s1 + $0x38] sm:$0xff]  ;;  %v2738_v1 = vld [vmem:[%s3587_s1 + $0x30] sm:$0xff]  ;;  %v2737_v2 = vld [vmem:[%s3587_s1 + $0x28] sm:$0xff]  ;;  %s3597_s28 = smov (!%p325_p4, %s2164_s28), 63  ;;  %vm373_vm0 = vcmask 523264  }
   0xd   : > { %2768 = vmatpush.bf16.msra.mxu1 %v2739_v0  ;;  %2769 = vmatpush.bf16.msra.mxu2 %v2739_v0  ;;  %v2736_v3 = vld [vmem:[%s3587_s1 + $0x20] sm:$0xff]  ;;  %v2735_v4 = vld [vmem:[%s3587_s1 + $0x18] sm:$0xff]  ;;  %v2734_v5 = vld [vmem:[%s3587_s1 + $0x10] sm:$0xff]  ;;  %s2792_s10 = smul.u32 20, %s3597_s28  ;;  %s2167_s13 = sshll.u32 %s3597_s28, 3 }
   0xe   : > { %2770 = vmatpush.bf16.msra.mxu3 %v2739_v0  ;;  %1271 = vmatpush.bf16.msra.mxu0 %v2739_v0  ;;  %v2733_v6 = vld [vmem:[%s3587_s1 + $0x8] sm:$0xff]  ;;  %v2732_v7 = vld [vmem:[%s3587_s1] sm:$0xff]  ;;  %v2755_v16 = vld [vmem:[%s3587_s1 + $0xb8] sm:$0xff]  ;;  %s3278_s22 = scalar_lea.vmem %s3590_s4, %s2167_s13  ;;  %s3298_s27 = scalar_lea.vmem %s3591_s5, %s2167_s13 }
   0xf   : > { %s2925_s15 = scalar_lea.vmem %s3586_s0, %s2792_s10  ;;  %v2763_v17 = vld [vmem:[%s3587_s1 + $0xf8] sm:$0xff]  ;;  %v2754_v24 = vld [vmem:[%s3587_s1 + $0xb0] sm:$0xff]  ;;  %v2753_v28 = vld [vmem:[%s3587_s1 + $0xa8] sm:$0xff] }
  0x10   : > { %v2252_v8 = vld [vmem:[%s2925_s15 + $0xa0] sm:$0xf]  ;;  %v2674_v9 = vld [vmem:[%s2925_s15 + $0xb0] sm:$0xf0]  ;;  %v2747_v22 = vld [vmem:[%s3587_s1 + $0x78] sm:$0xff] }
  0x11   : > { %2771 = vmatpush.bf16.msra.mxu1 %v2738_v1  ;;  %2772 = vmatpush.bf16.msra.mxu2 %v2738_v1  ;;  %v2332_v10 = vld [vmem:[%s2925_s15 + $0x140] sm:$0xf]  ;;  %v2694_v11 = vld [vmem:[%s2925_s15 + $0x150] sm:$0xf0]  ;;  %v2253_v18 = vor.u32 %v2674_v9, %v2252_v8  ;;  %v2767_v23 = vld [vmem:[%s3587_s1 + $0x118] sm:$0xff] }
  0x12   : > { %2773 = vmatpush.bf16.msra.mxu3 %v2738_v1  ;;  %1272 = vmatpush.bf16.msra.mxu0 %v2738_v1  ;;  %v2412_v12 = vld [vmem:[%s2925_s15 + $0x1e0] sm:$0xf]  ;;  %v2714_v13 = vld [vmem:[%s2925_s15 + $0x1f0] sm:$0xf0]  ;;  %v2333_v19 = vor.u32 %v2694_v11, %v2332_v10  ;;  %v2761_v29 = vld [vmem:[%s3587_s1 + $0xe8] sm:$0xff] }
  0x13   : > { %v2172_v14 = vld [vmem:[%s2925_s15] sm:$0xf]  ;;  %v2654_v15 = vld [vmem:[%s2925_s15 + $0x10] sm:$0xf0]  ;;  %v2413_v20 = vor.u32 %v2714_v13, %v2412_v12  ;;  %v2745_v30 = vld [vmem:[%s3587_s1 + $0x68] sm:$0xff] }
  0x14   : > { %v2173_v21 = vor.u32 %v2654_v15, %v2172_v14  ;;  %v2762_v25 = vld [vmem:[%s3587_s1 + $0xf0] sm:$0xff]  ;;  %v2765_v31 = vld [vmem:[%s3587_s1 + $0x108] sm:$0xff]  ;;  %v2752_v32 = vld [vmem:[%s3587_s1 + $0xa0] sm:$0xff] }
  0x15   : > { %2774 = vmatpush.bf16.msra.mxu1 %v2737_v2  ;;  %2775 = vmatpush.bf16.msra.mxu2 %v2737_v2  ;;  %v2746_v26 = vld [vmem:[%s3587_s1 + $0x70] sm:$0xff]  ;;  %v2760_v33 = vld [vmem:[%s3587_s1 + $0xe0] sm:$0xff]  ;;  %v2272_v34 = vld [vmem:[%s2925_s15 + $0xc8] sm:$0xf] }
  0x16   : > { %2776 = vmatpush.bf16.msra.mxu3 %v2737_v2  ;;  %1273 = vmatpush.bf16.msra.mxu0 %v2737_v2  ;;  %v2766_v27 = vld [vmem:[%s3587_s1 + $0x110] sm:$0xff]  ;;  %v2679_v35 = vld [vmem:[%s2925_s15 + $0xd8] sm:$0xf0]  ;;  %v2352_v36 = vld [vmem:[%s2925_s15 + $0x168] sm:$0xf] }
  0x17   : > { %v2699_v37 = vld [vmem:[%s2925_s15 + $0x178] sm:$0xf0]  ;;  %v2432_v38 = vld [vmem:[%s2925_s15 + $0x208] sm:$0xf]  ;;  %v2744_v42 = vld [vmem:[%s3587_s1 + $0x60] sm:$0xff]  ;;  %v2273_v45 = vor.u32 %v2679_v35, %v2272_v34 }
  0x18   : > { %v2719_v39 = vld [vmem:[%s2925_s15 + $0x218] sm:$0xf0]  ;;  %v2192_v40 = vld [vmem:[%s2925_s15 + $0x28] sm:$0xf]  ;;  %v2353_v46 = vor.u32 %v2699_v37, %v2352_v36  ;;  %v2750_v50 = vld [vmem:[%s3587_s1 + $0x90] sm:$0xff] }
  0x19   : > { %2777 = vmatpush.bf16.msra.mxu1 %v2736_v3  ;;  %2778 = vmatpush.bf16.msra.mxu2 %v2736_v3  ;;  %v2659_v41 = vld [vmem:[%s2925_s15 + $0x38] sm:$0xf0]  ;;  %v2433_v47 = vor.u32 %v2719_v39, %v2432_v38  ;;  %v2758_v51 = vld [vmem:[%s3587_s1 + $0xd0] sm:$0xff]  ;;  %v2764_v53 = vld [vmem:[%s3587_s1 + $0x100] sm:$0xff] }
  0x1a   : > { %2779 = vmatpush.bf16.msra.mxu3 %v2736_v3  ;;  %1274 = vmatpush.bf16.msra.mxu0 %v2736_v3  ;;  %v2751_v43 = vld [vmem:[%s3587_s1 + $0x98] sm:$0xff]  ;;  %v2193_v48 = vor.u32 %v2659_v41, %v2192_v40  ;;  %v2742_v52 = vld [vmem:[%s3587_s1 + $0x50] sm:$0xff]  ;;  %v2749_v54 = vld [vmem:[%s3587_s1 + $0x88] sm:$0xff] }
  0x1b   : > { %v2759_v44 = vld [vmem:[%s3587_s1 + $0xd8] sm:$0xff]  ;;  %v2757_v55 = vld [vmem:[%s3587_s1 + $0xc8] sm:$0xff]  ;;  %v2748_v57 = vld [vmem:[%s3587_s1 + $0x80] sm:$0xff] }
  0x1c   : > { %v2743_v49 = vld [vmem:[%s3587_s1 + $0x58] sm:$0xff]  ;;  %v2741_v56 = vld [vmem:[%s3587_s1 + $0x48] sm:$0xff]  ;;  %v2756_v58 = vld [vmem:[%s3587_s1 + $0xc0] sm:$0xff] }
  0x1d   : > { %2780 = vmatpush.bf16.msra.mxu1 %v2735_v4  ;;  %2781 = vmatpush.bf16.msra.mxu2 %v2735_v4  ;;  %v2292_v59 = vld [vmem:[%s2925_s15 + $0xf0] sm:$0xf]  ;;  %v2684_v60 = vld [vmem:[%s2925_s15 + $0x100] sm:$0xf0]  ;;  %v2312_v8 = vld [vmem:[%s2925_s15 + $0x118] sm:$0xf] }
  0x1e   : > { %2782 = vmatpush.bf16.msra.mxu3 %v2735_v4  ;;  %1275 = vmatpush.bf16.msra.mxu0 %v2735_v4  ;;  %v2372_v61 = vld [vmem:[%s2925_s15 + $0x190] sm:$0xf]  ;;  %v2704_v62 = vld [vmem:[%s2925_s15 + $0x1a0] sm:$0xf0]  ;;  %v2293_v4 = vor.u32 %v2684_v60, %v2292_v59  ;;  %v2689_v9 = vld [vmem:[%s2925_s15 + $0x128] sm:$0xf0] }
  0x1f   : > { %v2452_v63 = vld [vmem:[%s2925_s15 + $0x230] sm:$0xf]  ;;  %v2724_v0 = vld [vmem:[%s2925_s15 + $0x240] sm:$0xf0]  ;;  %v2392_v10 = vld [vmem:[%s2925_s15 + $0x1b8] sm:$0xf] }
  0x20   : > { %v2212_v1 = vld [vmem:[%s2925_s15 + $0x50] sm:$0xf]  ;;  %v2664_v2 = vld [vmem:[%s2925_s15 + $0x60] sm:$0xf0]  ;;  %v2709_v11 = vld [vmem:[%s2925_s15 + $0x1c8] sm:$0xf0] }
  0x21   : > { %2783 = vmatpush.bf16.msra.mxu1 %v2734_v5  ;;  %2784 = vmatpush.bf16.msra.mxu2 %v2734_v5  ;;  %v2740_v3 = vld [vmem:[%s3587_s1 + $0x40] sm:$0xff]  ;;  %v2472_v12 = vld [vmem:[%s2925_s15 + $0x258] sm:$0xf]  ;;  %v2729_v13 = vld [vmem:[%s2925_s15 + $0x268] sm:$0xf0] }
  0x22   : > { %2785 = vmatpush.bf16.msra.mxu3 %v2734_v5  ;;  %1276 = vmatpush.bf16.msra.mxu0 %v2734_v5  ;;  %v2373_v5 = vor.u32 %v2704_v62, %v2372_v61  ;;  %v2232_v14 = vld [vmem:[%s2925_s15 + $0x78] sm:$0xf]  ;;  %v2669_v15 = vld [vmem:[%s2925_s15 + $0x88] sm:$0xf0]  ;;  %v2200_v34 = vld [vmem:[%s2925_s15 + $0x30] sm:$0xf] }
  0x23   : > { %v2660_v35 = vld [vmem:[%s2925_s15 + $0x40] sm:$0xf0]  ;;  %v2658_v36 = vld [vmem:[%s2925_s15 + $0x34] sm:$0xf]  ;;  %v2202_v37 = vld [vmem:[%s2925_s15 + $0x44] sm:$0xf0] }
  0x24   : > { %v2208_v38 = vld [vmem:[%s2925_s15 + $0x38] sm:$0xf]  ;;  %v2661_v39 = vld [vmem:[%s2925_s15 + $0x48] sm:$0xf0]  ;;  %v2201_v41 = vor.u32 %v2660_v35, %v2200_v34  ;;  %v2670_v59 = vld [vmem:[%s2925_s15 + $0x90] sm:$0xf0] }
  0x25   : > { %2786 = vmatpush.bf16.msra.mxu1 %v2733_v6  ;;  %2787 = vmatpush.bf16.msra.mxu2 %v2733_v6  ;;  %v2668_v60 = vld [vmem:[%s2925_s15 + $0x84] sm:$0xf]  ;;  %v2242_v61 = vld [vmem:[%s2925_s15 + $0x94] sm:$0xf0]  ;;  %v2248_v62 = vld [vmem:[%s2925_s15 + $0x88] sm:$0xf] }
  0x26   : > { %2788 = vmatpush.bf16.msra.mxu3 %v2733_v6  ;;  %1277 = vmatpush.bf16.msra.mxu0 %v2733_v6  ;;  %v2453_v6 = vor.u32 %v2724_v0, %v2452_v63  ;;  %v2671_v63 = vld [vmem:[%s2925_s15 + $0x98] sm:$0xf0] }
  0x29   : > { %2789 = vmatpush.bf16.msra.mxu1 %v2732_v7  ;;  %2790 = vmatpush.bf16.msra.mxu2 %v2732_v7 }
  0x2a   : > { %2791 = vmatpush.bf16.msra.mxu3 %v2732_v7  ;;  %1278 = vmatpush.bf16.msra.mxu0 %v2732_v7  ;;  %v2213_v7 = vor.u32 %v2664_v2, %v2212_v1  ;;  %v2245_v2 = vor.u32 %v2668_v60, %v2242_v61 }
  0x2c   : > { %1299 = vmatmul.bf16.vlgmr.msra.gmra.mxu1 %v2253_v18  ;;  %1319 = vmatmul.bf16.vlgmr.msra.gmra.mxu2 %v2333_v19  ;;  %v2473_v18 = vor.u32 %v2729_v13, %v2472_v12  ;;  %v2233_v19 = vor.u32 %v2669_v15, %v2232_v14 }
  0x2d   : > { %1449 = vmatpush.bf16.msrb.mxu2 %v2755_v16  ;;  %1339 = vmatmul.bf16.vlgmr.msra.gmra.mxu3 %v2413_v20  ;;  %v2313_v16 = vor.u32 %v2689_v9, %v2312_v8  ;;  %v2652_v20 = vld [vmem:[%s2925_s15 + $0x4] sm:$0xf]  ;;  %v2673_v8 = vld [vmem:[%s2925_s15 + $0xac] sm:$0xf]  ;;  %v2262_v9 = vld [vmem:[%s2925_s15 + $0xbc] sm:$0xf0] }
  0x2e   : > { %1538 = vmatpush.bf16.msrb.mxu3 %v2763_v17  ;;  %1279 = vmatmul.bf16.vlgmr.msra.gmra.mxu0 %v2173_v21  ;;  %v2393_v17 = vor.u32 %v2709_v11, %v2392_v10  ;;  %v2174_v21 = vld [vmem:[%s2925_s15 + $0x14] sm:$0xf0]  ;;  %v2268_v10 = vld [vmem:[%s2925_s15 + $0xb0] sm:$0xf]  ;;  %v2676_v11 = vld [vmem:[%s2925_s15 + $0xc0] sm:$0xf0]  ;;  %v2265_v15 = vor.u32 %v2673_v8, %v2262_v9 }
  0x2f   : > { %1360 = vmatpush.bf16.msrb.mxu1 %v2747_v22  ;;  %1631 = vmatpush.bf16.msrb.mxu0 %v2767_v23  ;;  %v2180_v22 = vld [vmem:[%s2925_s15 + $0x8] sm:$0xf]  ;;  %v2655_v23 = vld [vmem:[%s2925_s15 + $0x18] sm:$0xf0] }
  0x31   : > { %1450 = vmatpush.bf16.msrb.mxu2 %v2754_v24  ;;  %v2653_v24 = vld [vmem:[%s2925_s15 + $0xc] sm:$0xf] }
  0x32   : > { %1539 = vmatpush.bf16.msrb.mxu3 %v2762_v25  ;;  %v2182_v25 = vld [vmem:[%s2925_s15 + $0x1c] sm:$0xf0] }
  0x33   : > { %1361 = vmatpush.bf16.msrb.mxu1 %v2746_v26  ;;  %1632 = vmatpush.bf16.msrb.mxu0 %v2766_v27  ;;  %v2188_v26 = vld [vmem:[%s2925_s15 + $0x10] sm:$0xf]  ;;  %v2656_v27 = vld [vmem:[%s2925_s15 + $0x20] sm:$0xf0] }
  0x35   : > { %1451 = vmatpush.bf16.msrb.mxu2 %v2753_v28  ;;  %v2177_v28 = vor.u32 %v2652_v20, %v2174_v21 }
  0x36   : > { %1540 = vmatpush.bf16.msrb.mxu3 %v2761_v29  ;;  %v2181_v29 = vor.u32 %v2655_v23, %v2180_v22  ;;  %v2677_v22 = vld [vmem:[%s2925_s15 + $0xcc] sm:$0xf]  ;;  %v2274_v23 = vld [vmem:[%s2925_s15 + $0xdc] sm:$0xf0] }
  0x37   : > { %1362 = vmatpush.bf16.msrb.mxu1 %v2745_v30  ;;  %1633 = vmatpush.bf16.msrb.mxu0 %v2765_v31  ;;  %v2185_v30 = vor.u32 %v2653_v24, %v2182_v25  ;;  %v2189_v31 = vor.u32 %v2656_v27, %v2188_v26  ;;  %v2280_v24 = vld [vmem:[%s2925_s15 + $0xd0] sm:$0xf]  ;;  %v2680_v25 = vld [vmem:[%s2925_s15 + $0xe0] sm:$0xf0]  ;;  %v2678_v26 = vld [vmem:[%s2925_s15 + $0xd4] sm:$0xf] }
  0x38   : > { %v2282_v27 = vld [vmem:[%s2925_s15 + $0xe4] sm:$0xf0] }
  0x39   : > { %1452 = vmatpush.bf16.msrb.mxu2 %v2752_v32  ;;  %v2657_v32 = vld [vmem:[%s2925_s15 + $0x2c] sm:$0xf]  ;;  %v2285_v35 = vor.u32 %v2678_v26, %v2282_v27  ;;  %v2334_v26 = vld [vmem:[%s2925_s15 + $0x154] sm:$0xf0]  ;;  %v2340_v27 = vld [vmem:[%s2925_s15 + $0x148] sm:$0xf] }
  0x3a   : > { %1541 = vmatpush.bf16.msrb.mxu3 %v2760_v33  ;;  %v2194_v33 = vld [vmem:[%s2925_s15 + $0x3c] sm:$0xf0] }
  0x3b   : > { %1363 = vmatpush.bf16.msrb.mxu1 %v2744_v42  ;;  %1634 = vmatpush.bf16.msrb.mxu0 %v2764_v53  ;;  %v2197_v40 = vor.u32 %v2657_v32, %v2194_v33  ;;  %v2205_v42 = vor.u32 %v2658_v36, %v2202_v37  ;;  %v2277_v32 = vor.u32 %v2677_v22, %v2274_v23 }
  0x3c   : > { %1304 = vmatmul.bf16.gmra.mxu1 %v2273_v45  ;;  %1324 = vmatmul.bf16.gmra.mxu2 %v2353_v46  ;;  %v2214_v45 = vld [vmem:[%s2925_s15 + $0x64] sm:$0xf0]  ;;  %v2220_v46 = vld [vmem:[%s2925_s15 + $0x58] sm:$0xf]  ;;  %v2281_v33 = vor.u32 %v2680_v25, %v2280_v24  ;;  %v2692_v25 = vld [vmem:[%s2925_s15 + $0x144] sm:$0xf] }
  0x3d   : > { %1453 = vmatpush.bf16.msrb.mxu2 %v2751_v43  ;;  %1344 = vmatmul.bf16.gmra.mxu3 %v2433_v47  ;;  %v2209_v43 = vor.u32 %v2661_v39, %v2208_v38  ;;  %v2665_v47 = vld [vmem:[%s2925_s15 + $0x68] sm:$0xf0] }
  0x3e   : > { %1542 = vmatpush.bf16.msrb.mxu3 %v2759_v44  ;;  %1284 = vmatmul.bf16.gmra.mxu0 %v2193_v48  ;;  %v2662_v44 = vld [vmem:[%s2925_s15 + $0x54] sm:$0xf]  ;;  %v2663_v48 = vld [vmem:[%s2925_s15 + $0x5c] sm:$0xf]  ;;  %v2221_v53 = vor.u32 %v2665_v47, %v2220_v46  ;;  %v2302_v47 = vld [vmem:[%s2925_s15 + $0x10c] sm:$0xf0] }
  0x3f   : > { %1364 = vmatpush.bf16.msrb.mxu1 %v2743_v49  ;;  %v2222_v49 = vld [vmem:[%s2925_s15 + $0x6c] sm:$0xf0]  ;;  %v2683_v46 = vld [vmem:[%s2925_s15 + $0xfc] sm:$0xf] }
  0x41   : > { %1454 = vmatpush.bf16.msrb.mxu2 %v2750_v50  ;;  %v2228_v50 = vld [vmem:[%s2925_s15 + $0x60] sm:$0xf] }
  0x42   : > { %1543 = vmatpush.bf16.msrb.mxu3 %v2758_v51  ;;  %v2666_v51 = vld [vmem:[%s2925_s15 + $0x70] sm:$0xf0] }
  0x43   : > { %1365 = vmatpush.bf16.msrb.mxu1 %v2742_v52  ;;  %v2217_v52 = vor.u32 %v2662_v44, %v2214_v45  ;;  %v2300_v44 = vld [vmem:[%s2925_s15 + $0xf8] sm:$0xf]  ;;  %v2685_v45 = vld [vmem:[%s2925_s15 + $0x108] sm:$0xf0] }
  0x45   : > { %1455 = vmatpush.bf16.msrb.mxu2 %v2749_v54  ;;  %v2225_v54 = vor.u32 %v2663_v48, %v2222_v49  ;;  %v2308_v48 = vld [vmem:[%s2925_s15 + $0x100] sm:$0xf]  ;;  %v2686_v49 = vld [vmem:[%s2925_s15 + $0x110] sm:$0xf0] }
  0x46   : > { %1544 = vmatpush.bf16.msrb.mxu3 %v2757_v55  ;;  %v2229_v55 = vor.u32 %v2666_v51, %v2228_v50 }
  0x47   : > { %1366 = vmatpush.bf16.msrb.mxu1 %v2741_v56  ;;  %v2667_v56 = vld [vmem:[%s2925_s15 + $0x7c] sm:$0xf] }
  0x49   : > { %1456 = vmatpush.bf16.msrb.mxu2 %v2748_v57  ;;  %v2234_v57 = vld [vmem:[%s2925_s15 + $0x8c] sm:$0xf0] }
  0x4a   : > { %1545 = vmatpush.bf16.msrb.mxu3 %v2756_v58  ;;  %v2240_v58 = vld [vmem:[%s2925_s15 + $0x80] sm:$0xf]  ;;  %v2237_v0 = vor.u32 %v2667_v56, %v2234_v57  ;;  %v2309_v56 = vor.u32 %v2686_v49, %v2308_v48 }
  0x4b   : > { %1367 = vmatpush.bf16.msrb.mxu1 %v2740_v3  ;;  %v2241_v1 = vor.u32 %v2670_v59, %v2240_v58  ;;  %v2249_v3 = vor.u32 %v2671_v63, %v2248_v62  ;;  %v2846_v59 = vmov 0.0   ;;  %v2687_v63 = vld [vmem:[%s2925_s15 + $0x11c] sm:$0xf] }
  0x4c   : > { %1309 = vmatmul.bf16.gmra.mxu1 %v2293_v4  ;;  %1329 = vmatmul.bf16.gmra.mxu2 %v2373_v5  ;;  %v2672_v4 = vld [vmem:[%s2925_s15 + $0xa4] sm:$0xf]  ;;  %v2254_v5 = vld [vmem:[%s2925_s15 + $0xb4] sm:$0xf0]  ;;  %374 = vst.msk [vmem:[#allocation2] sm:$0xff] %vm373_vm0, %v2846_v59 }
  0x4d   : > { %1349 = vmatmul.bf16.gmra.mxu3 %v2453_v6  ;;  %v2260_v6 = vld [vmem:[%s2925_s15 + $0xa8] sm:$0xf]  ;;  %v2257_v12 = vor.u32 %v2672_v4, %v2254_v5  ;;  %375 = vst.msk [vmem:[#allocation2 + $0x8] sm:$0xff] %vm373_vm0, %v2846_v59  ;;  %v2322_v4 = vld [vmem:[%s2925_s15 + $0x134] sm:$0xf0] }
  0x4e   : > { %1289 = vmatmul.bf16.gmra.mxu0 %v2213_v7  ;;  %v2675_v7 = vld [vmem:[%s2925_s15 + $0xb8] sm:$0xf0]  ;;  %376 = vst.msk [vmem:[#allocation2 + $0x10] sm:$0xff] %vm373_vm0, %v2846_v59  ;;  %v2328_v5 = vld [vmem:[%s2925_s15 + $0x128] sm:$0xf] }
  0x4f   : > { %v2261_v13 = vor.u32 %v2675_v7, %v2260_v6  ;;  %377 = vst.msk [vmem:[#allocation2 + $0x18] sm:$0xff] %vm373_vm0, %v2846_v59  ;;  %v2691_v6 = vld [vmem:[%s2925_s15 + $0x138] sm:$0xf0] }
  0x50   : > { %378 = vst.msk [vmem:[#allocation2 + $0x20] sm:$0xff] %vm373_vm0, %v2846_v59 }
  0x51   : > { %379 = vst.msk [vmem:[#allocation2 + $0x28] sm:$0xff] %vm373_vm0, %v2846_v59 }
  0x52   : > { %380 = vst.msk [vmem:[#allocation2 + $0x30] sm:$0xff] %vm373_vm0, %v2846_v59 }
  0x53   : > { %381 = vst.msk [vmem:[#allocation2 + $0x38] sm:$0xff] %vm373_vm0, %v2846_v59 }
  0x54   : > { %382 = vst.msk [vmem:[#allocation2 + $0x40] sm:$0xff] %vm373_vm0, %v2846_v59 }
  0x55   : > { %383 = vst.msk [vmem:[#allocation2 + $0x48] sm:$0xff] %vm373_vm0, %v2846_v59 }
  0x56   : > { %384 = vst.msk [vmem:[#allocation2 + $0x50] sm:$0xff] %vm373_vm0, %v2846_v59 }
  0x57   : > { %385 = vst.msk [vmem:[#allocation2 + $0x58] sm:$0xff] %vm373_vm0, %v2846_v59 }
  0x58   : > { %386 = vst.msk [vmem:[#allocation2 + $0x60] sm:$0xff] %vm373_vm0, %v2846_v59 }
  0x59   : > { %387 = vst.msk [vmem:[#allocation2 + $0x68] sm:$0xff] %vm373_vm0, %v2846_v59 }
  0x5a   : > { %388 = vst.msk [vmem:[#allocation2 + $0x70] sm:$0xff] %vm373_vm0, %v2846_v59 }
  0x5b   : > { %389 = vst.msk [vmem:[#allocation2 + $0x78] sm:$0xff] %vm373_vm0, %v2846_v59 }
  0x5c   : > { %1314 = vmatmul.bf16.gmra.mxu1 %v2313_v16  ;;  %1334 = vmatmul.bf16.gmra.mxu2 %v2393_v17  ;;  %v2269_v16 = vor.u32 %v2676_v11, %v2268_v10  ;;  %390 = vst.msk [vmem:[#allocation2 + $0x80] sm:$0xff] %vm373_vm0, %v2846_v59 }
  0x5d   : > { %1354 = vmatmul.bf16.gmra.mxu3 %v2473_v18  ;;  %391 = vst.msk [vmem:[#allocation2 + $0x88] sm:$0xff] %vm373_vm0, %v2846_v59 }
  0x5e   : > { %1294 = vmatmul.bf16.gmra.mxu0 %v2233_v19  ;;  %392 = vst.msk [vmem:[#allocation2 + $0x90] sm:$0xff] %vm373_vm0, %v2846_v59 }
  0x5f   : > { %393 = vst.msk [vmem:[#allocation2 + $0x98] sm:$0xff] %vm373_vm0, %v2846_v59 }
  0x60   : > { %394 = vst.msk [vmem:[#allocation2 + $0xa0] sm:$0xff] %vm373_vm0, %v2846_v59 }
  0x61   : > { %395 = vst.msk [vmem:[#allocation2 + $0xa8] sm:$0xff] %vm373_vm0, %v2846_v59 }
  0x62   : > { %396 = vst.msk [vmem:[#allocation2 + $0xb0] sm:$0xff] %vm373_vm0, %v2846_v59 }
  0x63   : > { %397 = vst.msk [vmem:[#allocation2 + $0xb8] sm:$0xff] %vm373_vm0, %v2846_v59 }
  0x64   : > { %398 = vst.msk [vmem:[#allocation2 + $0xc0] sm:$0xff] %vm373_vm0, %v2846_v59 }
  0x65   : > { %399 = vst.msk [vmem:[#allocation2 + $0xc8] sm:$0xff] %vm373_vm0, %v2846_v59 }
  0x66   : > { %400 = vst.msk [vmem:[#allocation2 + $0xd0] sm:$0xff] %vm373_vm0, %v2846_v59 }
  0x67   : > { %401 = vst.msk [vmem:[#allocation2 + $0xd8] sm:$0xff] %vm373_vm0, %v2846_v59 }
  0x68   : > { %402 = vst.msk [vmem:[#allocation2 + $0xe0] sm:$0xff] %vm373_vm0, %v2846_v59 }
  0x69   : > { %403 = vst.msk [vmem:[#allocation2 + $0xe8] sm:$0xff] %vm373_vm0, %v2846_v59 }
  0x6a   : > { %404 = vst.msk [vmem:[#allocation2 + $0xf0] sm:$0xff] %vm373_vm0, %v2846_v59 }
  0x6b   : > { %405 = vst.msk [vmem:[#allocation2 + $0xf8] sm:$0xff] %vm373_vm0, %v2846_v59 }
  0x6c   : > { %1368 = vmatmul.bf16.vlgmr.msrb.gmra.mxu1 %v2177_v28  ;;  %1457 = vmatmul.bf16.vlgmr.msrb.gmra.mxu2 %v2181_v29  ;;  %v2288_v28 = vld [vmem:[%s2925_s15 + $0xd8] sm:$0xf]  ;;  %v2681_v29 = vld [vmem:[%s2925_s15 + $0xe8] sm:$0xf0] }
  0x6d   : > { %1546 = vmatmul.bf16.vlgmr.msrb.gmra.mxu3 %v2185_v30  ;;  %v2289_v36 = vor.u32 %v2681_v29, %v2288_v28  ;;  %v2695_v28 = vld [vmem:[%s2925_s15 + $0x158] sm:$0xf0]  ;;  %v2693_v29 = vld [vmem:[%s2925_s15 + $0x14c] sm:$0xf] }
  0x6e   : > { %2634 = vmatmul.msk.bf16.vlgmr.msrb.gmra.mxu0 %vm373_vm0, %v2189_v31 }
  0x7c   : > { %1373 = vmatmul.bf16.gmra.mxu1 %v2197_v40  ;;  %1462 = vmatmul.bf16.gmra.mxu2 %v2201_v41 }
  0x7d   : > { %1551 = vmatmul.bf16.gmra.mxu3 %v2205_v42  ;;  %v2682_v42 = vld [vmem:[%s2925_s15 + $0xf4] sm:$0xf] }
  0x7e   : > { %2635 = vmatmul.msk.bf16.gmra.mxu0 %vm373_vm0, %v2209_v43  ;;  %v2294_v43 = vld [vmem:[%s2925_s15 + $0x104] sm:$0xf0] }
  0x8c   : > { %1378 = vmatmul.bf16.gmra.mxu1 %v2217_v52  ;;  %1467 = vmatmul.bf16.gmra.mxu2 %v2221_v53  ;;  %v2297_v52 = vor.u32 %v2682_v42, %v2294_v43  ;;  %v2301_v53 = vor.u32 %v2685_v45, %v2300_v44  ;;  %v2337_v43 = vor.u32 %v2692_v25, %v2334_v26 }
  0x8d   : > { %1556 = vmatmul.bf16.gmra.mxu3 %v2225_v54  ;;  %v2341_v44 = vor.u32 %v2695_v28, %v2340_v27 }
  0x8e   : > { %2636 = vmatmul.msk.bf16.gmra.mxu0 %vm373_vm0, %v2229_v55  ;;  %v2305_v55 = vor.u32 %v2683_v46, %v2302_v47 }
  0x9c   : > { %1383 = vmatmul.bf16.gmra.mxu1 %v2237_v0  ;;  %1472 = vmatmul.bf16.gmra.mxu2 %v2241_v1  ;;  %v2314_v0 = vld [vmem:[%s2925_s15 + $0x12c] sm:$0xf0]  ;;  %v2320_v1 = vld [vmem:[%s2925_s15 + $0x120] sm:$0xf] }
  0x9d   : > { %1561 = vmatmul.bf16.gmra.mxu3 %v2245_v2  ;;  %v2690_v2 = vld [vmem:[%s2925_s15 + $0x130] sm:$0xf0]  ;;  %v2317_v9 = vor.u32 %v2687_v63, %v2314_v0 }
  0x9e   : > { %2637 = vmatmul.msk.bf16.gmra.mxu0 %vm373_vm0, %v2249_v3  ;;  %v2688_v3 = vld [vmem:[%s2925_s15 + $0x124] sm:$0xf]  ;;  %v2321_v10 = vor.u32 %v2690_v2, %v2320_v1 }
  0x9f   : > { %v406_v1 = vld [vmem:[#allocation2] sm:$0xff] }
  0xa9   : > { %v3090_v14 = vpop.f32.mrf.mxu1 }
  0xab   : > { %v3092_v17 = vpop.f32.mrf.mxu0 }
  0xac   : > { %1388 = vmatmul.bf16.gmra.mxu1 %v2257_v12  ;;  %1477 = vmatmul.bf16.gmra.mxu2 %v2261_v13  ;;  %v2325_v12 = vor.u32 %v2688_v3, %v2322_v4  ;;  %v2329_v13 = vor.u32 %v2691_v6, %v2328_v5  ;;  %v2697_v3 = vld [vmem:[%s2925_s15 + $0x16c] sm:$0xf]  ;;  %v2354_v4 = vld [vmem:[%s2925_s15 + $0x17c] sm:$0xf0]  ;;  %v2360_v5 = vld [vmem:[%s2925_s15 + $0x170] sm:$0xf] }
  0xad   : > { %1566 = vmatmul.bf16.gmra.mxu3 %v2265_v15  ;;  %v2700_v6 = vld [vmem:[%s2925_s15 + $0x180] sm:$0xf0]  ;;  %v2357_v28 = vor.u32 %v2697_v3, %v2354_v4  ;;  %v408_v4 = vld [vmem:[#allocation2 + $0x10] sm:$0xff] }
  0xae   : > { %2638 = vmatmul.msk.bf16.gmra.mxu0 %vm373_vm0, %v2269_v16 }
  0xaf   : > { %v3095_v18 = vpop.f32.mrf.mxu2 }
  0xb0   : > { %v3097_v19 = vpop.f32.mrf.mxu3 }
  0xb1   : > { %v3099_v20 = vpop.f32.mrf.mxu1 }
  0xb3   : > { %v3101_v21 = vpop.f32.mrf.mxu0 }
  0xb7   : > { %v3111_v30 = vpop.f32.mrf.mxu2 }
  0xb8   : > { %v3113_v31 = vpop.f32.mrf.mxu3 }
  0xb9   : > { %v3115_v34 = vpop.f32.mrf.mxu1 }
  0xbb   : > { %v3117_v37 = vpop.f32.mrf.mxu0 }
  0xbc   : > { %1393 = vmatmul.bf16.gmra.mxu1 %v2277_v32  ;;  %1482 = vmatmul.bf16.gmra.mxu2 %v2281_v33  ;;  %v2342_v32 = vld [vmem:[%s2925_s15 + $0x15c] sm:$0xf0]  ;;  %v2348_v33 = vld [vmem:[%s2925_s15 + $0x150] sm:$0xf] }
  0xbd   : > { %1571 = vmatmul.bf16.gmra.mxu3 %v2285_v35  ;;  %v2696_v35 = vld [vmem:[%s2925_s15 + $0x160] sm:$0xf0]  ;;  %v2345_v46 = vor.u32 %v2693_v29, %v2342_v32  ;;  %v2361_v29 = vor.u32 %v2700_v6, %v2360_v5 }
  0xbe   : > { %2639 = vmatmul.msk.bf16.gmra.mxu0 %vm373_vm0, %v2289_v36  ;;  %v2349_v47 = vor.u32 %v2696_v35, %v2348_v33 }
  0xbf   : > { %v3120_v38 = vpop.f32.mrf.mxu2 }
  0xc0   : > { %v3122_v39 = vpop.f32.mrf.mxu3 }
  0xc1   : > { %v3124_v40 = vpop.f32.mrf.mxu1 }
  0xc3   : > { %v3126_v41 = vpop.f32.mrf.mxu0 }
  0xc7   : > { %v3136_v50 = vpop.f32.mrf.mxu2 }
  0xc8   : > { %v3138_v51 = vpop.f32.mrf.mxu3 }
  0xc9   : > { %v3140_v54 = vpop.f32.mrf.mxu1 }
  0xcb   : > { %v3142_v57 = vpop.f32.mrf.mxu0 }
  0xcc   : > { %1398 = vmatmul.bf16.gmra.mxu1 %v2297_v52  ;;  %1487 = vmatmul.bf16.gmra.mxu2 %v2301_v53 }
  0xcd   : > { %1576 = vmatmul.bf16.gmra.mxu3 %v2305_v55 }
  0xce   : > { %2640 = vmatmul.msk.bf16.gmra.mxu0 %vm373_vm0, %v2309_v56 }
  0xcf   : > { %v3145_v58 = vpop.f32.mrf.mxu2 }
  0xd0   : > { %v3149_v60 = vpop.f32.mrf.mxu3 }
  0xd1   : > { %v3153_v61 = vpop.f32.mrf.mxu1 }
  0xd3   : > { %v3157_v62 = vpop.f32.mrf.mxu0 }
  0xd7   : > { %v3177_v7 = vpop.f32.mrf.mxu2 }
  0xd8   : > { %v3181_v8 = vpop.f32.mrf.mxu3 }
  0xd9   : > { %v3185_v11 = vpop.f32.mrf.mxu1 }
  0xdb   : > { %v3189_v15 = vpop.f32.mrf.mxu0 }
  0xdc   : > { %1403 = vmatmul.bf16.gmra.mxu1 %v2317_v9  ;;  %1492 = vmatmul.bf16.gmra.mxu2 %v2321_v10  ;;  %v2698_v9 = vld [vmem:[%s2925_s15 + $0x174] sm:$0xf]  ;;  %v2362_v10 = vld [vmem:[%s2925_s15 + $0x184] sm:$0xf0] }
  0xdd   : > { %1581 = vmatmul.bf16.gmra.mxu3 %v2325_v12  ;;  %v2368_v12 = vld [vmem:[%s2925_s15 + $0x178] sm:$0xf]  ;;  %v2365_v33 = vor.u32 %v2698_v9, %v2362_v10  ;;  %v2702_v9 = vld [vmem:[%s2925_s15 + $0x194] sm:$0xf]  ;;  %v2705_v10 = vld [vmem:[%s2925_s15 + $0x1a8] sm:$0xf0] }
  0xde   : > { %2641 = vmatmul.msk.bf16.gmra.mxu0 %vm373_vm0, %v2329_v13  ;;  %v2701_v13 = vld [vmem:[%s2925_s15 + $0x188] sm:$0xf0] }
  0xdf   : > { %v3202_v16 = vpop.f32.mrf.mxu2  ;;  %v2369_v35 = vor.u32 %v2701_v13, %v2368_v12  ;;  %v2703_v12 = vld [vmem:[%s2925_s15 + $0x19c] sm:$0xf]  ;;  %v2382_v13 = vld [vmem:[%s2925_s15 + $0x1ac] sm:$0xf0] }
  0xe0   : > { %v3206_v22 = vpop.f32.mrf.mxu3 }
  0xe1   : > { %v3210_v23 = vpop.f32.mrf.mxu1 }
  0xe3   : > { %v3214_v24 = vpop.f32.mrf.mxu0 }
  0xe7   : > { %v3234_v36 = vpop.f32.mrf.mxu2 }
  0xe8   : > { %v3238_v42 = vpop.f32.mrf.mxu3 }
  0xe9   : > { %v1369_v45 = vpop.f32.mrf.mxu1 }
  0xea   : > { %v1370_v49 = vadd.f32 %v1369_v45, %v3092_v17  ;;  %v407_v45 = vld [vmem:[#allocation2 + $0x8] sm:$0xff] }
  0xeb   : > { %v1636_v48 = vpop.f32.mrf.mxu0 }
  0xec   : > { %1408 = vmatmul.bf16.gmra.mxu1 %v2337_v43  ;;  %1497 = vmatmul.bf16.gmra.mxu2 %v2341_v44 }
  0xed   : > { %1586 = vmatmul.bf16.gmra.mxu3 %v2345_v46 }
  0xee   : > { %2642 = vmatmul.msk.bf16.gmra.mxu0 %vm373_vm0, %v2349_v47  ;;  %v3283_v47 = vld [vmem:[%s3589_s3] ss:$0 sm:$0xff] }
  0xef   : > { %v1458_v52 = vpop.f32.mrf.mxu2 }
  0xf0   : > { %v1459_v53 = vadd.f32 %v1458_v52, %v1370_v49  ;;  %v1547_v55 = vpop.f32.mrf.mxu3 }
  0xf1   : > { %v1371_v56 = vpop.f32.mrf.mxu1 }
  0xf2   : > { %v1548_v63 = vadd.f32 %v1547_v55, %v1459_v53  ;;  %v1372_v59 = vadd.f32 %v1371_v56, %v3101_v21  ;;  %v3270_v21 = vld [vmem:[%s3588_s2] ss:$0 sm:$0xff] }
  0xf3   : > { %v1638_v0 = vpop.f32.mrf.mxu0 }
  0xf4   : > { %v1637_v2 = vadd.f32 %v1636_v48, %v1548_v63 }
  0xf6   : > { %v1716_v17 = vadd.f32 %v1637_v2, %v406_v1 }
  0xf7   : > { %v1460_v25 = vpop.f32.mrf.mxu2 }
  0xf8   : > { %1748 = vst.msk [vmem:[#allocation2] sm:$0xff] %vm373_vm0, %v1716_v17  ;;  %v1461_v26 = vadd.f32 %v1460_v25, %v1372_v59  ;;  %v1549_v27 = vpop.f32.mrf.mxu3  ;;  %v2374_v17 = vld [vmem:[%s2925_s15 + $0x1a4] sm:$0xf0]  ;;  %v2380_v59 = vld [vmem:[%s2925_s15 + $0x198] sm:$0xf] }
  0xf9   : > { %v1374_v32 = vpop.f32.mrf.mxu1 }
  0xfa   : > { %v1550_v43 = vadd.f32 %v1549_v27, %v1461_v26  ;;  %v1375_v49 = vadd.f32 %v1374_v32, %v3117_v37 }
  0xfb   : > { %v1641_v44 = vpop.f32.mrf.mxu0 }
  0xfc   : > { %v1639_v46 = vadd.f32 %v1638_v0, %v1550_v43  ;;  %1413 = vmatmul.bf16.gmra.mxu1 %v2357_v28  ;;  %1502 = vmatmul.bf16.gmra.mxu2 %v2361_v29  ;;  %v1887_v0 = vld [vmem:[%s3278_s22] sm:$0xff]  ;;  %v2706_v29 = vld [vmem:[%s2925_s15 + $0x1b0] sm:$0xf0] }
  0xfd   : > { %1591 = vmatmul.bf16.gmra.mxu3 %v2365_v33  ;;  %v2388_v28 = vld [vmem:[%s2925_s15 + $0x1a0] sm:$0xf] }
  0xfe   : > { %2643 = vmatmul.msk.bf16.gmra.mxu0 %vm373_vm0, %v2369_v35  ;;  %v1717_v48 = vadd.f32 %v1639_v46, %v407_v45  ;;  %v2377_v45 = vor.u32 %v2702_v9, %v2374_v17  ;;  %v2381_v46 = vor.u32 %v2705_v10, %v2380_v59  ;;  %v1889_v10 = vld [vmem:[%s3278_s22 + $0x10] sm:$0xff] }
  0xff   : > { %v1783_v52 = vld [vmem:[#allocation2] sm:$0xff]  ;;  %v1463_v53 = vpop.f32.mrf.mxu2 }
 0x100   : > { %v1819_v55 = vmul.f32 %v3270_v21, %v1783_v52  ;;  %1749 = vst.msk [vmem:[#allocation2 + $0x8] sm:$0xff] %vm373_vm0, %v1717_v48  ;;  %v1464_v56 = vadd.f32 %v1463_v53, %v1375_v49  ;;  %v1552_v63 = vpop.f32.mrf.mxu3  ;;  %v1888_v48 = vld [vmem:[%s3278_s22 + $0x8] sm:$0xff]  ;;  %v2385_v52 = vor.u32 %v2703_v12, %v2382_v13  ;;  %v2389_v53 = vor.u32 %v2706_v29, %v2388_v28  ;;  %v2394_v28 = vld [vmem:[%s2925_s15 + $0x1cc] sm:$0xf0] }
 0x101   : > { %v1376_v1 = vpop.f32.mrf.mxu1 }
 0x102   : > { %v1855_v2 = vadd.f32 %v3283_v47, %v1819_v55  ;;  %v1553_v37 = vadd.f32 %v1552_v63, %v1464_v56  ;;  %v1377_v27 = vadd.f32 %v1376_v1, %v3126_v41  ;;  %v409_v63 = vld [vmem:[#allocation2 + $0x18] sm:$0xff] }
 0x103   : > { %v1643_v3 = vpop.f32.mrf.mxu0 }
 0x104   : > { %v1919_v5 = vadd.f32 %v1887_v0, %v1855_v2  ;;  %v1642_v6 = vadd.f32 %v1641_v44, %v1553_v37 }
 0x106   : > { %v1951_v25 = vmax.f32 %v1919_v5, 0.0  ;;  %v1718_v26 = vadd.f32 %v1642_v6, %v408_v4 }
 0x107   : > { %v1784_v32 = vld [vmem:[#allocation2 + $0x8] sm:$0xff]  ;;  %v1465_v33 = vpop.f32.mrf.mxu2 }
 0x108   : > { %1983 = vst.msk [vmem:[%s3298_s27] sm:$0xff] %vm373_vm0, %v1951_v25  ;;  %v1820_v35 = vmul.f32 %v3270_v21, %v1784_v32  ;;  %v1466_v43 = vadd.f32 %v1465_v33, %v1377_v27  ;;  %v1554_v44 = vpop.f32.mrf.mxu3  ;;  %v410_v25 = vld [vmem:[#allocation2 + $0x20] sm:$0xff]  ;;  %v2707_v27 = vld [vmem:[%s2925_s15 + $0x1bc] sm:$0xf]  ;;  %v2710_v33 = vld [vmem:[%s2925_s15 + $0x1d0] sm:$0xf0] }
 0x109   : > { %1750 = vst.msk [vmem:[#allocation2 + $0x10] sm:$0xff] %vm373_vm0, %v1718_v26  ;;  %v1379_v49 = vpop.f32.mrf.mxu1  ;;  %v2400_v32 = vld [vmem:[%s2925_s15 + $0x1c0] sm:$0xf] }
 0x10a   : > { %v1856_v41 = vadd.f32 %v3283_v47, %v1820_v35  ;;  %v1555_v55 = vadd.f32 %v1554_v44, %v1466_v43  ;;  %v1380_v4 = vadd.f32 %v1379_v49, %v3142_v57  ;;  %v2708_v35 = vld [vmem:[%s2925_s15 + $0x1c4] sm:$0xf] }
 0x10b   : > { %v1646_v56 = vpop.f32.mrf.mxu0 }
 0x10c   : > { %v1920_v0 = vadd.f32 %v1888_v48, %v1856_v41  ;;  %v1644_v1 = vadd.f32 %v1643_v3, %v1555_v55  ;;  %1418 = vmatmul.bf16.gmra.mxu1 %v2377_v45  ;;  %1507 = vmatmul.bf16.gmra.mxu2 %v2381_v46  ;;  %v2402_v45 = vld [vmem:[%s2925_s15 + $0x1d4] sm:$0xf0]  ;;  %v2408_v46 = vld [vmem:[%s2925_s15 + $0x1c8] sm:$0xf]  ;;  %v2711_v48 = vld [vmem:[%s2925_s15 + $0x1d8] sm:$0xf0] }
 0x10d   : > { %1596 = vmatmul.bf16.gmra.mxu3 %v2385_v52 }
 0x10e   : > { %2644 = vmatmul.msk.bf16.gmra.mxu0 %vm373_vm0, %v2389_v53  ;;  %v1952_v2 = vmax.f32 %v1920_v0, 0.0  ;;  %v1719_v37 = vadd.f32 %v1644_v1, %v409_v63  ;;  %v2401_v63 = vor.u32 %v2710_v33, %v2400_v32 }
 0x10f   : > { %v1468_v5 = vpop.f32.mrf.mxu2 }
 0x110   : > { %1984 = vst.msk [vmem:[%s3298_s27 + $0x8] sm:$0xff] %vm373_vm0, %v1952_v2  ;;  %v1785_v6 = vld [vmem:[#allocation2 + $0x10] sm:$0xff]  ;;  %v1469_v9 = vadd.f32 %v1468_v5, %v1380_v4  ;;  %v1557_v3 = vpop.f32.mrf.mxu3  ;;  %v2405_v2 = vor.u32 %v2708_v35, %v2402_v45  ;;  %v2712_v45 = vld [vmem:[%s2925_s15 + $0x1e4] sm:$0xf] }
 0x111   : > { %v1821_v17 = vmul.f32 %v3270_v21, %v1785_v6  ;;  %1751 = vst.msk [vmem:[#allocation2 + $0x18] sm:$0xff] %vm373_vm0, %v1719_v37  ;;  %v1381_v59 = vpop.f32.mrf.mxu1  ;;  %v1890_v37 = vld [vmem:[%s3278_s22 + $0x18] sm:$0xff]  ;;  %v412_v35 = vld [vmem:[#allocation2 + $0x30] sm:$0xff] }
 0x112   : > { %v1558_v57 = vadd.f32 %v1557_v3, %v1469_v9  ;;  %v1382_v44 = vadd.f32 %v1381_v59, %v3157_v62  ;;  %v2409_v62 = vor.u32 %v2711_v48, %v2408_v46  ;;  %v411_v9 = vld [vmem:[#allocation2 + $0x28] sm:$0xff]  ;;  %v2414_v46 = vld [vmem:[%s2925_s15 + $0x1f4] sm:$0xf0] }
 0x113   : > { %v1648_v12 = vpop.f32.mrf.mxu0  ;;  %v1857_v13 = vadd.f32 %v3283_v47, %v1821_v17  ;;  %v2420_v48 = vld [vmem:[%s2925_s15 + $0x1e8] sm:$0xf] }
 0x114   : > { %v1647_v26 = vadd.f32 %v1646_v56, %v1558_v57  ;;  %v2397_v56 = vor.u32 %v2707_v27, %v2394_v28  ;;  %v1891_v28 = vld [vmem:[%s3278_s22 + $0x20] sm:$0xff] }
 0x115   : > { %v1921_v29 = vadd.f32 %v1889_v10, %v1857_v13 }
 0x116   : > { %v1720_v43 = vadd.f32 %v1647_v26, %v410_v25 }
 0x117   : > { %v1953_v49 = vmax.f32 %v1921_v29, 0.0  ;;  %v1470_v52 = vpop.f32.mrf.mxu2 }
 0x118   : > { %v1786_v53 = vld [vmem:[#allocation2 + $0x18] sm:$0xff]  ;;  %1752 = vst.msk [vmem:[#allocation2 + $0x20] sm:$0xff] %vm373_vm0, %v1720_v43  ;;  %v1471_v41 = vadd.f32 %v1470_v52, %v1382_v44  ;;  %v1559_v55 = vpop.f32.mrf.mxu3  ;;  %v2713_v52 = vld [vmem:[%s2925_s15 + $0x1ec] sm:$0xf] }
 0x119   : > { %1985 = vst.msk [vmem:[%s3298_s27 + $0x10] sm:$0xff] %vm373_vm0, %v1953_v49  ;;  %v1822_v0 = vmul.f32 %v3270_v21, %v1786_v53  ;;  %v1384_v1 = vpop.f32.mrf.mxu1  ;;  %v2715_v49 = vld [vmem:[%s2925_s15 + $0x1f8] sm:$0xf0]  ;;  %v2422_v53 = vld [vmem:[%s2925_s15 + $0x1fc] sm:$0xf0] }
 0x11a   : > { %v1560_v4 = vadd.f32 %v1559_v55, %v1471_v41  ;;  %v1385_v10 = vadd.f32 %v1384_v1, %v3189_v15 }
 0x11b   : > { %v1651_v5 = vpop.f32.mrf.mxu0  ;;  %v1858_v6 = vadd.f32 %v3283_v47, %v1822_v0  ;;  %v2716_v0 = vld [vmem:[%s2925_s15 + $0x200] sm:$0xf0] }
 0x11c   : > { %v1649_v3 = vadd.f32 %v1648_v12, %v1560_v4  ;;  %1423 = vmatmul.bf16.gmra.mxu1 %v2397_v56  ;;  %1512 = vmatmul.bf16.gmra.mxu2 %v2401_v63  ;;  %v2428_v63 = vld [vmem:[%s2925_s15 + $0x1f0] sm:$0xf] }
 0x11d   : > { %v1922_v17 = vadd.f32 %v1890_v37, %v1858_v6  ;;  %1601 = vmatmul.bf16.gmra.mxu3 %v2405_v2  ;;  %v2421_v6 = vor.u32 %v2715_v49, %v2420_v48  ;;  %v414_v48 = vld [vmem:[#allocation2 + $0x40] sm:$0xff] }
 0x11e   : > { %2645 = vmatmul.msk.bf16.gmra.mxu0 %vm373_vm0, %v2409_v62  ;;  %v1721_v59 = vadd.f32 %v1649_v3, %v411_v9  ;;  %v1892_v9 = vld [vmem:[%s3278_s22 + $0x28] sm:$0xff] }
 0x11f   : > { %v1954_v57 = vmax.f32 %v1922_v17, 0.0  ;;  %v1787_v13 = vld [vmem:[#allocation2 + $0x20] sm:$0xff]  ;;  %v1473_v25 = vpop.f32.mrf.mxu2  ;;  %v2425_v17 = vor.u32 %v2713_v52, %v2422_v53  ;;  %v2717_v52 = vld [vmem:[%s2925_s15 + $0x20c] sm:$0xf] }
 0x120   : > { %v1823_v26 = vmul.f32 %v3270_v21, %v1787_v13  ;;  %1753 = vst.msk [vmem:[#allocation2 + $0x28] sm:$0xff] %vm373_vm0, %v1721_v59  ;;  %v1474_v12 = vadd.f32 %v1473_v25, %v1385_v10  ;;  %v1562_v27 = vpop.f32.mrf.mxu3  ;;  %v2429_v59 = vor.u32 %v2716_v0, %v2428_v63  ;;  %v413_v13 = vld [vmem:[#allocation2 + $0x38] sm:$0xff]  ;;  %v2434_v53 = vld [vmem:[%s2925_s15 + $0x21c] sm:$0xf0]  ;;  %v2718_v63 = vld [vmem:[%s2925_s15 + $0x214] sm:$0xf] }
 0x121   : > { %1986 = vst.msk [vmem:[%s3298_s27 + $0x18] sm:$0xff] %vm373_vm0, %v1954_v57  ;;  %v1386_v29 = vpop.f32.mrf.mxu1 }
 0x122   : > { %v1859_v15 = vadd.f32 %v3283_v47, %v1823_v26  ;;  %v1563_v32 = vadd.f32 %v1562_v27, %v1474_v12  ;;  %v1387_v56 = vadd.f32 %v1386_v29, %v3214_v24 }
 0x123   : > { %v1653_v33 = vpop.f32.mrf.mxu0 }
 0x124   : > { %v1923_v43 = vadd.f32 %v1891_v28, %v1859_v15  ;;  %v1652_v44 = vadd.f32 %v1651_v5, %v1563_v32  ;;  %v2417_v5 = vor.u32 %v2712_v45, %v2414_v46 }
 0x126   : > { %v1955_v41 = vmax.f32 %v1923_v43, 0.0  ;;  %v1722_v55 = vadd.f32 %v1652_v44, %v412_v35  ;;  %v1893_v44 = vld [vmem:[%s3278_s22 + $0x30] sm:$0xff] }
 0x127   : > { %v1788_v1 = vld [vmem:[#allocation2 + $0x28] sm:$0xff]  ;;  %v1475_v2 = vpop.f32.mrf.mxu2 }
 0x128   : > { %1987 = vst.msk [vmem:[%s3298_s27 + $0x20] sm:$0xff] %vm373_vm0, %v1955_v41  ;;  %v1824_v62 = vmul.f32 %v3270_v21, %v1788_v1  ;;  %v1476_v37 = vadd.f32 %v1475_v2, %v1387_v56  ;;  %v1564_v4 = vpop.f32.mrf.mxu3  ;;  %v2720_v56 = vld [vmem:[%s2925_s15 + $0x220] sm:$0xf0]  ;;  %v2442_v2 = vld [vmem:[%s2925_s15 + $0x224] sm:$0xf0] }
 0x129   : > { %1754 = vst.msk [vmem:[#allocation2 + $0x30] sm:$0xff] %vm373_vm0, %v1722_v55  ;;  %v1389_v3 = vpop.f32.mrf.mxu1  ;;  %v2440_v55 = vld [vmem:[%s2925_s15 + $0x210] sm:$0xf] }
 0x12a   : > { %v1860_v24 = vadd.f32 %v3283_v47, %v1824_v62  ;;  %v1565_v10 = vadd.f32 %v1564_v4, %v1476_v37  ;;  %v1390_v28 = vadd.f32 %v1389_v3, %v3090_v14  ;;  %v2448_v62 = vld [vmem:[%s2925_s15 + $0x218] sm:$0xf]  ;;  %v2721_v37 = vld [vmem:[%s2925_s15 + $0x228] sm:$0xf0] }
 0x12b   : > { %v1656_v57 = vpop.f32.mrf.mxu0 }
 0x12c   : > { %v1924_v25 = vadd.f32 %v1892_v9, %v1860_v24  ;;  %v1654_v26 = vadd.f32 %v1653_v33, %v1565_v10  ;;  %1428 = vmatmul.bf16.gmra.mxu1 %v2417_v5  ;;  %1517 = vmatmul.bf16.gmra.mxu2 %v2421_v6 }
 0x12d   : > { %1606 = vmatmul.bf16.gmra.mxu3 %v2425_v17  ;;  %v2437_v17 = vor.u32 %v2717_v52, %v2434_v53  ;;  %v416_v53 = vld [vmem:[#allocation2 + $0x50] sm:$0xff] }
 0x12e   : > { %2646 = vmatmul.msk.bf16.gmra.mxu0 %vm373_vm0, %v2429_v59  ;;  %v1956_v12 = vmax.f32 %v1924_v25, 0.0  ;;  %v1723_v27 = vadd.f32 %v1654_v26, %v413_v13  ;;  %v2441_v59 = vor.u32 %v2720_v56, %v2440_v55  ;;  %v1894_v13 = vld [vmem:[%s3278_s22 + $0x38] sm:$0xff]  ;;  %v2722_v56 = vld [vmem:[%s2925_s15 + $0x234] sm:$0xf] }
 0x12f   : > { %v1478_v29 = vpop.f32.mrf.mxu2 }
 0x130   : > { %1988 = vst.msk [vmem:[%s3298_s27 + $0x28] sm:$0xff] %vm373_vm0, %v1956_v12  ;;  %v1789_v15 = vld [vmem:[#allocation2 + $0x30] sm:$0xff]  ;;  %v1479_v32 = vadd.f32 %v1478_v29, %v1390_v28  ;;  %v1567_v33 = vpop.f32.mrf.mxu3 }
 0x131   : > { %v1825_v35 = vmul.f32 %v3270_v21, %v1789_v15  ;;  %1755 = vst.msk [vmem:[#allocation2 + $0x38] sm:$0xff] %vm373_vm0, %v1723_v27  ;;  %v1391_v43 = vpop.f32.mrf.mxu1  ;;  %v415_v27 = vld [vmem:[#allocation2 + $0x48] sm:$0xff] }
 0x132   : > { %v1568_v14 = vadd.f32 %v1567_v33, %v1479_v32  ;;  %v1392_v1 = vadd.f32 %v1391_v43, %v3099_v20  ;;  %v2449_v20 = vor.u32 %v2721_v37, %v2448_v62  ;;  %v2462_v62 = vld [vmem:[%s2925_s15 + $0x24c] sm:$0xf0] }
 0x133   : > { %v1658_v45 = vpop.f32.mrf.mxu0  ;;  %v1861_v46 = vadd.f32 %v3283_v47, %v1825_v35 }
 0x134   : > { %v1657_v49 = vadd.f32 %v1656_v57, %v1568_v14  ;;  %v2445_v57 = vor.u32 %v2718_v63, %v2442_v2  ;;  %v2454_v63 = vld [vmem:[%s2925_s15 + $0x244] sm:$0xf0]  ;;  %v2723_v2 = vld [vmem:[%s2925_s15 + $0x23c] sm:$0xf] }
 0x135   : > { %v1925_v41 = vadd.f32 %v1893_v44, %v1861_v46  ;;  %v1895_v46 = vld [vmem:[%s3278_s22 + $0x40] sm:$0xff] }
 0x136   : > { %v1724_v0 = vadd.f32 %v1657_v49, %v414_v48 }
 0x137   : > { %v1957_v4 = vmax.f32 %v1925_v41, 0.0  ;;  %v1480_v5 = vpop.f32.mrf.mxu2 }
 0x138   : > { %v1790_v6 = vld [vmem:[#allocation2 + $0x38] sm:$0xff]  ;;  %1756 = vst.msk [vmem:[#allocation2 + $0x40] sm:$0xff] %vm373_vm0, %v1724_v0  ;;  %v1481_v9 = vadd.f32 %v1480_v5, %v1392_v1  ;;  %v1569_v3 = vpop.f32.mrf.mxu3  ;;  %v2725_v1 = vld [vmem:[%s2925_s15 + $0x248] sm:$0xf0] }
 0x139   : > { %1989 = vst.msk [vmem:[%s3298_s27 + $0x30] sm:$0xff] %vm373_vm0, %v1957_v4  ;;  %v1826_v24 = vmul.f32 %v3270_v21, %v1790_v6  ;;  %v1394_v10 = vpop.f32.mrf.mxu1  ;;  %v2460_v0 = vld [vmem:[%s2925_s15 + $0x238] sm:$0xf]  ;;  %v2468_v6 = vld [vmem:[%s2925_s15 + $0x240] sm:$0xf] }
 0x13a   : > { %v1570_v25 = vadd.f32 %v1569_v3, %v1481_v9  ;;  %v1395_v32 = vadd.f32 %v1394_v10, %v3115_v34  ;;  %v2726_v9 = vld [vmem:[%s2925_s15 + $0x250] sm:$0xf0] }
 0x13b   : > { %v1661_v26 = vpop.f32.mrf.mxu0  ;;  %v1862_v12 = vadd.f32 %v3283_v47, %v1826_v24 }
 0x13c   : > { %v1659_v28 = vadd.f32 %v1658_v45, %v1570_v25  ;;  %1433 = vmatmul.bf16.gmra.mxu1 %v2437_v17  ;;  %1522 = vmatmul.bf16.gmra.mxu2 %v2441_v59 }
 0x13d   : > { %v1926_v29 = vadd.f32 %v1894_v13, %v1862_v12  ;;  %1611 = vmatmul.bf16.gmra.mxu3 %v2445_v57  ;;  %v2457_v57 = vor.u32 %v2722_v56, %v2454_v63  ;;  %v1896_v13 = vld [vmem:[%s3278_s22 + $0x48] sm:$0xff]  ;;  %v2469_v12 = vor.u32 %v2726_v9, %v2468_v6  ;;  %v2727_v56 = vld [vmem:[%s2925_s15 + $0x25c] sm:$0xf]  ;;  %v2474_v63 = vld [vmem:[%s2925_s15 + $0x26c] sm:$0xf0] }
 0x13e   : > { %2647 = vmatmul.msk.bf16.gmra.mxu0 %vm373_vm0, %v2449_v20  ;;  %v1725_v15 = vadd.f32 %v1659_v28, %v415_v27  ;;  %v2461_v20 = vor.u32 %v2725_v1, %v2460_v0  ;;  %v2480_v1 = vld [vmem:[%s2925_s15 + $0x260] sm:$0xf]  ;;  %v2488_v6 = vld [vmem:[%s2925_s15 + $0x268] sm:$0xf]  ;;  %v2731_v9 = vld [vmem:[%s2925_s15 + $0x278] sm:$0xf0] }
 0x13f   : > { %v1958_v33 = vmax.f32 %v1926_v29, 0.0  ;;  %v1791_v35 = vld [vmem:[#allocation2 + $0x40] sm:$0xff]  ;;  %v1483_v43 = vpop.f32.mrf.mxu2  ;;  %v417_v29 = vld [vmem:[#allocation2 + $0x58] sm:$0xff] }
 0x140   : > { %v1827_v44 = vmul.f32 %v3270_v21, %v1791_v35  ;;  %1757 = vst.msk [vmem:[#allocation2 + $0x48] sm:$0xff] %vm373_vm0, %v1725_v15  ;;  %v1484_v14 = vadd.f32 %v1483_v43, %v1395_v32  ;;  %v1572_v45 = vpop.f32.mrf.mxu3 }
 0x141   : > { %1990 = vst.msk [vmem:[%s3298_s27 + $0x38] sm:$0xff] %vm373_vm0, %v1958_v33  ;;  %v1396_v48 = vpop.f32.mrf.mxu1 }
 0x142   : > { %v1863_v34 = vadd.f32 %v3283_v47, %v1827_v44  ;;  %v1573_v49 = vadd.f32 %v1572_v45, %v1484_v14  ;;  %v1397_v5 = vadd.f32 %v1396_v48, %v3124_v40 }
 0x143   : > { %v1663_v52 = vpop.f32.mrf.mxu0 }
 0x144   : > { %v1927_v41 = vadd.f32 %v1895_v46, %v1863_v34  ;;  %v1662_v55 = vadd.f32 %v1661_v26, %v1573_v49  ;;  %v2465_v26 = vor.u32 %v2723_v2, %v2462_v62  ;;  %v1897_v49 = vld [vmem:[%s3278_s22 + $0x50] sm:$0xff]  ;;  %v2728_v62 = vld [vmem:[%s2925_s15 + $0x264] sm:$0xf] }
 0x145   : > { %v2730_v2 = vld [vmem:[%s2925_s15 + $0x270] sm:$0xf0] }
 0x146   : > { %v1959_v37 = vmax.f32 %v1927_v41, 0.0  ;;  %v1726_v4 = vadd.f32 %v1662_v55, %v416_v53  ;;  %v418_v41 = vld [vmem:[#allocation2 + $0x60] sm:$0xff] }
 0x147   : > { %v1792_v3 = vld [vmem:[#allocation2 + $0x48] sm:$0xff]  ;;  %v1485_v17 = vpop.f32.mrf.mxu2 }
 0x148   : > { %1991 = vst.msk [vmem:[%s3298_s27 + $0x40] sm:$0xff] %vm373_vm0, %v1959_v37  ;;  %v1828_v59 = vmul.f32 %v3270_v21, %v1792_v3  ;;  %v1486_v24 = vadd.f32 %v1485_v17, %v1397_v5  ;;  %v1574_v10 = vpop.f32.mrf.mxu3  ;;  %v2482_v5 = vld [vmem:[%s2925_s15 + $0x274] sm:$0xf0] }
 0x149   : > { %1758 = vst.msk [vmem:[#allocation2 + $0x50] sm:$0xff] %vm373_vm0, %v1726_v4  ;;  %v1399_v25 = vpop.f32.mrf.mxu1 }
 0x14a   : > { %v1864_v40 = vadd.f32 %v3283_v47, %v1828_v59  ;;  %v1575_v27 = vadd.f32 %v1574_v10, %v1486_v24  ;;  %v1400_v43 = vadd.f32 %v1399_v25, %v3140_v54 }
 0x14b   : > { %v1666_v28 = vpop.f32.mrf.mxu0 }
 0x14c   : > { %v1928_v15 = vadd.f32 %v1896_v13, %v1864_v40  ;;  %v1664_v32 = vadd.f32 %v1663_v52, %v1575_v27  ;;  %1438 = vmatmul.bf16.gmra.mxu1 %v2457_v57  ;;  %1527 = vmatmul.bf16.gmra.mxu2 %v2461_v20  ;;  %v2477_v57 = vor.u32 %v2727_v56, %v2474_v63 }
 0x14d   : > { %1616 = vmatmul.bf16.gmra.mxu3 %v2465_v26  ;;  %v2481_v20 = vor.u32 %v2730_v2, %v2480_v1  ;;  %v2485_v26 = vor.u32 %v2728_v62, %v2482_v5  ;;  %v1900_v5 = vld [vmem:[%s3278_s22 + $0x68] sm:$0xff] }
 0x14e   : > { %2648 = vmatmul.msk.bf16.gmra.mxu0 %vm373_vm0, %v2469_v12  ;;  %v1960_v33 = vmax.f32 %v1928_v15, 0.0  ;;  %v1727_v35 = vadd.f32 %v1664_v32, %v417_v29  ;;  %v1898_v12 = vld [vmem:[%s3278_s22 + $0x58] sm:$0xff]  ;;  %v419_v29 = vld [vmem:[#allocation2 + $0x68] sm:$0xff] }
 0x14f   : > { %v1488_v44 = vpop.f32.mrf.mxu2 }
 0x150   : > { %1992 = vst.msk [vmem:[%s3298_s27 + $0x48] sm:$0xff] %vm373_vm0, %v1960_v33  ;;  %v1793_v14 = vld [vmem:[#allocation2 + $0x50] sm:$0xff]  ;;  %v1489_v45 = vadd.f32 %v1488_v44, %v1400_v43  ;;  %v1577_v46 = vpop.f32.mrf.mxu3 }
 0x151   : > { %v1829_v48 = vmul.f32 %v3270_v21, %v1793_v14  ;;  %1759 = vst.msk [vmem:[#allocation2 + $0x58] sm:$0xff] %vm373_vm0, %v1727_v35  ;;  %v1401_v34 = vpop.f32.mrf.mxu1 }
 0x152   : > { %v1578_v54 = vadd.f32 %v1577_v46, %v1489_v45  ;;  %v1402_v4 = vadd.f32 %v1401_v34, %v3153_v61  ;;  %v2489_v61 = vor.u32 %v2731_v9, %v2488_v6  ;;  %v1899_v34 = vld [vmem:[%s3278_s22 + $0x60] sm:$0xff] }
 0x153   : > { %v1668_v52 = vpop.f32.mrf.mxu0  ;;  %v1865_v53 = vadd.f32 %v3283_v47, %v1829_v48 }
 0x154   : > { %v1667_v55 = vadd.f32 %v1666_v28, %v1578_v54 }
 0x155   : > { %v1929_v0 = vadd.f32 %v1897_v49, %v1865_v53 }
 0x156   : > { %v1728_v37 = vadd.f32 %v1667_v55, %v418_v41 }
 0x157   : > { %v1961_v3 = vmax.f32 %v1929_v0, 0.0  ;;  %v1490_v17 = vpop.f32.mrf.mxu2 }
 0x158   : > { %v1794_v59 = vld [vmem:[#allocation2 + $0x58] sm:$0xff]  ;;  %1760 = vst.msk [vmem:[#allocation2 + $0x60] sm:$0xff] %vm373_vm0, %v1728_v37  ;;  %v1491_v24 = vadd.f32 %v1490_v17, %v1402_v4  ;;  %v1579_v10 = vpop.f32.mrf.mxu3 }
 0x159   : > { %1993 = vst.msk [vmem:[%s3298_s27 + $0x50] sm:$0xff] %vm373_vm0, %v1961_v3  ;;  %v1830_v13 = vmul.f32 %v3270_v21, %v1794_v59  ;;  %v1404_v25 = vpop.f32.mrf.mxu1  ;;  %v421_v59 = vld [vmem:[#allocation2 + $0x78] sm:$0xff] }
 0x15a   : > { %v1580_v40 = vadd.f32 %v1579_v10, %v1491_v24  ;;  %v1405_v35 = vadd.f32 %v1404_v25, %v3185_v11  ;;  %v420_v11 = vld [vmem:[#allocation2 + $0x70] sm:$0xff] }
 0x15b   : > { %v1671_v27 = vpop.f32.mrf.mxu0  ;;  %v1866_v28 = vadd.f32 %v3283_v47, %v1830_v13 }
 0x15c   : > { %v1669_v15 = vadd.f32 %v1668_v52, %v1580_v40  ;;  %1443 = vmatmul.bf16.gmra.mxu1 %v2477_v57  ;;  %1532 = vmatmul.bf16.gmra.mxu2 %v2481_v20 }
 0x15d   : > { %v1930_v32 = vadd.f32 %v1898_v12, %v1866_v28  ;;  %1621 = vmatmul.bf16.gmra.mxu3 %v2485_v26 }
 0x15e   : > { %2649 = vmatmul.msk.bf16.gmra.mxu0 %vm373_vm0, %v2489_v61  ;;  %v1729_v33 = vadd.f32 %v1669_v15, %v419_v29 }
 0x15f   : > { %v1962_v43 = vmax.f32 %v1930_v32, 0.0  ;;  %v1795_v44 = vld [vmem:[#allocation2 + $0x60] sm:$0xff]  ;;  %v1493_v14 = vpop.f32.mrf.mxu2 }
 0x160   : > { %v1831_v45 = vmul.f32 %v3270_v21, %v1795_v44  ;;  %1761 = vst.msk [vmem:[#allocation2 + $0x68] sm:$0xff] %vm373_vm0, %v1729_v33  ;;  %v1494_v46 = vadd.f32 %v1493_v14, %v1405_v35  ;;  %v1582_v48 = vpop.f32.mrf.mxu3  ;;  %v422_v32 = vld [vmem:[#allocation2 + $0x80] sm:$0xff] }
 0x161   : > { %1994 = vst.msk [vmem:[%s3298_s27 + $0x58] sm:$0xff] %vm373_vm0, %v1962_v43  ;;  %v1406_v49 = vpop.f32.mrf.mxu1 }
 0x162   : > { %v1867_v54 = vadd.f32 %v3283_v47, %v1831_v45  ;;  %v1583_v52 = vadd.f32 %v1582_v48, %v1494_v46  ;;  %v1407_v0 = vadd.f32 %v1406_v49, %v3210_v23 }
 0x163   : > { %v1673_v53 = vpop.f32.mrf.mxu0 }
 0x164   : > { %v1931_v41 = vadd.f32 %v1899_v34, %v1867_v54  ;;  %v1672_v55 = vadd.f32 %v1671_v27, %v1583_v52  ;;  %v1901_v27 = vld [vmem:[%s3278_s22 + $0x70] sm:$0xff]  ;;  %v1902_v54 = vld [vmem:[%s3278_s22 + $0x78] sm:$0xff] }
 0x166   : > { %v1963_v56 = vmax.f32 %v1931_v41, 0.0  ;;  %v1730_v63 = vadd.f32 %v1672_v55, %v420_v11 }
 0x167   : > { %v1796_v1 = vld [vmem:[#allocation2 + $0x68] sm:$0xff]  ;;  %v1495_v2 = vpop.f32.mrf.mxu2 }
 0x168   : > { %1995 = vst.msk [vmem:[%s3298_s27 + $0x60] sm:$0xff] %vm373_vm0, %v1963_v56  ;;  %v1832_v62 = vmul.f32 %v3270_v21, %v1796_v1  ;;  %v1496_v37 = vadd.f32 %v1495_v2, %v1407_v0  ;;  %v1584_v4 = vpop.f32.mrf.mxu3 }
 0x169   : > { %1762 = vst.msk [vmem:[#allocation2 + $0x70] sm:$0xff] %vm373_vm0, %v1730_v63  ;;  %v1409_v6 = vpop.f32.mrf.mxu1 }
 0x16a   : > { %v1868_v9 = vadd.f32 %v3283_v47, %v1832_v62  ;;  %v1585_v3 = vadd.f32 %v1584_v4, %v1496_v37  ;;  %v1410_v20 = vadd.f32 %v1409_v6, %v3095_v18 }
 0x16b   : > { %v1676_v17 = vpop.f32.mrf.mxu0 }
 0x16c   : > { %v1932_v23 = vadd.f32 %v1900_v5, %v1868_v9  ;;  %v1674_v24 = vadd.f32 %v1673_v53, %v1585_v3  ;;  %v1903_v5 = vld [vmem:[%s3278_s22 + $0x80] sm:$0xff] }
 0x16e   : > { %v1964_v10 = vmax.f32 %v1932_v23, 0.0  ;;  %v1731_v57 = vadd.f32 %v1674_v24, %v421_v59 }
 0x16f   : > { %v1498_v13 = vpop.f32.mrf.mxu2 }
 0x170   : > { %1996 = vst.msk [vmem:[%s3298_s27 + $0x68] sm:$0xff] %vm373_vm0, %v1964_v10  ;;  %v1797_v25 = vld [vmem:[#allocation2 + $0x70] sm:$0xff]  ;;  %v1499_v26 = vadd.f32 %v1498_v13, %v1410_v20  ;;  %v1587_v61 = vpop.f32.mrf.mxu3 }
 0x171   : > { %v1833_v12 = vmul.f32 %v3270_v21, %v1797_v25  ;;  %1763 = vst.msk [vmem:[#allocation2 + $0x78] sm:$0xff] %vm373_vm0, %v1731_v57  ;;  %v1411_v40 = vpop.f32.mrf.mxu1 }
 0x172   : > { %v1588_v28 = vadd.f32 %v1587_v61, %v1499_v26  ;;  %v1412_v43 = vadd.f32 %v1411_v40, %v3111_v30  ;;  %v423_v30 = vld [vmem:[#allocation2 + $0x88] sm:$0xff] }
 0x173   : > { %v1678_v29 = vpop.f32.mrf.mxu0  ;;  %v1869_v15 = vadd.f32 %v3283_v47, %v1833_v12  ;;  %v1904_v12 = vld [vmem:[%s3278_s22 + $0x88] sm:$0xff] }
 0x174   : > { %v1677_v18 = vadd.f32 %v1676_v17, %v1588_v28 }
 0x175   : > { %v1933_v33 = vadd.f32 %v1901_v27, %v1869_v15  ;;  %v425_v15 = vld [vmem:[#allocation2 + $0x98] sm:$0xff] }
 0x176   : > { %v1732_v35 = vadd.f32 %v1677_v18, %v422_v32 }
 0x177   : > { %v1965_v44 = vmax.f32 %v1933_v33, 0.0  ;;  %v1500_v14 = vpop.f32.mrf.mxu2 }
 0x178   : > { %v1798_v45 = vld [vmem:[#allocation2 + $0x78] sm:$0xff]  ;;  %1764 = vst.msk [vmem:[#allocation2 + $0x80] sm:$0xff] %vm373_vm0, %v1732_v35  ;;  %v1501_v46 = vadd.f32 %v1500_v14, %v1412_v43  ;;  %v1589_v48 = vpop.f32.mrf.mxu3 }
 0x179   : > { %1997 = vst.msk [vmem:[%s3298_s27 + $0x70] sm:$0xff] %vm373_vm0, %v1965_v44  ;;  %v1834_v34 = vmul.f32 %v3270_v21, %v1798_v45  ;;  %v1414_v49 = vpop.f32.mrf.mxu1 }
 0x17a   : > { %v1590_v52 = vadd.f32 %v1589_v48, %v1501_v46  ;;  %v1415_v63 = vadd.f32 %v1414_v49, %v3120_v38  ;;  %v424_v38 = vld [vmem:[#allocation2 + $0x90] sm:$0xff] }
 0x17b   : > { %v1681_v53 = vpop.f32.mrf.mxu0  ;;  %v1870_v11 = vadd.f32 %v3283_v47, %v1834_v34  ;;  %v1905_v34 = vld [vmem:[%s3278_s22 + $0x90] sm:$0xff] }
 0x17c   : > { %v1679_v41 = vadd.f32 %v1678_v29, %v1590_v52 }
 0x17d   : > { %v1934_v55 = vadd.f32 %v1902_v54, %v1870_v11 }
 0x17e   : > { %v1733_v56 = vadd.f32 %v1679_v41, %v423_v30 }
 0x17f   : > { %v1966_v0 = vmax.f32 %v1934_v55, 0.0  ;;  %v1799_v1 = vld [vmem:[#allocation2 + $0x80] sm:$0xff]  ;;  %v1503_v2 = vpop.f32.mrf.mxu2 }
 0x180   : > { %v1835_v62 = vmul.f32 %v3270_v21, %v1799_v1  ;;  %1765 = vst.msk [vmem:[#allocation2 + $0x88] sm:$0xff] %vm373_vm0, %v1733_v56  ;;  %v1504_v37 = vadd.f32 %v1503_v2, %v1415_v63  ;;  %v1592_v4 = vpop.f32.mrf.mxu3 }
 0x181   : > { %1998 = vst.msk [vmem:[%s3298_s27 + $0x78] sm:$0xff] %vm373_vm0, %v1966_v0  ;;  %v1416_v6 = vpop.f32.mrf.mxu1 }
 0x182   : > { %v1871_v9 = vadd.f32 %v3283_v47, %v1835_v62  ;;  %v1593_v3 = vadd.f32 %v1592_v4, %v1504_v37  ;;  %v1417_v57 = vadd.f32 %v1416_v6, %v3136_v50  ;;  %v1906_v37 = vld [vmem:[%s3278_s22 + $0x98] sm:$0xff] }
 0x183   : > { %v1683_v17 = vpop.f32.mrf.mxu0 }
 0x184   : > { %v1935_v59 = vadd.f32 %v1903_v5, %v1871_v9  ;;  %v1682_v23 = vadd.f32 %v1681_v53, %v1593_v3  ;;  %v426_v53 = vld [vmem:[#allocation2 + $0xa0] sm:$0xff] }
 0x186   : > { %v1967_v24 = vmax.f32 %v1935_v59, 0.0  ;;  %v1734_v10 = vadd.f32 %v1682_v23, %v424_v38 }
 0x187   : > { %v1800_v20 = vld [vmem:[#allocation2 + $0x88] sm:$0xff]  ;;  %v1505_v13 = vpop.f32.mrf.mxu2 }
 0x188   : > { %1999 = vst.msk [vmem:[%s3298_s27 + $0x80] sm:$0xff] %vm373_vm0, %v1967_v24  ;;  %v1836_v25 = vmul.f32 %v3270_v21, %v1800_v20  ;;  %v1506_v26 = vadd.f32 %v1505_v13, %v1417_v57  ;;  %v1594_v61 = vpop.f32.mrf.mxu3  ;;  %v1907_v13 = vld [vmem:[%s3278_s22 + $0xa0] sm:$0xff] }
 0x189   : > { %1766 = vst.msk [vmem:[#allocation2 + $0x90] sm:$0xff] %vm373_vm0, %v1734_v10  ;;  %v1419_v40 = vpop.f32.mrf.mxu1 }
 0x18a   : > { %v1872_v27 = vadd.f32 %v3283_v47, %v1836_v25  ;;  %v1595_v28 = vadd.f32 %v1594_v61, %v1506_v26  ;;  %v1420_v35 = vadd.f32 %v1419_v40, %v3145_v58 }
 0x18b   : > { %v1686_v29 = vpop.f32.mrf.mxu0 }
 0x18c   : > { %v1936_v50 = vadd.f32 %v1904_v12, %v1872_v27  ;;  %v1684_v32 = vadd.f32 %v1683_v17, %v1595_v28 }
 0x18e   : > { %v1968_v18 = vmax.f32 %v1936_v50, 0.0  ;;  %v1735_v33 = vadd.f32 %v1684_v32, %v425_v15 }
 0x18f   : > { %v1508_v43 = vpop.f32.mrf.mxu2 }
 0x190   : > { %2000 = vst.msk [vmem:[%s3298_s27 + $0x88] sm:$0xff] %vm373_vm0, %v1968_v18  ;;  %v1801_v44 = vld [vmem:[#allocation2 + $0x90] sm:$0xff]  ;;  %v1509_v14 = vadd.f32 %v1508_v43, %v1420_v35  ;;  %v1597_v45 = vpop.f32.mrf.mxu3  ;;  %v1908_v43 = vld [vmem:[%s3278_s22 + $0xa8] sm:$0xff] }
 0x191   : > { %v1837_v46 = vmul.f32 %v3270_v21, %v1801_v44  ;;  %1767 = vst.msk [vmem:[#allocation2 + $0x98] sm:$0xff] %vm373_vm0, %v1735_v33  ;;  %v1421_v48 = vpop.f32.mrf.mxu1 }
 0x192   : > { %v1598_v49 = vadd.f32 %v1597_v45, %v1509_v14  ;;  %v1422_v41 = vadd.f32 %v1421_v48, %v3177_v7  ;;  %v427_v7 = vld [vmem:[#allocation2 + $0xa8] sm:$0xff]  ;;  %v429_v48 = vld [vmem:[#allocation2 + $0xb8] sm:$0xff] }
 0x193   : > { %v1688_v54 = vpop.f32.mrf.mxu0  ;;  %v1873_v52 = vadd.f32 %v3283_v47, %v1837_v46 }
 0x194   : > { %v1687_v58 = vadd.f32 %v1686_v29, %v1598_v49 }
 0x195   : > { %v1937_v11 = vadd.f32 %v1905_v34, %v1873_v52 }
 0x196   : > { %v1736_v30 = vadd.f32 %v1687_v58, %v426_v53 }
 0x197   : > { %v1969_v55 = vmax.f32 %v1937_v11, 0.0  ;;  %v1510_v56 = vpop.f32.mrf.mxu2 }
 0x198   : > { %v1802_v63 = vld [vmem:[#allocation2 + $0x98] sm:$0xff]  ;;  %1768 = vst.msk [vmem:[#allocation2 + $0xa0] sm:$0xff] %vm373_vm0, %v1736_v30  ;;  %v1511_v0 = vadd.f32 %v1510_v56, %v1422_v41  ;;  %v1599_v1 = vpop.f32.mrf.mxu3  ;;  %v1909_v56 = vld [vmem:[%s3278_s22 + $0xb0] sm:$0xff] }
 0x199   : > { %2001 = vst.msk [vmem:[%s3298_s27 + $0x90] sm:$0xff] %vm373_vm0, %v1969_v55  ;;  %v1838_v2 = vmul.f32 %v3270_v21, %v1802_v63  ;;  %v1424_v62 = vpop.f32.mrf.mxu1 }
 0x19a   : > { %v1600_v4 = vadd.f32 %v1599_v1, %v1511_v0  ;;  %v1425_v38 = vadd.f32 %v1424_v62, %v3202_v16  ;;  %v428_v16 = vld [vmem:[#allocation2 + $0xb0] sm:$0xff] }
 0x19b   : > { %v1691_v5 = vpop.f32.mrf.mxu0  ;;  %v1874_v6 = vadd.f32 %v3283_v47, %v1838_v2  ;;  %v430_v2 = vld [vmem:[#allocation2 + $0xc0] sm:$0xff] }
 0x19c   : > { %v1689_v9 = vadd.f32 %v1688_v54, %v1600_v4 }
 0x19d   : > { %v1938_v3 = vadd.f32 %v1906_v37, %v1874_v6 }
 0x19e   : > { %v1737_v17 = vadd.f32 %v1689_v9, %v427_v7 }
 0x19f   : > { %v1970_v59 = vmax.f32 %v1938_v3, 0.0  ;;  %v1803_v23 = vld [vmem:[#allocation2 + $0xa0] sm:$0xff]  ;;  %v1513_v24 = vpop.f32.mrf.mxu2 }
 0x1a0   : > { %v1839_v10 = vmul.f32 %v3270_v21, %v1803_v23  ;;  %1769 = vst.msk [vmem:[#allocation2 + $0xa8] sm:$0xff] %vm373_vm0, %v1737_v17  ;;  %v1514_v57 = vadd.f32 %v1513_v24, %v1425_v38  ;;  %v1602_v20 = vpop.f32.mrf.mxu3  ;;  %v1910_v38 = vld [vmem:[%s3278_s22 + $0xb8] sm:$0xff]  ;;  %v3519_v23 = vld [vmem:[%s3589_s3] ss:$0 sm:$0xff] }
 0x1a1   : > { %2002 = vst.msk [vmem:[%s3298_s27 + $0x98] sm:$0xff] %vm373_vm0, %v1970_v59  ;;  %v1426_v25 = vpop.f32.mrf.mxu1 }
 0x1a2   : > { %v1875_v26 = vadd.f32 %v3283_v47, %v1839_v10  ;;  %v1603_v61 = vadd.f32 %v1602_v20, %v1514_v57  ;;  %v1427_v15 = vadd.f32 %v1426_v25, %v3234_v36  ;;  %v431_v10 = vld [vmem:[#allocation2 + $0xc8] sm:$0xff] }
 0x1a3   : > { %v1693_v12 = vpop.f32.mrf.mxu0 }
 0x1a4   : > { %v1939_v40 = vadd.f32 %v1907_v13, %v1875_v26  ;;  %v1692_v27 = vadd.f32 %v1691_v5, %v1603_v61 }
 0x1a6   : > { %v1971_v28 = vmax.f32 %v1939_v40, 0.0  ;;  %v1738_v29 = vadd.f32 %v1692_v27, %v428_v16 }
 0x1a7   : > { %v1804_v50 = vld [vmem:[#allocation2 + $0xa8] sm:$0xff]  ;;  %v1515_v32 = vpop.f32.mrf.mxu2 }
 0x1a8   : > { %2003 = vst.msk [vmem:[%s3298_s27 + $0xa0] sm:$0xff] %vm373_vm0, %v1971_v28  ;;  %v1840_v18 = vmul.f32 %v3270_v21, %v1804_v50  ;;  %v1516_v33 = vadd.f32 %v1515_v32, %v1427_v15  ;;  %v1604_v35 = vpop.f32.mrf.mxu3  ;;  %v1911_v28 = vld [vmem:[%s3278_s22 + $0xc0] sm:$0xff]  ;;  %v432_v32 = vld [vmem:[#allocation2 + $0xd0] sm:$0xff] }
 0x1a9   : > { %1770 = vst.msk [vmem:[#allocation2 + $0xb0] sm:$0xff] %vm373_vm0, %v1738_v29  ;;  %v1429_v44 = vpop.f32.mrf.mxu1 }
 0x1aa   : > { %v1876_v14 = vadd.f32 %v3283_v47, %v1840_v18  ;;  %v1605_v45 = vadd.f32 %v1604_v35, %v1516_v33  ;;  %v1430_v52 = vadd.f32 %v1429_v44, %v3097_v19 }
 0x1ab   : > { %v1696_v46 = vpop.f32.mrf.mxu0 }
 0x1ac   : > { %v1940_v36 = vadd.f32 %v1908_v43, %v1876_v14  ;;  %v1694_v34 = vadd.f32 %v1693_v12, %v1605_v45 }
 0x1ae   : > { %v1972_v49 = vmax.f32 %v1940_v36, 0.0  ;;  %v1739_v54 = vadd.f32 %v1694_v34, %v429_v48  ;;  %v1912_v34 = vld [vmem:[%s3278_s22 + $0xc8] sm:$0xff] }
 0x1af   : > { %v1518_v53 = vpop.f32.mrf.mxu2 }
 0x1b0   : > { %2004 = vst.msk [vmem:[%s3298_s27 + $0xa8] sm:$0xff] %vm373_vm0, %v1972_v49  ;;  %v1805_v58 = vld [vmem:[#allocation2 + $0xb0] sm:$0xff]  ;;  %v1519_v11 = vadd.f32 %v1518_v53, %v1430_v52  ;;  %v1607_v30 = vpop.f32.mrf.mxu3  ;;  %v433_v53 = vld [vmem:[#allocation2 + $0xd8] sm:$0xff] }
 0x1b1   : > { %v1841_v41 = vmul.f32 %v3270_v21, %v1805_v58  ;;  %1771 = vst.msk [vmem:[#allocation2 + $0xb8] sm:$0xff] %vm373_vm0, %v1739_v54  ;;  %v1431_v55 = vpop.f32.mrf.mxu1 }
 0x1b2   : > { %v1608_v63 = vadd.f32 %v1607_v30, %v1519_v11  ;;  %v1432_v4 = vadd.f32 %v1431_v55, %v3113_v31 }
 0x1b3   : > { %v1698_v0 = vpop.f32.mrf.mxu0  ;;  %v1877_v1 = vadd.f32 %v3283_v47, %v1841_v41  ;;  %v3512_v47 = vld [vmem:[%s3588_s2] ss:$0 sm:$0xff] }
 0x1b4   : > { %v1697_v19 = vadd.f32 %v1696_v46, %v1608_v63 }
 0x1b5   : > { %v1941_v62 = vadd.f32 %v1909_v56, %v1877_v1 }
 0x1b6   : > { %v1740_v37 = vadd.f32 %v1697_v19, %v430_v2 }
 0x1b7   : > { %v1973_v5 = vmax.f32 %v1941_v62, 0.0  ;;  %v1520_v6 = vpop.f32.mrf.mxu2  ;;  %v1913_v62 = vld [vmem:[%s3278_s22 + $0xd0] sm:$0xff] }
 0x1b8   : > { %v1806_v7 = vld [vmem:[#allocation2 + $0xb8] sm:$0xff]  ;;  %1772 = vst.msk [vmem:[#allocation2 + $0xc0] sm:$0xff] %vm373_vm0, %v1740_v37  ;;  %v1521_v21 = vadd.f32 %v1520_v6, %v1432_v4  ;;  %v1609_v9 = vpop.f32.mrf.mxu3 }
 0x1b9   : > { %2005 = vst.msk [vmem:[%s3298_s27 + $0xb0] sm:$0xff] %vm373_vm0, %v1973_v5  ;;  %v1842_v3 = vmul.f32 %v3512_v47, %v1806_v7  ;;  %v1434_v17 = vpop.f32.mrf.mxu1  ;;  %v434_v5 = vld [vmem:[#allocation2 + $0xe0] sm:$0xff] }
 0x1ba   : > { %v1610_v59 = vadd.f32 %v1609_v9, %v1521_v21  ;;  %v1435_v25 = vadd.f32 %v1434_v17, %v3122_v39 }
 0x1bb   : > { %v1701_v31 = vpop.f32.mrf.mxu0  ;;  %v1878_v24 = vadd.f32 %v3519_v23, %v1842_v3 }
 0x1bc   : > { %v1699_v57 = vadd.f32 %v1698_v0, %v1610_v59 }
 0x1bd   : > { %v1942_v20 = vadd.f32 %v1910_v38, %v1878_v24 }
 0x1be   : > { %v1741_v13 = vadd.f32 %v1699_v57, %v431_v10  ;;  %v1914_v57 = vld [vmem:[%s3278_s22 + $0xd8] sm:$0xff] }
 0x1bf   : > { %v1974_v26 = vmax.f32 %v1942_v20, 0.0  ;;  %v1807_v61 = vld [vmem:[#allocation2 + $0xc0] sm:$0xff]  ;;  %v1523_v12 = vpop.f32.mrf.mxu2 }
 0x1c0   : > { %v1843_v16 = vmul.f32 %v3512_v47, %v1807_v61  ;;  %1773 = vst.msk [vmem:[#allocation2 + $0xc8] sm:$0xff] %vm373_vm0, %v1741_v13  ;;  %v1524_v40 = vadd.f32 %v1523_v12, %v1435_v25  ;;  %v1612_v27 = vpop.f32.mrf.mxu3 }
 0x1c1   : > { %2006 = vst.msk [vmem:[%s3298_s27 + $0xb8] sm:$0xff] %vm373_vm0, %v1974_v26  ;;  %v1436_v29 = vpop.f32.mrf.mxu1 }
 0x1c2   : > { %v1879_v15 = vadd.f32 %v3519_v23, %v1843_v16  ;;  %v1613_v50 = vadd.f32 %v1612_v27, %v1524_v40  ;;  %v1437_v44 = vadd.f32 %v1436_v29, %v3138_v51 }
 0x1c3   : > { %v1703_v39 = vpop.f32.mrf.mxu0 }
 0x1c4   : > { %v1943_v18 = vadd.f32 %v1911_v28, %v1879_v15  ;;  %v1702_v33 = vadd.f32 %v1701_v31, %v1613_v50  ;;  %v1915_v50 = vld [vmem:[%s3278_s22 + $0xe0] sm:$0xff] }
 0x1c6   : > { %v1975_v35 = vmax.f32 %v1943_v18, 0.0  ;;  %v1742_v43 = vadd.f32 %v1702_v33, %v432_v32  ;;  %v436_v33 = vld [vmem:[#allocation2 + $0xf0] sm:$0xff] }
 0x1c7   : > { %v1808_v14 = vld [vmem:[#allocation2 + $0xc8] sm:$0xff]  ;;  %v1525_v45 = vpop.f32.mrf.mxu2 }
 0x1c8   : > { %2007 = vst.msk [vmem:[%s3298_s27 + $0xc0] sm:$0xff] %vm373_vm0, %v1975_v35  ;;  %v1844_v46 = vmul.f32 %v3512_v47, %v1808_v14  ;;  %v1526_v48 = vadd.f32 %v1525_v45, %v1437_v44  ;;  %v1614_v36 = vpop.f32.mrf.mxu3 }
 0x1c9   : > { %1774 = vst.msk [vmem:[#allocation2 + $0xd0] sm:$0xff] %vm373_vm0, %v1742_v43  ;;  %v1439_v49 = vpop.f32.mrf.mxu1 }
 0x1ca   : > { %v1880_v54 = vadd.f32 %v3519_v23, %v1844_v46  ;;  %v1615_v52 = vadd.f32 %v1614_v36, %v1526_v48  ;;  %v1440_v55 = vadd.f32 %v1439_v49, %v3149_v60  ;;  %v1916_v49 = vld [vmem:[%s3278_s22 + $0xe8] sm:$0xff] }
 0x1cb   : > { %v1706_v11 = vpop.f32.mrf.mxu0 }
 0x1cc   : > { %v1944_v58 = vadd.f32 %v1912_v34, %v1880_v54  ;;  %v1704_v51 = vadd.f32 %v1703_v39, %v1615_v52 }
 0x1ce   : > { %v1976_v30 = vmax.f32 %v1944_v58, 0.0  ;;  %v1743_v41 = vadd.f32 %v1704_v51, %v433_v53  ;;  %v437_v51 = vld [vmem:[#allocation2 + $0xf8] sm:$0xff] }
 0x1cf   : > { %v1528_v56 = vpop.f32.mrf.mxu2 }
 0x1d0   : > { %2008 = vst.msk [vmem:[%s3298_s27 + $0xc8] sm:$0xff] %vm373_vm0, %v1976_v30  ;;  %v1809_v63 = vld [vmem:[#allocation2 + $0xd0] sm:$0xff]  ;;  %v1529_v0 = vadd.f32 %v1528_v56, %v1440_v55  ;;  %v1617_v1 = vpop.f32.mrf.mxu3 }
 0x1d1   : > { %v1845_v2 = vmul.f32 %v3512_v47, %v1809_v63  ;;  %1775 = vst.msk [vmem:[#allocation2 + $0xd8] sm:$0xff] %vm373_vm0, %v1743_v41  ;;  %v1441_v19 = vpop.f32.mrf.mxu1  ;;  %v1917_v63 = vld [vmem:[%s3278_s22 + $0xf0] sm:$0xff] }
 0x1d2   : > { %v1618_v37 = vadd.f32 %v1617_v1, %v1529_v0  ;;  %v1442_v21 = vadd.f32 %v1441_v19, %v3181_v8  ;;  %v435_v8 = vld [vmem:[#allocation2 + $0xe8] sm:$0xff] }
 0x1d3   : > { %v1881_v4 = vadd.f32 %v3519_v23, %v1845_v2  ;;  %v1708_v3 = vpop.f32.mrf.mxu0 }
 0x1d4   : > { %v1707_v6 = vadd.f32 %v1706_v11, %v1618_v37  ;;  %v1918_v37 = vld [vmem:[%s3278_s22 + $0xf8] sm:$0xff] }
 0x1d5   : > { %v1945_v60 = vadd.f32 %v1913_v62, %v1881_v4 }
 0x1d6   : > { %v1744_v7 = vadd.f32 %v1707_v6, %v434_v5 }
 0x1d7   : > { %v1977_v9 = vmax.f32 %v1945_v60, 0.0  ;;  %v1530_v17 = vpop.f32.mrf.mxu2 }
 0x1d8   : > { %v1810_v38 = vld [vmem:[#allocation2 + $0xd8] sm:$0xff]  ;;  %1776 = vst.msk [vmem:[#allocation2 + $0xe0] sm:$0xff] %vm373_vm0, %v1744_v7  ;;  %v1531_v59 = vadd.f32 %v1530_v17, %v1442_v21  ;;  %v1619_v31 = vpop.f32.mrf.mxu3 }
 0x1d9   : > { %2009 = vst.msk [vmem:[%s3298_s27 + $0xd0] sm:$0xff] %vm373_vm0, %v1977_v9  ;;  %v1846_v24 = vmul.f32 %v3512_v47, %v1810_v38  ;;  %v1444_v10 = vpop.f32.mrf.mxu1 }
 0x1da   : > { %v1620_v20 = vadd.f32 %v1619_v31, %v1531_v59  ;;  %v1445_v12 = vadd.f32 %v1444_v10, %v3206_v22 }
 0x1db   : > { %v1882_v13 = vadd.f32 %v3519_v23, %v1846_v24  ;;  %v1711_v32 = vpop.f32.mrf.mxu0 }
 0x1dc   : > { %v1709_v25 = vadd.f32 %v1708_v3, %v1620_v20 }
 0x1dd   : > { %v1946_v26 = vadd.f32 %v1914_v57, %v1882_v13 }
 0x1de   : > { %v1745_v61 = vadd.f32 %v1709_v25, %v435_v8 }
 0x1df   : > { %v1978_v16 = vmax.f32 %v1946_v26, 0.0  ;;  %v1811_v40 = vld [vmem:[#allocation2 + $0xe0] sm:$0xff]  ;;  %v1533_v27 = vpop.f32.mrf.mxu2 }
 0x1e0   : > { %v1847_v28 = vmul.f32 %v3512_v47, %v1811_v40  ;;  %1777 = vst.msk [vmem:[#allocation2 + $0xe8] sm:$0xff] %vm373_vm0, %v1745_v61  ;;  %v1534_v29 = vadd.f32 %v1533_v27, %v1445_v12  ;;  %v1622_v15 = vpop.f32.mrf.mxu3 }
 0x1e1   : > { %2010 = vst.msk [vmem:[%s3298_s27 + $0xd8] sm:$0xff] %vm373_vm0, %v1978_v16  ;;  %v1446_v22 = vpop.f32.mrf.mxu1 }
 0x1e2   : > { %v1883_v39 = vadd.f32 %v3519_v23, %v1847_v28  ;;  %v1623_v18 = vadd.f32 %v1622_v15, %v1534_v29  ;;  %v1447_v45 = vadd.f32 %v1446_v22, %v3238_v42 }
 0x1e3   : > { %v1713_v58 = vpop.f32.mrf.mxu0 }
 0x1e4   : > { %v1947_v35 = vadd.f32 %v1915_v50, %v1883_v39  ;;  %v1712_v43 = vadd.f32 %v1711_v32, %v1623_v18 }
 0x1e6   : > { %v1979_v44 = vmax.f32 %v1947_v35, 0.0  ;;  %v1746_v14 = vadd.f32 %v1712_v43, %v436_v33 }
 0x1e7   : > { %v1812_v46 = vld [vmem:[#allocation2 + $0xe8] sm:$0xff]  ;;  %v1535_v48 = vpop.f32.mrf.mxu2 }
 0x1e8   : > { %2011 = vst.msk [vmem:[%s3298_s27 + $0xe0] sm:$0xff] %vm373_vm0, %v1979_v44  ;;  %v1848_v36 = vmul.f32 %v3512_v47, %v1812_v46  ;;  %v1536_v34 = vadd.f32 %v1535_v48, %v1447_v45  ;;  %v1624_v54 = vpop.f32.mrf.mxu3 }
 0x1e9   : > { %1778 = vst.msk [vmem:[#allocation2 + $0xf0] sm:$0xff] %vm373_vm0, %v1746_v14 }
 0x1ea   : > { %v1884_v52 = vadd.f32 %v3519_v23, %v1848_v36  ;;  %v1625_v53 = vadd.f32 %v1624_v54, %v1536_v34 }
 0x1ec   : > { %v1948_v42 = vadd.f32 %v1916_v49, %v1884_v52  ;;  %v1714_v11 = vadd.f32 %v1713_v58, %v1625_v53 }
 0x1ee   : > { %v1980_v30 = vmax.f32 %v1948_v42, 0.0  ;;  %v1747_v41 = vadd.f32 %v1714_v11, %v437_v51 }
 0x1f0   : > { %2012 = vst.msk [vmem:[%s3298_s27 + $0xe8] sm:$0xff] %vm373_vm0, %v1980_v30  ;;  %v1813_v55 = vld [vmem:[#allocation2 + $0xf0] sm:$0xff] }
 0x1f1   : > { %v1849_v56 = vmul.f32 %v3512_v47, %v1813_v55  ;;  %1779 = vst.msk [vmem:[#allocation2 + $0xf8] sm:$0xff] %vm373_vm0, %v1747_v41 }
 0x1f3   : > { %v1885_v0 = vadd.f32 %v3519_v23, %v1849_v56 }
 0x1f5   : > { %v1949_v1 = vadd.f32 %v1917_v63, %v1885_v0 }
 0x1f7   : > { %v1981_v2 = vmax.f32 %v1949_v1, 0.0 }
 0x1f8   : > { %v1814_v19 = vld [vmem:[#allocation2 + $0xf8] sm:$0xff] }
 0x1f9   : > { %2013 = vst.msk [vmem:[%s3298_s27 + $0xf0] sm:$0xff] %vm373_vm0, %v1981_v2  ;;  %v1850_v62 = vmul.f32 %v3512_v47, %v1814_v19 }
 0x1fb   : > { %v1886_v4 = vadd.f32 %v3519_v23, %v1850_v62 }
 0x1fd   : > { %v1950_v5 = vadd.f32 %v1918_v37, %v1886_v4 }
 0x1ff   : > { %v1982_v6 = vmax.f32 %v1950_v5, 0.0 }
 0x201   : > { %2014 = vst.msk [vmem:[%s3298_s27 + $0xf8] sm:$0xff] %vm373_vm0, %v1982_v6 }
 0x202 PF: > { %s15_s20 = sadd.s32 1, %s2844_s20   ;;  %s3592_s18 = smov %s2840_s19 }
 0x203   : > { %p12_p5 = scmp.ge.s32.totalorder %s15_s20, 4   ;;  %s3593_s19 = smov %s3595_s21 }
 0x205   :  { %14 = sbr.rel (!%p12_p5) target bundleno = 2 (0x2), region = 90 }

// kernel: enc_resnet_forward.10
= control target key start
LH: loop header
LB: loop body
LE: loop exit
PB: predicated region body
PF: predicated region fallthrough
CT: control target
= control target key end

     0   :  { %s2731_s15 = smov 0   ;;  %s2733_s16 = smov 0   ;;  %s3399_s0 = inlined_call_operand.vmem [shape: bf16[512,576], index: 0, kind: input, shape index: {}]   ;;  %s3400_s1 = inlined_call_operand.vmem [shape: bf16[576,64], index: 1, kind: input, shape index: {}]   ;;  %s3401_s2 = inlined_call_operand.vmem [shape: f32[1,64], index: 2, kind: input, shape index: {}]   ;;  %s3402_s3 = inlined_call_operand.vmem [shape: f32[1,64], index: 3, kind: input, shape index: {}]   ;;  %s3403_s4 = inlined_call_operand.vmem [shape: f32[512,64], index: 4, kind: output, shape index: {}]  }
   0x1   :  { %s2735_s17 = smov 0  }
   0x2 LB: > { %s33_s18 = sadd.s32 1, %s2699_s16  ;;  %p2024_p0 = scmp.ge.s32.totalorder %s2703_s17, 1  ;;  %s2703_s17 = sphi %s2735_s17, %s14_s17   ;;  %s2699_s16 = sphi %s2733_s16, %s3405_s16   ;;  %s2695_s15 = sphi %s2731_s15, %s3404_s15  }
   0x3   : > { %p35_p1 = scmp.ge.s32.totalorder %s33_s18, 2  ;;  %p224_p2 = scmp.lt.s32.totalorder %s2703_s17, 3 }
   0x5   : > { %s3407_s18 = smov (%p35_p1, %s33_s18), 0  ;;  %p225_p3 = pnand %p2024_p0, %p224_p2 }
   0x6   : > { %s2025_s25 = sshll.u32 (!%p225_p3), %s2695_s15, 5 }
   0x7   : > { %228 = sbr.rel (%p225_p3) target bundleno = 511 (0x1ff), region = 36  ;;  %p274_p4 = scmp.lt.s32.totalorder (!%p225_p3), %s2025_s25, 63 }
   0xc   : > { %v2598_v0 = vld [vmem:[%s3400_s1 + $0x38] sm:$0xff]  ;;  %v2597_v1 = vld [vmem:[%s3400_s1 + $0x30] sm:$0xff]  ;;  %v2596_v2 = vld [vmem:[%s3400_s1 + $0x28] sm:$0xff]  ;;  %s3409_s25 = smov (!%p274_p4, %s2025_s25), 63  ;;  %vm313_vm0 = vcmask 523264  }
   0xd   : > { %2627 = vmatpush.bf16.msra.mxu1 %v2598_v0  ;;  %2628 = vmatpush.bf16.msra.mxu2 %v2598_v0  ;;  %v2595_v3 = vld [vmem:[%s3400_s1 + $0x20] sm:$0xff]  ;;  %v2594_v4 = vld [vmem:[%s3400_s1 + $0x18] sm:$0xff]  ;;  %v2593_v5 = vld [vmem:[%s3400_s1 + $0x10] sm:$0xff]  ;;  %s2651_s6 = smul.u32 20, %s3409_s25  ;;  %s2028_s10 = sshll.u32 %s3409_s25, 3 }
   0xe   : > { %2629 = vmatpush.bf16.msra.mxu3 %v2598_v0  ;;  %1211 = vmatpush.bf16.msra.mxu0 %v2598_v0  ;;  %v2592_v6 = vld [vmem:[%s3400_s1 + $0x8] sm:$0xff]  ;;  %v2591_v7 = vld [vmem:[%s3400_s1] sm:$0xff]  ;;  %v2614_v16 = vld [vmem:[%s3400_s1 + $0xb8] sm:$0xff]  ;;  %s3139_s25 = scalar_lea.vmem %s3403_s4, %s2028_s10 }
   0xf   : > { %s2779_s11 = scalar_lea.vmem %s3399_s0, %s2651_s6  ;;  %v2622_v17 = vld [vmem:[%s3400_s1 + $0xf8] sm:$0xff]  ;;  %v2613_v24 = vld [vmem:[%s3400_s1 + $0xb0] sm:$0xff]  ;;  %v2612_v28 = vld [vmem:[%s3400_s1 + $0xa8] sm:$0xff] }
  0x10   : > { %v2111_v8 = vld [vmem:[%s2779_s11 + $0xa0] sm:$0xf]  ;;  %v2533_v9 = vld [vmem:[%s2779_s11 + $0xb0] sm:$0xf0]  ;;  %v2606_v22 = vld [vmem:[%s3400_s1 + $0x78] sm:$0xff] }
  0x11   : > { %2630 = vmatpush.bf16.msra.mxu1 %v2597_v1  ;;  %2631 = vmatpush.bf16.msra.mxu2 %v2597_v1  ;;  %v2191_v10 = vld [vmem:[%s2779_s11 + $0x140] sm:$0xf]  ;;  %v2553_v11 = vld [vmem:[%s2779_s11 + $0x150] sm:$0xf0]  ;;  %v2112_v18 = vor.u32 %v2533_v9, %v2111_v8  ;;  %v2626_v23 = vld [vmem:[%s3400_s1 + $0x118] sm:$0xff] }
  0x12   : > { %2632 = vmatpush.bf16.msra.mxu3 %v2597_v1  ;;  %1212 = vmatpush.bf16.msra.mxu0 %v2597_v1  ;;  %v2271_v12 = vld [vmem:[%s2779_s11 + $0x1e0] sm:$0xf]  ;;  %v2573_v13 = vld [vmem:[%s2779_s11 + $0x1f0] sm:$0xf0]  ;;  %v2192_v19 = vor.u32 %v2553_v11, %v2191_v10  ;;  %v2620_v29 = vld [vmem:[%s3400_s1 + $0xe8] sm:$0xff] }
  0x13   : > { %v2031_v14 = vld [vmem:[%s2779_s11] sm:$0xf]  ;;  %v2513_v15 = vld [vmem:[%s2779_s11 + $0x10] sm:$0xf0]  ;;  %v2272_v20 = vor.u32 %v2573_v13, %v2271_v12  ;;  %v2604_v30 = vld [vmem:[%s3400_s1 + $0x68] sm:$0xff] }
  0x14   : > { %v2032_v21 = vor.u32 %v2513_v15, %v2031_v14  ;;  %v2621_v25 = vld [vmem:[%s3400_s1 + $0xf0] sm:$0xff]  ;;  %v2624_v31 = vld [vmem:[%s3400_s1 + $0x108] sm:$0xff]  ;;  %v2611_v32 = vld [vmem:[%s3400_s1 + $0xa0] sm:$0xff] }
  0x15   : > { %2633 = vmatpush.bf16.msra.mxu1 %v2596_v2  ;;  %2634 = vmatpush.bf16.msra.mxu2 %v2596_v2  ;;  %v2605_v26 = vld [vmem:[%s3400_s1 + $0x70] sm:$0xff]  ;;  %v2619_v33 = vld [vmem:[%s3400_s1 + $0xe0] sm:$0xff]  ;;  %v2131_v34 = vld [vmem:[%s2779_s11 + $0xc8] sm:$0xf] }
  0x16   : > { %2635 = vmatpush.bf16.msra.mxu3 %v2596_v2  ;;  %1213 = vmatpush.bf16.msra.mxu0 %v2596_v2  ;;  %v2625_v27 = vld [vmem:[%s3400_s1 + $0x110] sm:$0xff]  ;;  %v2538_v35 = vld [vmem:[%s2779_s11 + $0xd8] sm:$0xf0]  ;;  %v2211_v36 = vld [vmem:[%s2779_s11 + $0x168] sm:$0xf] }
  0x17   : > { %v2558_v37 = vld [vmem:[%s2779_s11 + $0x178] sm:$0xf0]  ;;  %v2291_v38 = vld [vmem:[%s2779_s11 + $0x208] sm:$0xf]  ;;  %v2603_v42 = vld [vmem:[%s3400_s1 + $0x60] sm:$0xff]  ;;  %v2132_v45 = vor.u32 %v2538_v35, %v2131_v34 }
  0x18   : > { %v2578_v39 = vld [vmem:[%s2779_s11 + $0x218] sm:$0xf0]  ;;  %v2051_v40 = vld [vmem:[%s2779_s11 + $0x28] sm:$0xf]  ;;  %v2212_v46 = vor.u32 %v2558_v37, %v2211_v36  ;;  %v2609_v50 = vld [vmem:[%s3400_s1 + $0x90] sm:$0xff] }
  0x19   : > { %2636 = vmatpush.bf16.msra.mxu1 %v2595_v3  ;;  %2637 = vmatpush.bf16.msra.mxu2 %v2595_v3  ;;  %v2518_v41 = vld [vmem:[%s2779_s11 + $0x38] sm:$0xf0]  ;;  %v2292_v47 = vor.u32 %v2578_v39, %v2291_v38  ;;  %v2617_v51 = vld [vmem:[%s3400_s1 + $0xd0] sm:$0xff]  ;;  %v2623_v53 = vld [vmem:[%s3400_s1 + $0x100] sm:$0xff] }
  0x1a   : > { %2638 = vmatpush.bf16.msra.mxu3 %v2595_v3  ;;  %1214 = vmatpush.bf16.msra.mxu0 %v2595_v3  ;;  %v2610_v43 = vld [vmem:[%s3400_s1 + $0x98] sm:$0xff]  ;;  %v2052_v48 = vor.u32 %v2518_v41, %v2051_v40  ;;  %v2601_v52 = vld [vmem:[%s3400_s1 + $0x50] sm:$0xff]  ;;  %v2608_v54 = vld [vmem:[%s3400_s1 + $0x88] sm:$0xff] }
  0x1b   : > { %v2618_v44 = vld [vmem:[%s3400_s1 + $0xd8] sm:$0xff]  ;;  %v2616_v55 = vld [vmem:[%s3400_s1 + $0xc8] sm:$0xff]  ;;  %v2607_v57 = vld [vmem:[%s3400_s1 + $0x80] sm:$0xff] }
  0x1c   : > { %v2602_v49 = vld [vmem:[%s3400_s1 + $0x58] sm:$0xff]  ;;  %v2600_v56 = vld [vmem:[%s3400_s1 + $0x48] sm:$0xff]  ;;  %v2615_v58 = vld [vmem:[%s3400_s1 + $0xc0] sm:$0xff] }
  0x1d   : > { %2639 = vmatpush.bf16.msra.mxu1 %v2594_v4  ;;  %2640 = vmatpush.bf16.msra.mxu2 %v2594_v4  ;;  %v2151_v59 = vld [vmem:[%s2779_s11 + $0xf0] sm:$0xf]  ;;  %v2543_v60 = vld [vmem:[%s2779_s11 + $0x100] sm:$0xf0]  ;;  %v2171_v8 = vld [vmem:[%s2779_s11 + $0x118] sm:$0xf] }
  0x1e   : > { %2641 = vmatpush.bf16.msra.mxu3 %v2594_v4  ;;  %1215 = vmatpush.bf16.msra.mxu0 %v2594_v4  ;;  %v2231_v61 = vld [vmem:[%s2779_s11 + $0x190] sm:$0xf]  ;;  %v2563_v62 = vld [vmem:[%s2779_s11 + $0x1a0] sm:$0xf0]  ;;  %v2152_v4 = vor.u32 %v2543_v60, %v2151_v59  ;;  %v2548_v9 = vld [vmem:[%s2779_s11 + $0x128] sm:$0xf0] }
  0x1f   : > { %v2311_v63 = vld [vmem:[%s2779_s11 + $0x230] sm:$0xf]  ;;  %v2583_v0 = vld [vmem:[%s2779_s11 + $0x240] sm:$0xf0]  ;;  %v2251_v10 = vld [vmem:[%s2779_s11 + $0x1b8] sm:$0xf] }
  0x20   : > { %v2071_v1 = vld [vmem:[%s2779_s11 + $0x50] sm:$0xf]  ;;  %v2523_v2 = vld [vmem:[%s2779_s11 + $0x60] sm:$0xf0]  ;;  %v2568_v11 = vld [vmem:[%s2779_s11 + $0x1c8] sm:$0xf0] }
  0x21   : > { %2642 = vmatpush.bf16.msra.mxu1 %v2593_v5  ;;  %2643 = vmatpush.bf16.msra.mxu2 %v2593_v5  ;;  %v2599_v3 = vld [vmem:[%s3400_s1 + $0x40] sm:$0xff]  ;;  %v2331_v12 = vld [vmem:[%s2779_s11 + $0x258] sm:$0xf]  ;;  %v2588_v13 = vld [vmem:[%s2779_s11 + $0x268] sm:$0xf0] }
  0x22   : > { %2644 = vmatpush.bf16.msra.mxu3 %v2593_v5  ;;  %1216 = vmatpush.bf16.msra.mxu0 %v2593_v5  ;;  %v2232_v5 = vor.u32 %v2563_v62, %v2231_v61  ;;  %v2091_v14 = vld [vmem:[%s2779_s11 + $0x78] sm:$0xf]  ;;  %v2528_v15 = vld [vmem:[%s2779_s11 + $0x88] sm:$0xf0]  ;;  %v2059_v34 = vld [vmem:[%s2779_s11 + $0x30] sm:$0xf] }
  0x23   : > { %v2519_v35 = vld [vmem:[%s2779_s11 + $0x40] sm:$0xf0]  ;;  %v2517_v36 = vld [vmem:[%s2779_s11 + $0x34] sm:$0xf]  ;;  %v2061_v37 = vld [vmem:[%s2779_s11 + $0x44] sm:$0xf0] }
  0x24   : > { %v2067_v38 = vld [vmem:[%s2779_s11 + $0x38] sm:$0xf]  ;;  %v2520_v39 = vld [vmem:[%s2779_s11 + $0x48] sm:$0xf0]  ;;  %v2060_v41 = vor.u32 %v2519_v35, %v2059_v34  ;;  %v2529_v59 = vld [vmem:[%s2779_s11 + $0x90] sm:$0xf0] }
  0x25   : > { %2645 = vmatpush.bf16.msra.mxu1 %v2592_v6  ;;  %2646 = vmatpush.bf16.msra.mxu2 %v2592_v6  ;;  %v2527_v60 = vld [vmem:[%s2779_s11 + $0x84] sm:$0xf]  ;;  %v2101_v61 = vld [vmem:[%s2779_s11 + $0x94] sm:$0xf0]  ;;  %v2107_v62 = vld [vmem:[%s2779_s11 + $0x88] sm:$0xf] }
  0x26   : > { %2647 = vmatpush.bf16.msra.mxu3 %v2592_v6  ;;  %1217 = vmatpush.bf16.msra.mxu0 %v2592_v6  ;;  %v2312_v6 = vor.u32 %v2583_v0, %v2311_v63  ;;  %v2530_v63 = vld [vmem:[%s2779_s11 + $0x98] sm:$0xf0] }
  0x29   : > { %2648 = vmatpush.bf16.msra.mxu1 %v2591_v7  ;;  %2649 = vmatpush.bf16.msra.mxu2 %v2591_v7 }
  0x2a   : > { %2650 = vmatpush.bf16.msra.mxu3 %v2591_v7  ;;  %1218 = vmatpush.bf16.msra.mxu0 %v2591_v7  ;;  %v2072_v7 = vor.u32 %v2523_v2, %v2071_v1  ;;  %v2104_v2 = vor.u32 %v2527_v60, %v2101_v61 }
  0x2c   : > { %1239 = vmatmul.bf16.vlgmr.msra.gmra.mxu1 %v2112_v18  ;;  %1259 = vmatmul.bf16.vlgmr.msra.gmra.mxu2 %v2192_v19  ;;  %v2332_v18 = vor.u32 %v2588_v13, %v2331_v12  ;;  %v2092_v19 = vor.u32 %v2528_v15, %v2091_v14 }
  0x2d   : > { %1389 = vmatpush.bf16.msrb.mxu2 %v2614_v16  ;;  %1279 = vmatmul.bf16.vlgmr.msra.gmra.mxu3 %v2272_v20  ;;  %v2172_v16 = vor.u32 %v2548_v9, %v2171_v8  ;;  %v2511_v20 = vld [vmem:[%s2779_s11 + $0x4] sm:$0xf]  ;;  %v2532_v8 = vld [vmem:[%s2779_s11 + $0xac] sm:$0xf]  ;;  %v2121_v9 = vld [vmem:[%s2779_s11 + $0xbc] sm:$0xf0] }
  0x2e   : > { %1478 = vmatpush.bf16.msrb.mxu3 %v2622_v17  ;;  %1219 = vmatmul.bf16.vlgmr.msra.gmra.mxu0 %v2032_v21  ;;  %v2252_v17 = vor.u32 %v2568_v11, %v2251_v10  ;;  %v2033_v21 = vld [vmem:[%s2779_s11 + $0x14] sm:$0xf0]  ;;  %v2127_v10 = vld [vmem:[%s2779_s11 + $0xb0] sm:$0xf]  ;;  %v2535_v11 = vld [vmem:[%s2779_s11 + $0xc0] sm:$0xf0]  ;;  %v2124_v15 = vor.u32 %v2532_v8, %v2121_v9 }
  0x2f   : > { %1300 = vmatpush.bf16.msrb.mxu1 %v2606_v22  ;;  %1571 = vmatpush.bf16.msrb.mxu0 %v2626_v23  ;;  %v2039_v22 = vld [vmem:[%s2779_s11 + $0x8] sm:$0xf]  ;;  %v2514_v23 = vld [vmem:[%s2779_s11 + $0x18] sm:$0xf0] }
  0x31   : > { %1390 = vmatpush.bf16.msrb.mxu2 %v2613_v24  ;;  %v2512_v24 = vld [vmem:[%s2779_s11 + $0xc] sm:$0xf] }
  0x32   : > { %1479 = vmatpush.bf16.msrb.mxu3 %v2621_v25  ;;  %v2041_v25 = vld [vmem:[%s2779_s11 + $0x1c] sm:$0xf0] }
  0x33   : > { %1301 = vmatpush.bf16.msrb.mxu1 %v2605_v26  ;;  %1572 = vmatpush.bf16.msrb.mxu0 %v2625_v27  ;;  %v2047_v26 = vld [vmem:[%s2779_s11 + $0x10] sm:$0xf]  ;;  %v2515_v27 = vld [vmem:[%s2779_s11 + $0x20] sm:$0xf0] }
  0x35   : > { %1391 = vmatpush.bf16.msrb.mxu2 %v2612_v28  ;;  %v2036_v28 = vor.u32 %v2511_v20, %v2033_v21 }
  0x36   : > { %1480 = vmatpush.bf16.msrb.mxu3 %v2620_v29  ;;  %v2040_v29 = vor.u32 %v2514_v23, %v2039_v22  ;;  %v2536_v22 = vld [vmem:[%s2779_s11 + $0xcc] sm:$0xf]  ;;  %v2133_v23 = vld [vmem:[%s2779_s11 + $0xdc] sm:$0xf0] }
  0x37   : > { %1302 = vmatpush.bf16.msrb.mxu1 %v2604_v30  ;;  %1573 = vmatpush.bf16.msrb.mxu0 %v2624_v31  ;;  %v2044_v30 = vor.u32 %v2512_v24, %v2041_v25  ;;  %v2048_v31 = vor.u32 %v2515_v27, %v2047_v26  ;;  %v2139_v24 = vld [vmem:[%s2779_s11 + $0xd0] sm:$0xf]  ;;  %v2539_v25 = vld [vmem:[%s2779_s11 + $0xe0] sm:$0xf0]  ;;  %v2537_v26 = vld [vmem:[%s2779_s11 + $0xd4] sm:$0xf] }
  0x38   : > { %v2141_v27 = vld [vmem:[%s2779_s11 + $0xe4] sm:$0xf0] }
  0x39   : > { %1392 = vmatpush.bf16.msrb.mxu2 %v2611_v32  ;;  %v2516_v32 = vld [vmem:[%s2779_s11 + $0x2c] sm:$0xf]  ;;  %v2144_v35 = vor.u32 %v2537_v26, %v2141_v27  ;;  %v2193_v26 = vld [vmem:[%s2779_s11 + $0x154] sm:$0xf0]  ;;  %v2199_v27 = vld [vmem:[%s2779_s11 + $0x148] sm:$0xf] }
  0x3a   : > { %1481 = vmatpush.bf16.msrb.mxu3 %v2619_v33  ;;  %v2053_v33 = vld [vmem:[%s2779_s11 + $0x3c] sm:$0xf0] }
  0x3b   : > { %1303 = vmatpush.bf16.msrb.mxu1 %v2603_v42  ;;  %1574 = vmatpush.bf16.msrb.mxu0 %v2623_v53  ;;  %v2056_v40 = vor.u32 %v2516_v32, %v2053_v33  ;;  %v2064_v42 = vor.u32 %v2517_v36, %v2061_v37  ;;  %v2136_v32 = vor.u32 %v2536_v22, %v2133_v23 }
  0x3c   : > { %1244 = vmatmul.bf16.gmra.mxu1 %v2132_v45  ;;  %1264 = vmatmul.bf16.gmra.mxu2 %v2212_v46  ;;  %v2073_v45 = vld [vmem:[%s2779_s11 + $0x64] sm:$0xf0]  ;;  %v2079_v46 = vld [vmem:[%s2779_s11 + $0x58] sm:$0xf]  ;;  %v2140_v33 = vor.u32 %v2539_v25, %v2139_v24  ;;  %v2551_v25 = vld [vmem:[%s2779_s11 + $0x144] sm:$0xf] }
  0x3d   : > { %1393 = vmatpush.bf16.msrb.mxu2 %v2610_v43  ;;  %1284 = vmatmul.bf16.gmra.mxu3 %v2292_v47  ;;  %v2068_v43 = vor.u32 %v2520_v39, %v2067_v38  ;;  %v2524_v47 = vld [vmem:[%s2779_s11 + $0x68] sm:$0xf0] }
  0x3e   : > { %1482 = vmatpush.bf16.msrb.mxu3 %v2618_v44  ;;  %1224 = vmatmul.bf16.gmra.mxu0 %v2052_v48  ;;  %v2521_v44 = vld [vmem:[%s2779_s11 + $0x54] sm:$0xf]  ;;  %v2522_v48 = vld [vmem:[%s2779_s11 + $0x5c] sm:$0xf]  ;;  %v2080_v53 = vor.u32 %v2524_v47, %v2079_v46  ;;  %v2161_v47 = vld [vmem:[%s2779_s11 + $0x10c] sm:$0xf0] }
  0x3f   : > { %1304 = vmatpush.bf16.msrb.mxu1 %v2602_v49  ;;  %v2081_v49 = vld [vmem:[%s2779_s11 + $0x6c] sm:$0xf0]  ;;  %v2542_v46 = vld [vmem:[%s2779_s11 + $0xfc] sm:$0xf] }
  0x41   : > { %1394 = vmatpush.bf16.msrb.mxu2 %v2609_v50  ;;  %v2087_v50 = vld [vmem:[%s2779_s11 + $0x60] sm:$0xf] }
  0x42   : > { %1483 = vmatpush.bf16.msrb.mxu3 %v2617_v51  ;;  %v2525_v51 = vld [vmem:[%s2779_s11 + $0x70] sm:$0xf0] }
  0x43   : > { %1305 = vmatpush.bf16.msrb.mxu1 %v2601_v52  ;;  %v2076_v52 = vor.u32 %v2521_v44, %v2073_v45  ;;  %v2159_v44 = vld [vmem:[%s2779_s11 + $0xf8] sm:$0xf]  ;;  %v2544_v45 = vld [vmem:[%s2779_s11 + $0x108] sm:$0xf0] }
  0x45   : > { %1395 = vmatpush.bf16.msrb.mxu2 %v2608_v54  ;;  %v2084_v54 = vor.u32 %v2522_v48, %v2081_v49  ;;  %v2167_v48 = vld [vmem:[%s2779_s11 + $0x100] sm:$0xf]  ;;  %v2545_v49 = vld [vmem:[%s2779_s11 + $0x110] sm:$0xf0] }
  0x46   : > { %1484 = vmatpush.bf16.msrb.mxu3 %v2616_v55  ;;  %v2088_v55 = vor.u32 %v2525_v51, %v2087_v50 }
  0x47   : > { %1306 = vmatpush.bf16.msrb.mxu1 %v2600_v56  ;;  %v2526_v56 = vld [vmem:[%s2779_s11 + $0x7c] sm:$0xf] }
  0x49   : > { %1396 = vmatpush.bf16.msrb.mxu2 %v2607_v57  ;;  %v2093_v57 = vld [vmem:[%s2779_s11 + $0x8c] sm:$0xf0] }
  0x4a   : > { %1485 = vmatpush.bf16.msrb.mxu3 %v2615_v58  ;;  %v2099_v58 = vld [vmem:[%s2779_s11 + $0x80] sm:$0xf]  ;;  %v2096_v0 = vor.u32 %v2526_v56, %v2093_v57  ;;  %v2168_v56 = vor.u32 %v2545_v49, %v2167_v48 }
  0x4b   : > { %1307 = vmatpush.bf16.msrb.mxu1 %v2599_v3  ;;  %v2100_v1 = vor.u32 %v2529_v59, %v2099_v58  ;;  %v2108_v3 = vor.u32 %v2530_v63, %v2107_v62  ;;  %v2705_v59 = vmov 0.0   ;;  %v2546_v63 = vld [vmem:[%s2779_s11 + $0x11c] sm:$0xf] }
  0x4c   : > { %1249 = vmatmul.bf16.gmra.mxu1 %v2152_v4  ;;  %1269 = vmatmul.bf16.gmra.mxu2 %v2232_v5  ;;  %v2531_v4 = vld [vmem:[%s2779_s11 + $0xa4] sm:$0xf]  ;;  %v2113_v5 = vld [vmem:[%s2779_s11 + $0xb4] sm:$0xf0]  ;;  %314 = vst.msk [vmem:[#allocation2] sm:$0xff] %vm313_vm0, %v2705_v59 }
  0x4d   : > { %1289 = vmatmul.bf16.gmra.mxu3 %v2312_v6  ;;  %v2119_v6 = vld [vmem:[%s2779_s11 + $0xa8] sm:$0xf]  ;;  %v2116_v12 = vor.u32 %v2531_v4, %v2113_v5  ;;  %315 = vst.msk [vmem:[#allocation2 + $0x8] sm:$0xff] %vm313_vm0, %v2705_v59  ;;  %v2181_v4 = vld [vmem:[%s2779_s11 + $0x134] sm:$0xf0] }
  0x4e   : > { %1229 = vmatmul.bf16.gmra.mxu0 %v2072_v7  ;;  %v2534_v7 = vld [vmem:[%s2779_s11 + $0xb8] sm:$0xf0]  ;;  %316 = vst.msk [vmem:[#allocation2 + $0x10] sm:$0xff] %vm313_vm0, %v2705_v59  ;;  %v2187_v5 = vld [vmem:[%s2779_s11 + $0x128] sm:$0xf] }
  0x4f   : > { %v2120_v13 = vor.u32 %v2534_v7, %v2119_v6  ;;  %317 = vst.msk [vmem:[#allocation2 + $0x18] sm:$0xff] %vm313_vm0, %v2705_v59  ;;  %v2550_v6 = vld [vmem:[%s2779_s11 + $0x138] sm:$0xf0] }
  0x50   : > { %318 = vst.msk [vmem:[#allocation2 + $0x20] sm:$0xff] %vm313_vm0, %v2705_v59 }
  0x51   : > { %319 = vst.msk [vmem:[#allocation2 + $0x28] sm:$0xff] %vm313_vm0, %v2705_v59 }
  0x52   : > { %320 = vst.msk [vmem:[#allocation2 + $0x30] sm:$0xff] %vm313_vm0, %v2705_v59 }
  0x53   : > { %321 = vst.msk [vmem:[#allocation2 + $0x38] sm:$0xff] %vm313_vm0, %v2705_v59 }
  0x54   : > { %322 = vst.msk [vmem:[#allocation2 + $0x40] sm:$0xff] %vm313_vm0, %v2705_v59 }
  0x55   : > { %323 = vst.msk [vmem:[#allocation2 + $0x48] sm:$0xff] %vm313_vm0, %v2705_v59 }
  0x56   : > { %324 = vst.msk [vmem:[#allocation2 + $0x50] sm:$0xff] %vm313_vm0, %v2705_v59 }
  0x57   : > { %325 = vst.msk [vmem:[#allocation2 + $0x58] sm:$0xff] %vm313_vm0, %v2705_v59 }
  0x58   : > { %326 = vst.msk [vmem:[#allocation2 + $0x60] sm:$0xff] %vm313_vm0, %v2705_v59 }
  0x59   : > { %327 = vst.msk [vmem:[#allocation2 + $0x68] sm:$0xff] %vm313_vm0, %v2705_v59 }
  0x5a   : > { %328 = vst.msk [vmem:[#allocation2 + $0x70] sm:$0xff] %vm313_vm0, %v2705_v59 }
  0x5b   : > { %329 = vst.msk [vmem:[#allocation2 + $0x78] sm:$0xff] %vm313_vm0, %v2705_v59 }
  0x5c   : > { %1254 = vmatmul.bf16.gmra.mxu1 %v2172_v16  ;;  %1274 = vmatmul.bf16.gmra.mxu2 %v2252_v17  ;;  %v2128_v16 = vor.u32 %v2535_v11, %v2127_v10  ;;  %330 = vst.msk [vmem:[#allocation2 + $0x80] sm:$0xff] %vm313_vm0, %v2705_v59 }
  0x5d   : > { %1294 = vmatmul.bf16.gmra.mxu3 %v2332_v18  ;;  %331 = vst.msk [vmem:[#allocation2 + $0x88] sm:$0xff] %vm313_vm0, %v2705_v59 }
  0x5e   : > { %1234 = vmatmul.bf16.gmra.mxu0 %v2092_v19  ;;  %332 = vst.msk [vmem:[#allocation2 + $0x90] sm:$0xff] %vm313_vm0, %v2705_v59 }
  0x5f   : > { %333 = vst.msk [vmem:[#allocation2 + $0x98] sm:$0xff] %vm313_vm0, %v2705_v59 }
  0x60   : > { %334 = vst.msk [vmem:[#allocation2 + $0xa0] sm:$0xff] %vm313_vm0, %v2705_v59 }
  0x61   : > { %335 = vst.msk [vmem:[#allocation2 + $0xa8] sm:$0xff] %vm313_vm0, %v2705_v59 }
  0x62   : > { %336 = vst.msk [vmem:[#allocation2 + $0xb0] sm:$0xff] %vm313_vm0, %v2705_v59 }
  0x63   : > { %337 = vst.msk [vmem:[#allocation2 + $0xb8] sm:$0xff] %vm313_vm0, %v2705_v59 }
  0x64   : > { %338 = vst.msk [vmem:[#allocation2 + $0xc0] sm:$0xff] %vm313_vm0, %v2705_v59 }
  0x65   : > { %339 = vst.msk [vmem:[#allocation2 + $0xc8] sm:$0xff] %vm313_vm0, %v2705_v59 }
  0x66   : > { %340 = vst.msk [vmem:[#allocation2 + $0xd0] sm:$0xff] %vm313_vm0, %v2705_v59 }
  0x67   : > { %341 = vst.msk [vmem:[#allocation2 + $0xd8] sm:$0xff] %vm313_vm0, %v2705_v59 }
  0x68   : > { %342 = vst.msk [vmem:[#allocation2 + $0xe0] sm:$0xff] %vm313_vm0, %v2705_v59 }
  0x69   : > { %343 = vst.msk [vmem:[#allocation2 + $0xe8] sm:$0xff] %vm313_vm0, %v2705_v59 }
  0x6a   : > { %344 = vst.msk [vmem:[#allocation2 + $0xf0] sm:$0xff] %vm313_vm0, %v2705_v59 }
  0x6b   : > { %345 = vst.msk [vmem:[#allocation2 + $0xf8] sm:$0xff] %vm313_vm0, %v2705_v59  ;;  %v2221_v59 = vld [vmem:[%s2779_s11 + $0x184] sm:$0xf0] }
  0x6c   : > { %1308 = vmatmul.bf16.vlgmr.msrb.gmra.mxu1 %v2036_v28  ;;  %1397 = vmatmul.bf16.vlgmr.msrb.gmra.mxu2 %v2040_v29  ;;  %v2147_v28 = vld [vmem:[%s2779_s11 + $0xd8] sm:$0xf]  ;;  %v2540_v29 = vld [vmem:[%s2779_s11 + $0xe8] sm:$0xf0] }
  0x6d   : > { %1486 = vmatmul.bf16.vlgmr.msrb.gmra.mxu3 %v2044_v30  ;;  %v2148_v36 = vor.u32 %v2540_v29, %v2147_v28  ;;  %v2554_v28 = vld [vmem:[%s2779_s11 + $0x158] sm:$0xf0]  ;;  %v2552_v29 = vld [vmem:[%s2779_s11 + $0x14c] sm:$0xf] }
  0x6e   : > { %2493 = vmatmul.msk.bf16.vlgmr.msrb.gmra.mxu0 %vm313_vm0, %v2048_v31 }
  0x7c   : > { %1313 = vmatmul.bf16.gmra.mxu1 %v2056_v40  ;;  %1402 = vmatmul.bf16.gmra.mxu2 %v2060_v41 }
  0x7d   : > { %1491 = vmatmul.bf16.gmra.mxu3 %v2064_v42  ;;  %v2541_v42 = vld [vmem:[%s2779_s11 + $0xf4] sm:$0xf] }
  0x7e   : > { %2494 = vmatmul.msk.bf16.gmra.mxu0 %vm313_vm0, %v2068_v43  ;;  %v2153_v43 = vld [vmem:[%s2779_s11 + $0x104] sm:$0xf0] }
  0x8c   : > { %1318 = vmatmul.bf16.gmra.mxu1 %v2076_v52  ;;  %1407 = vmatmul.bf16.gmra.mxu2 %v2080_v53  ;;  %v2156_v52 = vor.u32 %v2541_v42, %v2153_v43  ;;  %v2160_v53 = vor.u32 %v2544_v45, %v2159_v44  ;;  %v2196_v43 = vor.u32 %v2551_v25, %v2193_v26 }
  0x8d   : > { %1496 = vmatmul.bf16.gmra.mxu3 %v2084_v54  ;;  %v2200_v44 = vor.u32 %v2554_v28, %v2199_v27 }
  0x8e   : > { %2495 = vmatmul.msk.bf16.gmra.mxu0 %vm313_vm0, %v2088_v55  ;;  %v2164_v55 = vor.u32 %v2542_v46, %v2161_v47 }
  0x9c   : > { %1323 = vmatmul.bf16.gmra.mxu1 %v2096_v0  ;;  %1412 = vmatmul.bf16.gmra.mxu2 %v2100_v1  ;;  %v2173_v0 = vld [vmem:[%s2779_s11 + $0x12c] sm:$0xf0]  ;;  %v2179_v1 = vld [vmem:[%s2779_s11 + $0x120] sm:$0xf] }
  0x9d   : > { %1501 = vmatmul.bf16.gmra.mxu3 %v2104_v2  ;;  %v2549_v2 = vld [vmem:[%s2779_s11 + $0x130] sm:$0xf0]  ;;  %v2176_v9 = vor.u32 %v2546_v63, %v2173_v0 }
  0x9e   : > { %2496 = vmatmul.msk.bf16.gmra.mxu0 %vm313_vm0, %v2108_v3  ;;  %v2547_v3 = vld [vmem:[%s2779_s11 + $0x124] sm:$0xf]  ;;  %v2180_v10 = vor.u32 %v2549_v2, %v2179_v1 }
  0x9f   : > { %v346_v1 = vld [vmem:[#allocation2] sm:$0xff] }
  0xa9   : > { %v2944_v14 = vpop.f32.mrf.mxu1 }
  0xab   : > { %v2946_v17 = vpop.f32.mrf.mxu0 }
  0xac   : > { %1328 = vmatmul.bf16.gmra.mxu1 %v2116_v12  ;;  %1417 = vmatmul.bf16.gmra.mxu2 %v2120_v13  ;;  %v2184_v12 = vor.u32 %v2547_v3, %v2181_v4  ;;  %v2188_v13 = vor.u32 %v2550_v6, %v2187_v5  ;;  %v2556_v3 = vld [vmem:[%s2779_s11 + $0x16c] sm:$0xf]  ;;  %v2213_v4 = vld [vmem:[%s2779_s11 + $0x17c] sm:$0xf0]  ;;  %v2219_v5 = vld [vmem:[%s2779_s11 + $0x170] sm:$0xf] }
  0xad   : > { %1506 = vmatmul.bf16.gmra.mxu3 %v2124_v15  ;;  %v2559_v6 = vld [vmem:[%s2779_s11 + $0x180] sm:$0xf0]  ;;  %v2216_v28 = vor.u32 %v2556_v3, %v2213_v4  ;;  %v348_v3 = vld [vmem:[#allocation2 + $0x10] sm:$0xff] }
  0xae   : > { %2497 = vmatmul.msk.bf16.gmra.mxu0 %vm313_vm0, %v2128_v16  ;;  %v2561_v4 = vld [vmem:[%s2779_s11 + $0x194] sm:$0xf] }
  0xaf   : > { %v2949_v18 = vpop.f32.mrf.mxu2 }
  0xb0   : > { %v2951_v19 = vpop.f32.mrf.mxu3 }
  0xb1   : > { %v2953_v20 = vpop.f32.mrf.mxu1 }
  0xb3   : > { %v2955_v21 = vpop.f32.mrf.mxu0 }
  0xb7   : > { %v2965_v30 = vpop.f32.mrf.mxu2 }
  0xb8   : > { %v2967_v31 = vpop.f32.mrf.mxu3 }
  0xb9   : > { %v2969_v34 = vpop.f32.mrf.mxu1 }
  0xbb   : > { %v2971_v37 = vpop.f32.mrf.mxu0 }
  0xbc   : > { %1333 = vmatmul.bf16.gmra.mxu1 %v2136_v32  ;;  %1422 = vmatmul.bf16.gmra.mxu2 %v2140_v33  ;;  %v2201_v32 = vld [vmem:[%s2779_s11 + $0x15c] sm:$0xf0]  ;;  %v2207_v33 = vld [vmem:[%s2779_s11 + $0x150] sm:$0xf] }
  0xbd   : > { %1511 = vmatmul.bf16.gmra.mxu3 %v2144_v35  ;;  %v2555_v35 = vld [vmem:[%s2779_s11 + $0x160] sm:$0xf0]  ;;  %v2204_v46 = vor.u32 %v2552_v29, %v2201_v32  ;;  %v2220_v29 = vor.u32 %v2559_v6, %v2219_v5 }
  0xbe   : > { %2498 = vmatmul.msk.bf16.gmra.mxu0 %vm313_vm0, %v2148_v36  ;;  %v2208_v47 = vor.u32 %v2555_v35, %v2207_v33 }
  0xbf   : > { %v2974_v38 = vpop.f32.mrf.mxu2 }
  0xc0   : > { %v2976_v39 = vpop.f32.mrf.mxu3 }
  0xc1   : > { %v2978_v40 = vpop.f32.mrf.mxu1 }
  0xc3   : > { %v2980_v41 = vpop.f32.mrf.mxu0 }
  0xc7   : > { %v2990_v50 = vpop.f32.mrf.mxu2 }
  0xc8   : > { %v2992_v51 = vpop.f32.mrf.mxu3 }
  0xc9   : > { %v2994_v54 = vpop.f32.mrf.mxu1 }
  0xcb   : > { %v2996_v57 = vpop.f32.mrf.mxu0 }
  0xcc   : > { %1338 = vmatmul.bf16.gmra.mxu1 %v2156_v52  ;;  %1427 = vmatmul.bf16.gmra.mxu2 %v2160_v53 }
  0xcd   : > { %1516 = vmatmul.bf16.gmra.mxu3 %v2164_v55 }
  0xce   : > { %2499 = vmatmul.msk.bf16.gmra.mxu0 %vm313_vm0, %v2168_v56 }
  0xcf   : > { %v2999_v58 = vpop.f32.mrf.mxu2 }
  0xd0   : > { %v3003_v60 = vpop.f32.mrf.mxu3 }
  0xd1   : > { %v3007_v61 = vpop.f32.mrf.mxu1 }
  0xd3   : > { %v3011_v62 = vpop.f32.mrf.mxu0 }
  0xd7   : > { %v3031_v7 = vpop.f32.mrf.mxu2 }
  0xd8   : > { %v3035_v8 = vpop.f32.mrf.mxu3 }
  0xd9   : > { %v3039_v11 = vpop.f32.mrf.mxu1 }
  0xdb   : > { %v3043_v15 = vpop.f32.mrf.mxu0 }
  0xdc   : > { %1343 = vmatmul.bf16.gmra.mxu1 %v2176_v9  ;;  %1432 = vmatmul.bf16.gmra.mxu2 %v2180_v10  ;;  %v2557_v9 = vld [vmem:[%s2779_s11 + $0x174] sm:$0xf] }
  0xdd   : > { %1521 = vmatmul.bf16.gmra.mxu3 %v2184_v12  ;;  %v2227_v12 = vld [vmem:[%s2779_s11 + $0x178] sm:$0xf]  ;;  %v2224_v33 = vor.u32 %v2557_v9, %v2221_v59  ;;  %v2233_v9 = vld [vmem:[%s2779_s11 + $0x1a4] sm:$0xf0]  ;;  %v2562_v59 = vld [vmem:[%s2779_s11 + $0x19c] sm:$0xf] }
  0xde   : > { %2500 = vmatmul.msk.bf16.gmra.mxu0 %vm313_vm0, %v2188_v13  ;;  %v2560_v13 = vld [vmem:[%s2779_s11 + $0x188] sm:$0xf0] }
  0xdf   : > { %v3056_v16 = vpop.f32.mrf.mxu2  ;;  %v2228_v35 = vor.u32 %v2560_v13, %v2227_v12  ;;  %v2241_v12 = vld [vmem:[%s2779_s11 + $0x1ac] sm:$0xf0] }
  0xe0   : > { %v3060_v22 = vpop.f32.mrf.mxu3 }
  0xe1   : > { %v3064_v23 = vpop.f32.mrf.mxu1 }
  0xe3   : > { %v3068_v24 = vpop.f32.mrf.mxu0 }
  0xe7   : > { %v3088_v36 = vpop.f32.mrf.mxu2 }
  0xe8   : > { %v3092_v42 = vpop.f32.mrf.mxu3 }
  0xe9   : > { %v1309_v45 = vpop.f32.mrf.mxu1 }
  0xea   : > { %v1310_v49 = vadd.f32 %v1309_v45, %v2946_v17  ;;  %v347_v45 = vld [vmem:[#allocation2 + $0x8] sm:$0xff] }
  0xeb   : > { %v1576_v48 = vpop.f32.mrf.mxu0 }
  0xec   : > { %1348 = vmatmul.bf16.gmra.mxu1 %v2196_v43  ;;  %1437 = vmatmul.bf16.gmra.mxu2 %v2200_v44 }
  0xed   : > { %1526 = vmatmul.bf16.gmra.mxu3 %v2204_v46 }
  0xee   : > { %2501 = vmatmul.msk.bf16.gmra.mxu0 %vm313_vm0, %v2208_v47  ;;  %v3129_v47 = vld [vmem:[%s3402_s3] ss:$0 sm:$0xff] }
  0xef   : > { %v1398_v52 = vpop.f32.mrf.mxu2 }
  0xf0   : > { %v1399_v53 = vadd.f32 %v1398_v52, %v1310_v49  ;;  %v1487_v55 = vpop.f32.mrf.mxu3 }
  0xf1   : > { %v1311_v56 = vpop.f32.mrf.mxu1 }
  0xf2   : > { %v1488_v63 = vadd.f32 %v1487_v55, %v1399_v53  ;;  %v1312_v10 = vadd.f32 %v1311_v56, %v2955_v21  ;;  %v3123_v21 = vld [vmem:[%s3401_s2] ss:$0 sm:$0xff] }
  0xf3   : > { %v1578_v0 = vpop.f32.mrf.mxu0 }
  0xf4   : > { %v1577_v2 = vadd.f32 %v1576_v48, %v1488_v63 }
  0xf6   : > { %v1656_v17 = vadd.f32 %v1577_v2, %v346_v1 }
  0xf7   : > { %v1400_v25 = vpop.f32.mrf.mxu2 }
  0xf8   : > { %1688 = vst.msk [vmem:[#allocation2] sm:$0xff] %vm313_vm0, %v1656_v17  ;;  %v1401_v26 = vadd.f32 %v1400_v25, %v1312_v10  ;;  %v1489_v27 = vpop.f32.mrf.mxu3  ;;  %v2239_v17 = vld [vmem:[%s2779_s11 + $0x198] sm:$0xf]  ;;  %v2564_v10 = vld [vmem:[%s2779_s11 + $0x1a8] sm:$0xf0] }
  0xf9   : > { %v1314_v32 = vpop.f32.mrf.mxu1 }
  0xfa   : > { %v1490_v43 = vadd.f32 %v1489_v27, %v1401_v26  ;;  %v1315_v49 = vadd.f32 %v1314_v32, %v2971_v37  ;;  %v2247_v26 = vld [vmem:[%s2779_s11 + $0x1a0] sm:$0xf]  ;;  %v2565_v27 = vld [vmem:[%s2779_s11 + $0x1b0] sm:$0xf0] }
  0xfb   : > { %v1581_v44 = vpop.f32.mrf.mxu0 }
  0xfc   : > { %v1579_v46 = vadd.f32 %v1578_v0, %v1490_v43  ;;  %1353 = vmatmul.bf16.gmra.mxu1 %v2216_v28  ;;  %1442 = vmatmul.bf16.gmra.mxu2 %v2220_v29  ;;  %v2236_v43 = vor.u32 %v2561_v4, %v2233_v9 }
  0xfd   : > { %1531 = vmatmul.bf16.gmra.mxu3 %v2224_v33 }
  0xfe   : > { %2502 = vmatmul.msk.bf16.gmra.mxu0 %vm313_vm0, %v2228_v35  ;;  %v1657_v48 = vadd.f32 %v1579_v46, %v347_v45  ;;  %v2244_v46 = vor.u32 %v2562_v59, %v2241_v12 }
  0xff   : > { %v1723_v52 = vld [vmem:[#allocation2] sm:$0xff]  ;;  %v1403_v53 = vpop.f32.mrf.mxu2 }
 0x100   : > { %v1759_v55 = vmul.f32 %v3123_v21, %v1723_v52  ;;  %1689 = vst.msk [vmem:[#allocation2 + $0x8] sm:$0xff] %vm313_vm0, %v1657_v48  ;;  %v1404_v56 = vadd.f32 %v1403_v53, %v1315_v49  ;;  %v1492_v63 = vpop.f32.mrf.mxu3  ;;  %v2248_v48 = vor.u32 %v2565_v27, %v2247_v26  ;;  %v349_v53 = vld [vmem:[#allocation2 + $0x18] sm:$0xff]  ;;  %v2569_v26 = vld [vmem:[%s2779_s11 + $0x1d0] sm:$0xf0]  ;;  %v2567_v27 = vld [vmem:[%s2779_s11 + $0x1c4] sm:$0xf] }
 0x101   : > { %v1316_v0 = vpop.f32.mrf.mxu1 }
 0x102   : > { %v1795_v1 = vadd.f32 %v3129_v47, %v1759_v55  ;;  %v1493_v2 = vadd.f32 %v1492_v63, %v1404_v56  ;;  %v1317_v25 = vadd.f32 %v1316_v0, %v2980_v41 }
 0x103   : > { %v1583_v37 = vpop.f32.mrf.mxu0 }
 0x104   : > { %v1827_v5 = vmax.f32 %v1795_v1, 0.0  ;;  %v1582_v6 = vadd.f32 %v1581_v44, %v1493_v2  ;;  %v2240_v44 = vor.u32 %v2564_v10, %v2239_v17  ;;  %v350_v17 = vld [vmem:[#allocation2 + $0x20] sm:$0xff]  ;;  %v2566_v10 = vld [vmem:[%s2779_s11 + $0x1bc] sm:$0xf] }
 0x106   : > { %1859 = vst.msk [vmem:[%s3139_s25] sm:$0xff] %vm313_vm0, %v1827_v5  ;;  %v1658_v13 = vadd.f32 %v1582_v6, %v348_v3 }
 0x107   : > { %v1724_v28 = vld [vmem:[#allocation2 + $0x8] sm:$0xff]  ;;  %v1405_v29 = vpop.f32.mrf.mxu2 }
 0x108   : > { %v1760_v32 = vmul.f32 %v3123_v21, %v1724_v28  ;;  %1690 = vst.msk [vmem:[#allocation2 + $0x10] sm:$0xff] %vm313_vm0, %v1658_v13  ;;  %v1406_v33 = vadd.f32 %v1405_v29, %v1317_v25  ;;  %v1494_v35 = vpop.f32.mrf.mxu3  ;;  %v2253_v13 = vld [vmem:[%s2779_s11 + $0x1cc] sm:$0xf0]  ;;  %v2259_v25 = vld [vmem:[%s2779_s11 + $0x1c0] sm:$0xf] }
 0x109   : > { %v1319_v45 = vpop.f32.mrf.mxu1  ;;  %v2261_v28 = vld [vmem:[%s2779_s11 + $0x1d4] sm:$0xf0] }
 0x10a   : > { %v1796_v49 = vadd.f32 %v3129_v47, %v1760_v32  ;;  %v1495_v52 = vadd.f32 %v1494_v35, %v1406_v33  ;;  %v1320_v0 = vadd.f32 %v1319_v45, %v2996_v57  ;;  %v2267_v33 = vld [vmem:[%s2779_s11 + $0x1c8] sm:$0xf]  ;;  %v2570_v35 = vld [vmem:[%s2779_s11 + $0x1d8] sm:$0xf0] }
 0x10b   : > { %v1586_v41 = vpop.f32.mrf.mxu0 }
 0x10c   : > { %v1828_v55 = vmax.f32 %v1796_v49, 0.0  ;;  %v1584_v56 = vadd.f32 %v1583_v37, %v1495_v52  ;;  %1358 = vmatmul.bf16.gmra.mxu1 %v2236_v43  ;;  %1447 = vmatmul.bf16.gmra.mxu2 %v2240_v44  ;;  %v2256_v49 = vor.u32 %v2566_v10, %v2253_v13  ;;  %v2260_v52 = vor.u32 %v2569_v26, %v2259_v25  ;;  %v2571_v13 = vld [vmem:[%s2779_s11 + $0x1e4] sm:$0xf] }
 0x10d   : > { %1536 = vmatmul.bf16.gmra.mxu3 %v2244_v46 }
 0x10e   : > { %2503 = vmatmul.msk.bf16.gmra.mxu0 %vm313_vm0, %v2248_v48  ;;  %1860 = vst.msk [vmem:[%s3139_s25 + $0x8] sm:$0xff] %vm313_vm0, %v1828_v55  ;;  %v1659_v63 = vadd.f32 %v1584_v56, %v349_v53  ;;  %v2264_v53 = vor.u32 %v2567_v27, %v2261_v28  ;;  %v2268_v55 = vor.u32 %v2570_v35, %v2267_v33  ;;  %v2273_v27 = vld [vmem:[%s2779_s11 + $0x1f4] sm:$0xf0]  ;;  %v2279_v28 = vld [vmem:[%s2779_s11 + $0x1e8] sm:$0xf] }
 0x10f   : > { %v1725_v1 = vld [vmem:[#allocation2 + $0x10] sm:$0xff]  ;;  %v1408_v2 = vpop.f32.mrf.mxu2  ;;  %v2281_v33 = vld [vmem:[%s2779_s11 + $0x1fc] sm:$0xf0] }
 0x110   : > { %v1761_v3 = vmul.f32 %v3123_v21, %v1725_v1  ;;  %1691 = vst.msk [vmem:[#allocation2 + $0x18] sm:$0xff] %vm313_vm0, %v1659_v63  ;;  %v1409_v37 = vadd.f32 %v1408_v2, %v1320_v0  ;;  %v1497_v4 = vpop.f32.mrf.mxu3  ;;  %v351_v0 = vld [vmem:[#allocation2 + $0x28] sm:$0xff] }
 0x111   : > { %v1321_v5 = vpop.f32.mrf.mxu1 }
 0x112   : > { %v1797_v6 = vadd.f32 %v3129_v47, %v1761_v3  ;;  %v1498_v9 = vadd.f32 %v1497_v4, %v1409_v37  ;;  %v1322_v32 = vadd.f32 %v1321_v5, %v3011_v62 }
 0x113   : > { %v1588_v57 = vpop.f32.mrf.mxu0 }
 0x114   : > { %v1829_v59 = vmax.f32 %v1797_v6, 0.0  ;;  %v1587_v12 = vadd.f32 %v1586_v41, %v1498_v9 }
 0x116   : > { %1861 = vst.msk [vmem:[%s3139_s25 + $0x10] sm:$0xff] %vm313_vm0, %v1829_v59  ;;  %v1660_v29 = vadd.f32 %v1587_v12, %v350_v17  ;;  %v352_v12 = vld [vmem:[#allocation2 + $0x30] sm:$0xff] }
 0x117   : > { %v1726_v43 = vld [vmem:[#allocation2 + $0x18] sm:$0xff]  ;;  %v1410_v44 = vpop.f32.mrf.mxu2 }
 0x118   : > { %v1762_v45 = vmul.f32 %v3123_v21, %v1726_v43  ;;  %1692 = vst.msk [vmem:[#allocation2 + $0x20] sm:$0xff] %vm313_vm0, %v1660_v29  ;;  %v1411_v46 = vadd.f32 %v1410_v44, %v1322_v32  ;;  %v1499_v48 = vpop.f32.mrf.mxu3  ;;  %v2574_v29 = vld [vmem:[%s2779_s11 + $0x1f8] sm:$0xf0]  ;;  %v2572_v32 = vld [vmem:[%s2779_s11 + $0x1ec] sm:$0xf] }
 0x119   : > { %v1324_v41 = vpop.f32.mrf.mxu1  ;;  %v2287_v44 = vld [vmem:[%s2779_s11 + $0x1f0] sm:$0xf] }
 0x11a   : > { %v1798_v56 = vadd.f32 %v3129_v47, %v1762_v45  ;;  %v1500_v63 = vadd.f32 %v1499_v48, %v1411_v46  ;;  %v1325_v37 = vadd.f32 %v1324_v41, %v3043_v15  ;;  %v2575_v45 = vld [vmem:[%s2779_s11 + $0x200] sm:$0xf0] }
 0x11b   : > { %v1591_v62 = vpop.f32.mrf.mxu0 }
 0x11c   : > { %v1830_v1 = vmax.f32 %v1798_v56, 0.0  ;;  %v1589_v2 = vadd.f32 %v1588_v57, %v1500_v63  ;;  %1363 = vmatmul.bf16.gmra.mxu1 %v2256_v49  ;;  %1452 = vmatmul.bf16.gmra.mxu2 %v2260_v52  ;;  %v2284_v63 = vor.u32 %v2572_v32, %v2281_v33  ;;  %v2579_v32 = vld [vmem:[%s2779_s11 + $0x220] sm:$0xf0]  ;;  %v2577_v33 = vld [vmem:[%s2779_s11 + $0x214] sm:$0xf] }
 0x11d   : > { %1541 = vmatmul.bf16.gmra.mxu3 %v2264_v53  ;;  %v2276_v53 = vor.u32 %v2571_v13, %v2273_v27  ;;  %v354_v13 = vld [vmem:[#allocation2 + $0x40] sm:$0xff] }
 0x11e   : > { %2504 = vmatmul.msk.bf16.gmra.mxu0 %vm313_vm0, %v2268_v55  ;;  %1862 = vst.msk [vmem:[%s3139_s25 + $0x18] sm:$0xff] %vm313_vm0, %v1830_v1  ;;  %v1661_v3 = vadd.f32 %v1589_v2, %v351_v0  ;;  %v2280_v55 = vor.u32 %v2574_v29, %v2279_v28  ;;  %v353_v2 = vld [vmem:[#allocation2 + $0x38] sm:$0xff]  ;;  %v2293_v28 = vld [vmem:[%s2779_s11 + $0x21c] sm:$0xf0]  ;;  %v2299_v29 = vld [vmem:[%s2779_s11 + $0x210] sm:$0xf] }
 0x11f   : > { %v1727_v4 = vld [vmem:[#allocation2 + $0x20] sm:$0xff]  ;;  %v1413_v5 = vpop.f32.mrf.mxu2 }
 0x120   : > { %v1763_v6 = vmul.f32 %v3123_v21, %v1727_v4  ;;  %1693 = vst.msk [vmem:[#allocation2 + $0x28] sm:$0xff] %vm313_vm0, %v1661_v3  ;;  %v1414_v9 = vadd.f32 %v1413_v5, %v1325_v37  ;;  %v1502_v57 = vpop.f32.mrf.mxu3 }
 0x121   : > { %v1326_v17 = vpop.f32.mrf.mxu1 }
 0x122   : > { %v1799_v10 = vadd.f32 %v3129_v47, %v1763_v6  ;;  %v1503_v59 = vadd.f32 %v1502_v57, %v1414_v9  ;;  %v1327_v43 = vadd.f32 %v1326_v17, %v3068_v24 }
 0x123   : > { %v1593_v15 = vpop.f32.mrf.mxu0 }
 0x124   : > { %v1831_v25 = vmax.f32 %v1799_v10, 0.0  ;;  %v1592_v26 = vadd.f32 %v1591_v62, %v1503_v59  ;;  %v2288_v62 = vor.u32 %v2575_v45, %v2287_v44  ;;  %v2307_v45 = vld [vmem:[%s2779_s11 + $0x218] sm:$0xf] }
 0x126   : > { %1863 = vst.msk [vmem:[%s3139_s25 + $0x20] sm:$0xff] %vm313_vm0, %v1831_v25  ;;  %v1662_v35 = vadd.f32 %v1592_v26, %v352_v12  ;;  %v2576_v25 = vld [vmem:[%s2779_s11 + $0x20c] sm:$0xf] }
 0x127   : > { %v1728_v46 = vld [vmem:[#allocation2 + $0x28] sm:$0xff]  ;;  %v1415_v48 = vpop.f32.mrf.mxu2 }
 0x128   : > { %v1764_v49 = vmul.f32 %v3123_v21, %v1728_v46  ;;  %1694 = vst.msk [vmem:[#allocation2 + $0x30] sm:$0xff] %vm313_vm0, %v1662_v35  ;;  %v1416_v52 = vadd.f32 %v1415_v48, %v1327_v43  ;;  %v1504_v41 = vpop.f32.mrf.mxu3  ;;  %v2301_v35 = vld [vmem:[%s2779_s11 + $0x224] sm:$0xf0]  ;;  %v2580_v46 = vld [vmem:[%s2779_s11 + $0x228] sm:$0xf0] }
 0x129   : > { %v1329_v56 = vpop.f32.mrf.mxu1 }
 0x12a   : > { %v1800_v0 = vadd.f32 %v3129_v47, %v1764_v49  ;;  %v1505_v1 = vadd.f32 %v1504_v41, %v1416_v52  ;;  %v1330_v5 = vadd.f32 %v1329_v56, %v2944_v14  ;;  %v2300_v56 = vor.u32 %v2579_v32, %v2299_v29  ;;  %v2584_v29 = vld [vmem:[%s2779_s11 + $0x248] sm:$0xf0]  ;;  %v2582_v32 = vld [vmem:[%s2779_s11 + $0x23c] sm:$0xf] }
 0x12b   : > { %v1596_v24 = vpop.f32.mrf.mxu0 }
 0x12c   : > { %v1832_v3 = vmax.f32 %v1800_v0, 0.0  ;;  %v1594_v37 = vadd.f32 %v1593_v15, %v1505_v1  ;;  %1368 = vmatmul.bf16.gmra.mxu1 %v2276_v53  ;;  %1457 = vmatmul.bf16.gmra.mxu2 %v2280_v55  ;;  %v2296_v55 = vor.u32 %v2576_v25, %v2293_v28  ;;  %v2308_v0 = vor.u32 %v2580_v46, %v2307_v45  ;;  %v2319_v28 = vld [vmem:[%s2779_s11 + $0x238] sm:$0xf]  ;;  %v2585_v45 = vld [vmem:[%s2779_s11 + $0x250] sm:$0xf0] }
 0x12d   : > { %1546 = vmatmul.bf16.gmra.mxu3 %v2284_v63 }
 0x12e   : > { %2505 = vmatmul.msk.bf16.gmra.mxu0 %vm313_vm0, %v2288_v62  ;;  %1864 = vst.msk [vmem:[%s3139_s25 + $0x28] sm:$0xff] %vm313_vm0, %v1832_v3  ;;  %v1663_v4 = vadd.f32 %v1594_v37, %v353_v2  ;;  %v2304_v62 = vor.u32 %v2577_v33, %v2301_v35  ;;  %v355_v2 = vld [vmem:[#allocation2 + $0x48] sm:$0xff]  ;;  %v2321_v33 = vld [vmem:[%s2779_s11 + $0x24c] sm:$0xf0] }
 0x12f   : > { %v1729_v6 = vld [vmem:[#allocation2 + $0x30] sm:$0xff]  ;;  %v1418_v9 = vpop.f32.mrf.mxu2 }
 0x130   : > { %v1765_v57 = vmul.f32 %v3123_v21, %v1729_v6  ;;  %1695 = vst.msk [vmem:[#allocation2 + $0x38] sm:$0xff] %vm313_vm0, %v1663_v4  ;;  %v1419_v17 = vadd.f32 %v1418_v9, %v1330_v5  ;;  %v1507_v10 = vpop.f32.mrf.mxu3 }
 0x131   : > { %v1331_v59 = vpop.f32.mrf.mxu1 }
 0x132   : > { %v1801_v15 = vadd.f32 %v3129_v47, %v1765_v57  ;;  %v1508_v12 = vadd.f32 %v1507_v10, %v1419_v17  ;;  %v1332_v44 = vadd.f32 %v1331_v59, %v2953_v20 }
 0x133   : > { %v1598_v14 = vpop.f32.mrf.mxu0 }
 0x134   : > { %v1833_v26 = vmax.f32 %v1801_v15, 0.0  ;;  %v1597_v27 = vadd.f32 %v1596_v24, %v1508_v12 }
 0x136   : > { %1865 = vst.msk [vmem:[%s3139_s25 + $0x30] sm:$0xff] %vm313_vm0, %v1833_v26  ;;  %v1664_v43 = vadd.f32 %v1597_v27, %v354_v13  ;;  %v2581_v13 = vld [vmem:[%s2779_s11 + $0x234] sm:$0xf]  ;;  %v2313_v27 = vld [vmem:[%s2779_s11 + $0x244] sm:$0xf0] }
 0x137   : > { %v1730_v48 = vld [vmem:[#allocation2 + $0x38] sm:$0xff]  ;;  %v1420_v49 = vpop.f32.mrf.mxu2 }
 0x138   : > { %v1766_v52 = vmul.f32 %v3123_v21, %v1730_v48  ;;  %1696 = vst.msk [vmem:[#allocation2 + $0x40] sm:$0xff] %vm313_vm0, %v1664_v43  ;;  %v1421_v41 = vadd.f32 %v1420_v49, %v1332_v44  ;;  %v1509_v53 = vpop.f32.mrf.mxu3  ;;  %v2327_v44 = vld [vmem:[%s2779_s11 + $0x240] sm:$0xf] }
 0x139   : > { %v1334_v63 = vpop.f32.mrf.mxu1 }
 0x13a   : > { %v1802_v1 = vadd.f32 %v3129_v47, %v1766_v52  ;;  %v1510_v24 = vadd.f32 %v1509_v53, %v1421_v41  ;;  %v1335_v5 = vadd.f32 %v1334_v63, %v2969_v34  ;;  %v2316_v53 = vor.u32 %v2581_v13, %v2313_v27  ;;  %v2333_v13 = vld [vmem:[%s2779_s11 + $0x26c] sm:$0xf0]  ;;  %v2587_v27 = vld [vmem:[%s2779_s11 + $0x264] sm:$0xf] }
 0x13b   : > { %v1601_v20 = vpop.f32.mrf.mxu0  ;;  %v2324_v63 = vor.u32 %v2582_v32, %v2321_v33  ;;  %v2347_v33 = vld [vmem:[%s2779_s11 + $0x268] sm:$0xf] }
 0x13c   : > { %v1834_v3 = vmax.f32 %v1802_v1, 0.0  ;;  %v1599_v37 = vadd.f32 %v1598_v14, %v1510_v24  ;;  %1373 = vmatmul.bf16.gmra.mxu1 %v2296_v55  ;;  %1462 = vmatmul.bf16.gmra.mxu2 %v2300_v56  ;;  %v356_v14 = vld [vmem:[#allocation2 + $0x50] sm:$0xff]  ;;  %v2320_v55 = vor.u32 %v2584_v29, %v2319_v28  ;;  %v357_v24 = vld [vmem:[#allocation2 + $0x58] sm:$0xff] }
 0x13d   : > { %1551 = vmatmul.bf16.gmra.mxu3 %v2304_v62  ;;  %v2328_v62 = vor.u32 %v2585_v45, %v2327_v44  ;;  %v2341_v28 = vld [vmem:[%s2779_s11 + $0x274] sm:$0xf0] }
 0x13e   : > { %2506 = vmatmul.msk.bf16.gmra.mxu0 %vm313_vm0, %v2308_v0  ;;  %1866 = vst.msk [vmem:[%s3139_s25 + $0x38] sm:$0xff] %vm313_vm0, %v1834_v3  ;;  %v1665_v4 = vadd.f32 %v1599_v37, %v355_v2 }
 0x13f   : > { %v1731_v6 = vld [vmem:[#allocation2 + $0x40] sm:$0xff]  ;;  %v1423_v9 = vpop.f32.mrf.mxu2 }
 0x140   : > { %v1767_v57 = vmul.f32 %v3123_v21, %v1731_v6  ;;  %1697 = vst.msk [vmem:[#allocation2 + $0x48] sm:$0xff] %vm313_vm0, %v1665_v4  ;;  %v1424_v17 = vadd.f32 %v1423_v9, %v1335_v5  ;;  %v1512_v10 = vpop.f32.mrf.mxu3 }
 0x141   : > { %v1336_v59 = vpop.f32.mrf.mxu1 }
 0x142   : > { %v1803_v15 = vadd.f32 %v3129_v47, %v1767_v57  ;;  %v1513_v12 = vadd.f32 %v1512_v10, %v1424_v17  ;;  %v1337_v43 = vadd.f32 %v1336_v59, %v2978_v40 }
 0x143   : > { %v1603_v34 = vpop.f32.mrf.mxu0 }
 0x144   : > { %v1835_v25 = vmax.f32 %v1803_v15, 0.0  ;;  %v1602_v26 = vadd.f32 %v1601_v20, %v1513_v12  ;;  %v358_v15 = vld [vmem:[#allocation2 + $0x60] sm:$0xff]  ;;  %v2586_v12 = vld [vmem:[%s2779_s11 + $0x25c] sm:$0xf] }
 0x146   : > { %1867 = vst.msk [vmem:[%s3139_s25 + $0x40] sm:$0xff] %vm313_vm0, %v1835_v25  ;;  %v1666_v35 = vadd.f32 %v1602_v26, %v356_v14  ;;  %v2339_v25 = vld [vmem:[%s2779_s11 + $0x260] sm:$0xf]  ;;  %v2589_v26 = vld [vmem:[%s2779_s11 + $0x270] sm:$0xf0] }
 0x147   : > { %v1732_v46 = vld [vmem:[#allocation2 + $0x48] sm:$0xff]  ;;  %v1425_v48 = vpop.f32.mrf.mxu2 }
 0x148   : > { %v1768_v49 = vmul.f32 %v3123_v21, %v1732_v46  ;;  %1698 = vst.msk [vmem:[#allocation2 + $0x50] sm:$0xff] %vm313_vm0, %v1666_v35  ;;  %v1426_v52 = vadd.f32 %v1425_v48, %v1337_v43  ;;  %v1514_v41 = vpop.f32.mrf.mxu3  ;;  %v2590_v35 = vld [vmem:[%s2779_s11 + $0x278] sm:$0xf0] }
 0x149   : > { %v1339_v56 = vpop.f32.mrf.mxu1 }
 0x14a   : > { %v1804_v0 = vadd.f32 %v3129_v47, %v1768_v49  ;;  %v1515_v1 = vadd.f32 %v1514_v41, %v1426_v52  ;;  %v1340_v37 = vadd.f32 %v1339_v56, %v2994_v54  ;;  %v2336_v49 = vor.u32 %v2586_v12, %v2333_v13 }
 0x14b   : > { %v1606_v40 = vpop.f32.mrf.mxu0  ;;  %v2340_v52 = vor.u32 %v2589_v26, %v2339_v25 }
 0x14c   : > { %v1836_v20 = vmax.f32 %v1804_v0, 0.0  ;;  %v1604_v2 = vadd.f32 %v1603_v34, %v1515_v1  ;;  %1378 = vmatmul.bf16.gmra.mxu1 %v2316_v53  ;;  %1467 = vmatmul.bf16.gmra.mxu2 %v2320_v55  ;;  %v2344_v53 = vor.u32 %v2587_v27, %v2341_v28  ;;  %v2348_v55 = vor.u32 %v2590_v35, %v2347_v33 }
 0x14d   : > { %1556 = vmatmul.bf16.gmra.mxu3 %v2324_v63 }
 0x14e   : > { %2507 = vmatmul.msk.bf16.gmra.mxu0 %vm313_vm0, %v2328_v62  ;;  %1868 = vst.msk [vmem:[%s3139_s25 + $0x48] sm:$0xff] %vm313_vm0, %v1836_v20  ;;  %v1667_v3 = vadd.f32 %v1604_v2, %v357_v24  ;;  %v359_v62 = vld [vmem:[#allocation2 + $0x68] sm:$0xff] }
 0x14f   : > { %v1733_v4 = vld [vmem:[#allocation2 + $0x50] sm:$0xff]  ;;  %v1428_v5 = vpop.f32.mrf.mxu2 }
 0x150   : > { %v1769_v6 = vmul.f32 %v3123_v21, %v1733_v4  ;;  %1699 = vst.msk [vmem:[#allocation2 + $0x58] sm:$0xff] %vm313_vm0, %v1667_v3  ;;  %v1429_v9 = vadd.f32 %v1428_v5, %v1340_v37  ;;  %v1517_v57 = vpop.f32.mrf.mxu3 }
 0x151   : > { %v1341_v17 = vpop.f32.mrf.mxu1 }
 0x152   : > { %v1805_v10 = vadd.f32 %v3129_v47, %v1769_v6  ;;  %v1518_v59 = vadd.f32 %v1517_v57, %v1429_v9  ;;  %v1342_v32 = vadd.f32 %v1341_v17, %v3007_v61  ;;  %v360_v17 = vld [vmem:[#allocation2 + $0x70] sm:$0xff] }
 0x153   : > { %v1608_v54 = vpop.f32.mrf.mxu0 }
 0x154   : > { %v1837_v34 = vmax.f32 %v1805_v10, 0.0  ;;  %v1607_v14 = vadd.f32 %v1606_v40, %v1518_v59 }
 0x156   : > { %1869 = vst.msk [vmem:[%s3139_s25 + $0x50] sm:$0xff] %vm313_vm0, %v1837_v34  ;;  %v1668_v29 = vadd.f32 %v1607_v14, %v358_v15 }
 0x157   : > { %v1734_v43 = vld [vmem:[#allocation2 + $0x58] sm:$0xff]  ;;  %v1430_v44 = vpop.f32.mrf.mxu2 }
 0x158   : > { %v1770_v45 = vmul.f32 %v3123_v21, %v1734_v43  ;;  %1700 = vst.msk [vmem:[#allocation2 + $0x60] sm:$0xff] %vm313_vm0, %v1668_v29  ;;  %v1431_v46 = vadd.f32 %v1430_v44, %v1342_v32  ;;  %v1519_v48 = vpop.f32.mrf.mxu3  ;;  %v361_v29 = vld [vmem:[#allocation2 + $0x78] sm:$0xff] }
 0x159   : > { %v1344_v41 = vpop.f32.mrf.mxu1 }
 0x15a   : > { %v1806_v56 = vadd.f32 %v3129_v47, %v1770_v45  ;;  %v1520_v63 = vadd.f32 %v1519_v48, %v1431_v46  ;;  %v1345_v24 = vadd.f32 %v1344_v41, %v3039_v11 }
 0x15b   : > { %v1611_v61 = vpop.f32.mrf.mxu0 }
 0x15c   : > { %v1838_v0 = vmax.f32 %v1806_v56, 0.0  ;;  %v1609_v1 = vadd.f32 %v1608_v54, %v1520_v63  ;;  %1383 = vmatmul.bf16.gmra.mxu1 %v2336_v49  ;;  %1472 = vmatmul.bf16.gmra.mxu2 %v2340_v52 }
 0x15d   : > { %1561 = vmatmul.bf16.gmra.mxu3 %v2344_v53 }
 0x15e   : > { %2508 = vmatmul.msk.bf16.gmra.mxu0 %vm313_vm0, %v2348_v55  ;;  %1870 = vst.msk [vmem:[%s3139_s25 + $0x58] sm:$0xff] %vm313_vm0, %v1838_v0  ;;  %v1669_v40 = vadd.f32 %v1609_v1, %v359_v62  ;;  %v362_v55 = vld [vmem:[#allocation2 + $0x80] sm:$0xff] }
 0x15f   : > { %v1735_v20 = vld [vmem:[#allocation2 + $0x60] sm:$0xff]  ;;  %v1433_v2 = vpop.f32.mrf.mxu2 }
 0x160   : > { %v1771_v3 = vmul.f32 %v3123_v21, %v1735_v20  ;;  %1701 = vst.msk [vmem:[#allocation2 + $0x68] sm:$0xff] %vm313_vm0, %v1669_v40  ;;  %v1434_v37 = vadd.f32 %v1433_v2, %v1345_v24  ;;  %v1522_v4 = vpop.f32.mrf.mxu3 }
 0x161   : > { %v1346_v5 = vpop.f32.mrf.mxu1 }
 0x162   : > { %v1807_v6 = vadd.f32 %v3129_v47, %v1771_v3  ;;  %v1523_v9 = vadd.f32 %v1522_v4, %v1434_v37  ;;  %v1347_v54 = vadd.f32 %v1346_v5, %v3064_v23  ;;  %v363_v4 = vld [vmem:[#allocation2 + $0x88] sm:$0xff] }
 0x163   : > { %v1613_v57 = vpop.f32.mrf.mxu0 }
 0x164   : > { %v1839_v10 = vmax.f32 %v1807_v6, 0.0  ;;  %v1612_v59 = vadd.f32 %v1611_v61, %v1523_v9 }
 0x166   : > { %1871 = vst.msk [vmem:[%s3139_s25 + $0x60] sm:$0xff] %vm313_vm0, %v1839_v10  ;;  %v1670_v11 = vadd.f32 %v1612_v59, %v360_v17 }
 0x167   : > { %v1736_v15 = vld [vmem:[#allocation2 + $0x68] sm:$0xff]  ;;  %v1435_v12 = vpop.f32.mrf.mxu2 }
 0x168   : > { %v1772_v34 = vmul.f32 %v3123_v21, %v1736_v15  ;;  %1702 = vst.msk [vmem:[#allocation2 + $0x70] sm:$0xff] %vm313_vm0, %v1670_v11  ;;  %v1436_v14 = vadd.f32 %v1435_v12, %v1347_v54  ;;  %v1524_v13 = vpop.f32.mrf.mxu3 }
 0x169   : > { %v1349_v25 = vpop.f32.mrf.mxu1 }
 0x16a   : > { %v1808_v26 = vadd.f32 %v3129_v47, %v1772_v34  ;;  %v1525_v27 = vadd.f32 %v1524_v13, %v1436_v14  ;;  %v1350_v35 = vadd.f32 %v1349_v25, %v2949_v18  ;;  %v364_v14 = vld [vmem:[#allocation2 + $0x90] sm:$0xff] }
 0x16b   : > { %v1616_v28 = vpop.f32.mrf.mxu0 }
 0x16c   : > { %v1840_v32 = vmax.f32 %v1808_v26, 0.0  ;;  %v1614_v33 = vadd.f32 %v1613_v57, %v1525_v27 }
 0x16e   : > { %1872 = vst.msk [vmem:[%s3139_s25 + $0x68] sm:$0xff] %vm313_vm0, %v1840_v32  ;;  %v1671_v23 = vadd.f32 %v1614_v33, %v361_v29 }
 0x16f   : > { %v1737_v43 = vld [vmem:[#allocation2 + $0x70] sm:$0xff]  ;;  %v1438_v44 = vpop.f32.mrf.mxu2 }
 0x170   : > { %v1773_v45 = vmul.f32 %v3123_v21, %v1737_v43  ;;  %1703 = vst.msk [vmem:[#allocation2 + $0x78] sm:$0xff] %vm313_vm0, %v1671_v23  ;;  %v1439_v46 = vadd.f32 %v1438_v44, %v1350_v35  ;;  %v1527_v48 = vpop.f32.mrf.mxu3 }
 0x171   : > { %v1351_v49 = vpop.f32.mrf.mxu1 }
 0x172   : > { %v1809_v52 = vadd.f32 %v3129_v47, %v1773_v45  ;;  %v1528_v41 = vadd.f32 %v1527_v48, %v1439_v46  ;;  %v1352_v61 = vadd.f32 %v1351_v49, %v2965_v30  ;;  %v365_v45 = vld [vmem:[#allocation2 + $0x98] sm:$0xff] }
 0x173   : > { %v1618_v53 = vpop.f32.mrf.mxu0 }
 0x174   : > { %v1841_v56 = vmax.f32 %v1809_v52, 0.0  ;;  %v1617_v63 = vadd.f32 %v1616_v28, %v1528_v41 }
 0x176   : > { %1873 = vst.msk [vmem:[%s3139_s25 + $0x70] sm:$0xff] %vm313_vm0, %v1841_v56  ;;  %v1672_v18 = vadd.f32 %v1617_v63, %v362_v55 }
 0x177   : > { %v1738_v62 = vld [vmem:[#allocation2 + $0x78] sm:$0xff]  ;;  %v1440_v0 = vpop.f32.mrf.mxu2 }
 0x178   : > { %v1774_v1 = vmul.f32 %v3123_v21, %v1738_v62  ;;  %1704 = vst.msk [vmem:[#allocation2 + $0x80] sm:$0xff] %vm313_vm0, %v1672_v18  ;;  %v1441_v40 = vadd.f32 %v1440_v0, %v1352_v61  ;;  %v1529_v24 = vpop.f32.mrf.mxu3  ;;  %v366_v0 = vld [vmem:[#allocation2 + $0xa0] sm:$0xff] }
 0x179   : > { %v1354_v20 = vpop.f32.mrf.mxu1 }
 0x17a   : > { %v1810_v2 = vadd.f32 %v3129_v47, %v1774_v1  ;;  %v1530_v3 = vadd.f32 %v1529_v24, %v1441_v40  ;;  %v1355_v9 = vadd.f32 %v1354_v20, %v2974_v38 }
 0x17b   : > { %v1621_v37 = vpop.f32.mrf.mxu0 }
 0x17c   : > { %v1842_v5 = vmax.f32 %v1810_v2, 0.0  ;;  %v1619_v6 = vadd.f32 %v1618_v53, %v1530_v3 }
 0x17e   : > { %1874 = vst.msk [vmem:[%s3139_s25 + $0x78] sm:$0xff] %vm313_vm0, %v1842_v5  ;;  %v1673_v30 = vadd.f32 %v1619_v6, %v363_v4 }
 0x17f   : > { %v1739_v57 = vld [vmem:[#allocation2 + $0x80] sm:$0xff]  ;;  %v1443_v17 = vpop.f32.mrf.mxu2 }
 0x180   : > { %v1775_v10 = vmul.f32 %v3123_v21, %v1739_v57  ;;  %1705 = vst.msk [vmem:[#allocation2 + $0x88] sm:$0xff] %vm313_vm0, %v1673_v30  ;;  %v1444_v59 = vadd.f32 %v1443_v17, %v1355_v9  ;;  %v1532_v11 = vpop.f32.mrf.mxu3  ;;  %v367_v57 = vld [vmem:[#allocation2 + $0xa8] sm:$0xff] }
 0x181   : > { %v1356_v54 = vpop.f32.mrf.mxu1 }
 0x182   : > { %v1811_v15 = vadd.f32 %v3129_v47, %v1775_v10  ;;  %v1533_v12 = vadd.f32 %v1532_v11, %v1444_v59  ;;  %v1357_v26 = vadd.f32 %v1356_v54, %v2990_v50 }
 0x183   : > { %v1623_v34 = vpop.f32.mrf.mxu0 }
 0x184   : > { %v1843_v13 = vmax.f32 %v1811_v15, 0.0  ;;  %v1622_v25 = vadd.f32 %v1621_v37, %v1533_v12 }
 0x186   : > { %1875 = vst.msk [vmem:[%s3139_s25 + $0x80] sm:$0xff] %vm313_vm0, %v1843_v13  ;;  %v1674_v38 = vadd.f32 %v1622_v25, %v364_v14 }
 0x187   : > { %v1740_v27 = vld [vmem:[#allocation2 + $0x88] sm:$0xff]  ;;  %v1445_v28 = vpop.f32.mrf.mxu2 }
 0x188   : > { %v1776_v29 = vmul.f32 %v3123_v21, %v1740_v27  ;;  %1706 = vst.msk [vmem:[#allocation2 + $0x90] sm:$0xff] %vm313_vm0, %v1674_v38  ;;  %v1446_v32 = vadd.f32 %v1445_v28, %v1357_v26  ;;  %v1534_v33 = vpop.f32.mrf.mxu3  ;;  %v368_v26 = vld [vmem:[#allocation2 + $0xb0] sm:$0xff] }
 0x189   : > { %v1359_v23 = vpop.f32.mrf.mxu1 }
 0x18a   : > { %v1812_v35 = vadd.f32 %v3129_v47, %v1776_v29  ;;  %v1535_v43 = vadd.f32 %v1534_v33, %v1446_v32  ;;  %v1360_v49 = vadd.f32 %v1359_v23, %v2999_v58 }
 0x18b   : > { %v1626_v44 = vpop.f32.mrf.mxu0 }
 0x18c   : > { %v1844_v46 = vmax.f32 %v1812_v35, 0.0  ;;  %v1624_v48 = vadd.f32 %v1623_v34, %v1535_v43 }
 0x18e   : > { %1876 = vst.msk [vmem:[%s3139_s25 + $0x88] sm:$0xff] %vm313_vm0, %v1844_v46  ;;  %v1675_v50 = vadd.f32 %v1624_v48, %v365_v45 }
 0x18f   : > { %v1741_v52 = vld [vmem:[#allocation2 + $0x90] sm:$0xff]  ;;  %v1448_v41 = vpop.f32.mrf.mxu2 }
 0x190   : > { %v1777_v53 = vmul.f32 %v3123_v21, %v1741_v52  ;;  %1707 = vst.msk [vmem:[#allocation2 + $0x98] sm:$0xff] %vm313_vm0, %v1675_v50  ;;  %v1449_v55 = vadd.f32 %v1448_v41, %v1360_v49  ;;  %v1537_v56 = vpop.f32.mrf.mxu3  ;;  %v369_v50 = vld [vmem:[#allocation2 + $0xb8] sm:$0xff] }
 0x191   : > { %v1361_v63 = vpop.f32.mrf.mxu1 }
 0x192   : > { %v1813_v18 = vadd.f32 %v3129_v47, %v1777_v53  ;;  %v1538_v61 = vadd.f32 %v1537_v56, %v1449_v55  ;;  %v1362_v24 = vadd.f32 %v1361_v63, %v3031_v7 }
 0x193   : > { %v1628_v62 = vpop.f32.mrf.mxu0 }
 0x194   : > { %v1845_v1 = vmax.f32 %v1813_v18, 0.0  ;;  %v1627_v40 = vadd.f32 %v1626_v44, %v1538_v61 }
 0x196   : > { %1877 = vst.msk [vmem:[%s3139_s25 + $0x90] sm:$0xff] %vm313_vm0, %v1845_v1  ;;  %v1676_v58 = vadd.f32 %v1627_v40, %v366_v0  ;;  %v370_v40 = vld [vmem:[#allocation2 + $0xc0] sm:$0xff] }
 0x197   : > { %v1742_v20 = vld [vmem:[#allocation2 + $0x98] sm:$0xff]  ;;  %v1450_v2 = vpop.f32.mrf.mxu2 }
 0x198   : > { %v1778_v3 = vmul.f32 %v3123_v21, %v1742_v20  ;;  %1708 = vst.msk [vmem:[#allocation2 + $0xa0] sm:$0xff] %vm313_vm0, %v1676_v58  ;;  %v1451_v37 = vadd.f32 %v1450_v2, %v1362_v24  ;;  %v1539_v4 = vpop.f32.mrf.mxu3 }
 0x199   : > { %v1364_v5 = vpop.f32.mrf.mxu1 }
 0x19a   : > { %v1814_v6 = vadd.f32 %v3129_v47, %v1778_v3  ;;  %v1540_v30 = vadd.f32 %v1539_v4, %v1451_v37  ;;  %v1365_v59 = vadd.f32 %v1364_v5, %v3056_v16 }
 0x19b   : > { %v1631_v9 = vpop.f32.mrf.mxu0 }
 0x19c   : > { %v1846_v17 = vmax.f32 %v1814_v6, 0.0  ;;  %v1629_v10 = vadd.f32 %v1628_v62, %v1540_v30 }
 0x19e   : > { %1878 = vst.msk [vmem:[%s3139_s25 + $0x98] sm:$0xff] %vm313_vm0, %v1846_v17  ;;  %v1677_v7 = vadd.f32 %v1629_v10, %v367_v57  ;;  %v371_v17 = vld [vmem:[#allocation2 + $0xc8] sm:$0xff] }
 0x19f   : > { %v1743_v11 = vld [vmem:[#allocation2 + $0xa0] sm:$0xff]  ;;  %v1453_v54 = vpop.f32.mrf.mxu2 }
 0x1a0   : > { %v1779_v15 = vmul.f32 %v3123_v21, %v1743_v11  ;;  %1709 = vst.msk [vmem:[#allocation2 + $0xa8] sm:$0xff] %vm313_vm0, %v1677_v7  ;;  %v1454_v12 = vadd.f32 %v1453_v54, %v1365_v59  ;;  %v1542_v34 = vpop.f32.mrf.mxu3 }
 0x1a1   : > { %v1366_v14 = vpop.f32.mrf.mxu1 }
 0x1a2   : > { %v1815_v13 = vadd.f32 %v3129_v47, %v1779_v15  ;;  %v1543_v25 = vadd.f32 %v1542_v34, %v1454_v12  ;;  %v1367_v29 = vadd.f32 %v1366_v14, %v3088_v36 }
 0x1a3   : > { %v1633_v38 = vpop.f32.mrf.mxu0 }
 0x1a4   : > { %v1847_v27 = vmax.f32 %v1815_v13, 0.0  ;;  %v1632_v28 = vadd.f32 %v1631_v9, %v1543_v25 }
 0x1a6   : > { %1879 = vst.msk [vmem:[%s3139_s25 + $0xa0] sm:$0xff] %vm313_vm0, %v1847_v27  ;;  %v1678_v16 = vadd.f32 %v1632_v28, %v368_v26 }
 0x1a7   : > { %v1744_v32 = vld [vmem:[#allocation2 + $0xa8] sm:$0xff]  ;;  %v1455_v33 = vpop.f32.mrf.mxu2 }
 0x1a8   : > { %v1780_v23 = vmul.f32 %v3123_v21, %v1744_v32  ;;  %1710 = vst.msk [vmem:[#allocation2 + $0xb0] sm:$0xff] %vm313_vm0, %v1678_v16  ;;  %v1456_v35 = vadd.f32 %v1455_v33, %v1367_v29  ;;  %v1544_v43 = vpop.f32.mrf.mxu3 }
 0x1a9   : > { %v1369_v44 = vpop.f32.mrf.mxu1 }
 0x1aa   : > { %v1816_v45 = vadd.f32 %v3129_v47, %v1780_v23  ;;  %v1545_v46 = vadd.f32 %v1544_v43, %v1456_v35  ;;  %v1370_v41 = vadd.f32 %v1369_v44, %v2951_v19 }
 0x1ab   : > { %v1636_v48 = vpop.f32.mrf.mxu0 }
 0x1ac   : > { %v1848_v49 = vmax.f32 %v1816_v45, 0.0  ;;  %v1634_v52 = vadd.f32 %v1633_v38, %v1545_v46  ;;  %v372_v38 = vld [vmem:[#allocation2 + $0xd0] sm:$0xff]  ;;  %v373_v46 = vld [vmem:[#allocation2 + $0xd8] sm:$0xff] }
 0x1ae   : > { %1880 = vst.msk [vmem:[%s3139_s25 + $0xa8] sm:$0xff] %vm313_vm0, %v1848_v49  ;;  %v1679_v36 = vadd.f32 %v1634_v52, %v369_v50 }
 0x1af   : > { %v1745_v53 = vld [vmem:[#allocation2 + $0xb0] sm:$0xff]  ;;  %v1458_v55 = vpop.f32.mrf.mxu2 }
 0x1b0   : > { %v1781_v56 = vmul.f32 %v3123_v21, %v1745_v53  ;;  %1711 = vst.msk [vmem:[#allocation2 + $0xb8] sm:$0xff] %vm313_vm0, %v1679_v36  ;;  %v1459_v63 = vadd.f32 %v1458_v55, %v1370_v41  ;;  %v1547_v18 = vpop.f32.mrf.mxu3  ;;  %v3351_v41 = vld [vmem:[%s3401_s2] ss:$0 sm:$0xff] }
 0x1b1   : > { %v1371_v61 = vpop.f32.mrf.mxu1 }
 0x1b2   : > { %v1817_v62 = vadd.f32 %v3129_v47, %v1781_v56  ;;  %v1548_v0 = vadd.f32 %v1547_v18, %v1459_v63  ;;  %v1372_v20 = vadd.f32 %v1371_v61, %v2967_v31  ;;  %v3358_v63 = vld [vmem:[%s3402_s3] ss:$0 sm:$0xff] }
 0x1b3   : > { %v1638_v1 = vpop.f32.mrf.mxu0  ;;  %v374_v61 = vld [vmem:[#allocation2 + $0xe0] sm:$0xff] }
 0x1b4   : > { %v1849_v58 = vmax.f32 %v1817_v62, 0.0  ;;  %v1637_v24 = vadd.f32 %v1636_v48, %v1548_v0 }
 0x1b6   : > { %1881 = vst.msk [vmem:[%s3139_s25 + $0xb0] sm:$0xff] %vm313_vm0, %v1849_v58  ;;  %v1680_v19 = vadd.f32 %v1637_v24, %v370_v40 }
 0x1b7   : > { %v1746_v2 = vld [vmem:[#allocation2 + $0xb8] sm:$0xff]  ;;  %v1460_v3 = vpop.f32.mrf.mxu2 }
 0x1b8   : > { %v1782_v37 = vmul.f32 %v3123_v21, %v1746_v2  ;;  %1712 = vst.msk [vmem:[#allocation2 + $0xc0] sm:$0xff] %vm313_vm0, %v1680_v19  ;;  %v1461_v4 = vadd.f32 %v1460_v3, %v1372_v20  ;;  %v1549_v5 = vpop.f32.mrf.mxu3 }
 0x1b9   : > { %v1374_v6 = vpop.f32.mrf.mxu1 }
 0x1ba   : > { %v1818_v30 = vadd.f32 %v3129_v47, %v1782_v37  ;;  %v1550_v9 = vadd.f32 %v1549_v5, %v1461_v4  ;;  %v1375_v59 = vadd.f32 %v1374_v6, %v2976_v39  ;;  %v375_v6 = vld [vmem:[#allocation2 + $0xe8] sm:$0xff] }
 0x1bb   : > { %v1641_v57 = vpop.f32.mrf.mxu0 }
 0x1bc   : > { %v1850_v10 = vmax.f32 %v1818_v30, 0.0  ;;  %v1639_v7 = vadd.f32 %v1638_v1, %v1550_v9 }
 0x1be   : > { %1882 = vst.msk [vmem:[%s3139_s25 + $0xb8] sm:$0xff] %vm313_vm0, %v1850_v10  ;;  %v1681_v31 = vadd.f32 %v1639_v7, %v371_v17 }
 0x1bf   : > { %v1747_v11 = vld [vmem:[#allocation2 + $0xc0] sm:$0xff]  ;;  %v1463_v54 = vpop.f32.mrf.mxu2 }
 0x1c0   : > { %v1783_v15 = vmul.f32 %v3123_v21, %v1747_v11  ;;  %1713 = vst.msk [vmem:[#allocation2 + $0xc8] sm:$0xff] %vm313_vm0, %v1681_v31  ;;  %v1464_v12 = vadd.f32 %v1463_v54, %v1375_v59  ;;  %v1552_v34 = vpop.f32.mrf.mxu3 }
 0x1c1   : > { %v1376_v14 = vpop.f32.mrf.mxu1 }
 0x1c2   : > { %v1819_v13 = vadd.f32 %v3129_v47, %v1783_v15  ;;  %v1553_v25 = vadd.f32 %v1552_v34, %v1464_v12  ;;  %v1377_v16 = vadd.f32 %v1376_v14, %v2992_v51  ;;  %v376_v12 = vld [vmem:[#allocation2 + $0xf0] sm:$0xff] }
 0x1c3   : > { %v1643_v26 = vpop.f32.mrf.mxu0 }
 0x1c4   : > { %v1851_v27 = vmax.f32 %v1819_v13, 0.0  ;;  %v1642_v28 = vadd.f32 %v1641_v57, %v1553_v25 }
 0x1c6   : > { %1883 = vst.msk [vmem:[%s3139_s25 + $0xc0] sm:$0xff] %vm313_vm0, %v1851_v27  ;;  %v1682_v39 = vadd.f32 %v1642_v28, %v372_v38 }
 0x1c7   : > { %v1748_v29 = vld [vmem:[#allocation2 + $0xc8] sm:$0xff]  ;;  %v1465_v32 = vpop.f32.mrf.mxu2 }
 0x1c8   : > { %v1784_v33 = vmul.f32 %v3123_v21, %v1748_v29  ;;  %1714 = vst.msk [vmem:[#allocation2 + $0xd0] sm:$0xff] %vm313_vm0, %v1682_v39  ;;  %v1466_v23 = vadd.f32 %v1465_v32, %v1377_v16  ;;  %v1554_v35 = vpop.f32.mrf.mxu3 }
 0x1c9   : > { %v1379_v43 = vpop.f32.mrf.mxu1 }
 0x1ca   : > { %v1820_v44 = vadd.f32 %v3129_v47, %v1784_v33  ;;  %v1555_v45 = vadd.f32 %v1554_v35, %v1466_v23  ;;  %v1380_v51 = vadd.f32 %v1379_v43, %v3003_v60  ;;  %v377_v33 = vld [vmem:[#allocation2 + $0xf8] sm:$0xff] }
 0x1cb   : > { %v1646_v49 = vpop.f32.mrf.mxu0 }
 0x1cc   : > { %v1852_v48 = vmax.f32 %v1820_v44, 0.0  ;;  %v1644_v50 = vadd.f32 %v1643_v26, %v1555_v45 }
 0x1ce   : > { %1884 = vst.msk [vmem:[%s3139_s25 + $0xc8] sm:$0xff] %vm313_vm0, %v1852_v48  ;;  %v1683_v52 = vadd.f32 %v1644_v50, %v373_v46 }
 0x1cf   : > { %v1749_v36 = vld [vmem:[#allocation2 + $0xd0] sm:$0xff]  ;;  %v1468_v21 = vpop.f32.mrf.mxu2 }
 0x1d0   : > { %v1785_v47 = vmul.f32 %v3351_v41, %v1749_v36  ;;  %1715 = vst.msk [vmem:[#allocation2 + $0xd8] sm:$0xff] %vm313_vm0, %v1683_v52  ;;  %v1469_v53 = vadd.f32 %v1468_v21, %v1380_v51  ;;  %v1557_v55 = vpop.f32.mrf.mxu3 }
 0x1d1   : > { %v1381_v56 = vpop.f32.mrf.mxu1 }
 0x1d2   : > { %v1821_v60 = vadd.f32 %v3358_v63, %v1785_v47  ;;  %v1558_v18 = vadd.f32 %v1557_v55, %v1469_v53  ;;  %v1382_v40 = vadd.f32 %v1381_v56, %v3035_v8 }
 0x1d3   : > { %v1648_v24 = vpop.f32.mrf.mxu0 }
 0x1d4   : > { %v1853_v62 = vmax.f32 %v1821_v60, 0.0  ;;  %v1647_v0 = vadd.f32 %v1646_v49, %v1558_v18 }
 0x1d6   : > { %1885 = vst.msk [vmem:[%s3139_s25 + $0xd0] sm:$0xff] %vm313_vm0, %v1853_v62  ;;  %v1684_v1 = vadd.f32 %v1647_v0, %v374_v61 }
 0x1d7   : > { %v1750_v58 = vld [vmem:[#allocation2 + $0xd8] sm:$0xff]  ;;  %v1470_v19 = vpop.f32.mrf.mxu2 }
 0x1d8   : > { %v1786_v20 = vmul.f32 %v3351_v41, %v1750_v58  ;;  %1716 = vst.msk [vmem:[#allocation2 + $0xe0] sm:$0xff] %vm313_vm0, %v1684_v1  ;;  %v1471_v2 = vadd.f32 %v1470_v19, %v1382_v40  ;;  %v1559_v3 = vpop.f32.mrf.mxu3 }
 0x1d9   : > { %v1384_v37 = vpop.f32.mrf.mxu1 }
 0x1da   : > { %v1822_v4 = vadd.f32 %v3358_v63, %v1786_v20  ;;  %v1560_v5 = vadd.f32 %v1559_v3, %v1471_v2  ;;  %v1385_v57 = vadd.f32 %v1384_v37, %v3060_v22 }
 0x1db   : > { %v1651_v11 = vpop.f32.mrf.mxu0 }
 0x1dc   : > { %v1854_v30 = vmax.f32 %v1822_v4, 0.0  ;;  %v1649_v9 = vadd.f32 %v1648_v24, %v1560_v5 }
 0x1de   : > { %1886 = vst.msk [vmem:[%s3139_s25 + $0xd8] sm:$0xff] %vm313_vm0, %v1854_v30  ;;  %v1685_v8 = vadd.f32 %v1649_v9, %v375_v6 }
 0x1df   : > { %v1751_v17 = vld [vmem:[#allocation2 + $0xe0] sm:$0xff]  ;;  %v1473_v10 = vpop.f32.mrf.mxu2 }
 0x1e0   : > { %v1787_v7 = vmul.f32 %v3351_v41, %v1751_v17  ;;  %1717 = vst.msk [vmem:[#allocation2 + $0xe8] sm:$0xff] %vm313_vm0, %v1685_v8  ;;  %v1474_v31 = vadd.f32 %v1473_v10, %v1385_v57  ;;  %v1562_v59 = vpop.f32.mrf.mxu3 }
 0x1e1   : > { %v1386_v34 = vpop.f32.mrf.mxu1 }
 0x1e2   : > { %v1823_v54 = vadd.f32 %v3358_v63, %v1787_v7  ;;  %v1563_v15 = vadd.f32 %v1562_v59, %v1474_v31  ;;  %v1387_v25 = vadd.f32 %v1386_v34, %v3092_v42 }
 0x1e3   : > { %v1653_v32 = vpop.f32.mrf.mxu0 }
 0x1e4   : > { %v1855_v14 = vmax.f32 %v1823_v54, 0.0  ;;  %v1652_v13 = vadd.f32 %v1651_v11, %v1563_v15 }
 0x1e6   : > { %1887 = vst.msk [vmem:[%s3139_s25 + $0xe0] sm:$0xff] %vm313_vm0, %v1855_v14  ;;  %v1686_v22 = vadd.f32 %v1652_v13, %v376_v12 }
 0x1e7   : > { %v1752_v38 = vld [vmem:[#allocation2 + $0xe8] sm:$0xff]  ;;  %v1475_v26 = vpop.f32.mrf.mxu2 }
 0x1e8   : > { %v1788_v27 = vmul.f32 %v3351_v41, %v1752_v38  ;;  %1718 = vst.msk [vmem:[#allocation2 + $0xf0] sm:$0xff] %vm313_vm0, %v1686_v22  ;;  %v1476_v28 = vadd.f32 %v1475_v26, %v1387_v25  ;;  %v1564_v39 = vpop.f32.mrf.mxu3 }
 0x1ea   : > { %v1824_v16 = vadd.f32 %v3358_v63, %v1788_v27  ;;  %v1565_v29 = vadd.f32 %v1564_v39, %v1476_v28 }
 0x1ec   : > { %v1856_v23 = vmax.f32 %v1824_v16, 0.0  ;;  %v1654_v35 = vadd.f32 %v1653_v32, %v1565_v29 }
 0x1ee   : > { %1888 = vst.msk [vmem:[%s3139_s25 + $0xe8] sm:$0xff] %vm313_vm0, %v1856_v23  ;;  %v1687_v42 = vadd.f32 %v1654_v35, %v377_v33 }
 0x1ef   : > { %v1753_v43 = vld [vmem:[#allocation2 + $0xf0] sm:$0xff] }
 0x1f0   : > { %v1789_v44 = vmul.f32 %v3351_v41, %v1753_v43  ;;  %1719 = vst.msk [vmem:[#allocation2 + $0xf8] sm:$0xff] %vm313_vm0, %v1687_v42 }
 0x1f2   : > { %v1825_v45 = vadd.f32 %v3358_v63, %v1789_v44 }
 0x1f4   : > { %v1857_v46 = vmax.f32 %v1825_v45, 0.0 }
 0x1f6   : > { %1889 = vst.msk [vmem:[%s3139_s25 + $0xf0] sm:$0xff] %vm313_vm0, %v1857_v46 }
 0x1f7   : > { %v1754_v48 = vld [vmem:[#allocation2 + $0xf8] sm:$0xff] }
 0x1f8   : > { %v1790_v50 = vmul.f32 %v3351_v41, %v1754_v48 }
 0x1fa   : > { %v1826_v49 = vadd.f32 %v3358_v63, %v1790_v50 }
 0x1fc   : > { %v1858_v52 = vmax.f32 %v1826_v49, 0.0 }
 0x1fe   : > { %1890 = vst.msk [vmem:[%s3139_s25 + $0xf8] sm:$0xff] %vm313_vm0, %v1858_v52 }
 0x1ff PF: > { %s14_s17 = sadd.s32 1, %s2703_s17   ;;  %s3404_s15 = smov %s2699_s16 }
 0x200   : > { %p11_p5 = scmp.ge.s32.totalorder %s14_s17, 4   ;;  %s3405_s16 = smov %s3407_s18 }
 0x202   :  { %13 = sbr.rel (!%p11_p5) target bundleno = 2 (0x2), region = 83 }

// kernel: enc_resnet_forward.15
= control target key start
LH: loop header
LB: loop body
LE: loop exit
PB: predicated region body
PF: predicated region fallthrough
CT: control target
= control target key end

     0   :  { %10 = vsyncpa [#allocation4], 0  ;;  %s3747_s0 = inlined_call_operand.vmem [shape: bf16[512,576], index: 0, kind: input, shape index: {}]   ;;  %s3748_s1 = inlined_call_operand.vmem [shape: bf16[576,64], index: 1, kind: input, shape index: {}]   ;;  %s3749_s2 = inlined_call_operand.vmem [shape: f32[1,64], index: 2, kind: input, shape index: {}]   ;;  %s3750_s3 = inlined_call_operand.vmem [shape: f32[1,64], index: 3, kind: input, shape index: {}]   ;;  %s3751_s4 = inlined_call_operand.vmem [shape: f32[512,64], index: 4, kind: input, shape index: {}]   ;;  %s3752_s5 = inlined_call_operand.hbm [shape: f32[512,64], index: 5, kind: output, shape index: {}]  }
   0x1   :  { %12 = vsyncpa [#allocation4 + $0x1], 0  ;;  %s2977_s18 = smov 0   ;;  %s2979_s19 = smov 0  }
   0x2   :  { %s2981_s20 = smov 0   ;;  %s2983_s21 = smov 0  }
   0x3   :  { %s2985_s22 = smov 0   ;;  %s2987_s23 = smov 0  }
   0x4 LB: > { %s2162_s24 = sadd.s32 4294967295, %s2942_s23   ;;  %s2163_s25 = sadd.s32 4294967294, %s2942_s23   ;;  %s2942_s23 = sphi %s2987_s23, %s18_s23   ;;  %s2938_s22 = sphi %s2985_s22, %s3759_s22   ;;  %s2934_s21 = sphi %s2983_s21, %s3758_s21   ;;  %s2930_s20 = sphi %s2981_s20, %s3757_s20   ;;  %s2926_s19 = sphi %s2979_s19, %s3756_s19   ;;  %s2922_s18 = sphi %s2977_s18, %s3755_s18  }
   0x5   : > { %s37_s26 = sadd.s32 1, %s2938_s22  ;;  %s182_s27 = sadd.s32 1, %s2930_s20 }
   0x6   : > { %p39_p0 = scmp.ge.s32.totalorder %s37_s26, 2  ;;  %p192_p1 = scmp.ne.s32.totalorder %s2930_s20, %s2926_s19 }
   0x7   : > { %p193_p2 = scmp.eq.s32.totalorder %s2162_s24, 1  ;;  %p198_p3 = scmp.ne.s32.totalorder %s2926_s19, %s2922_s18 }
   0x8   : > { %s3761_s26 = smov (%p39_p0, %s37_s26), 0  ;;  %p199_p5 = scmp.eq.s32.totalorder %s2163_s25, 1 }
   0x9   : > { %p3017_p4 = por %p193_p2, %p192_p1  ;;  %s177_s29 = ssub.s32 %s2938_s22, %s3761_s26 }
   0xa   : > { %p2169_p6 = scmp.ge.s32.totalorder %s2942_s23, 1  ;;  %p180_p7 = scmp.eq.s32.totalorder %s177_s29, 0 }
   0xb   : > { %p3024_p8 = por %p199_p5, %p198_p3  ;;  %p268_p9 = scmp.lt.s32.totalorder %s2942_s23, 3 }
   0xc   : > { %s3030_s6 = scalar_select %p180_p7, %s2930_s20, %s182_s27  }
   0xd   : > { %p269_p10 = pnand %p2169_p6, %p268_p9 }
   0xe   : > { %s2171_s13 = sshll.u32 (!%p269_p10), %s2934_s21, 5  ;;  %s320_s29 = sand.u32 (!%p269_p10), 1, %s2926_s19  }
   0xf   : > { %272 = sbr.rel (%p269_p10) target bundleno = 525 (0x20d), region = 40  ;;  %p325_p11 = scmp.lt.s32.totalorder (!%p269_p10), %s2171_s13, 63 }
  0x10   : > { %s2170_s12 = sshll.u32 (!%p269_p10), %s320_s29, 8  ;;  %s2884_s15 = scalar_lea.hbm (!%p269_p10), %s3752_s5, 512 }
  0x11   : > { %s3435_s14 = scalar_lea.vmem (!%p269_p10), [#allocation3], %s2170_s12 }
  0x12   : > { %s2021_s8 = sshll.u32 (!%p269_p10), %s3435_s14, 4  ;;  %s2022_s8 = int_to_ptr.vmem [resolvable:$true] %s2021_s8 }
  0x14   : > { %v2747_v0 = vld [vmem:[%s3748_s1 + $0x38] sm:$0xff]  ;;  %v2746_v1 = vld [vmem:[%s3748_s1 + $0x30] sm:$0xff]  ;;  %v2745_v2 = vld [vmem:[%s3748_s1 + $0x28] sm:$0xff]  ;;  %s3763_s13 = smov (!%p325_p11, %s2171_s13), 63  ;;  %vm365_vm0 = vcmask 523264  }
  0x15   : > { %2777 = vmatpush.bf16.msra.mxu1 %v2747_v0  ;;  %2778 = vmatpush.bf16.msra.mxu2 %v2747_v0  ;;  %v2744_v3 = vld [vmem:[%s3748_s1 + $0x20] sm:$0xff]  ;;  %v2743_v4 = vld [vmem:[%s3748_s1 + $0x18] sm:$0xff]  ;;  %v2742_v5 = vld [vmem:[%s3748_s1 + $0x10] sm:$0xff]  ;;  %s2801_s27 = smul.u32 20, %s3763_s13  ;;  %s2174_s24 = sshll.u32 %s3763_s13, 3 }
  0x16   : > { %2779 = vmatpush.bf16.msra.mxu3 %v2747_v0  ;;  %1263 = vmatpush.bf16.msra.mxu0 %v2747_v0  ;;  %v2741_v6 = vld [vmem:[%s3748_s1 + $0x8] sm:$0xff]  ;;  %v2740_v7 = vld [vmem:[%s3748_s1] sm:$0xff]  ;;  %v2763_v16 = vld [vmem:[%s3748_s1 + $0xb8] sm:$0xff]  ;;  %s3412_s9 = scalar_lea.vmem %s3751_s4, %s2174_s24  ;;  %s2776_s24 = sshll.u32 %s2934_s21, 8 }
  0x17   : > { %s3060_s10 = scalar_lea.vmem %s3747_s0, %s2801_s27  ;;  %v2771_v17 = vld [vmem:[%s3748_s1 + $0xf8] sm:$0xff]  ;;  %v2762_v24 = vld [vmem:[%s3748_s1 + $0xb0] sm:$0xff]  ;;  %v2761_v28 = vld [vmem:[%s3748_s1 + $0xa8] sm:$0xff]  ;;  %s2020_s7 = scalar_lea.hbm %s3752_s5, %s2776_s24 }
  0x18   : > { %v2257_v8 = vld [vmem:[%s3060_s10 + $0xa0] sm:$0xf]  ;;  %v2682_v9 = vld [vmem:[%s3060_s10 + $0xb0] sm:$0xf0]  ;;  %v2755_v22 = vld [vmem:[%s3748_s1 + $0x78] sm:$0xff]  ;;  %s2023_s11 = sshll.u32 %s2020_s7, 4  ;;  %s2024_s11 = int_to_ptr.hbm [resolvable:$true] %s2023_s11 }
  0x19   : > { %2780 = vmatpush.bf16.msra.mxu1 %v2746_v1  ;;  %2781 = vmatpush.bf16.msra.mxu2 %v2746_v1  ;;  %v2337_v10 = vld [vmem:[%s3060_s10 + $0x140] sm:$0xf]  ;;  %v2702_v11 = vld [vmem:[%s3060_s10 + $0x150] sm:$0xf0]  ;;  %v2258_v18 = vor.u32 %v2682_v9, %v2257_v8  ;;  %v2775_v23 = vld [vmem:[%s3748_s1 + $0x118] sm:$0xff]  ;;  %s2008_s21 = scalar_lea.sflag [#allocation4], %s320_s29 }
  0x1a   : > { %2782 = vmatpush.bf16.msra.mxu3 %v2746_v1  ;;  %1264 = vmatpush.bf16.msra.mxu0 %v2746_v1  ;;  %v2417_v12 = vld [vmem:[%s3060_s10 + $0x1e0] sm:$0xf]  ;;  %v2722_v13 = vld [vmem:[%s3060_s10 + $0x1f0] sm:$0xf0]  ;;  %v2338_v19 = vor.u32 %v2702_v11, %v2337_v10  ;;  %v2769_v29 = vld [vmem:[%s3748_s1 + $0xe8] sm:$0xff]  ;;  %s2878_s13 = sshra.s32 %s2024_s11, 4  ;;  %s2879_s13 = int_to_ptr.hbm [resolvable:$true] %s2878_s13 }
  0x1b   : > { %v2177_v14 = vld [vmem:[%s3060_s10] sm:$0xf]  ;;  %v2662_v15 = vld [vmem:[%s3060_s10 + $0x10] sm:$0xf0]  ;;  %v2418_v20 = vor.u32 %v2722_v13, %v2417_v12  ;;  %v2753_v30 = vld [vmem:[%s3748_s1 + $0x68] sm:$0xff]  ;;  %s2880_s12 = scalar_lea.hbm %s2879_s13, 256  ;;  %p2885_p1 = scmp.lt.s32.totalorder %s2879_s13, %s3752_s5 }
  0x1c   : > { %v2178_v21 = vor.u32 %v2662_v15, %v2177_v14  ;;  %v2770_v25 = vld [vmem:[%s3748_s1 + $0xf0] sm:$0xff]  ;;  %v2773_v31 = vld [vmem:[%s3748_s1 + $0x108] sm:$0xff]  ;;  %v2760_v32 = vld [vmem:[%s3748_s1 + $0xa0] sm:$0xff]  ;;  %p2881_p12 = scmp.ne.s32.totalorder %s2879_s13, %s2880_s12  ;;  %p2886_p2 = scmp.lt.s32.totalorder %s2884_s15, %s2880_s12 }
  0x1d   : > { %2783 = vmatpush.bf16.msra.mxu1 %v2745_v2  ;;  %2784 = vmatpush.bf16.msra.mxu2 %v2745_v2  ;;  %v2754_v26 = vld [vmem:[%s3748_s1 + $0x70] sm:$0xff]  ;;  %v2768_v33 = vld [vmem:[%s3748_s1 + $0xe0] sm:$0xff]  ;;  %v2277_v34 = vld [vmem:[%s3060_s10 + $0xc8] sm:$0xf] }
  0x1e   : > { %2785 = vmatpush.bf16.msra.mxu3 %v2745_v2  ;;  %1265 = vmatpush.bf16.msra.mxu0 %v2745_v2  ;;  %v2774_v27 = vld [vmem:[%s3748_s1 + $0x110] sm:$0xff]  ;;  %v2687_v35 = vld [vmem:[%s3060_s10 + $0xd8] sm:$0xf0]  ;;  %v2357_v36 = vld [vmem:[%s3060_s10 + $0x168] sm:$0xf]  ;;  %p2882_p13 = pnand %p2881_p12, %p3017_p4  ;;  %p2887_p3 = por %p2886_p2, %p2885_p1 }
  0x1f   : > { %v2707_v37 = vld [vmem:[%s3060_s10 + $0x178] sm:$0xf0]  ;;  %v2437_v38 = vld [vmem:[%s3060_s10 + $0x208] sm:$0xf]  ;;  %v2752_v42 = vld [vmem:[%s3748_s1 + $0x60] sm:$0xff]  ;;  %v2278_v45 = vor.u32 %v2687_v35, %v2277_v34 }
  0x20   : > { %v2727_v39 = vld [vmem:[%s3060_s10 + $0x218] sm:$0xf0]  ;;  %v2197_v40 = vld [vmem:[%s3060_s10 + $0x28] sm:$0xf]  ;;  %v2358_v46 = vor.u32 %v2707_v37, %v2357_v36  ;;  %v2758_v50 = vld [vmem:[%s3748_s1 + $0x90] sm:$0xff]  ;;  %p2883_p0 = pneg %p2882_p13 }
  0x21   : > { %2786 = vmatpush.bf16.msra.mxu1 %v2744_v3  ;;  %2787 = vmatpush.bf16.msra.mxu2 %v2744_v3  ;;  %v2667_v41 = vld [vmem:[%s3060_s10 + $0x38] sm:$0xf0]  ;;  %v2438_v47 = vor.u32 %v2727_v39, %v2437_v38  ;;  %v2766_v51 = vld [vmem:[%s3748_s1 + $0xd0] sm:$0xff]  ;;  %v2772_v53 = vld [vmem:[%s3748_s1 + $0x100] sm:$0xff] }
  0x22   : > { %2788 = vmatpush.bf16.msra.mxu3 %v2744_v3  ;;  %1266 = vmatpush.bf16.msra.mxu0 %v2744_v3  ;;  %v2759_v43 = vld [vmem:[%s3748_s1 + $0x98] sm:$0xff]  ;;  %v2198_v48 = vor.u32 %v2667_v41, %v2197_v40  ;;  %v2750_v52 = vld [vmem:[%s3748_s1 + $0x50] sm:$0xff]  ;;  %v2757_v54 = vld [vmem:[%s3748_s1 + $0x88] sm:$0xff]  ;;  %p2888_p5 = pnand %p2887_p3, %p2883_p0 }
  0x23   : > { %v2767_v44 = vld [vmem:[%s3748_s1 + $0xd8] sm:$0xff]  ;;  %v2765_v55 = vld [vmem:[%s3748_s1 + $0xc8] sm:$0xff]  ;;  %v2756_v57 = vld [vmem:[%s3748_s1 + $0x80] sm:$0xff] }
  0x24   : > { %v2751_v49 = vld [vmem:[%s3748_s1 + $0x58] sm:$0xff]  ;;  %v2749_v56 = vld [vmem:[%s3748_s1 + $0x48] sm:$0xff]  ;;  %v2764_v58 = vld [vmem:[%s3748_s1 + $0xc0] sm:$0xff] }
  0x25   : > { %2789 = vmatpush.bf16.msra.mxu1 %v2743_v4  ;;  %2790 = vmatpush.bf16.msra.mxu2 %v2743_v4  ;;  %v2297_v59 = vld [vmem:[%s3060_s10 + $0xf0] sm:$0xf]  ;;  %v2692_v60 = vld [vmem:[%s3060_s10 + $0x100] sm:$0xf0]  ;;  %v2317_v8 = vld [vmem:[%s3060_s10 + $0x118] sm:$0xf] }
  0x26   : > { %2791 = vmatpush.bf16.msra.mxu3 %v2743_v4  ;;  %1267 = vmatpush.bf16.msra.mxu0 %v2743_v4  ;;  %v2377_v61 = vld [vmem:[%s3060_s10 + $0x190] sm:$0xf]  ;;  %v2712_v62 = vld [vmem:[%s3060_s10 + $0x1a0] sm:$0xf0]  ;;  %v2298_v4 = vor.u32 %v2692_v60, %v2297_v59  ;;  %v2697_v9 = vld [vmem:[%s3060_s10 + $0x128] sm:$0xf0] }
  0x27   : > { %v2457_v63 = vld [vmem:[%s3060_s10 + $0x230] sm:$0xf]  ;;  %v2732_v0 = vld [vmem:[%s3060_s10 + $0x240] sm:$0xf0]  ;;  %v2397_v10 = vld [vmem:[%s3060_s10 + $0x1b8] sm:$0xf] }
  0x28   : > { %v2217_v1 = vld [vmem:[%s3060_s10 + $0x50] sm:$0xf]  ;;  %v2672_v2 = vld [vmem:[%s3060_s10 + $0x60] sm:$0xf0]  ;;  %v2717_v11 = vld [vmem:[%s3060_s10 + $0x1c8] sm:$0xf0] }
  0x29   : > { %2792 = vmatpush.bf16.msra.mxu1 %v2742_v5  ;;  %2793 = vmatpush.bf16.msra.mxu2 %v2742_v5  ;;  %v2748_v3 = vld [vmem:[%s3748_s1 + $0x40] sm:$0xff]  ;;  %v2477_v12 = vld [vmem:[%s3060_s10 + $0x258] sm:$0xf]  ;;  %v2737_v13 = vld [vmem:[%s3060_s10 + $0x268] sm:$0xf0] }
  0x2a   : > { %2794 = vmatpush.bf16.msra.mxu3 %v2742_v5  ;;  %1268 = vmatpush.bf16.msra.mxu0 %v2742_v5  ;;  %v2378_v5 = vor.u32 %v2712_v62, %v2377_v61  ;;  %v2237_v14 = vld [vmem:[%s3060_s10 + $0x78] sm:$0xf]  ;;  %v2677_v15 = vld [vmem:[%s3060_s10 + $0x88] sm:$0xf0]  ;;  %v2205_v34 = vld [vmem:[%s3060_s10 + $0x30] sm:$0xf] }
  0x2b   : > { %v2668_v35 = vld [vmem:[%s3060_s10 + $0x40] sm:$0xf0]  ;;  %v2666_v36 = vld [vmem:[%s3060_s10 + $0x34] sm:$0xf]  ;;  %v2207_v37 = vld [vmem:[%s3060_s10 + $0x44] sm:$0xf0] }
  0x2c   : > { %v2213_v38 = vld [vmem:[%s3060_s10 + $0x38] sm:$0xf]  ;;  %v2669_v39 = vld [vmem:[%s3060_s10 + $0x48] sm:$0xf0]  ;;  %v2206_v41 = vor.u32 %v2668_v35, %v2205_v34  ;;  %v2678_v59 = vld [vmem:[%s3060_s10 + $0x90] sm:$0xf0] }
  0x2d   : > { %2795 = vmatpush.bf16.msra.mxu1 %v2741_v6  ;;  %2796 = vmatpush.bf16.msra.mxu2 %v2741_v6  ;;  %v2676_v60 = vld [vmem:[%s3060_s10 + $0x84] sm:$0xf]  ;;  %v2247_v61 = vld [vmem:[%s3060_s10 + $0x94] sm:$0xf0]  ;;  %v2253_v62 = vld [vmem:[%s3060_s10 + $0x88] sm:$0xf] }
  0x2e   : > { %2797 = vmatpush.bf16.msra.mxu3 %v2741_v6  ;;  %1269 = vmatpush.bf16.msra.mxu0 %v2741_v6  ;;  %v2458_v6 = vor.u32 %v2732_v0, %v2457_v63  ;;  %v2679_v63 = vld [vmem:[%s3060_s10 + $0x98] sm:$0xf0] }
  0x31   : > { %2798 = vmatpush.bf16.msra.mxu1 %v2740_v7  ;;  %2799 = vmatpush.bf16.msra.mxu2 %v2740_v7 }
  0x32   : > { %2800 = vmatpush.bf16.msra.mxu3 %v2740_v7  ;;  %1270 = vmatpush.bf16.msra.mxu0 %v2740_v7  ;;  %v2218_v7 = vor.u32 %v2672_v2, %v2217_v1  ;;  %v2250_v2 = vor.u32 %v2676_v60, %v2247_v61 }
  0x34   : > { %1291 = vmatmul.bf16.vlgmr.msra.gmra.mxu1 %v2258_v18  ;;  %1311 = vmatmul.bf16.vlgmr.msra.gmra.mxu2 %v2338_v19  ;;  %v2478_v18 = vor.u32 %v2737_v13, %v2477_v12  ;;  %v2238_v19 = vor.u32 %v2677_v15, %v2237_v14 }
  0x35   : > { %1441 = vmatpush.bf16.msrb.mxu2 %v2763_v16  ;;  %1331 = vmatmul.bf16.vlgmr.msra.gmra.mxu3 %v2418_v20  ;;  %v2318_v16 = vor.u32 %v2697_v9, %v2317_v8  ;;  %v2660_v20 = vld [vmem:[%s3060_s10 + $0x4] sm:$0xf]  ;;  %v2681_v8 = vld [vmem:[%s3060_s10 + $0xac] sm:$0xf]  ;;  %v2267_v9 = vld [vmem:[%s3060_s10 + $0xbc] sm:$0xf0] }
  0x36   : > { %1530 = vmatpush.bf16.msrb.mxu3 %v2771_v17  ;;  %1271 = vmatmul.bf16.vlgmr.msra.gmra.mxu0 %v2178_v21  ;;  %v2398_v17 = vor.u32 %v2717_v11, %v2397_v10  ;;  %v2179_v21 = vld [vmem:[%s3060_s10 + $0x14] sm:$0xf0]  ;;  %v2273_v10 = vld [vmem:[%s3060_s10 + $0xb0] sm:$0xf]  ;;  %v2684_v11 = vld [vmem:[%s3060_s10 + $0xc0] sm:$0xf0]  ;;  %v2270_v15 = vor.u32 %v2681_v8, %v2267_v9 }
  0x37   : > { %1352 = vmatpush.bf16.msrb.mxu1 %v2755_v22  ;;  %1623 = vmatpush.bf16.msrb.mxu0 %v2775_v23  ;;  %v2185_v22 = vld [vmem:[%s3060_s10 + $0x8] sm:$0xf]  ;;  %v2663_v23 = vld [vmem:[%s3060_s10 + $0x18] sm:$0xf0] }
  0x39   : > { %1442 = vmatpush.bf16.msrb.mxu2 %v2762_v24  ;;  %v2661_v24 = vld [vmem:[%s3060_s10 + $0xc] sm:$0xf] }
  0x3a   : > { %1531 = vmatpush.bf16.msrb.mxu3 %v2770_v25  ;;  %v2187_v25 = vld [vmem:[%s3060_s10 + $0x1c] sm:$0xf0] }
  0x3b   : > { %1353 = vmatpush.bf16.msrb.mxu1 %v2754_v26  ;;  %1624 = vmatpush.bf16.msrb.mxu0 %v2774_v27  ;;  %v2193_v26 = vld [vmem:[%s3060_s10 + $0x10] sm:$0xf]  ;;  %v2664_v27 = vld [vmem:[%s3060_s10 + $0x20] sm:$0xf0] }
  0x3d   : > { %1443 = vmatpush.bf16.msrb.mxu2 %v2761_v28  ;;  %v2182_v28 = vor.u32 %v2660_v20, %v2179_v21 }
  0x3e   : > { %1532 = vmatpush.bf16.msrb.mxu3 %v2769_v29  ;;  %v2186_v29 = vor.u32 %v2663_v23, %v2185_v22  ;;  %v2685_v22 = vld [vmem:[%s3060_s10 + $0xcc] sm:$0xf]  ;;  %v2279_v23 = vld [vmem:[%s3060_s10 + $0xdc] sm:$0xf0] }
  0x3f   : > { %1354 = vmatpush.bf16.msrb.mxu1 %v2753_v30  ;;  %1625 = vmatpush.bf16.msrb.mxu0 %v2773_v31  ;;  %v2190_v30 = vor.u32 %v2661_v24, %v2187_v25  ;;  %v2194_v31 = vor.u32 %v2664_v27, %v2193_v26  ;;  %v2285_v24 = vld [vmem:[%s3060_s10 + $0xd0] sm:$0xf]  ;;  %v2688_v25 = vld [vmem:[%s3060_s10 + $0xe0] sm:$0xf0]  ;;  %v2686_v26 = vld [vmem:[%s3060_s10 + $0xd4] sm:$0xf] }
  0x40   : > { %v2287_v27 = vld [vmem:[%s3060_s10 + $0xe4] sm:$0xf0] }
  0x41   : > { %1444 = vmatpush.bf16.msrb.mxu2 %v2760_v32  ;;  %v2665_v32 = vld [vmem:[%s3060_s10 + $0x2c] sm:$0xf]  ;;  %v2290_v35 = vor.u32 %v2686_v26, %v2287_v27  ;;  %v2339_v26 = vld [vmem:[%s3060_s10 + $0x154] sm:$0xf0]  ;;  %v2345_v27 = vld [vmem:[%s3060_s10 + $0x148] sm:$0xf] }
  0x42   : > { %1533 = vmatpush.bf16.msrb.mxu3 %v2768_v33  ;;  %v2199_v33 = vld [vmem:[%s3060_s10 + $0x3c] sm:$0xf0] }
  0x43   : > { %1355 = vmatpush.bf16.msrb.mxu1 %v2752_v42  ;;  %1626 = vmatpush.bf16.msrb.mxu0 %v2772_v53  ;;  %v2202_v40 = vor.u32 %v2665_v32, %v2199_v33  ;;  %v2210_v42 = vor.u32 %v2666_v36, %v2207_v37  ;;  %v2282_v32 = vor.u32 %v2685_v22, %v2279_v23 }
  0x44   : > { %1296 = vmatmul.bf16.gmra.mxu1 %v2278_v45  ;;  %1316 = vmatmul.bf16.gmra.mxu2 %v2358_v46  ;;  %v2219_v45 = vld [vmem:[%s3060_s10 + $0x64] sm:$0xf0]  ;;  %v2225_v46 = vld [vmem:[%s3060_s10 + $0x58] sm:$0xf]  ;;  %v2286_v33 = vor.u32 %v2688_v25, %v2285_v24  ;;  %v2700_v25 = vld [vmem:[%s3060_s10 + $0x144] sm:$0xf] }
  0x45   : > { %1445 = vmatpush.bf16.msrb.mxu2 %v2759_v43  ;;  %1336 = vmatmul.bf16.gmra.mxu3 %v2438_v47  ;;  %v2214_v43 = vor.u32 %v2669_v39, %v2213_v38  ;;  %v2673_v47 = vld [vmem:[%s3060_s10 + $0x68] sm:$0xf0] }
  0x46   : > { %1534 = vmatpush.bf16.msrb.mxu3 %v2767_v44  ;;  %1276 = vmatmul.bf16.gmra.mxu0 %v2198_v48  ;;  %v2670_v44 = vld [vmem:[%s3060_s10 + $0x54] sm:$0xf]  ;;  %v2671_v48 = vld [vmem:[%s3060_s10 + $0x5c] sm:$0xf]  ;;  %v2226_v53 = vor.u32 %v2673_v47, %v2225_v46  ;;  %v2307_v47 = vld [vmem:[%s3060_s10 + $0x10c] sm:$0xf0] }
  0x47   : > { %1356 = vmatpush.bf16.msrb.mxu1 %v2751_v49  ;;  %v2227_v49 = vld [vmem:[%s3060_s10 + $0x6c] sm:$0xf0]  ;;  %v2691_v46 = vld [vmem:[%s3060_s10 + $0xfc] sm:$0xf] }
  0x49   : > { %1446 = vmatpush.bf16.msrb.mxu2 %v2758_v50  ;;  %v2233_v50 = vld [vmem:[%s3060_s10 + $0x60] sm:$0xf] }
  0x4a   : > { %1535 = vmatpush.bf16.msrb.mxu3 %v2766_v51  ;;  %v2674_v51 = vld [vmem:[%s3060_s10 + $0x70] sm:$0xf0] }
  0x4b   : > { %1357 = vmatpush.bf16.msrb.mxu1 %v2750_v52  ;;  %v2222_v52 = vor.u32 %v2670_v44, %v2219_v45  ;;  %v2305_v44 = vld [vmem:[%s3060_s10 + $0xf8] sm:$0xf]  ;;  %v2693_v45 = vld [vmem:[%s3060_s10 + $0x108] sm:$0xf0] }
  0x4d   : > { %1447 = vmatpush.bf16.msrb.mxu2 %v2757_v54  ;;  %v2230_v54 = vor.u32 %v2671_v48, %v2227_v49  ;;  %v2313_v48 = vld [vmem:[%s3060_s10 + $0x100] sm:$0xf]  ;;  %v2694_v49 = vld [vmem:[%s3060_s10 + $0x110] sm:$0xf0] }
  0x4e   : > { %1536 = vmatpush.bf16.msrb.mxu3 %v2765_v55  ;;  %v2234_v55 = vor.u32 %v2674_v51, %v2233_v50 }
  0x4f   : > { %1358 = vmatpush.bf16.msrb.mxu1 %v2749_v56  ;;  %v2675_v56 = vld [vmem:[%s3060_s10 + $0x7c] sm:$0xf] }
  0x51   : > { %1448 = vmatpush.bf16.msrb.mxu2 %v2756_v57  ;;  %v2239_v57 = vld [vmem:[%s3060_s10 + $0x8c] sm:$0xf0] }
  0x52   : > { %1537 = vmatpush.bf16.msrb.mxu3 %v2764_v58  ;;  %v2245_v58 = vld [vmem:[%s3060_s10 + $0x80] sm:$0xf]  ;;  %v2242_v0 = vor.u32 %v2675_v56, %v2239_v57  ;;  %v2314_v56 = vor.u32 %v2694_v49, %v2313_v48 }
  0x53   : > { %1359 = vmatpush.bf16.msrb.mxu1 %v2748_v3  ;;  %v2246_v1 = vor.u32 %v2678_v59, %v2245_v58  ;;  %v2254_v3 = vor.u32 %v2679_v63, %v2253_v62  ;;  %v2944_v59 = vmov 0.0   ;;  %v2695_v63 = vld [vmem:[%s3060_s10 + $0x11c] sm:$0xf] }
  0x54   : > { %1301 = vmatmul.bf16.gmra.mxu1 %v2298_v4  ;;  %1321 = vmatmul.bf16.gmra.mxu2 %v2378_v5  ;;  %v2680_v4 = vld [vmem:[%s3060_s10 + $0xa4] sm:$0xf]  ;;  %v2259_v5 = vld [vmem:[%s3060_s10 + $0xb4] sm:$0xf0]  ;;  %366 = vst.msk [vmem:[#allocation2] sm:$0xff] %vm365_vm0, %v2944_v59 }
  0x55   : > { %1341 = vmatmul.bf16.gmra.mxu3 %v2458_v6  ;;  %v2265_v6 = vld [vmem:[%s3060_s10 + $0xa8] sm:$0xf]  ;;  %v2262_v12 = vor.u32 %v2680_v4, %v2259_v5  ;;  %367 = vst.msk [vmem:[#allocation2 + $0x8] sm:$0xff] %vm365_vm0, %v2944_v59  ;;  %v2327_v4 = vld [vmem:[%s3060_s10 + $0x134] sm:$0xf0] }
  0x56   : > { %1281 = vmatmul.bf16.gmra.mxu0 %v2218_v7  ;;  %v2683_v7 = vld [vmem:[%s3060_s10 + $0xb8] sm:$0xf0]  ;;  %368 = vst.msk [vmem:[#allocation2 + $0x10] sm:$0xff] %vm365_vm0, %v2944_v59  ;;  %v2333_v5 = vld [vmem:[%s3060_s10 + $0x128] sm:$0xf] }
  0x57   : > { %v2266_v13 = vor.u32 %v2683_v7, %v2265_v6  ;;  %369 = vst.msk [vmem:[#allocation2 + $0x18] sm:$0xff] %vm365_vm0, %v2944_v59  ;;  %v2699_v6 = vld [vmem:[%s3060_s10 + $0x138] sm:$0xf0] }
  0x58   : > { %370 = vst.msk [vmem:[#allocation2 + $0x20] sm:$0xff] %vm365_vm0, %v2944_v59 }
  0x59   : > { %371 = vst.msk [vmem:[#allocation2 + $0x28] sm:$0xff] %vm365_vm0, %v2944_v59 }
  0x5a   : > { %372 = vst.msk [vmem:[#allocation2 + $0x30] sm:$0xff] %vm365_vm0, %v2944_v59 }
  0x5b   : > { %373 = vst.msk [vmem:[#allocation2 + $0x38] sm:$0xff] %vm365_vm0, %v2944_v59 }
  0x5c   : > { %374 = vst.msk [vmem:[#allocation2 + $0x40] sm:$0xff] %vm365_vm0, %v2944_v59 }
  0x5d   : > { %375 = vst.msk [vmem:[#allocation2 + $0x48] sm:$0xff] %vm365_vm0, %v2944_v59 }
  0x5e   : > { %376 = vst.msk [vmem:[#allocation2 + $0x50] sm:$0xff] %vm365_vm0, %v2944_v59 }
  0x5f   : > { %377 = vst.msk [vmem:[#allocation2 + $0x58] sm:$0xff] %vm365_vm0, %v2944_v59 }
  0x60   : > { %378 = vst.msk [vmem:[#allocation2 + $0x60] sm:$0xff] %vm365_vm0, %v2944_v59 }
  0x61   : > { %379 = vst.msk [vmem:[#allocation2 + $0x68] sm:$0xff] %vm365_vm0, %v2944_v59 }
  0x62   : > { %380 = vst.msk [vmem:[#allocation2 + $0x70] sm:$0xff] %vm365_vm0, %v2944_v59 }
  0x63   : > { %381 = vst.msk [vmem:[#allocation2 + $0x78] sm:$0xff] %vm365_vm0, %v2944_v59 }
  0x64   : > { %1306 = vmatmul.bf16.gmra.mxu1 %v2318_v16  ;;  %1326 = vmatmul.bf16.gmra.mxu2 %v2398_v17  ;;  %v2274_v16 = vor.u32 %v2684_v11, %v2273_v10  ;;  %382 = vst.msk [vmem:[#allocation2 + $0x80] sm:$0xff] %vm365_vm0, %v2944_v59 }
  0x65   : > { %1346 = vmatmul.bf16.gmra.mxu3 %v2478_v18  ;;  %383 = vst.msk [vmem:[#allocation2 + $0x88] sm:$0xff] %vm365_vm0, %v2944_v59 }
  0x66   : > { %1286 = vmatmul.bf16.gmra.mxu0 %v2238_v19  ;;  %384 = vst.msk [vmem:[#allocation2 + $0x90] sm:$0xff] %vm365_vm0, %v2944_v59 }
  0x67   : > { %385 = vst.msk [vmem:[#allocation2 + $0x98] sm:$0xff] %vm365_vm0, %v2944_v59 }
  0x68   : > { %386 = vst.msk [vmem:[#allocation2 + $0xa0] sm:$0xff] %vm365_vm0, %v2944_v59 }
  0x69   : > { %387 = vst.msk [vmem:[#allocation2 + $0xa8] sm:$0xff] %vm365_vm0, %v2944_v59 }
  0x6a   : > { %388 = vst.msk [vmem:[#allocation2 + $0xb0] sm:$0xff] %vm365_vm0, %v2944_v59 }
  0x6b   : > { %389 = vst.msk [vmem:[#allocation2 + $0xb8] sm:$0xff] %vm365_vm0, %v2944_v59 }
  0x6c   : > { %390 = vst.msk [vmem:[#allocation2 + $0xc0] sm:$0xff] %vm365_vm0, %v2944_v59 }
  0x6d   : > { %391 = vst.msk [vmem:[#allocation2 + $0xc8] sm:$0xff] %vm365_vm0, %v2944_v59 }
  0x6e   : > { %392 = vst.msk [vmem:[#allocation2 + $0xd0] sm:$0xff] %vm365_vm0, %v2944_v59 }
  0x6f   : > { %393 = vst.msk [vmem:[#allocation2 + $0xd8] sm:$0xff] %vm365_vm0, %v2944_v59 }
  0x70   : > { %394 = vst.msk [vmem:[#allocation2 + $0xe0] sm:$0xff] %vm365_vm0, %v2944_v59 }
  0x71   : > { %395 = vst.msk [vmem:[#allocation2 + $0xe8] sm:$0xff] %vm365_vm0, %v2944_v59 }
  0x72   : > { %396 = vst.msk [vmem:[#allocation2 + $0xf0] sm:$0xff] %vm365_vm0, %v2944_v59 }
  0x73   : > { %397 = vst.msk [vmem:[#allocation2 + $0xf8] sm:$0xff] %vm365_vm0, %v2944_v59 }
  0x74   : > { %1360 = vmatmul.bf16.vlgmr.msrb.gmra.mxu1 %v2182_v28  ;;  %1449 = vmatmul.bf16.vlgmr.msrb.gmra.mxu2 %v2186_v29  ;;  %v2293_v28 = vld [vmem:[%s3060_s10 + $0xd8] sm:$0xf]  ;;  %v2689_v29 = vld [vmem:[%s3060_s10 + $0xe8] sm:$0xf0] }
  0x75   : > { %1538 = vmatmul.bf16.vlgmr.msrb.gmra.mxu3 %v2190_v30  ;;  %v2294_v36 = vor.u32 %v2689_v29, %v2293_v28  ;;  %v2703_v28 = vld [vmem:[%s3060_s10 + $0x158] sm:$0xf0]  ;;  %v2701_v29 = vld [vmem:[%s3060_s10 + $0x14c] sm:$0xf] }
  0x76   : > { %2639 = vmatmul.msk.bf16.vlgmr.msrb.gmra.mxu0 %vm365_vm0, %v2194_v31 }
  0x84   : > { %1365 = vmatmul.bf16.gmra.mxu1 %v2202_v40  ;;  %1454 = vmatmul.bf16.gmra.mxu2 %v2206_v41 }
  0x85   : > { %1543 = vmatmul.bf16.gmra.mxu3 %v2210_v42  ;;  %v2690_v42 = vld [vmem:[%s3060_s10 + $0xf4] sm:$0xf] }
  0x86   : > { %2640 = vmatmul.msk.bf16.gmra.mxu0 %vm365_vm0, %v2214_v43  ;;  %v2299_v43 = vld [vmem:[%s3060_s10 + $0x104] sm:$0xf0] }
  0x94   : > { %1370 = vmatmul.bf16.gmra.mxu1 %v2222_v52  ;;  %1459 = vmatmul.bf16.gmra.mxu2 %v2226_v53  ;;  %v2302_v52 = vor.u32 %v2690_v42, %v2299_v43  ;;  %v2306_v53 = vor.u32 %v2693_v45, %v2305_v44  ;;  %v2342_v43 = vor.u32 %v2700_v25, %v2339_v26 }
  0x95   : > { %1548 = vmatmul.bf16.gmra.mxu3 %v2230_v54  ;;  %v2346_v44 = vor.u32 %v2703_v28, %v2345_v27 }
  0x96   : > { %2641 = vmatmul.msk.bf16.gmra.mxu0 %vm365_vm0, %v2234_v55  ;;  %v2310_v55 = vor.u32 %v2691_v46, %v2307_v47 }
  0xa4   : > { %1375 = vmatmul.bf16.gmra.mxu1 %v2242_v0  ;;  %1464 = vmatmul.bf16.gmra.mxu2 %v2246_v1  ;;  %v2319_v0 = vld [vmem:[%s3060_s10 + $0x12c] sm:$0xf0]  ;;  %v2325_v1 = vld [vmem:[%s3060_s10 + $0x120] sm:$0xf] }
  0xa5   : > { %1553 = vmatmul.bf16.gmra.mxu3 %v2250_v2  ;;  %v2698_v2 = vld [vmem:[%s3060_s10 + $0x130] sm:$0xf0]  ;;  %v2322_v9 = vor.u32 %v2695_v63, %v2319_v0 }
  0xa6   : > { %2642 = vmatmul.msk.bf16.gmra.mxu0 %vm365_vm0, %v2254_v3  ;;  %v2696_v3 = vld [vmem:[%s3060_s10 + $0x124] sm:$0xf]  ;;  %v2326_v10 = vor.u32 %v2698_v2, %v2325_v1 }
  0xa7   : > { %v398_v1 = vld [vmem:[#allocation2] sm:$0xff] }
  0xb1   : > { %v3225_v14 = vpop.f32.mrf.mxu1 }
  0xb3   : > { %v3227_v17 = vpop.f32.mrf.mxu0 }
  0xb4   : > { %1380 = vmatmul.bf16.gmra.mxu1 %v2262_v12  ;;  %1469 = vmatmul.bf16.gmra.mxu2 %v2266_v13  ;;  %v2330_v12 = vor.u32 %v2696_v3, %v2327_v4  ;;  %v2334_v13 = vor.u32 %v2699_v6, %v2333_v5  ;;  %v2705_v3 = vld [vmem:[%s3060_s10 + $0x16c] sm:$0xf]  ;;  %v2359_v4 = vld [vmem:[%s3060_s10 + $0x17c] sm:$0xf0]  ;;  %v2365_v5 = vld [vmem:[%s3060_s10 + $0x170] sm:$0xf] }
  0xb5   : > { %1558 = vmatmul.bf16.gmra.mxu3 %v2270_v15  ;;  %v2708_v6 = vld [vmem:[%s3060_s10 + $0x180] sm:$0xf0]  ;;  %v2362_v28 = vor.u32 %v2705_v3, %v2359_v4  ;;  %v400_v4 = vld [vmem:[#allocation2 + $0x10] sm:$0xff] }
  0xb6   : > { %2643 = vmatmul.msk.bf16.gmra.mxu0 %vm365_vm0, %v2274_v16 }
  0xb7   : > { %v3230_v18 = vpop.f32.mrf.mxu2 }
  0xb8   : > { %v3232_v19 = vpop.f32.mrf.mxu3 }
  0xb9   : > { %v3234_v20 = vpop.f32.mrf.mxu1 }
  0xbb   : > { %v3236_v21 = vpop.f32.mrf.mxu0 }
  0xbf   : > { %v3246_v30 = vpop.f32.mrf.mxu2 }
  0xc0   : > { %v3248_v31 = vpop.f32.mrf.mxu3 }
  0xc1   : > { %v3250_v34 = vpop.f32.mrf.mxu1 }
  0xc3   : > { %v3252_v37 = vpop.f32.mrf.mxu0 }
  0xc4   : > { %1385 = vmatmul.bf16.gmra.mxu1 %v2282_v32  ;;  %1474 = vmatmul.bf16.gmra.mxu2 %v2286_v33  ;;  %v2347_v32 = vld [vmem:[%s3060_s10 + $0x15c] sm:$0xf0]  ;;  %v2353_v33 = vld [vmem:[%s3060_s10 + $0x150] sm:$0xf] }
  0xc5   : > { %1563 = vmatmul.bf16.gmra.mxu3 %v2290_v35  ;;  %v2704_v35 = vld [vmem:[%s3060_s10 + $0x160] sm:$0xf0]  ;;  %v2350_v46 = vor.u32 %v2701_v29, %v2347_v32  ;;  %v2366_v29 = vor.u32 %v2708_v6, %v2365_v5 }
  0xc6   : > { %2644 = vmatmul.msk.bf16.gmra.mxu0 %vm365_vm0, %v2294_v36  ;;  %v2354_v47 = vor.u32 %v2704_v35, %v2353_v33 }
  0xc7   : > { %v3255_v38 = vpop.f32.mrf.mxu2 }
  0xc8   : > { %v3257_v39 = vpop.f32.mrf.mxu3 }
  0xc9   : > { %v3259_v40 = vpop.f32.mrf.mxu1 }
  0xcb   : > { %v3261_v41 = vpop.f32.mrf.mxu0 }
  0xcf   : > { %v3271_v50 = vpop.f32.mrf.mxu2 }
  0xd0   : > { %v3273_v51 = vpop.f32.mrf.mxu3 }
  0xd1   : > { %v3275_v54 = vpop.f32.mrf.mxu1 }
  0xd3   : > { %v3277_v57 = vpop.f32.mrf.mxu0 }
  0xd4   : > { %1390 = vmatmul.bf16.gmra.mxu1 %v2302_v52  ;;  %1479 = vmatmul.bf16.gmra.mxu2 %v2306_v53 }
  0xd5   : > { %1568 = vmatmul.bf16.gmra.mxu3 %v2310_v55 }
  0xd6   : > { %2645 = vmatmul.msk.bf16.gmra.mxu0 %vm365_vm0, %v2314_v56 }
  0xd7   : > { %v3280_v58 = vpop.f32.mrf.mxu2 }
  0xd8   : > { %v3284_v60 = vpop.f32.mrf.mxu3 }
  0xd9   : > { %v3288_v61 = vpop.f32.mrf.mxu1 }
  0xdb   : > { %v3292_v62 = vpop.f32.mrf.mxu0 }
  0xdf   : > { %v3312_v7 = vpop.f32.mrf.mxu2 }
  0xe0   : > { %v3316_v8 = vpop.f32.mrf.mxu3 }
  0xe1   : > { %v3320_v11 = vpop.f32.mrf.mxu1 }
  0xe3   : > { %v3324_v15 = vpop.f32.mrf.mxu0 }
  0xe4   : > { %1395 = vmatmul.bf16.gmra.mxu1 %v2322_v9  ;;  %1484 = vmatmul.bf16.gmra.mxu2 %v2326_v10  ;;  %v2706_v9 = vld [vmem:[%s3060_s10 + $0x174] sm:$0xf]  ;;  %v2367_v10 = vld [vmem:[%s3060_s10 + $0x184] sm:$0xf0] }
  0xe5   : > { %1573 = vmatmul.bf16.gmra.mxu3 %v2330_v12  ;;  %v2373_v12 = vld [vmem:[%s3060_s10 + $0x178] sm:$0xf]  ;;  %v2370_v33 = vor.u32 %v2706_v9, %v2367_v10  ;;  %v2710_v9 = vld [vmem:[%s3060_s10 + $0x194] sm:$0xf]  ;;  %v2713_v10 = vld [vmem:[%s3060_s10 + $0x1a8] sm:$0xf0] }
  0xe6   : > { %2646 = vmatmul.msk.bf16.gmra.mxu0 %vm365_vm0, %v2334_v13  ;;  %v2709_v13 = vld [vmem:[%s3060_s10 + $0x188] sm:$0xf0] }
  0xe7   : > { %v3337_v16 = vpop.f32.mrf.mxu2  ;;  %v2374_v35 = vor.u32 %v2709_v13, %v2373_v12  ;;  %v2711_v12 = vld [vmem:[%s3060_s10 + $0x19c] sm:$0xf]  ;;  %v2387_v13 = vld [vmem:[%s3060_s10 + $0x1ac] sm:$0xf0] }
  0xe8   : > { %v3341_v22 = vpop.f32.mrf.mxu3 }
  0xe9   : > { %v3345_v23 = vpop.f32.mrf.mxu1 }
  0xeb   : > { %v3349_v24 = vpop.f32.mrf.mxu0 }
  0xef   : > { %v3369_v36 = vpop.f32.mrf.mxu2 }
  0xf0   : > { %v3373_v42 = vpop.f32.mrf.mxu3 }
  0xf1   : > { %v1361_v45 = vpop.f32.mrf.mxu1 }
  0xf2   : > { %v1362_v49 = vadd.f32 %v1361_v45, %v3227_v17  ;;  %v399_v45 = vld [vmem:[#allocation2 + $0x8] sm:$0xff] }
  0xf3   : > { %v1628_v48 = vpop.f32.mrf.mxu0 }
  0xf4   : > { %1400 = vmatmul.bf16.gmra.mxu1 %v2342_v43  ;;  %1489 = vmatmul.bf16.gmra.mxu2 %v2346_v44 }
  0xf5   : > { %1578 = vmatmul.bf16.gmra.mxu3 %v2350_v46 }
  0xf6   : > { %2647 = vmatmul.msk.bf16.gmra.mxu0 %vm365_vm0, %v2354_v47  ;;  %v3417_v47 = vld [vmem:[%s3750_s3] ss:$0 sm:$0xff] }
  0xf7   : > { %v1450_v52 = vpop.f32.mrf.mxu2 }
  0xf8   : > { %v1451_v53 = vadd.f32 %v1450_v52, %v1362_v49  ;;  %v1539_v55 = vpop.f32.mrf.mxu3 }
  0xf9   : > { %v1363_v56 = vpop.f32.mrf.mxu1 }
  0xfa   : > { %v1540_v63 = vadd.f32 %v1539_v55, %v1451_v53  ;;  %v1364_v59 = vadd.f32 %v1363_v56, %v3236_v21  ;;  %v3405_v21 = vld [vmem:[%s3749_s2] ss:$0 sm:$0xff] }
  0xfb   : > { %v1630_v0 = vpop.f32.mrf.mxu0 }
  0xfc   : > { %v1629_v2 = vadd.f32 %v1628_v48, %v1540_v63 }
  0xfe   : > { %v1708_v17 = vadd.f32 %v1629_v2, %v398_v1 }
  0xff   : > { %v1452_v25 = vpop.f32.mrf.mxu2 }
 0x100   : > { %1740 = vst.msk [vmem:[#allocation2] sm:$0xff] %vm365_vm0, %v1708_v17  ;;  %v1453_v26 = vadd.f32 %v1452_v25, %v1364_v59  ;;  %v1541_v27 = vpop.f32.mrf.mxu3  ;;  %v2379_v17 = vld [vmem:[%s3060_s10 + $0x1a4] sm:$0xf0]  ;;  %v2385_v59 = vld [vmem:[%s3060_s10 + $0x198] sm:$0xf] }
 0x101   : > { %v1366_v32 = vpop.f32.mrf.mxu1 }
 0x102   : > { %v1542_v43 = vadd.f32 %v1541_v27, %v1453_v26  ;;  %v1367_v49 = vadd.f32 %v1366_v32, %v3252_v37 }
 0x103   : > { %v1633_v44 = vpop.f32.mrf.mxu0 }
 0x104   : > { %v1631_v46 = vadd.f32 %v1630_v0, %v1542_v43  ;;  %1405 = vmatmul.bf16.gmra.mxu1 %v2362_v28  ;;  %1494 = vmatmul.bf16.gmra.mxu2 %v2366_v29  ;;  %v1879_v0 = vld [vmem:[%s3412_s9] sm:$0xff]  ;;  %v2714_v29 = vld [vmem:[%s3060_s10 + $0x1b0] sm:$0xf0] }
 0x105   : > { %1583 = vmatmul.bf16.gmra.mxu3 %v2370_v33  ;;  %v2393_v28 = vld [vmem:[%s3060_s10 + $0x1a0] sm:$0xf] }
 0x106   : > { %2648 = vmatmul.msk.bf16.gmra.mxu0 %vm365_vm0, %v2374_v35  ;;  %v1709_v48 = vadd.f32 %v1631_v46, %v399_v45  ;;  %v2382_v45 = vor.u32 %v2710_v9, %v2379_v17  ;;  %v2386_v46 = vor.u32 %v2713_v10, %v2385_v59  ;;  %v1881_v10 = vld [vmem:[%s3412_s9 + $0x10] sm:$0xff] }
 0x107   : > { %v1775_v52 = vld [vmem:[#allocation2] sm:$0xff]  ;;  %v1455_v53 = vpop.f32.mrf.mxu2 }
 0x108   : > { %v1811_v55 = vmul.f32 %v3405_v21, %v1775_v52  ;;  %1741 = vst.msk [vmem:[#allocation2 + $0x8] sm:$0xff] %vm365_vm0, %v1709_v48  ;;  %v1456_v56 = vadd.f32 %v1455_v53, %v1367_v49  ;;  %v1544_v63 = vpop.f32.mrf.mxu3  ;;  %v1880_v48 = vld [vmem:[%s3412_s9 + $0x8] sm:$0xff]  ;;  %v2394_v52 = vor.u32 %v2714_v29, %v2393_v28  ;;  %v2399_v28 = vld [vmem:[%s3060_s10 + $0x1cc] sm:$0xf0] }
 0x109   : > { %v1368_v1 = vpop.f32.mrf.mxu1 }
 0x10a   : > { %v1847_v37 = vadd.f32 %v3417_v47, %v1811_v55  ;;  %v1545_v2 = vadd.f32 %v1544_v63, %v1456_v56  ;;  %v1369_v27 = vadd.f32 %v1368_v1, %v3261_v41  ;;  %v2390_v41 = vor.u32 %v2711_v12, %v2387_v13  ;;  %v401_v63 = vld [vmem:[#allocation2 + $0x18] sm:$0xff] }
 0x10b   : > { %v1635_v3 = vpop.f32.mrf.mxu0 }
 0x10c   : > { %v1911_v5 = vadd.f32 %v1879_v0, %v1847_v37  ;;  %v1634_v6 = vadd.f32 %v1633_v44, %v1545_v2 }
 0x10e   : > { %v1943_v25 = vmax.f32 %v1911_v5, 0.0  ;;  %v1710_v26 = vadd.f32 %v1634_v6, %v400_v4 }
 0x10f   : > { %v1776_v32 = vld [vmem:[#allocation2 + $0x8] sm:$0xff]  ;;  %v1457_v33 = vpop.f32.mrf.mxu2 }
 0x110   : > { %1975 = vst.msk [vmem:[%s3435_s14] sm:$0xff] %vm365_vm0, %v1943_v25  ;;  %v1812_v35 = vmul.f32 %v3405_v21, %v1776_v32  ;;  %v1458_v43 = vadd.f32 %v1457_v33, %v1369_v27  ;;  %v1546_v44 = vpop.f32.mrf.mxu3  ;;  %v402_v25 = vld [vmem:[#allocation2 + $0x20] sm:$0xff]  ;;  %v2715_v27 = vld [vmem:[%s3060_s10 + $0x1bc] sm:$0xf]  ;;  %v2718_v33 = vld [vmem:[%s3060_s10 + $0x1d0] sm:$0xf0] }
 0x111   : > { %1742 = vst.msk [vmem:[#allocation2 + $0x10] sm:$0xff] %vm365_vm0, %v1710_v26  ;;  %v1371_v49 = vpop.f32.mrf.mxu1  ;;  %v2405_v32 = vld [vmem:[%s3060_s10 + $0x1c0] sm:$0xf] }
 0x112   : > { %v1848_v53 = vadd.f32 %v3417_v47, %v1812_v35  ;;  %v1547_v55 = vadd.f32 %v1546_v44, %v1458_v43  ;;  %v1372_v4 = vadd.f32 %v1371_v49, %v3277_v57  ;;  %v2716_v35 = vld [vmem:[%s3060_s10 + $0x1c4] sm:$0xf] }
 0x113   : > { %v1638_v56 = vpop.f32.mrf.mxu0 }
 0x114   : > { %v1912_v0 = vadd.f32 %v1880_v48, %v1848_v53  ;;  %v1636_v1 = vadd.f32 %v1635_v3, %v1547_v55  ;;  %1410 = vmatmul.bf16.gmra.mxu1 %v2382_v45  ;;  %1499 = vmatmul.bf16.gmra.mxu2 %v2386_v46  ;;  %v2407_v45 = vld [vmem:[%s3060_s10 + $0x1d4] sm:$0xf0]  ;;  %v2413_v46 = vld [vmem:[%s3060_s10 + $0x1c8] sm:$0xf]  ;;  %v2719_v48 = vld [vmem:[%s3060_s10 + $0x1d8] sm:$0xf0] }
 0x115   : > { %1588 = vmatmul.bf16.gmra.mxu3 %v2390_v41 }
 0x116   : > { %2649 = vmatmul.msk.bf16.gmra.mxu0 %vm365_vm0, %v2394_v52  ;;  %v1944_v37 = vmax.f32 %v1912_v0, 0.0  ;;  %v1711_v2 = vadd.f32 %v1636_v1, %v401_v63  ;;  %v2406_v63 = vor.u32 %v2718_v33, %v2405_v32 }
 0x117   : > { %v1460_v5 = vpop.f32.mrf.mxu2 }
 0x118   : > { %1976 = vst.msk [vmem:[%s3435_s14 + $0x8] sm:$0xff] %vm365_vm0, %v1944_v37  ;;  %v1777_v6 = vld [vmem:[#allocation2 + $0x10] sm:$0xff]  ;;  %v1461_v9 = vadd.f32 %v1460_v5, %v1372_v4  ;;  %v1549_v3 = vpop.f32.mrf.mxu3  ;;  %v2410_v37 = vor.u32 %v2716_v35, %v2407_v45  ;;  %v2720_v45 = vld [vmem:[%s3060_s10 + $0x1e4] sm:$0xf] }
 0x119   : > { %v1813_v17 = vmul.f32 %v3405_v21, %v1777_v6  ;;  %1743 = vst.msk [vmem:[#allocation2 + $0x18] sm:$0xff] %vm365_vm0, %v1711_v2  ;;  %v1373_v59 = vpop.f32.mrf.mxu1  ;;  %v1882_v2 = vld [vmem:[%s3412_s9 + $0x18] sm:$0xff]  ;;  %v404_v35 = vld [vmem:[#allocation2 + $0x30] sm:$0xff] }
 0x11a   : > { %v1550_v57 = vadd.f32 %v1549_v3, %v1461_v9  ;;  %v1374_v44 = vadd.f32 %v1373_v59, %v3292_v62  ;;  %v2414_v62 = vor.u32 %v2719_v48, %v2413_v46  ;;  %v403_v9 = vld [vmem:[#allocation2 + $0x28] sm:$0xff]  ;;  %v2419_v46 = vld [vmem:[%s3060_s10 + $0x1f4] sm:$0xf0] }
 0x11b   : > { %v1640_v12 = vpop.f32.mrf.mxu0  ;;  %v1849_v13 = vadd.f32 %v3417_v47, %v1813_v17  ;;  %v2425_v48 = vld [vmem:[%s3060_s10 + $0x1e8] sm:$0xf] }
 0x11c   : > { %v1639_v26 = vadd.f32 %v1638_v56, %v1550_v57  ;;  %v2402_v56 = vor.u32 %v2715_v27, %v2399_v28  ;;  %v1883_v28 = vld [vmem:[%s3412_s9 + $0x20] sm:$0xff] }
 0x11d   : > { %v1913_v29 = vadd.f32 %v1881_v10, %v1849_v13 }
 0x11e   : > { %v1712_v43 = vadd.f32 %v1639_v26, %v402_v25 }
 0x11f   : > { %v1945_v49 = vmax.f32 %v1913_v29, 0.0  ;;  %v1462_v41 = vpop.f32.mrf.mxu2 }
 0x120   : > { %v1778_v52 = vld [vmem:[#allocation2 + $0x18] sm:$0xff]  ;;  %1744 = vst.msk [vmem:[#allocation2 + $0x20] sm:$0xff] %vm365_vm0, %v1712_v43  ;;  %v1463_v53 = vadd.f32 %v1462_v41, %v1374_v44  ;;  %v1551_v55 = vpop.f32.mrf.mxu3  ;;  %v2721_v41 = vld [vmem:[%s3060_s10 + $0x1ec] sm:$0xf] }
 0x121   : > { %1977 = vst.msk [vmem:[%s3435_s14 + $0x10] sm:$0xff] %vm365_vm0, %v1945_v49  ;;  %v1814_v0 = vmul.f32 %v3405_v21, %v1778_v52  ;;  %v1376_v1 = vpop.f32.mrf.mxu1  ;;  %v2723_v49 = vld [vmem:[%s3060_s10 + $0x1f8] sm:$0xf0]  ;;  %v2427_v52 = vld [vmem:[%s3060_s10 + $0x1fc] sm:$0xf0] }
 0x122   : > { %v1552_v4 = vadd.f32 %v1551_v55, %v1463_v53  ;;  %v1377_v10 = vadd.f32 %v1376_v1, %v3324_v15 }
 0x123   : > { %v1643_v5 = vpop.f32.mrf.mxu0  ;;  %v1850_v6 = vadd.f32 %v3417_v47, %v1814_v0  ;;  %v2724_v0 = vld [vmem:[%s3060_s10 + $0x200] sm:$0xf0] }
 0x124   : > { %v1641_v3 = vadd.f32 %v1640_v12, %v1552_v4  ;;  %1415 = vmatmul.bf16.gmra.mxu1 %v2402_v56  ;;  %1504 = vmatmul.bf16.gmra.mxu2 %v2406_v63  ;;  %v2433_v63 = vld [vmem:[%s3060_s10 + $0x1f0] sm:$0xf] }
 0x125   : > { %v1914_v17 = vadd.f32 %v1882_v2, %v1850_v6  ;;  %1593 = vmatmul.bf16.gmra.mxu3 %v2410_v37  ;;  %v2426_v6 = vor.u32 %v2723_v49, %v2425_v48  ;;  %v406_v48 = vld [vmem:[#allocation2 + $0x40] sm:$0xff] }
 0x126   : > { %2650 = vmatmul.msk.bf16.gmra.mxu0 %vm365_vm0, %v2414_v62  ;;  %v1713_v59 = vadd.f32 %v1641_v3, %v403_v9  ;;  %v1884_v9 = vld [vmem:[%s3412_s9 + $0x28] sm:$0xff] }
 0x127   : > { %v1946_v57 = vmax.f32 %v1914_v17, 0.0  ;;  %v1779_v13 = vld [vmem:[#allocation2 + $0x20] sm:$0xff]  ;;  %v1465_v25 = vpop.f32.mrf.mxu2  ;;  %v2430_v17 = vor.u32 %v2721_v41, %v2427_v52  ;;  %v2725_v41 = vld [vmem:[%s3060_s10 + $0x20c] sm:$0xf] }
 0x128   : > { %v1815_v26 = vmul.f32 %v3405_v21, %v1779_v13  ;;  %1745 = vst.msk [vmem:[#allocation2 + $0x28] sm:$0xff] %vm365_vm0, %v1713_v59  ;;  %v1466_v12 = vadd.f32 %v1465_v25, %v1377_v10  ;;  %v1554_v27 = vpop.f32.mrf.mxu3  ;;  %v2434_v59 = vor.u32 %v2724_v0, %v2433_v63  ;;  %v405_v13 = vld [vmem:[#allocation2 + $0x38] sm:$0xff]  ;;  %v2439_v52 = vld [vmem:[%s3060_s10 + $0x21c] sm:$0xf0]  ;;  %v2726_v63 = vld [vmem:[%s3060_s10 + $0x214] sm:$0xf] }
 0x129   : > { %1978 = vst.msk [vmem:[%s3435_s14 + $0x18] sm:$0xff] %vm365_vm0, %v1946_v57  ;;  %v1378_v29 = vpop.f32.mrf.mxu1 }
 0x12a   : > { %v1851_v15 = vadd.f32 %v3417_v47, %v1815_v26  ;;  %v1555_v32 = vadd.f32 %v1554_v27, %v1466_v12  ;;  %v1379_v56 = vadd.f32 %v1378_v29, %v3349_v24 }
 0x12b   : > { %v1645_v33 = vpop.f32.mrf.mxu0 }
 0x12c   : > { %v1915_v43 = vadd.f32 %v1883_v28, %v1851_v15  ;;  %v1644_v44 = vadd.f32 %v1643_v5, %v1555_v32  ;;  %v2422_v5 = vor.u32 %v2720_v45, %v2419_v46 }
 0x12e   : > { %v1947_v53 = vmax.f32 %v1915_v43, 0.0  ;;  %v1714_v55 = vadd.f32 %v1644_v44, %v404_v35  ;;  %v1885_v44 = vld [vmem:[%s3412_s9 + $0x30] sm:$0xff] }
 0x12f   : > { %v1780_v1 = vld [vmem:[#allocation2 + $0x28] sm:$0xff]  ;;  %v1467_v37 = vpop.f32.mrf.mxu2 }
 0x130   : > { %1979 = vst.msk [vmem:[%s3435_s14 + $0x20] sm:$0xff] %vm365_vm0, %v1947_v53  ;;  %v1816_v62 = vmul.f32 %v3405_v21, %v1780_v1  ;;  %v1468_v2 = vadd.f32 %v1467_v37, %v1379_v56  ;;  %v1556_v4 = vpop.f32.mrf.mxu3  ;;  %v2728_v56 = vld [vmem:[%s3060_s10 + $0x220] sm:$0xf0]  ;;  %v2447_v37 = vld [vmem:[%s3060_s10 + $0x224] sm:$0xf0] }
 0x131   : > { %1746 = vst.msk [vmem:[#allocation2 + $0x30] sm:$0xff] %vm365_vm0, %v1714_v55  ;;  %v1381_v3 = vpop.f32.mrf.mxu1  ;;  %v2445_v55 = vld [vmem:[%s3060_s10 + $0x210] sm:$0xf] }
 0x132   : > { %v1852_v24 = vadd.f32 %v3417_v47, %v1816_v62  ;;  %v1557_v10 = vadd.f32 %v1556_v4, %v1468_v2  ;;  %v1382_v28 = vadd.f32 %v1381_v3, %v3225_v14  ;;  %v2453_v62 = vld [vmem:[%s3060_s10 + $0x218] sm:$0xf]  ;;  %v2729_v2 = vld [vmem:[%s3060_s10 + $0x228] sm:$0xf0] }
 0x133   : > { %v1648_v57 = vpop.f32.mrf.mxu0 }
 0x134   : > { %v1916_v25 = vadd.f32 %v1884_v9, %v1852_v24  ;;  %v1646_v26 = vadd.f32 %v1645_v33, %v1557_v10  ;;  %1420 = vmatmul.bf16.gmra.mxu1 %v2422_v5  ;;  %1509 = vmatmul.bf16.gmra.mxu2 %v2426_v6 }
 0x135   : > { %1598 = vmatmul.bf16.gmra.mxu3 %v2430_v17  ;;  %v2442_v17 = vor.u32 %v2725_v41, %v2439_v52  ;;  %v408_v52 = vld [vmem:[#allocation2 + $0x50] sm:$0xff] }
 0x136   : > { %2651 = vmatmul.msk.bf16.gmra.mxu0 %vm365_vm0, %v2434_v59  ;;  %v1948_v12 = vmax.f32 %v1916_v25, 0.0  ;;  %v1715_v27 = vadd.f32 %v1646_v26, %v405_v13  ;;  %v2446_v59 = vor.u32 %v2728_v56, %v2445_v55  ;;  %v1886_v13 = vld [vmem:[%s3412_s9 + $0x38] sm:$0xff]  ;;  %v2730_v56 = vld [vmem:[%s3060_s10 + $0x234] sm:$0xf] }
 0x137   : > { %v1470_v29 = vpop.f32.mrf.mxu2 }
 0x138   : > { %1980 = vst.msk [vmem:[%s3435_s14 + $0x28] sm:$0xff] %vm365_vm0, %v1948_v12  ;;  %v1781_v15 = vld [vmem:[#allocation2 + $0x30] sm:$0xff]  ;;  %v1471_v32 = vadd.f32 %v1470_v29, %v1382_v28  ;;  %v1559_v33 = vpop.f32.mrf.mxu3 }
 0x139   : > { %v1817_v35 = vmul.f32 %v3405_v21, %v1781_v15  ;;  %1747 = vst.msk [vmem:[#allocation2 + $0x38] sm:$0xff] %vm365_vm0, %v1715_v27  ;;  %v1383_v43 = vpop.f32.mrf.mxu1  ;;  %v407_v27 = vld [vmem:[#allocation2 + $0x48] sm:$0xff] }
 0x13a   : > { %v1560_v14 = vadd.f32 %v1559_v33, %v1471_v32  ;;  %v1384_v1 = vadd.f32 %v1383_v43, %v3234_v20  ;;  %v2454_v20 = vor.u32 %v2729_v2, %v2453_v62  ;;  %v2467_v62 = vld [vmem:[%s3060_s10 + $0x24c] sm:$0xf0] }
 0x13b   : > { %v1650_v45 = vpop.f32.mrf.mxu0  ;;  %v1853_v46 = vadd.f32 %v3417_v47, %v1817_v35 }
 0x13c   : > { %v1649_v49 = vadd.f32 %v1648_v57, %v1560_v14  ;;  %v2450_v57 = vor.u32 %v2726_v63, %v2447_v37  ;;  %v2459_v63 = vld [vmem:[%s3060_s10 + $0x244] sm:$0xf0]  ;;  %v2731_v37 = vld [vmem:[%s3060_s10 + $0x23c] sm:$0xf] }
 0x13d   : > { %v1917_v53 = vadd.f32 %v1885_v44, %v1853_v46  ;;  %v1887_v46 = vld [vmem:[%s3412_s9 + $0x40] sm:$0xff] }
 0x13e   : > { %v1716_v0 = vadd.f32 %v1649_v49, %v406_v48 }
 0x13f   : > { %v1949_v4 = vmax.f32 %v1917_v53, 0.0  ;;  %v1472_v5 = vpop.f32.mrf.mxu2 }
 0x140   : > { %v1782_v6 = vld [vmem:[#allocation2 + $0x38] sm:$0xff]  ;;  %1748 = vst.msk [vmem:[#allocation2 + $0x40] sm:$0xff] %vm365_vm0, %v1716_v0  ;;  %v1473_v9 = vadd.f32 %v1472_v5, %v1384_v1  ;;  %v1561_v3 = vpop.f32.mrf.mxu3  ;;  %v2733_v1 = vld [vmem:[%s3060_s10 + $0x248] sm:$0xf0] }
 0x141   : > { %1981 = vst.msk [vmem:[%s3435_s14 + $0x30] sm:$0xff] %vm365_vm0, %v1949_v4  ;;  %v1818_v24 = vmul.f32 %v3405_v21, %v1782_v6  ;;  %v1386_v10 = vpop.f32.mrf.mxu1  ;;  %v2465_v0 = vld [vmem:[%s3060_s10 + $0x238] sm:$0xf]  ;;  %v2473_v6 = vld [vmem:[%s3060_s10 + $0x240] sm:$0xf] }
 0x142   : > { %v1562_v25 = vadd.f32 %v1561_v3, %v1473_v9  ;;  %v1387_v32 = vadd.f32 %v1386_v10, %v3250_v34  ;;  %v2734_v9 = vld [vmem:[%s3060_s10 + $0x250] sm:$0xf0] }
 0x143   : > { %v1653_v26 = vpop.f32.mrf.mxu0  ;;  %v1854_v12 = vadd.f32 %v3417_v47, %v1818_v24 }
 0x144   : > { %v1651_v28 = vadd.f32 %v1650_v45, %v1562_v25  ;;  %1425 = vmatmul.bf16.gmra.mxu1 %v2442_v17  ;;  %1514 = vmatmul.bf16.gmra.mxu2 %v2446_v59 }
 0x145   : > { %v1918_v29 = vadd.f32 %v1886_v13, %v1854_v12  ;;  %1603 = vmatmul.bf16.gmra.mxu3 %v2450_v57  ;;  %v2462_v57 = vor.u32 %v2730_v56, %v2459_v63  ;;  %v1888_v13 = vld [vmem:[%s3412_s9 + $0x48] sm:$0xff]  ;;  %v2474_v12 = vor.u32 %v2734_v9, %v2473_v6  ;;  %v2735_v56 = vld [vmem:[%s3060_s10 + $0x25c] sm:$0xf]  ;;  %v2479_v63 = vld [vmem:[%s3060_s10 + $0x26c] sm:$0xf0] }
 0x146   : > { %2652 = vmatmul.msk.bf16.gmra.mxu0 %vm365_vm0, %v2454_v20  ;;  %v1717_v15 = vadd.f32 %v1651_v28, %v407_v27  ;;  %v2466_v20 = vor.u32 %v2733_v1, %v2465_v0  ;;  %v2485_v1 = vld [vmem:[%s3060_s10 + $0x260] sm:$0xf]  ;;  %v2493_v6 = vld [vmem:[%s3060_s10 + $0x268] sm:$0xf]  ;;  %v2739_v9 = vld [vmem:[%s3060_s10 + $0x278] sm:$0xf0] }
 0x147   : > { %v1950_v33 = vmax.f32 %v1918_v29, 0.0  ;;  %v1783_v35 = vld [vmem:[#allocation2 + $0x40] sm:$0xff]  ;;  %v1475_v43 = vpop.f32.mrf.mxu2  ;;  %v409_v29 = vld [vmem:[#allocation2 + $0x58] sm:$0xff] }
 0x148   : > { %v1819_v44 = vmul.f32 %v3405_v21, %v1783_v35  ;;  %1749 = vst.msk [vmem:[#allocation2 + $0x48] sm:$0xff] %vm365_vm0, %v1717_v15  ;;  %v1476_v14 = vadd.f32 %v1475_v43, %v1387_v32  ;;  %v1564_v45 = vpop.f32.mrf.mxu3 }
 0x149   : > { %1982 = vst.msk [vmem:[%s3435_s14 + $0x38] sm:$0xff] %vm365_vm0, %v1950_v33  ;;  %v1388_v48 = vpop.f32.mrf.mxu1 }
 0x14a   : > { %v1855_v34 = vadd.f32 %v3417_v47, %v1819_v44  ;;  %v1565_v49 = vadd.f32 %v1564_v45, %v1476_v14  ;;  %v1389_v5 = vadd.f32 %v1388_v48, %v3259_v40 }
 0x14b   : > { %v1655_v41 = vpop.f32.mrf.mxu0 }
 0x14c   : > { %v1919_v53 = vadd.f32 %v1887_v46, %v1855_v34  ;;  %v1654_v55 = vadd.f32 %v1653_v26, %v1565_v49  ;;  %v2470_v26 = vor.u32 %v2731_v37, %v2467_v62  ;;  %v1889_v49 = vld [vmem:[%s3412_s9 + $0x50] sm:$0xff]  ;;  %v2736_v62 = vld [vmem:[%s3060_s10 + $0x264] sm:$0xf] }
 0x14d   : > { %v2738_v37 = vld [vmem:[%s3060_s10 + $0x270] sm:$0xf0] }
 0x14e   : > { %v1951_v2 = vmax.f32 %v1919_v53, 0.0  ;;  %v1718_v4 = vadd.f32 %v1654_v55, %v408_v52  ;;  %v410_v53 = vld [vmem:[#allocation2 + $0x60] sm:$0xff] }
 0x14f   : > { %v1784_v3 = vld [vmem:[#allocation2 + $0x48] sm:$0xff]  ;;  %v1477_v17 = vpop.f32.mrf.mxu2 }
 0x150   : > { %1983 = vst.msk [vmem:[%s3435_s14 + $0x40] sm:$0xff] %vm365_vm0, %v1951_v2  ;;  %v1820_v59 = vmul.f32 %v3405_v21, %v1784_v3  ;;  %v1478_v24 = vadd.f32 %v1477_v17, %v1389_v5  ;;  %v1566_v10 = vpop.f32.mrf.mxu3  ;;  %v2487_v5 = vld [vmem:[%s3060_s10 + $0x274] sm:$0xf0] }
 0x151   : > { %1750 = vst.msk [vmem:[#allocation2 + $0x50] sm:$0xff] %vm365_vm0, %v1718_v4  ;;  %v1391_v25 = vpop.f32.mrf.mxu1 }
 0x152   : > { %v1856_v40 = vadd.f32 %v3417_v47, %v1820_v59  ;;  %v1567_v27 = vadd.f32 %v1566_v10, %v1478_v24  ;;  %v1392_v43 = vadd.f32 %v1391_v25, %v3275_v54 }
 0x153   : > { %v1658_v28 = vpop.f32.mrf.mxu0 }
 0x154   : > { %v1920_v15 = vadd.f32 %v1888_v13, %v1856_v40  ;;  %v1656_v32 = vadd.f32 %v1655_v41, %v1567_v27  ;;  %1430 = vmatmul.bf16.gmra.mxu1 %v2462_v57  ;;  %1519 = vmatmul.bf16.gmra.mxu2 %v2466_v20  ;;  %v2482_v57 = vor.u32 %v2735_v56, %v2479_v63 }
 0x155   : > { %1608 = vmatmul.bf16.gmra.mxu3 %v2470_v26  ;;  %v2486_v20 = vor.u32 %v2738_v37, %v2485_v1  ;;  %v2490_v26 = vor.u32 %v2736_v62, %v2487_v5  ;;  %v1892_v5 = vld [vmem:[%s3412_s9 + $0x68] sm:$0xff] }
 0x156   : > { %2653 = vmatmul.msk.bf16.gmra.mxu0 %vm365_vm0, %v2474_v12  ;;  %v1952_v33 = vmax.f32 %v1920_v15, 0.0  ;;  %v1719_v35 = vadd.f32 %v1656_v32, %v409_v29  ;;  %v1890_v12 = vld [vmem:[%s3412_s9 + $0x58] sm:$0xff]  ;;  %v411_v29 = vld [vmem:[#allocation2 + $0x68] sm:$0xff] }
 0x157   : > { %v1480_v44 = vpop.f32.mrf.mxu2 }
 0x158   : > { %1984 = vst.msk [vmem:[%s3435_s14 + $0x48] sm:$0xff] %vm365_vm0, %v1952_v33  ;;  %v1785_v14 = vld [vmem:[#allocation2 + $0x50] sm:$0xff]  ;;  %v1481_v45 = vadd.f32 %v1480_v44, %v1392_v43  ;;  %v1569_v46 = vpop.f32.mrf.mxu3 }
 0x159   : > { %v1821_v48 = vmul.f32 %v3405_v21, %v1785_v14  ;;  %1751 = vst.msk [vmem:[#allocation2 + $0x58] sm:$0xff] %vm365_vm0, %v1719_v35  ;;  %v1393_v34 = vpop.f32.mrf.mxu1 }
 0x15a   : > { %v1570_v54 = vadd.f32 %v1569_v46, %v1481_v45  ;;  %v1394_v4 = vadd.f32 %v1393_v34, %v3288_v61  ;;  %v2494_v61 = vor.u32 %v2739_v9, %v2493_v6  ;;  %v1891_v34 = vld [vmem:[%s3412_s9 + $0x60] sm:$0xff] }
 0x15b   : > { %v1660_v41 = vpop.f32.mrf.mxu0  ;;  %v1857_v52 = vadd.f32 %v3417_v47, %v1821_v48 }
 0x15c   : > { %v1659_v55 = vadd.f32 %v1658_v28, %v1570_v54 }
 0x15d   : > { %v1921_v0 = vadd.f32 %v1889_v49, %v1857_v52 }
 0x15e   : > { %v1720_v2 = vadd.f32 %v1659_v55, %v410_v53 }
 0x15f   : > { %v1953_v3 = vmax.f32 %v1921_v0, 0.0  ;;  %v1482_v17 = vpop.f32.mrf.mxu2 }
 0x160   : > { %v1786_v59 = vld [vmem:[#allocation2 + $0x58] sm:$0xff]  ;;  %1752 = vst.msk [vmem:[#allocation2 + $0x60] sm:$0xff] %vm365_vm0, %v1720_v2  ;;  %v1483_v24 = vadd.f32 %v1482_v17, %v1394_v4  ;;  %v1571_v10 = vpop.f32.mrf.mxu3 }
 0x161   : > { %1985 = vst.msk [vmem:[%s3435_s14 + $0x50] sm:$0xff] %vm365_vm0, %v1953_v3  ;;  %v1822_v13 = vmul.f32 %v3405_v21, %v1786_v59  ;;  %v1396_v25 = vpop.f32.mrf.mxu1  ;;  %v413_v59 = vld [vmem:[#allocation2 + $0x78] sm:$0xff] }
 0x162   : > { %v1572_v40 = vadd.f32 %v1571_v10, %v1483_v24  ;;  %v1397_v35 = vadd.f32 %v1396_v25, %v3320_v11  ;;  %v412_v11 = vld [vmem:[#allocation2 + $0x70] sm:$0xff] }
 0x163   : > { %v1663_v27 = vpop.f32.mrf.mxu0  ;;  %v1858_v28 = vadd.f32 %v3417_v47, %v1822_v13 }
 0x164   : > { %v1661_v15 = vadd.f32 %v1660_v41, %v1572_v40  ;;  %1435 = vmatmul.bf16.gmra.mxu1 %v2482_v57  ;;  %1524 = vmatmul.bf16.gmra.mxu2 %v2486_v20 }
 0x165   : > { %v1922_v32 = vadd.f32 %v1890_v12, %v1858_v28  ;;  %1613 = vmatmul.bf16.gmra.mxu3 %v2490_v26 }
 0x166   : > { %2654 = vmatmul.msk.bf16.gmra.mxu0 %vm365_vm0, %v2494_v61  ;;  %v1721_v33 = vadd.f32 %v1661_v15, %v411_v29 }
 0x167   : > { %v1954_v43 = vmax.f32 %v1922_v32, 0.0  ;;  %v1787_v44 = vld [vmem:[#allocation2 + $0x60] sm:$0xff]  ;;  %v1485_v14 = vpop.f32.mrf.mxu2 }
 0x168   : > { %v1823_v45 = vmul.f32 %v3405_v21, %v1787_v44  ;;  %1753 = vst.msk [vmem:[#allocation2 + $0x68] sm:$0xff] %vm365_vm0, %v1721_v33  ;;  %v1486_v46 = vadd.f32 %v1485_v14, %v1397_v35  ;;  %v1574_v48 = vpop.f32.mrf.mxu3  ;;  %v414_v32 = vld [vmem:[#allocation2 + $0x80] sm:$0xff] }
 0x169   : > { %1986 = vst.msk [vmem:[%s3435_s14 + $0x58] sm:$0xff] %vm365_vm0, %v1954_v43  ;;  %v1398_v49 = vpop.f32.mrf.mxu1 }
 0x16a   : > { %v1859_v54 = vadd.f32 %v3417_v47, %v1823_v45  ;;  %v1575_v41 = vadd.f32 %v1574_v48, %v1486_v46  ;;  %v1399_v0 = vadd.f32 %v1398_v49, %v3345_v23 }
 0x16b   : > { %v1665_v52 = vpop.f32.mrf.mxu0 }
 0x16c   : > { %v1923_v53 = vadd.f32 %v1891_v34, %v1859_v54  ;;  %v1664_v55 = vadd.f32 %v1663_v27, %v1575_v41  ;;  %v1893_v27 = vld [vmem:[%s3412_s9 + $0x70] sm:$0xff]  ;;  %v1894_v54 = vld [vmem:[%s3412_s9 + $0x78] sm:$0xff] }
 0x16e   : > { %v1955_v56 = vmax.f32 %v1923_v53, 0.0  ;;  %v1722_v63 = vadd.f32 %v1664_v55, %v412_v11 }
 0x16f   : > { %v1788_v1 = vld [vmem:[#allocation2 + $0x68] sm:$0xff]  ;;  %v1487_v37 = vpop.f32.mrf.mxu2 }
 0x170   : > { %1987 = vst.msk [vmem:[%s3435_s14 + $0x60] sm:$0xff] %vm365_vm0, %v1955_v56  ;;  %v1824_v62 = vmul.f32 %v3405_v21, %v1788_v1  ;;  %v1488_v2 = vadd.f32 %v1487_v37, %v1399_v0  ;;  %v1576_v4 = vpop.f32.mrf.mxu3 }
 0x171   : > { %1754 = vst.msk [vmem:[#allocation2 + $0x70] sm:$0xff] %vm365_vm0, %v1722_v63  ;;  %v1401_v6 = vpop.f32.mrf.mxu1 }
 0x172   : > { %v1860_v9 = vadd.f32 %v3417_v47, %v1824_v62  ;;  %v1577_v3 = vadd.f32 %v1576_v4, %v1488_v2  ;;  %v1402_v20 = vadd.f32 %v1401_v6, %v3230_v18 }
 0x173   : > { %v1668_v17 = vpop.f32.mrf.mxu0 }
 0x174   : > { %v1924_v23 = vadd.f32 %v1892_v5, %v1860_v9  ;;  %v1666_v24 = vadd.f32 %v1665_v52, %v1577_v3  ;;  %v1895_v5 = vld [vmem:[%s3412_s9 + $0x80] sm:$0xff] }
 0x176   : > { %v1956_v10 = vmax.f32 %v1924_v23, 0.0  ;;  %v1723_v57 = vadd.f32 %v1666_v24, %v413_v59 }
 0x177   : > { %v1490_v13 = vpop.f32.mrf.mxu2 }
 0x178   : > { %1988 = vst.msk [vmem:[%s3435_s14 + $0x68] sm:$0xff] %vm365_vm0, %v1956_v10  ;;  %v1789_v25 = vld [vmem:[#allocation2 + $0x70] sm:$0xff]  ;;  %v1491_v26 = vadd.f32 %v1490_v13, %v1402_v20  ;;  %v1579_v61 = vpop.f32.mrf.mxu3 }
 0x179   : > { %v1825_v12 = vmul.f32 %v3405_v21, %v1789_v25  ;;  %1755 = vst.msk [vmem:[#allocation2 + $0x78] sm:$0xff] %vm365_vm0, %v1723_v57  ;;  %v1403_v40 = vpop.f32.mrf.mxu1 }
 0x17a   : > { %v1580_v28 = vadd.f32 %v1579_v61, %v1491_v26  ;;  %v1404_v43 = vadd.f32 %v1403_v40, %v3246_v30  ;;  %v415_v30 = vld [vmem:[#allocation2 + $0x88] sm:$0xff] }
 0x17b   : > { %v1670_v29 = vpop.f32.mrf.mxu0  ;;  %v1861_v15 = vadd.f32 %v3417_v47, %v1825_v12  ;;  %v1896_v12 = vld [vmem:[%s3412_s9 + $0x88] sm:$0xff] }
 0x17c   : > { %v1669_v18 = vadd.f32 %v1668_v17, %v1580_v28 }
 0x17d   : > { %v1925_v33 = vadd.f32 %v1893_v27, %v1861_v15  ;;  %v417_v15 = vld [vmem:[#allocation2 + $0x98] sm:$0xff] }
 0x17e   : > { %v1724_v35 = vadd.f32 %v1669_v18, %v414_v32 }
 0x17f   : > { %v1957_v44 = vmax.f32 %v1925_v33, 0.0  ;;  %v1492_v14 = vpop.f32.mrf.mxu2 }
 0x180   : > { %v1790_v45 = vld [vmem:[#allocation2 + $0x78] sm:$0xff]  ;;  %1756 = vst.msk [vmem:[#allocation2 + $0x80] sm:$0xff] %vm365_vm0, %v1724_v35  ;;  %v1493_v46 = vadd.f32 %v1492_v14, %v1404_v43  ;;  %v1581_v48 = vpop.f32.mrf.mxu3 }
 0x181   : > { %1989 = vst.msk [vmem:[%s3435_s14 + $0x70] sm:$0xff] %vm365_vm0, %v1957_v44  ;;  %v1826_v34 = vmul.f32 %v3405_v21, %v1790_v45  ;;  %v1406_v49 = vpop.f32.mrf.mxu1 }
 0x182   : > { %v1582_v41 = vadd.f32 %v1581_v48, %v1493_v46  ;;  %v1407_v63 = vadd.f32 %v1406_v49, %v3255_v38  ;;  %v416_v38 = vld [vmem:[#allocation2 + $0x90] sm:$0xff] }
 0x183   : > { %v1673_v52 = vpop.f32.mrf.mxu0  ;;  %v1862_v11 = vadd.f32 %v3417_v47, %v1826_v34  ;;  %v1897_v34 = vld [vmem:[%s3412_s9 + $0x90] sm:$0xff] }
 0x184   : > { %v1671_v53 = vadd.f32 %v1670_v29, %v1582_v41 }
 0x185   : > { %v1926_v55 = vadd.f32 %v1894_v54, %v1862_v11 }
 0x186   : > { %v1725_v56 = vadd.f32 %v1671_v53, %v415_v30 }
 0x187   : > { %v1958_v0 = vmax.f32 %v1926_v55, 0.0  ;;  %v1791_v1 = vld [vmem:[#allocation2 + $0x80] sm:$0xff]  ;;  %v1495_v37 = vpop.f32.mrf.mxu2 }
 0x188   : > { %v1827_v62 = vmul.f32 %v3405_v21, %v1791_v1  ;;  %1757 = vst.msk [vmem:[#allocation2 + $0x88] sm:$0xff] %vm365_vm0, %v1725_v56  ;;  %v1496_v2 = vadd.f32 %v1495_v37, %v1407_v63  ;;  %v1584_v4 = vpop.f32.mrf.mxu3 }
 0x189   : > { %1990 = vst.msk [vmem:[%s3435_s14 + $0x78] sm:$0xff] %vm365_vm0, %v1958_v0  ;;  %v1408_v6 = vpop.f32.mrf.mxu1 }
 0x18a   : > { %v1863_v9 = vadd.f32 %v3417_v47, %v1827_v62  ;;  %v1585_v3 = vadd.f32 %v1584_v4, %v1496_v2  ;;  %v1409_v57 = vadd.f32 %v1408_v6, %v3271_v50  ;;  %v1898_v2 = vld [vmem:[%s3412_s9 + $0x98] sm:$0xff] }
 0x18b   : > { %v1675_v17 = vpop.f32.mrf.mxu0 }
 0x18c   : > { %v1927_v59 = vadd.f32 %v1895_v5, %v1863_v9  ;;  %v1674_v23 = vadd.f32 %v1673_v52, %v1585_v3  ;;  %v418_v52 = vld [vmem:[#allocation2 + $0xa0] sm:$0xff] }
 0x18e   : > { %v1959_v24 = vmax.f32 %v1927_v59, 0.0  ;;  %v1726_v10 = vadd.f32 %v1674_v23, %v416_v38 }
 0x18f   : > { %v1792_v20 = vld [vmem:[#allocation2 + $0x88] sm:$0xff]  ;;  %v1497_v13 = vpop.f32.mrf.mxu2 }
 0x190   : > { %1991 = vst.msk [vmem:[%s3435_s14 + $0x80] sm:$0xff] %vm365_vm0, %v1959_v24  ;;  %v1828_v25 = vmul.f32 %v3405_v21, %v1792_v20  ;;  %v1498_v26 = vadd.f32 %v1497_v13, %v1409_v57  ;;  %v1586_v61 = vpop.f32.mrf.mxu3  ;;  %v1899_v13 = vld [vmem:[%s3412_s9 + $0xa0] sm:$0xff] }
 0x191   : > { %1758 = vst.msk [vmem:[#allocation2 + $0x90] sm:$0xff] %vm365_vm0, %v1726_v10  ;;  %v1411_v40 = vpop.f32.mrf.mxu1 }
 0x192   : > { %v1864_v27 = vadd.f32 %v3417_v47, %v1828_v25  ;;  %v1587_v28 = vadd.f32 %v1586_v61, %v1498_v26  ;;  %v1412_v35 = vadd.f32 %v1411_v40, %v3280_v58 }
 0x193   : > { %v1678_v29 = vpop.f32.mrf.mxu0 }
 0x194   : > { %v1928_v50 = vadd.f32 %v1896_v12, %v1864_v27  ;;  %v1676_v32 = vadd.f32 %v1675_v17, %v1587_v28 }
 0x196   : > { %v1960_v18 = vmax.f32 %v1928_v50, 0.0  ;;  %v1727_v33 = vadd.f32 %v1676_v32, %v417_v15 }
 0x197   : > { %v1500_v43 = vpop.f32.mrf.mxu2 }
 0x198   : > { %1992 = vst.msk [vmem:[%s3435_s14 + $0x88] sm:$0xff] %vm365_vm0, %v1960_v18  ;;  %v1793_v44 = vld [vmem:[#allocation2 + $0x90] sm:$0xff]  ;;  %v1501_v14 = vadd.f32 %v1500_v43, %v1412_v35  ;;  %v1589_v45 = vpop.f32.mrf.mxu3  ;;  %v1900_v43 = vld [vmem:[%s3412_s9 + $0xa8] sm:$0xff] }
 0x199   : > { %v1829_v46 = vmul.f32 %v3405_v21, %v1793_v44  ;;  %1759 = vst.msk [vmem:[#allocation2 + $0x98] sm:$0xff] %vm365_vm0, %v1727_v33  ;;  %v1413_v48 = vpop.f32.mrf.mxu1 }
 0x19a   : > { %v1590_v49 = vadd.f32 %v1589_v45, %v1501_v14  ;;  %v1414_v53 = vadd.f32 %v1413_v48, %v3312_v7  ;;  %v419_v7 = vld [vmem:[#allocation2 + $0xa8] sm:$0xff]  ;;  %v421_v48 = vld [vmem:[#allocation2 + $0xb8] sm:$0xff] }
 0x19b   : > { %v1680_v54 = vpop.f32.mrf.mxu0  ;;  %v1865_v41 = vadd.f32 %v3417_v47, %v1829_v46 }
 0x19c   : > { %v1679_v58 = vadd.f32 %v1678_v29, %v1590_v49 }
 0x19d   : > { %v1929_v11 = vadd.f32 %v1897_v34, %v1865_v41 }
 0x19e   : > { %v1728_v30 = vadd.f32 %v1679_v58, %v418_v52 }
 0x19f   : > { %v1961_v55 = vmax.f32 %v1929_v11, 0.0  ;;  %v1502_v56 = vpop.f32.mrf.mxu2 }
 0x1a0   : > { %v1794_v63 = vld [vmem:[#allocation2 + $0x98] sm:$0xff]  ;;  %1760 = vst.msk [vmem:[#allocation2 + $0xa0] sm:$0xff] %vm365_vm0, %v1728_v30  ;;  %v1503_v0 = vadd.f32 %v1502_v56, %v1414_v53  ;;  %v1591_v1 = vpop.f32.mrf.mxu3  ;;  %v1901_v56 = vld [vmem:[%s3412_s9 + $0xb0] sm:$0xff] }
 0x1a1   : > { %1993 = vst.msk [vmem:[%s3435_s14 + $0x90] sm:$0xff] %vm365_vm0, %v1961_v55  ;;  %v1830_v37 = vmul.f32 %v3405_v21, %v1794_v63  ;;  %v1416_v62 = vpop.f32.mrf.mxu1 }
 0x1a2   : > { %v1592_v4 = vadd.f32 %v1591_v1, %v1503_v0  ;;  %v1417_v38 = vadd.f32 %v1416_v62, %v3337_v16  ;;  %v420_v16 = vld [vmem:[#allocation2 + $0xb0] sm:$0xff] }
 0x1a3   : > { %v1683_v5 = vpop.f32.mrf.mxu0  ;;  %v1866_v6 = vadd.f32 %v3417_v47, %v1830_v37  ;;  %v422_v37 = vld [vmem:[#allocation2 + $0xc0] sm:$0xff] }
 0x1a4   : > { %v1681_v9 = vadd.f32 %v1680_v54, %v1592_v4 }
 0x1a5   : > { %v1930_v3 = vadd.f32 %v1898_v2, %v1866_v6 }
 0x1a6   : > { %v1729_v17 = vadd.f32 %v1681_v9, %v419_v7 }
 0x1a7   : > { %v1962_v59 = vmax.f32 %v1930_v3, 0.0  ;;  %v1795_v23 = vld [vmem:[#allocation2 + $0xa0] sm:$0xff]  ;;  %v1505_v24 = vpop.f32.mrf.mxu2 }
 0x1a8   : > { %v1831_v10 = vmul.f32 %v3405_v21, %v1795_v23  ;;  %1761 = vst.msk [vmem:[#allocation2 + $0xa8] sm:$0xff] %vm365_vm0, %v1729_v17  ;;  %v1506_v57 = vadd.f32 %v1505_v24, %v1417_v38  ;;  %v1594_v20 = vpop.f32.mrf.mxu3  ;;  %v1902_v38 = vld [vmem:[%s3412_s9 + $0xb8] sm:$0xff]  ;;  %v3650_v23 = vld [vmem:[%s3750_s3] ss:$0 sm:$0xff] }
 0x1a9   : > { %1994 = vst.msk [vmem:[%s3435_s14 + $0x98] sm:$0xff] %vm365_vm0, %v1962_v59  ;;  %v1418_v25 = vpop.f32.mrf.mxu1 }
 0x1aa   : > { %v1867_v26 = vadd.f32 %v3417_v47, %v1831_v10  ;;  %v1595_v61 = vadd.f32 %v1594_v20, %v1506_v57  ;;  %v1419_v15 = vadd.f32 %v1418_v25, %v3369_v36  ;;  %v423_v10 = vld [vmem:[#allocation2 + $0xc8] sm:$0xff] }
 0x1ab   : > { %v1685_v12 = vpop.f32.mrf.mxu0 }
 0x1ac   : > { %v1931_v40 = vadd.f32 %v1899_v13, %v1867_v26  ;;  %v1684_v27 = vadd.f32 %v1683_v5, %v1595_v61 }
 0x1ae   : > { %v1963_v28 = vmax.f32 %v1931_v40, 0.0  ;;  %v1730_v29 = vadd.f32 %v1684_v27, %v420_v16 }
 0x1af   : > { %v1796_v50 = vld [vmem:[#allocation2 + $0xa8] sm:$0xff]  ;;  %v1507_v32 = vpop.f32.mrf.mxu2 }
 0x1b0   : > { %1995 = vst.msk [vmem:[%s3435_s14 + $0xa0] sm:$0xff] %vm365_vm0, %v1963_v28  ;;  %v1832_v18 = vmul.f32 %v3405_v21, %v1796_v50  ;;  %v1508_v33 = vadd.f32 %v1507_v32, %v1419_v15  ;;  %v1596_v35 = vpop.f32.mrf.mxu3  ;;  %v1903_v28 = vld [vmem:[%s3412_s9 + $0xc0] sm:$0xff]  ;;  %v424_v32 = vld [vmem:[#allocation2 + $0xd0] sm:$0xff] }
 0x1b1   : > { %1762 = vst.msk [vmem:[#allocation2 + $0xb0] sm:$0xff] %vm365_vm0, %v1730_v29  ;;  %v1421_v44 = vpop.f32.mrf.mxu1 }
 0x1b2   : > { %v1868_v14 = vadd.f32 %v3417_v47, %v1832_v18  ;;  %v1597_v45 = vadd.f32 %v1596_v35, %v1508_v33  ;;  %v1422_v41 = vadd.f32 %v1421_v44, %v3232_v19 }
 0x1b3   : > { %v1688_v46 = vpop.f32.mrf.mxu0 }
 0x1b4   : > { %v1932_v36 = vadd.f32 %v1900_v43, %v1868_v14  ;;  %v1686_v34 = vadd.f32 %v1685_v12, %v1597_v45 }
 0x1b6   : > { %v1964_v49 = vmax.f32 %v1932_v36, 0.0  ;;  %v1731_v54 = vadd.f32 %v1686_v34, %v421_v48  ;;  %v1904_v34 = vld [vmem:[%s3412_s9 + $0xc8] sm:$0xff] }
 0x1b7   : > { %v1510_v52 = vpop.f32.mrf.mxu2 }
 0x1b8   : > { %1996 = vst.msk [vmem:[%s3435_s14 + $0xa8] sm:$0xff] %vm365_vm0, %v1964_v49  ;;  %v1797_v58 = vld [vmem:[#allocation2 + $0xb0] sm:$0xff]  ;;  %v1511_v11 = vadd.f32 %v1510_v52, %v1422_v41  ;;  %v1599_v30 = vpop.f32.mrf.mxu3  ;;  %v425_v52 = vld [vmem:[#allocation2 + $0xd8] sm:$0xff] }
 0x1b9   : > { %v1833_v53 = vmul.f32 %v3405_v21, %v1797_v58  ;;  %1763 = vst.msk [vmem:[#allocation2 + $0xb8] sm:$0xff] %vm365_vm0, %v1731_v54  ;;  %v1423_v55 = vpop.f32.mrf.mxu1 }
 0x1ba   : > { %v1600_v63 = vadd.f32 %v1599_v30, %v1511_v11  ;;  %v1424_v4 = vadd.f32 %v1423_v55, %v3248_v31 }
 0x1bb   : > { %v1690_v0 = vpop.f32.mrf.mxu0  ;;  %v1869_v1 = vadd.f32 %v3417_v47, %v1833_v53  ;;  %v3643_v47 = vld [vmem:[%s3749_s2] ss:$0 sm:$0xff] }
 0x1bc   : > { %v1689_v19 = vadd.f32 %v1688_v46, %v1600_v63 }
 0x1bd   : > { %v1933_v62 = vadd.f32 %v1901_v56, %v1869_v1 }
 0x1be   : > { %v1732_v2 = vadd.f32 %v1689_v19, %v422_v37 }
 0x1bf   : > { %v1965_v5 = vmax.f32 %v1933_v62, 0.0  ;;  %v1512_v6 = vpop.f32.mrf.mxu2  ;;  %v1905_v62 = vld [vmem:[%s3412_s9 + $0xd0] sm:$0xff] }
 0x1c0   : > { %v1798_v7 = vld [vmem:[#allocation2 + $0xb8] sm:$0xff]  ;;  %1764 = vst.msk [vmem:[#allocation2 + $0xc0] sm:$0xff] %vm365_vm0, %v1732_v2  ;;  %v1513_v21 = vadd.f32 %v1512_v6, %v1424_v4  ;;  %v1601_v9 = vpop.f32.mrf.mxu3 }
 0x1c1   : > { %1997 = vst.msk [vmem:[%s3435_s14 + $0xb0] sm:$0xff] %vm365_vm0, %v1965_v5  ;;  %v1834_v3 = vmul.f32 %v3643_v47, %v1798_v7  ;;  %v1426_v17 = vpop.f32.mrf.mxu1  ;;  %v426_v5 = vld [vmem:[#allocation2 + $0xe0] sm:$0xff] }
 0x1c2   : > { %v1602_v59 = vadd.f32 %v1601_v9, %v1513_v21  ;;  %v1427_v25 = vadd.f32 %v1426_v17, %v3257_v39 }
 0x1c3   : > { %v1693_v31 = vpop.f32.mrf.mxu0  ;;  %v1870_v24 = vadd.f32 %v3650_v23, %v1834_v3 }
 0x1c4   : > { %v1691_v57 = vadd.f32 %v1690_v0, %v1602_v59 }
 0x1c5   : > { %v1934_v20 = vadd.f32 %v1902_v38, %v1870_v24 }
 0x1c6   : > { %v1733_v13 = vadd.f32 %v1691_v57, %v423_v10  ;;  %v1906_v57 = vld [vmem:[%s3412_s9 + $0xd8] sm:$0xff] }
 0x1c7   : > { %v1966_v26 = vmax.f32 %v1934_v20, 0.0  ;;  %v1799_v61 = vld [vmem:[#allocation2 + $0xc0] sm:$0xff]  ;;  %v1515_v12 = vpop.f32.mrf.mxu2 }
 0x1c8   : > { %v1835_v16 = vmul.f32 %v3643_v47, %v1799_v61  ;;  %1765 = vst.msk [vmem:[#allocation2 + $0xc8] sm:$0xff] %vm365_vm0, %v1733_v13  ;;  %v1516_v40 = vadd.f32 %v1515_v12, %v1427_v25  ;;  %v1604_v27 = vpop.f32.mrf.mxu3 }
 0x1c9   : > { %1998 = vst.msk [vmem:[%s3435_s14 + $0xb8] sm:$0xff] %vm365_vm0, %v1966_v26  ;;  %v1428_v29 = vpop.f32.mrf.mxu1 }
 0x1ca   : > { %v1871_v15 = vadd.f32 %v3650_v23, %v1835_v16  ;;  %v1605_v50 = vadd.f32 %v1604_v27, %v1516_v40  ;;  %v1429_v44 = vadd.f32 %v1428_v29, %v3273_v51 }
 0x1cb   : > { %v1695_v39 = vpop.f32.mrf.mxu0 }
 0x1cc   : > { %v1935_v18 = vadd.f32 %v1903_v28, %v1871_v15  ;;  %v1694_v33 = vadd.f32 %v1693_v31, %v1605_v50  ;;  %v1907_v50 = vld [vmem:[%s3412_s9 + $0xe0] sm:$0xff] }
 0x1ce   : > { %v1967_v35 = vmax.f32 %v1935_v18, 0.0  ;;  %v1734_v43 = vadd.f32 %v1694_v33, %v424_v32  ;;  %v428_v33 = vld [vmem:[#allocation2 + $0xf0] sm:$0xff] }
 0x1cf   : > { %v1800_v14 = vld [vmem:[#allocation2 + $0xc8] sm:$0xff]  ;;  %v1517_v45 = vpop.f32.mrf.mxu2 }
 0x1d0   : > { %1999 = vst.msk [vmem:[%s3435_s14 + $0xc0] sm:$0xff] %vm365_vm0, %v1967_v35  ;;  %v1836_v46 = vmul.f32 %v3643_v47, %v1800_v14  ;;  %v1518_v48 = vadd.f32 %v1517_v45, %v1429_v44  ;;  %v1606_v36 = vpop.f32.mrf.mxu3 }
 0x1d1   : > { %1766 = vst.msk [vmem:[#allocation2 + $0xd0] sm:$0xff] %vm365_vm0, %v1734_v43  ;;  %v1431_v49 = vpop.f32.mrf.mxu1 }
 0x1d2   : > { %v1872_v54 = vadd.f32 %v3650_v23, %v1836_v46  ;;  %v1607_v41 = vadd.f32 %v1606_v36, %v1518_v48  ;;  %v1432_v55 = vadd.f32 %v1431_v49, %v3284_v60  ;;  %v1908_v49 = vld [vmem:[%s3412_s9 + $0xe8] sm:$0xff] }
 0x1d3   : > { %v1698_v11 = vpop.f32.mrf.mxu0 }
 0x1d4   : > { %v1936_v58 = vadd.f32 %v1904_v34, %v1872_v54  ;;  %v1696_v51 = vadd.f32 %v1695_v39, %v1607_v41 }
 0x1d6   : > { %v1968_v30 = vmax.f32 %v1936_v58, 0.0  ;;  %v1735_v53 = vadd.f32 %v1696_v51, %v425_v52  ;;  %v429_v51 = vld [vmem:[#allocation2 + $0xf8] sm:$0xff] }
 0x1d7   : > { %v1520_v56 = vpop.f32.mrf.mxu2 }
 0x1d8   : > { %2000 = vst.msk [vmem:[%s3435_s14 + $0xc8] sm:$0xff] %vm365_vm0, %v1968_v30  ;;  %v1801_v63 = vld [vmem:[#allocation2 + $0xd0] sm:$0xff]  ;;  %v1521_v0 = vadd.f32 %v1520_v56, %v1432_v55  ;;  %v1609_v1 = vpop.f32.mrf.mxu3 }
 0x1d9   : > { %v1837_v37 = vmul.f32 %v3643_v47, %v1801_v63  ;;  %1767 = vst.msk [vmem:[#allocation2 + $0xd8] sm:$0xff] %vm365_vm0, %v1735_v53  ;;  %v1433_v19 = vpop.f32.mrf.mxu1  ;;  %v1909_v63 = vld [vmem:[%s3412_s9 + $0xf0] sm:$0xff] }
 0x1da   : > { %v1610_v2 = vadd.f32 %v1609_v1, %v1521_v0  ;;  %v1434_v21 = vadd.f32 %v1433_v19, %v3316_v8  ;;  %v427_v8 = vld [vmem:[#allocation2 + $0xe8] sm:$0xff] }
 0x1db   : > { %v1873_v4 = vadd.f32 %v3650_v23, %v1837_v37  ;;  %v1700_v3 = vpop.f32.mrf.mxu0 }
 0x1dc   : > { %v1699_v6 = vadd.f32 %v1698_v11, %v1610_v2  ;;  %v1910_v2 = vld [vmem:[%s3412_s9 + $0xf8] sm:$0xff] }
 0x1dd   : > { %v1937_v60 = vadd.f32 %v1905_v62, %v1873_v4 }
 0x1de   : > { %v1736_v7 = vadd.f32 %v1699_v6, %v426_v5 }
 0x1df   : > { %v1969_v9 = vmax.f32 %v1937_v60, 0.0  ;;  %v1522_v17 = vpop.f32.mrf.mxu2 }
 0x1e0   : > { %v1802_v38 = vld [vmem:[#allocation2 + $0xd8] sm:$0xff]  ;;  %1768 = vst.msk [vmem:[#allocation2 + $0xe0] sm:$0xff] %vm365_vm0, %v1736_v7  ;;  %v1523_v59 = vadd.f32 %v1522_v17, %v1434_v21  ;;  %v1611_v31 = vpop.f32.mrf.mxu3 }
 0x1e1   : > { %2001 = vst.msk [vmem:[%s3435_s14 + $0xd0] sm:$0xff] %vm365_vm0, %v1969_v9  ;;  %v1838_v24 = vmul.f32 %v3643_v47, %v1802_v38  ;;  %v1436_v10 = vpop.f32.mrf.mxu1 }
 0x1e2   : > { %v1612_v20 = vadd.f32 %v1611_v31, %v1523_v59  ;;  %v1437_v12 = vadd.f32 %v1436_v10, %v3341_v22 }
 0x1e3   : > { %v1874_v13 = vadd.f32 %v3650_v23, %v1838_v24  ;;  %v1703_v32 = vpop.f32.mrf.mxu0 }
 0x1e4   : > { %v1701_v25 = vadd.f32 %v1700_v3, %v1612_v20 }
 0x1e5   : > { %v1938_v26 = vadd.f32 %v1906_v57, %v1874_v13 }
 0x1e6   : > { %v1737_v61 = vadd.f32 %v1701_v25, %v427_v8 }
 0x1e7   : > { %v1970_v16 = vmax.f32 %v1938_v26, 0.0  ;;  %v1803_v40 = vld [vmem:[#allocation2 + $0xe0] sm:$0xff]  ;;  %v1525_v27 = vpop.f32.mrf.mxu2 }
 0x1e8   : > { %v1839_v28 = vmul.f32 %v3643_v47, %v1803_v40  ;;  %1769 = vst.msk [vmem:[#allocation2 + $0xe8] sm:$0xff] %vm365_vm0, %v1737_v61  ;;  %v1526_v29 = vadd.f32 %v1525_v27, %v1437_v12  ;;  %v1614_v15 = vpop.f32.mrf.mxu3 }
 0x1e9   : > { %2002 = vst.msk [vmem:[%s3435_s14 + $0xd8] sm:$0xff] %vm365_vm0, %v1970_v16  ;;  %v1438_v22 = vpop.f32.mrf.mxu1 }
 0x1ea   : > { %v1875_v39 = vadd.f32 %v3650_v23, %v1839_v28  ;;  %v1615_v18 = vadd.f32 %v1614_v15, %v1526_v29  ;;  %v1439_v45 = vadd.f32 %v1438_v22, %v3373_v42 }
 0x1eb   : > { %v1705_v58 = vpop.f32.mrf.mxu0 }
 0x1ec   : > { %v1939_v35 = vadd.f32 %v1907_v50, %v1875_v39  ;;  %v1704_v43 = vadd.f32 %v1703_v32, %v1615_v18 }
 0x1ee   : > { %v1971_v44 = vmax.f32 %v1939_v35, 0.0  ;;  %v1738_v14 = vadd.f32 %v1704_v43, %v428_v33 }
 0x1ef   : > { %v1804_v46 = vld [vmem:[#allocation2 + $0xe8] sm:$0xff]  ;;  %v1527_v48 = vpop.f32.mrf.mxu2 }
 0x1f0   : > { %2003 = vst.msk [vmem:[%s3435_s14 + $0xe0] sm:$0xff] %vm365_vm0, %v1971_v44  ;;  %v1840_v36 = vmul.f32 %v3643_v47, %v1804_v46  ;;  %v1528_v34 = vadd.f32 %v1527_v48, %v1439_v45  ;;  %v1616_v54 = vpop.f32.mrf.mxu3 }
 0x1f1   : > { %1770 = vst.msk [vmem:[#allocation2 + $0xf0] sm:$0xff] %vm365_vm0, %v1738_v14 }
 0x1f2   : > { %v1876_v41 = vadd.f32 %v3650_v23, %v1840_v36  ;;  %v1617_v52 = vadd.f32 %v1616_v54, %v1528_v34 }
 0x1f4   : > { %v1940_v42 = vadd.f32 %v1908_v49, %v1876_v41  ;;  %v1706_v11 = vadd.f32 %v1705_v58, %v1617_v52 }
 0x1f6   : > { %v1972_v30 = vmax.f32 %v1940_v42, 0.0  ;;  %v1739_v53 = vadd.f32 %v1706_v11, %v429_v51 }
 0x1f8   : > { %2004 = vst.msk [vmem:[%s3435_s14 + $0xe8] sm:$0xff] %vm365_vm0, %v1972_v30  ;;  %v1805_v55 = vld [vmem:[#allocation2 + $0xf0] sm:$0xff] }
 0x1f9   : > { %v1841_v56 = vmul.f32 %v3643_v47, %v1805_v55  ;;  %1771 = vst.msk [vmem:[#allocation2 + $0xf8] sm:$0xff] %vm365_vm0, %v1739_v53 }
 0x1fb   : > { %v1877_v0 = vadd.f32 %v3650_v23, %v1841_v56 }
 0x1fd   : > { %v1941_v1 = vadd.f32 %v1909_v63, %v1877_v0 }
 0x1ff   : > { %v1973_v37 = vmax.f32 %v1941_v1, 0.0 }
 0x200   : > { %v1806_v19 = vld [vmem:[#allocation2 + $0xf8] sm:$0xff] }
 0x201   : > { %2005 = vst.msk [vmem:[%s3435_s14 + $0xf0] sm:$0xff] %vm365_vm0, %v1973_v37  ;;  %v1842_v62 = vmul.f32 %v3643_v47, %v1806_v19 }
 0x203   : > { %v1878_v4 = vadd.f32 %v3650_v23, %v1842_v62 }
 0x205   : > { %v1942_v5 = vadd.f32 %v1910_v2, %v1878_v4 }
 0x207   : > { %v1974_v6 = vmax.f32 %v1942_v5, 0.0 }
 0x209   : > { %2006 = vst.msk [vmem:[%s3435_s14 + $0xf8] sm:$0xff] %vm365_vm0, %v1974_v6 }
 0x20a   : > { %2891 = shalt.err (!%p2888_p5)
}
 0x20b   : > { %s2945_s29 = smov 128   ;;  %s2946_s14 = smov 8  }
 0x20c   : > { %2802 = dma.vmem_to_hbm [thread:$0]  (%p3017_p4), %s2022_s8, 4096, %s2024_s11, %s2008_s21, %s2945_s29, %s2945_s29, %s2946_s14  }
 0x20d PF: > { %p2808_p6 = scmp.ge.s32.totalorder %s2942_s23, 2  ;;  %s2038_s24 = sand.u32 1, %s2922_s18  }
 0x20e   : > { %s2039_s25 = scalar_lea.sflag [#allocation4], %s2038_s24 }
 0x20f   : > { %p2805_p7 = pnand %p2808_p6, %p3024_p8 }
 0x211   : > { %p2806_p9 = pneg %p2805_p7 }
 0x213   : > { %2917 = dma.done.wait (%p2806_p9), %s2039_s25, 4096  }
 0x214   : > { %2919 = vsyncadd (%p2806_p9), %s2039_s25, 4294963200  ;;  %s18_s23 = sadd.s32 1, %s2942_s23   ;;  %s3755_s18 = smov %s2926_s19 }
 0x215   : > { %p15_p10 = scmp.ge.s32.totalorder %s18_s23, 4   ;;  %s3756_s19 = smov %s2930_s20 }
 0x216   : > { %s3757_s20 = smov %s3030_s6  ;;  %s3758_s21 = smov %s2938_s22 }
 0x217   : > { %s3759_s22 = smov %s3761_s26  ;;  %17 = sbr.rel (!%p15_p10) target bundleno = 4 (0x4), region = 95 }
 0x21c   :  { %2045 = vsyncpa [#allocation4], 1 }
 0x21d   :  { %2047 = vsyncpa [#allocation4 + $0x1], 1 }

</bundles_post_ra>
